<compile_context>
chip_gen: v5e
topology: v5e:2x2
jax: 0.10.0
libtpu: 0.0.40
codegen_flags: <defaults>
</compile_context>

<pallas_src>
import math

import jax
import jax.numpy as jnp
from jax.experimental import pallas as pl
from jax.experimental.pallas import tpu as pltpu


# ----------------------------------------------------------------------------
# Fused forward kernel
# ----------------------------------------------------------------------------
def _make_cnn_kernel(dims, chans):
    H1, P1, H2, P2, H3, P3 = dims          # spatial sizes after each layer
    C1, C2, C3, CF = chans                 # 32, 64, 128, 64

    def pool3_s2(src_ref, n_out):
        # 3-wide window, stride 2, over an already padded VMEM buffer.
        m = src_ref[pl.ds(0, n_out, stride=2), :]
        m = jnp.maximum(m, src_ref[pl.ds(1, n_out, stride=2), :])
        m = jnp.maximum(m, src_ref[pl.ds(2, n_out, stride=2), :])
        return m

    def conv7_s2(src_ref, w_ref, b_ref, n_out, c_out):
        # 7-tap stride-2 conv = 7 accumulated (n_out,Cin)@(Cin,Cout) matmuls
        # read with stride 2 from the zero-padded buffer, then bias + ReLU.
        acc = jnp.zeros((n_out, c_out), jnp.float32)
        for dh in range(7):
            acc = acc + jnp.dot(src_ref[pl.ds(dh, n_out, stride=2), :],
                                w_ref[dh], preferred_element_type=jnp.float32)
        return jnp.maximum(acc + b_ref[...], 0.0)

    def kernel(x_ref, w1_ref, b1_ref, w2_ref, b2_ref, w3_ref, b3_ref,
               fcw_ref, fcb_ref, ow_ref, ob_ref, o_ref,
               a1, a2, a3, a4, a5):
        f32 = jnp.float32

        # ---- stage 1: conv1 (Cin=1 -> broadcast-multiply taps) + ReLU ------
        acc = jnp.zeros((H1, C1), f32)
        for dh in range(7):
            acc = acc + x_ref[pl.ds(dh, H1, stride=2), :] * w1_ref[dh]
        h = jnp.maximum(acc + b1_ref[...], 0.0)
        # maxpool(3,s2,p1): post-ReLU values are >= 0, so zero pad == -inf pad.
        a1[pl.ds(0, 1), :] = jnp.zeros((1, C1), f32)
        a1[pl.ds(H1 + 1, 1), :] = jnp.zeros((1, C1), f32)
        a1[pl.ds(1, H1), :] = h
        p = pool3_s2(a1, P1)                                  # (P1, C1)

        # ---- stage 2: conv2 + ReLU + pool2 ---------------------------------
        a2[pl.ds(0, 3), :] = jnp.zeros((3, C1), f32)
        a2[pl.ds(P1 + 3, 3), :] = jnp.zeros((3, C1), f32)
        a2[pl.ds(3, P1), :] = p
        h = conv7_s2(a2, w2_ref, b2_ref, H2, C2)              # (H2, C2)
        a3[pl.ds(0, 1), :] = jnp.zeros((1, C2), f32)
        a3[pl.ds(H2 + 1, 1), :] = jnp.zeros((1, C2), f32)
        a3[pl.ds(1, H2), :] = h
        p = pool3_s2(a3, P2)                                  # (P2, C2)

        # ---- stage 3: conv3 + ReLU + pool3 ---------------------------------
        a4[pl.ds(0, 3), :] = jnp.zeros((3, C2), f32)
        a4[pl.ds(P2 + 3, 3), :] = jnp.zeros((3, C2), f32)
        a4[pl.ds(3, P2), :] = p
        h = conv7_s2(a4, w3_ref, b3_ref, H3, C3)              # (H3, C3)
        a5[pl.ds(0, 1), :] = jnp.zeros((1, C3), f32)
        a5[pl.ds(H3 + 1, 1), :] = jnp.zeros((1, C3), f32)
        a5[pl.ds(1, H3), :] = h
        feat = pool3_s2(a5, P3)                               # (P3, C3)

        # ---- fc (+ReLU) and out (+sigmoid), fully fused --------------------
        fc = jnp.zeros((1, CF), f32)
        for r in range(P3):
            fc = fc + jnp.dot(feat[r:r + 1, :], fcw_ref[r],
                              preferred_element_type=f32)
        fc = jnp.maximum(fc + fcb_ref[...], 0.0)              # (1, CF)
        z = jnp.sum(fc * ow_ref[...], axis=1, keepdims=True) + ob_ref[...]
        ez = jnp.exp(-jnp.abs(z))                             # stable sigmoid
        y = jnp.where(z >= 0.0, 1.0 / (1.0 + ez), ez / (1.0 + ez))
        o_ref[...] = jnp.broadcast_to(y, (1, 128))            # lane-dense row

    return kernel


# ----------------------------------------------------------------------------
# Parameters (PyTorch layout) and one-time re-layout for the kernel
# ----------------------------------------------------------------------------
def init_params(key):
    def uniform(k, shape, fan_in):
        bound = 1.0 / math.sqrt(fan_in)
        return jax.random.uniform(k, shape, jnp.float32, -bound, bound)

    keys = jax.random.split(key, 10)
    return {
        "conv1_w": uniform(keys[0], (32, 1, 7, 7), 1 * 49),
        "conv1_b": uniform(keys[1], (32,), 1 * 49),
        "conv2_w": uniform(keys[2], (64, 32, 7, 7), 32 * 49),
        "conv2_b": uniform(keys[3], (64,), 32 * 49),
        "conv3_w": uniform(keys[4], (128, 64, 7, 7), 64 * 49),
        "conv3_b": uniform(keys[5], (128,), 64 * 49),
        "fc_w": uniform(keys[6], (64, 128 * 13), 128 * 13),
        "fc_b": uniform(keys[7], (64,), 128 * 13),
        "out_w": uniform(keys[8], (1, 64), 64),
        "out_b": uniform(keys[9], (1,), 64),
    }


def pack_params(p):
    """PyTorch-layout params -> kernel layout (done once, outside the jit)."""
    def conv_taps(w):
        # (Cout, Cin, 7, 7): with W=1, pad=3 only the centre kw tap sees data.
        kw_mid = w.shape[3] // 2
        return jnp.transpose(w[:, :, :, kw_mid], (2, 1, 0))   # (7, Cin, Cout)

    nf, fin = p["fc_w"].shape                                  # (64, 128*13)
    c3 = p["conv3_w"].shape[0]
    p3 = fin // c3
    # torch.flatten of NCHW (C, H, 1) is C-major: feature f = c*P3 + h.
    # Kernel features are (h, c), so fcw[h, c, n] = fc_w[n, c*P3 + h].
    fcw = jnp.transpose(p["fc_w"].reshape(nf, c3, p3), (2, 1, 0))  # (P3, C3, 64)
    return {
        "w1": conv_taps(p["conv1_w"]), "b1": p["conv1_b"].reshape(1, -1),
        "w2": conv_taps(p["conv2_w"]), "b2": p["conv2_b"].reshape(1, -1),
        "w3": conv_taps(p["conv3_w"]), "b3": p["conv3_b"].reshape(1, -1),
        "fcw": fcw, "fcb": p["fc_b"].reshape(1, -1),
        "ow": p["out_w"].reshape(1, -1), "ob": p["out_b"].reshape(1, 1),
    }


# ----------------------------------------------------------------------------
# Forward pass
# ----------------------------------------------------------------------------
def cnn_forward(packed, x_nchw):
    B, cin, H, W = x_nchw.shape
    assert cin == 1 and W == 1, "wavelet image is a single-channel H x 1 strip"
    C1 = packed["w1"].shape[2]
    C2 = packed["w2"].shape[2]
    C3 = packed["w3"].shape[2]
    CF = packed["fcw"].shape[2]

    H1 = (H + 6 - 7) // 2 + 1          # conv1
    P1 = (H1 + 2 - 3) // 2 + 1         # pool1
    H2 = (P1 + 6 - 7) // 2 + 1         # conv2
    P2 = (H2 + 2 - 3) // 2 + 1         # pool2
    H3 = (P2 + 6 - 7) // 2 + 1         # conv3
    P3 = (H3 + 2 - 3) // 2 + 1         # pool3
    assert packed["fcw"].shape[0] == P3 and packed["fcw"].shape[1] == C3

    # Only host-side glue: drop singleton dims, zero-pad H by 3 on both sides.
    xpad = jnp.pad(x_nchw[:, 0, :, 0], ((0, 0), (3, 3)))[:, :, None]  # (B,H+6,1)
    Hp = H + 6

    kernel = _make_cnn_kernel((H1, P1, H2, P2, H3, P3), (C1, C2, C3, CF))

    out = pl.pallas_call(
        kernel,
        out_shape=jax.ShapeDtypeStruct((B, 1, 128), jnp.float32),
        grid=(B,),
        in_specs=[
            pl.BlockSpec((None, Hp, 1), lambda b: (b, 0, 0)),    # x, one sample
            pl.BlockSpec((7, 1, C1), lambda b: (0, 0, 0)),       # conv1 taps
            pl.BlockSpec((1, C1), lambda b: (0, 0)),             # conv1 bias
            pl.BlockSpec((7, C1, C2), lambda b: (0, 0, 0)),      # conv2 taps
            pl.BlockSpec((1, C2), lambda b: (0, 0)),             # conv2 bias
            pl.BlockSpec((7, C2, C3), lambda b: (0, 0, 0)),      # conv3 taps
            pl.BlockSpec((1, C3), lambda b: (0, 0)),             # conv3 bias
            pl.BlockSpec((P3, C3, CF), lambda b: (0, 0, 0)),     # fc weight
            pl.BlockSpec((1, CF), lambda b: (0, 0)),             # fc bias
            pl.BlockSpec((1, CF), lambda b: (0, 0)),             # out weight
            pl.BlockSpec((1, 1), lambda b: (0, 0)),              # out bias
        ],
        out_specs=pl.BlockSpec((None, 1, 128), lambda b: (b, 0, 0)),
        scratch_shapes=[
            pltpu.VMEM((H1 + 2, C1), jnp.float32),   # conv1 out, pool1-padded
            pltpu.VMEM((P1 + 6, C1), jnp.float32),   # pool1 out, conv2-padded
            pltpu.VMEM((H2 + 2, C2), jnp.float32),   # conv2 out, pool2-padded
            pltpu.VMEM((P2 + 6, C2), jnp.float32),   # pool2 out, conv3-padded
            pltpu.VMEM((H3 + 2, C3), jnp.float32),   # conv3 out, pool3-padded
        ],
        compiler_params=pltpu.CompilerParams(
            dimension_semantics=("parallel",)),
    )(xpad, packed["w1"], packed["b1"], packed["w2"], packed["b2"],
      packed["w3"], packed["b3"], packed["fcw"], packed["fcb"],
      packed["ow"], packed["ob"])

    return out[:, 0, :1]                                        # (B, 1)


if __name__ == "__main__":
    key = jax.random.PRNGKey(0)
    kp, kx = jax.random.split(key)
    params = init_params(kp)           # PyTorch-layout parameters
    packed = pack_params(params)       # kernel layout, prepared once
    # Wavelet "image": single channel, 800 x 1 -> after three conv+pool stages
    # the spatial size is 13 x 1, matching fc's expected 128*13 features.
    x = jax.random.normal(kx, (2, 1, 800, 1), jnp.float32)
    fwd = jax.jit(cnn_forward)
    y = jax.block_until_ready(fwd(packed, x))
    assert y.shape == (2, 1)
    assert bool(jnp.all((y >= 0.0) & (y <= 1.0)))
    print("KERNEL_OK")
</pallas_src>

<mosaic_0001>
module attributes {stable_mosaic.version = 11 : i64} {
  func.func @kernel(%arg0: i32, %arg1: memref<1x806x1xf32, #tpu.memory_space<vmem>>, %arg2: memref<7x1x32xf32, #tpu.memory_space<vmem>>, %arg3: memref<1x32xf32, #tpu.memory_space<vmem>>, %arg4: memref<7x32x64xf32, #tpu.memory_space<vmem>>, %arg5: memref<1x64xf32, #tpu.memory_space<vmem>>, %arg6: memref<7x64x128xf32, #tpu.memory_space<vmem>>, %arg7: memref<1x128xf32, #tpu.memory_space<vmem>>, %arg8: memref<13x128x64xf32, #tpu.memory_space<vmem>>, %arg9: memref<1x64xf32, #tpu.memory_space<vmem>>, %arg10: memref<1x64xf32, #tpu.memory_space<vmem>>, %arg11: memref<1x1xf32, #tpu.memory_space<vmem>>, %arg12: memref<1x1x128xf32, #tpu.memory_space<vmem>>, %arg13: memref<402x32xf32, #tpu.memory_space<vmem>>, %arg14: memref<206x32xf32, #tpu.memory_space<vmem>>, %arg15: memref<102x64xf32, #tpu.memory_space<vmem>>, %arg16: memref<56x64xf32, #tpu.memory_space<vmem>>, %arg17: memref<27x128xf32, #tpu.memory_space<vmem>>) attributes {dimension_semantics = [#tpu.dimension_semantics<parallel>], iteration_bounds = array<i64: 2>, scalar_prefetch = 0 : i64, scratch_operands = 5 : i64, tpu.core_type = #tpu.core_type<tc>, window_params = [{transform_indices = @transform_0, window_bounds = array<i64: 1, 806, 1>}, {pipeline_mode = #tpu.pipeline_mode<synchronous>, transform_indices = @transform_1, window_bounds = array<i64: 7, 1, 32>}, {pipeline_mode = #tpu.pipeline_mode<synchronous>, transform_indices = @transform_2, window_bounds = array<i64: 1, 32>}, {pipeline_mode = #tpu.pipeline_mode<synchronous>, transform_indices = @transform_3, window_bounds = array<i64: 7, 32, 64>}, {pipeline_mode = #tpu.pipeline_mode<synchronous>, transform_indices = @transform_4, window_bounds = array<i64: 1, 64>}, {pipeline_mode = #tpu.pipeline_mode<synchronous>, transform_indices = @transform_5, window_bounds = array<i64: 7, 64, 128>}, {pipeline_mode = #tpu.pipeline_mode<synchronous>, transform_indices = @transform_6, window_bounds = array<i64: 1, 128>}, {pipeline_mode = #tpu.pipeline_mode<synchronous>, transform_indices = @transform_7, window_bounds = array<i64: 13, 128, 64>}, {pipeline_mode = #tpu.pipeline_mode<synchronous>, transform_indices = @transform_8, window_bounds = array<i64: 1, 64>}, {pipeline_mode = #tpu.pipeline_mode<synchronous>, transform_indices = @transform_9, window_bounds = array<i64: 1, 64>}, {pipeline_mode = #tpu.pipeline_mode<synchronous>, transform_indices = @transform_10, window_bounds = array<i64: 1, 1>}, {transform_indices = @transform_11, window_bounds = array<i64: 1, 1, 128>}]} {
    %cst = arith.constant 0.000000e+00 : f32
    %0 = vector.broadcast %cst : f32 to vector<400x32xf32>
    %c0 = arith.constant 0 : index
    %c0_0 = arith.constant 0 : index
    %c0_1 = arith.constant 0 : index
    %1 = tpu.strided_load %arg1[%c0, %c0_0, %c0_1] {strides = array<i32: 1, 2, 1>} : memref<1x806x1xf32, #tpu.memory_space<vmem>>, vector<1x400x1xf32>
    %2 = vector.shape_cast %1 : vector<1x400x1xf32> to vector<400x1xf32>
    %c0_2 = arith.constant 0 : index
    %c0_3 = arith.constant 0 : index
    %c0_4 = arith.constant 0 : index
    %3 = vector.load %arg2[%c0_2, %c0_3, %c0_4] : memref<7x1x32xf32, #tpu.memory_space<vmem>>, vector<1x1x32xf32>
    %4 = vector.shape_cast %3 : vector<1x1x32xf32> to vector<1x32xf32>
    %5 = vector.broadcast %2 : vector<400x1xf32> to vector<400x32xf32>
    %6 = vector.broadcast %4 : vector<1x32xf32> to vector<400x32xf32>
    %7 = arith.mulf %5, %6 : vector<400x32xf32>
    %8 = arith.addf %0, %7 : vector<400x32xf32>
    %c0_5 = arith.constant 0 : index
    %c1 = arith.constant 1 : index
    %c0_6 = arith.constant 0 : index
    %9 = tpu.strided_load %arg1[%c0_5, %c1, %c0_6] {strides = array<i32: 1, 2, 1>} : memref<1x806x1xf32, #tpu.memory_space<vmem>>, vector<1x400x1xf32>
    %10 = vector.shape_cast %9 : vector<1x400x1xf32> to vector<400x1xf32>
    %c1_7 = arith.constant 1 : index
    %c0_8 = arith.constant 0 : index
    %c0_9 = arith.constant 0 : index
    %11 = vector.load %arg2[%c1_7, %c0_8, %c0_9] : memref<7x1x32xf32, #tpu.memory_space<vmem>>, vector<1x1x32xf32>
    %12 = vector.shape_cast %11 : vector<1x1x32xf32> to vector<1x32xf32>
    %13 = vector.broadcast %10 : vector<400x1xf32> to vector<400x32xf32>
    %14 = vector.broadcast %12 : vector<1x32xf32> to vector<400x32xf32>
    %15 = arith.mulf %13, %14 : vector<400x32xf32>
    %16 = arith.addf %8, %15 : vector<400x32xf32>
    %c0_10 = arith.constant 0 : index
    %c2 = arith.constant 2 : index
    %c0_11 = arith.constant 0 : index
    %17 = tpu.strided_load %arg1[%c0_10, %c2, %c0_11] {strides = array<i32: 1, 2, 1>} : memref<1x806x1xf32, #tpu.memory_space<vmem>>, vector<1x400x1xf32>
    %18 = vector.shape_cast %17 : vector<1x400x1xf32> to vector<400x1xf32>
    %c2_12 = arith.constant 2 : index
    %c0_13 = arith.constant 0 : index
    %c0_14 = arith.constant 0 : index
    %19 = vector.load %arg2[%c2_12, %c0_13, %c0_14] : memref<7x1x32xf32, #tpu.memory_space<vmem>>, vector<1x1x32xf32>
    %20 = vector.shape_cast %19 : vector<1x1x32xf32> to vector<1x32xf32>
    %21 = vector.broadcast %18 : vector<400x1xf32> to vector<400x32xf32>
    %22 = vector.broadcast %20 : vector<1x32xf32> to vector<400x32xf32>
    %23 = arith.mulf %21, %22 : vector<400x32xf32>
    %24 = arith.addf %16, %23 : vector<400x32xf32>
    %c0_15 = arith.constant 0 : index
    %c3 = arith.constant 3 : index
    %c0_16 = arith.constant 0 : index
    %25 = tpu.strided_load %arg1[%c0_15, %c3, %c0_16] {strides = array<i32: 1, 2, 1>} : memref<1x806x1xf32, #tpu.memory_space<vmem>>, vector<1x400x1xf32>
    %26 = vector.shape_cast %25 : vector<1x400x1xf32> to vector<400x1xf32>
    %c3_17 = arith.constant 3 : index
    %c0_18 = arith.constant 0 : index
    %c0_19 = arith.constant 0 : index
    %27 = vector.load %arg2[%c3_17, %c0_18, %c0_19] : memref<7x1x32xf32, #tpu.memory_space<vmem>>, vector<1x1x32xf32>
    %28 = vector.shape_cast %27 : vector<1x1x32xf32> to vector<1x32xf32>
    %29 = vector.broadcast %26 : vector<400x1xf32> to vector<400x32xf32>
    %30 = vector.broadcast %28 : vector<1x32xf32> to vector<400x32xf32>
    %31 = arith.mulf %29, %30 : vector<400x32xf32>
    %32 = arith.addf %24, %31 : vector<400x32xf32>
    %c0_20 = arith.constant 0 : index
    %c4 = arith.constant 4 : index
    %c0_21 = arith.constant 0 : index
    %33 = tpu.strided_load %arg1[%c0_20, %c4, %c0_21] {strides = array<i32: 1, 2, 1>} : memref<1x806x1xf32, #tpu.memory_space<vmem>>, vector<1x400x1xf32>
    %34 = vector.shape_cast %33 : vector<1x400x1xf32> to vector<400x1xf32>
    %c4_22 = arith.constant 4 : index
    %c0_23 = arith.constant 0 : index
    %c0_24 = arith.constant 0 : index
    %35 = vector.load %arg2[%c4_22, %c0_23, %c0_24] : memref<7x1x32xf32, #tpu.memory_space<vmem>>, vector<1x1x32xf32>
    %36 = vector.shape_cast %35 : vector<1x1x32xf32> to vector<1x32xf32>
    %37 = vector.broadcast %34 : vector<400x1xf32> to vector<400x32xf32>
    %38 = vector.broadcast %36 : vector<1x32xf32> to vector<400x32xf32>
    %39 = arith.mulf %37, %38 : vector<400x32xf32>
    %40 = arith.addf %32, %39 : vector<400x32xf32>
    %c0_25 = arith.constant 0 : index
    %c5 = arith.constant 5 : index
    %c0_26 = arith.constant 0 : index
    %41 = tpu.strided_load %arg1[%c0_25, %c5, %c0_26] {strides = array<i32: 1, 2, 1>} : memref<1x806x1xf32, #tpu.memory_space<vmem>>, vector<1x400x1xf32>
    %42 = vector.shape_cast %41 : vector<1x400x1xf32> to vector<400x1xf32>
    %c5_27 = arith.constant 5 : index
    %c0_28 = arith.constant 0 : index
    %c0_29 = arith.constant 0 : index
    %43 = vector.load %arg2[%c5_27, %c0_28, %c0_29] : memref<7x1x32xf32, #tpu.memory_space<vmem>>, vector<1x1x32xf32>
    %44 = vector.shape_cast %43 : vector<1x1x32xf32> to vector<1x32xf32>
    %45 = vector.broadcast %42 : vector<400x1xf32> to vector<400x32xf32>
    %46 = vector.broadcast %44 : vector<1x32xf32> to vector<400x32xf32>
    %47 = arith.mulf %45, %46 : vector<400x32xf32>
    %48 = arith.addf %40, %47 : vector<400x32xf32>
    %c0_30 = arith.constant 0 : index
    %c6 = arith.constant 6 : index
    %c0_31 = arith.constant 0 : index
    %49 = tpu.strided_load %arg1[%c0_30, %c6, %c0_31] {strides = array<i32: 1, 2, 1>} : memref<1x806x1xf32, #tpu.memory_space<vmem>>, vector<1x400x1xf32>
    %50 = vector.shape_cast %49 : vector<1x400x1xf32> to vector<400x1xf32>
    %c6_32 = arith.constant 6 : index
    %c0_33 = arith.constant 0 : index
    %c0_34 = arith.constant 0 : index
    %51 = vector.load %arg2[%c6_32, %c0_33, %c0_34] : memref<7x1x32xf32, #tpu.memory_space<vmem>>, vector<1x1x32xf32>
    %52 = vector.shape_cast %51 : vector<1x1x32xf32> to vector<1x32xf32>
    %53 = vector.broadcast %50 : vector<400x1xf32> to vector<400x32xf32>
    %54 = vector.broadcast %52 : vector<1x32xf32> to vector<400x32xf32>
    %55 = arith.mulf %53, %54 : vector<400x32xf32>
    %56 = arith.addf %48, %55 : vector<400x32xf32>
    %c0_35 = arith.constant 0 : index
    %c0_36 = arith.constant 0 : index
    %57 = vector.load %arg3[%c0_35, %c0_36] : memref<1x32xf32, #tpu.memory_space<vmem>>, vector<1x32xf32>
    %58 = vector.broadcast %57 : vector<1x32xf32> to vector<400x32xf32>
    %59 = arith.addf %56, %58 : vector<400x32xf32>
    %cst_37 = arith.constant 0.000000e+00 : f32
    %60 = vector.broadcast %cst_37 : f32 to vector<400x32xf32>
    %61 = arith.maximumf %59, %60 : vector<400x32xf32>
    %cst_38 = arith.constant 0.000000e+00 : f32
    %62 = vector.broadcast %cst_38 : f32 to vector<1x32xf32>
    %c0_39 = arith.constant 0 : index
    %c0_40 = arith.constant 0 : index
    %63 = vector.load %arg13[%c0_39, %c0_40] : memref<402x32xf32, #tpu.memory_space<vmem>>, vector<1x32xf32>
    tpu.vector_store %arg13[%c0_39, %c0_40], %62 {strides = array<i32>} : memref<402x32xf32, #tpu.memory_space<vmem>>, vector<1x32xf32>,
    %cst_41 = arith.constant 0.000000e+00 : f32
    %64 = vector.broadcast %cst_41 : f32 to vector<1x32xf32>
    %c401 = arith.constant 401 : index
    %c0_42 = arith.constant 0 : index
    %65 = vector.load %arg13[%c401, %c0_42] : memref<402x32xf32, #tpu.memory_space<vmem>>, vector<1x32xf32>
    tpu.vector_store %arg13[%c401, %c0_42], %64 {strides = array<i32>} : memref<402x32xf32, #tpu.memory_space<vmem>>, vector<1x32xf32>,
    %c1_43 = arith.constant 1 : index
    %c0_44 = arith.constant 0 : index
    %66 = vector.load %arg13[%c1_43, %c0_44] : memref<402x32xf32, #tpu.memory_space<vmem>>, vector<400x32xf32>
    tpu.vector_store %arg13[%c1_43, %c0_44], %61 {strides = array<i32>} : memref<402x32xf32, #tpu.memory_space<vmem>>, vector<400x32xf32>,
    %c0_45 = arith.constant 0 : index
    %c0_46 = arith.constant 0 : index
    %67 = tpu.strided_load %arg13[%c0_45, %c0_46] {strides = array<i32: 2, 1>} : memref<402x32xf32, #tpu.memory_space<vmem>>, vector<200x32xf32>
    %c1_47 = arith.constant 1 : index
    %c0_48 = arith.constant 0 : index
    %68 = tpu.strided_load %arg13[%c1_47, %c0_48] {strides = array<i32: 2, 1>} : memref<402x32xf32, #tpu.memory_space<vmem>>, vector<200x32xf32>
    %69 = arith.maximumf %67, %68 : vector<200x32xf32>
    %c2_49 = arith.constant 2 : index
    %c0_50 = arith.constant 0 : index
    %70 = tpu.strided_load %arg13[%c2_49, %c0_50] {strides = array<i32: 2, 1>} : memref<402x32xf32, #tpu.memory_space<vmem>>, vector<200x32xf32>
    %71 = arith.maximumf %69, %70 : vector<200x32xf32>
    %cst_51 = arith.constant 0.000000e+00 : f32
    %72 = vector.broadcast %cst_51 : f32 to vector<3x32xf32>
    %c0_52 = arith.constant 0 : index
    %c0_53 = arith.constant 0 : index
    %73 = vector.load %arg14[%c0_52, %c0_53] : memref<206x32xf32, #tpu.memory_space<vmem>>, vector<3x32xf32>
    tpu.vector_store %arg14[%c0_52, %c0_53], %72 {strides = array<i32>} : memref<206x32xf32, #tpu.memory_space<vmem>>, vector<3x32xf32>,
    %cst_54 = arith.constant 0.000000e+00 : f32
    %74 = vector.broadcast %cst_54 : f32 to vector<3x32xf32>
    %c203 = arith.constant 203 : index
    %c0_55 = arith.constant 0 : index
    %75 = vector.load %arg14[%c203, %c0_55] : memref<206x32xf32, #tpu.memory_space<vmem>>, vector<3x32xf32>
    tpu.vector_store %arg14[%c203, %c0_55], %74 {strides = array<i32>} : memref<206x32xf32, #tpu.memory_space<vmem>>, vector<3x32xf32>,
    %c3_56 = arith.constant 3 : index
    %c0_57 = arith.constant 0 : index
    %76 = vector.load %arg14[%c3_56, %c0_57] : memref<206x32xf32, #tpu.memory_space<vmem>>, vector<200x32xf32>
    tpu.vector_store %arg14[%c3_56, %c0_57], %71 {strides = array<i32>} : memref<206x32xf32, #tpu.memory_space<vmem>>, vector<200x32xf32>,
    %cst_58 = arith.constant 0.000000e+00 : f32
    %77 = vector.broadcast %cst_58 : f32 to vector<100x64xf32>
    %c0_59 = arith.constant 0 : index
    %c0_60 = arith.constant 0 : index
    %78 = tpu.strided_load %arg14[%c0_59, %c0_60] {strides = array<i32: 2, 1>} : memref<206x32xf32, #tpu.memory_space<vmem>>, vector<100x32xf32>
    %c0_61 = arith.constant 0 : index
    %c0_62 = arith.constant 0 : index
    %c0_63 = arith.constant 0 : index
    %79 = vector.load %arg4[%c0_61, %c0_62, %c0_63] : memref<7x32x64xf32, #tpu.memory_space<vmem>>, vector<1x32x64xf32>
    %80 = vector.shape_cast %79 : vector<1x32x64xf32> to vector<32x64xf32>
    %cst_64 = arith.constant dense<0.000000e+00> : vector<100x64xf32>
    %81 = tpu.matmul %78, %80, %cst_64 {dimension_numbers = #tpu.dot_dimension_numbers<[1], [0], [0], [1], [0, 0, 1, 1], [], []>} : vector<100x32xf32>, vector<32x64xf32>, vector<100x64xf32> -> vector<100x64xf32>
    %82 = arith.addf %77, %81 : vector<100x64xf32>
    %c1_65 = arith.constant 1 : index
    %c0_66 = arith.constant 0 : index
    %83 = tpu.strided_load %arg14[%c1_65, %c0_66] {strides = array<i32: 2, 1>} : memref<206x32xf32, #tpu.memory_space<vmem>>, vector<100x32xf32>
    %c1_67 = arith.constant 1 : index
    %c0_68 = arith.constant 0 : index
    %c0_69 = arith.constant 0 : index
    %84 = vector.load %arg4[%c1_67, %c0_68, %c0_69] : memref<7x32x64xf32, #tpu.memory_space<vmem>>, vector<1x32x64xf32>
    %85 = vector.shape_cast %84 : vector<1x32x64xf32> to vector<32x64xf32>
    %cst_70 = arith.constant dense<0.000000e+00> : vector<100x64xf32>
    %86 = tpu.matmul %83, %85, %cst_70 {dimension_numbers = #tpu.dot_dimension_numbers<[1], [0], [0], [1], [0, 0, 1, 1], [], []>} : vector<100x32xf32>, vector<32x64xf32>, vector<100x64xf32> -> vector<100x64xf32>
    %87 = arith.addf %82, %86 : vector<100x64xf32>
    %c2_71 = arith.constant 2 : index
    %c0_72 = arith.constant 0 : index
    %88 = tpu.strided_load %arg14[%c2_71, %c0_72] {strides = array<i32: 2, 1>} : memref<206x32xf32, #tpu.memory_space<vmem>>, vector<100x32xf32>
    %c2_73 = arith.constant 2 : index
    %c0_74 = arith.constant 0 : index
    %c0_75 = arith.constant 0 : index
    %89 = vector.load %arg4[%c2_73, %c0_74, %c0_75] : memref<7x32x64xf32, #tpu.memory_space<vmem>>, vector<1x32x64xf32>
    %90 = vector.shape_cast %89 : vector<1x32x64xf32> to vector<32x64xf32>
    %cst_76 = arith.constant dense<0.000000e+00> : vector<100x64xf32>
    %91 = tpu.matmul %88, %90, %cst_76 {dimension_numbers = #tpu.dot_dimension_numbers<[1], [0], [0], [1], [0, 0, 1, 1], [], []>} : vector<100x32xf32>, vector<32x64xf32>, vector<100x64xf32> -> vector<100x64xf32>
    %92 = arith.addf %87, %91 : vector<100x64xf32>
    %c3_77 = arith.constant 3 : index
    %c0_78 = arith.constant 0 : index
    %93 = tpu.strided_load %arg14[%c3_77, %c0_78] {strides = array<i32: 2, 1>} : memref<206x32xf32, #tpu.memory_space<vmem>>, vector<100x32xf32>
    %c3_79 = arith.constant 3 : index
    %c0_80 = arith.constant 0 : index
    %c0_81 = arith.constant 0 : index
    %94 = vector.load %arg4[%c3_79, %c0_80, %c0_81] : memref<7x32x64xf32, #tpu.memory_space<vmem>>, vector<1x32x64xf32>
    %95 = vector.shape_cast %94 : vector<1x32x64xf32> to vector<32x64xf32>
    %cst_82 = arith.constant dense<0.000000e+00> : vector<100x64xf32>
    %96 = tpu.matmul %93, %95, %cst_82 {dimension_numbers = #tpu.dot_dimension_numbers<[1], [0], [0], [1], [0, 0, 1, 1], [], []>} : vector<100x32xf32>, vector<32x64xf32>, vector<100x64xf32> -> vector<100x64xf32>
    %97 = arith.addf %92, %96 : vector<100x64xf32>
    %c4_83 = arith.constant 4 : index
    %c0_84 = arith.constant 0 : index
    %98 = tpu.strided_load %arg14[%c4_83, %c0_84] {strides = array<i32: 2, 1>} : memref<206x32xf32, #tpu.memory_space<vmem>>, vector<100x32xf32>
    %c4_85 = arith.constant 4 : index
    %c0_86 = arith.constant 0 : index
    %c0_87 = arith.constant 0 : index
    %99 = vector.load %arg4[%c4_85, %c0_86, %c0_87] : memref<7x32x64xf32, #tpu.memory_space<vmem>>, vector<1x32x64xf32>
    %100 = vector.shape_cast %99 : vector<1x32x64xf32> to vector<32x64xf32>
    %cst_88 = arith.constant dense<0.000000e+00> : vector<100x64xf32>
    %101 = tpu.matmul %98, %100, %cst_88 {dimension_numbers = #tpu.dot_dimension_numbers<[1], [0], [0], [1], [0, 0, 1, 1], [], []>} : vector<100x32xf32>, vector<32x64xf32>, vector<100x64xf32> -> vector<100x64xf32>
    %102 = arith.addf %97, %101 : vector<100x64xf32>
    %c5_89 = arith.constant 5 : index
    %c0_90 = arith.constant 0 : index
    %103 = tpu.strided_load %arg14[%c5_89, %c0_90] {strides = array<i32: 2, 1>} : memref<206x32xf32, #tpu.memory_space<vmem>>, vector<100x32xf32>
    %c5_91 = arith.constant 5 : index
    %c0_92 = arith.constant 0 : index
    %c0_93 = arith.constant 0 : index
    %104 = vector.load %arg4[%c5_91, %c0_92, %c0_93] : memref<7x32x64xf32, #tpu.memory_space<vmem>>, vector<1x32x64xf32>
    %105 = vector.shape_cast %104 : vector<1x32x64xf32> to vector<32x64xf32>
    %cst_94 = arith.constant dense<0.000000e+00> : vector<100x64xf32>
    %106 = tpu.matmul %103, %105, %cst_94 {dimension_numbers = #tpu.dot_dimension_numbers<[1], [0], [0], [1], [0, 0, 1, 1], [], []>} : vector<100x32xf32>, vector<32x64xf32>, vector<100x64xf32> -> vector<100x64xf32>
    %107 = arith.addf %102, %106 : vector<100x64xf32>
    %c6_95 = arith.constant 6 : index
    %c0_96 = arith.constant 0 : index
    %108 = tpu.strided_load %arg14[%c6_95, %c0_96] {strides = array<i32: 2, 1>} : memref<206x32xf32, #tpu.memory_space<vmem>>, vector<100x32xf32>
    %c6_97 = arith.constant 6 : index
    %c0_98 = arith.constant 0 : index
    %c0_99 = arith.constant 0 : index
    %109 = vector.load %arg4[%c6_97, %c0_98, %c0_99] : memref<7x32x64xf32, #tpu.memory_space<vmem>>, vector<1x32x64xf32>
    %110 = vector.shape_cast %109 : vector<1x32x64xf32> to vector<32x64xf32>
    %cst_100 = arith.constant dense<0.000000e+00> : vector<100x64xf32>
    %111 = tpu.matmul %108, %110, %cst_100 {dimension_numbers = #tpu.dot_dimension_numbers<[1], [0], [0], [1], [0, 0, 1, 1], [], []>} : vector<100x32xf32>, vector<32x64xf32>, vector<100x64xf32> -> vector<100x64xf32>
    %112 = arith.addf %107, %111 : vector<100x64xf32>
    %c0_101 = arith.constant 0 : index
    %c0_102 = arith.constant 0 : index
    %113 = vector.load %arg5[%c0_101, %c0_102] : memref<1x64xf32, #tpu.memory_space<vmem>>, vector<1x64xf32>
    %114 = vector.broadcast %113 : vector<1x64xf32> to vector<100x64xf32>
    %115 = arith.addf %112, %114 : vector<100x64xf32>
    %cst_103 = arith.constant 0.000000e+00 : f32
    %116 = vector.broadcast %cst_103 : f32 to vector<100x64xf32>
    %117 = arith.maximumf %115, %116 : vector<100x64xf32>
    %cst_104 = arith.constant 0.000000e+00 : f32
    %118 = vector.broadcast %cst_104 : f32 to vector<1x64xf32>
    %c0_105 = arith.constant 0 : index
    %c0_106 = arith.constant 0 : index
    %119 = vector.load %arg15[%c0_105, %c0_106] : memref<102x64xf32, #tpu.memory_space<vmem>>, vector<1x64xf32>
    tpu.vector_store %arg15[%c0_105, %c0_106], %118 {strides = array<i32>} : memref<102x64xf32, #tpu.memory_space<vmem>>, vector<1x64xf32>,
    %cst_107 = arith.constant 0.000000e+00 : f32
    %120 = vector.broadcast %cst_107 : f32 to vector<1x64xf32>
    %c101 = arith.constant 101 : index
    %c0_108 = arith.constant 0 : index
    %121 = vector.load %arg15[%c101, %c0_108] : memref<102x64xf32, #tpu.memory_space<vmem>>, vector<1x64xf32>
    tpu.vector_store %arg15[%c101, %c0_108], %120 {strides = array<i32>} : memref<102x64xf32, #tpu.memory_space<vmem>>, vector<1x64xf32>,
    %c1_109 = arith.constant 1 : index
    %c0_110 = arith.constant 0 : index
    %122 = vector.load %arg15[%c1_109, %c0_110] : memref<102x64xf32, #tpu.memory_space<vmem>>, vector<100x64xf32>
    tpu.vector_store %arg15[%c1_109, %c0_110], %117 {strides = array<i32>} : memref<102x64xf32, #tpu.memory_space<vmem>>, vector<100x64xf32>,
    %c0_111 = arith.constant 0 : index
    %c0_112 = arith.constant 0 : index
    %123 = tpu.strided_load %arg15[%c0_111, %c0_112] {strides = array<i32: 2, 1>} : memref<102x64xf32, #tpu.memory_space<vmem>>, vector<50x64xf32>
    %c1_113 = arith.constant 1 : index
    %c0_114 = arith.constant 0 : index
    %124 = tpu.strided_load %arg15[%c1_113, %c0_114] {strides = array<i32: 2, 1>} : memref<102x64xf32, #tpu.memory_space<vmem>>, vector<50x64xf32>
    %125 = arith.maximumf %123, %124 : vector<50x64xf32>
    %c2_115 = arith.constant 2 : index
    %c0_116 = arith.constant 0 : index
    %126 = tpu.strided_load %arg15[%c2_115, %c0_116] {strides = array<i32: 2, 1>} : memref<102x64xf32, #tpu.memory_space<vmem>>, vector<50x64xf32>
    %127 = arith.maximumf %125, %126 : vector<50x64xf32>
    %cst_117 = arith.constant 0.000000e+00 : f32
    %128 = vector.broadcast %cst_117 : f32 to vector<3x64xf32>
    %c0_118 = arith.constant 0 : index
    %c0_119 = arith.constant 0 : index
    %129 = vector.load %arg16[%c0_118, %c0_119] : memref<56x64xf32, #tpu.memory_space<vmem>>, vector<3x64xf32>
    tpu.vector_store %arg16[%c0_118, %c0_119], %128 {strides = array<i32>} : memref<56x64xf32, #tpu.memory_space<vmem>>, vector<3x64xf32>,
    %cst_120 = arith.constant 0.000000e+00 : f32
    %130 = vector.broadcast %cst_120 : f32 to vector<3x64xf32>
    %c53 = arith.constant 53 : index
    %c0_121 = arith.constant 0 : index
    %131 = vector.load %arg16[%c53, %c0_121] : memref<56x64xf32, #tpu.memory_space<vmem>>, vector<3x64xf32>
    tpu.vector_store %arg16[%c53, %c0_121], %130 {strides = array<i32>} : memref<56x64xf32, #tpu.memory_space<vmem>>, vector<3x64xf32>,
    %c3_122 = arith.constant 3 : index
    %c0_123 = arith.constant 0 : index
    %132 = vector.load %arg16[%c3_122, %c0_123] : memref<56x64xf32, #tpu.memory_space<vmem>>, vector<50x64xf32>
    tpu.vector_store %arg16[%c3_122, %c0_123], %127 {strides = array<i32>} : memref<56x64xf32, #tpu.memory_space<vmem>>, vector<50x64xf32>,
    %cst_124 = arith.constant 0.000000e+00 : f32
    %133 = vector.broadcast %cst_124 : f32 to vector<25x128xf32>
    %c0_125 = arith.constant 0 : index
    %c0_126 = arith.constant 0 : index
    %134 = tpu.strided_load %arg16[%c0_125, %c0_126] {strides = array<i32: 2, 1>} : memref<56x64xf32, #tpu.memory_space<vmem>>, vector<25x64xf32>
    %c0_127 = arith.constant 0 : index
    %c0_128 = arith.constant 0 : index
    %c0_129 = arith.constant 0 : index
    %135 = vector.load %arg6[%c0_127, %c0_128, %c0_129] : memref<7x64x128xf32, #tpu.memory_space<vmem>>, vector<1x64x128xf32>
    %136 = vector.shape_cast %135 : vector<1x64x128xf32> to vector<64x128xf32>
    %cst_130 = arith.constant dense<0.000000e+00> : vector<25x128xf32>
    %137 = tpu.matmul %134, %136, %cst_130 {dimension_numbers = #tpu.dot_dimension_numbers<[1], [0], [0], [1], [0, 0, 1, 1], [], []>} : vector<25x64xf32>, vector<64x128xf32>, vector<25x128xf32> -> vector<25x128xf32>
    %138 = arith.addf %133, %137 : vector<25x128xf32>
    %c1_131 = arith.constant 1 : index
    %c0_132 = arith.constant 0 : index
    %139 = tpu.strided_load %arg16[%c1_131, %c0_132] {strides = array<i32: 2, 1>} : memref<56x64xf32, #tpu.memory_space<vmem>>, vector<25x64xf32>
    %c1_133 = arith.constant 1 : index
    %c0_134 = arith.constant 0 : index
    %c0_135 = arith.constant 0 : index
    %140 = vector.load %arg6[%c1_133, %c0_134, %c0_135] : memref<7x64x128xf32, #tpu.memory_space<vmem>>, vector<1x64x128xf32>
    %141 = vector.shape_cast %140 : vector<1x64x128xf32> to vector<64x128xf32>
    %cst_136 = arith.constant dense<0.000000e+00> : vector<25x128xf32>
    %142 = tpu.matmul %139, %141, %cst_136 {dimension_numbers = #tpu.dot_dimension_numbers<[1], [0], [0], [1], [0, 0, 1, 1], [], []>} : vector<25x64xf32>, vector<64x128xf32>, vector<25x128xf32> -> vector<25x128xf32>
    %143 = arith.addf %138, %142 : vector<25x128xf32>
    %c2_137 = arith.constant 2 : index
    %c0_138 = arith.constant 0 : index
    %144 = tpu.strided_load %arg16[%c2_137, %c0_138] {strides = array<i32: 2, 1>} : memref<56x64xf32, #tpu.memory_space<vmem>>, vector<25x64xf32>
    %c2_139 = arith.constant 2 : index
    %c0_140 = arith.constant 0 : index
    %c0_141 = arith.constant 0 : index
    %145 = vector.load %arg6[%c2_139, %c0_140, %c0_141] : memref<7x64x128xf32, #tpu.memory_space<vmem>>, vector<1x64x128xf32>
    %146 = vector.shape_cast %145 : vector<1x64x128xf32> to vector<64x128xf32>
    %cst_142 = arith.constant dense<0.000000e+00> : vector<25x128xf32>
    %147 = tpu.matmul %144, %146, %cst_142 {dimension_numbers = #tpu.dot_dimension_numbers<[1], [0], [0], [1], [0, 0, 1, 1], [], []>} : vector<25x64xf32>, vector<64x128xf32>, vector<25x128xf32> -> vector<25x128xf32>
    %148 = arith.addf %143, %147 : vector<25x128xf32>
    %c3_143 = arith.constant 3 : index
    %c0_144 = arith.constant 0 : index
    %149 = tpu.strided_load %arg16[%c3_143, %c0_144] {strides = array<i32: 2, 1>} : memref<56x64xf32, #tpu.memory_space<vmem>>, vector<25x64xf32>
    %c3_145 = arith.constant 3 : index
    %c0_146 = arith.constant 0 : index
    %c0_147 = arith.constant 0 : index
    %150 = vector.load %arg6[%c3_145, %c0_146, %c0_147] : memref<7x64x128xf32, #tpu.memory_space<vmem>>, vector<1x64x128xf32>
    %151 = vector.shape_cast %150 : vector<1x64x128xf32> to vector<64x128xf32>
    %cst_148 = arith.constant dense<0.000000e+00> : vector<25x128xf32>
    %152 = tpu.matmul %149, %151, %cst_148 {dimension_numbers = #tpu.dot_dimension_numbers<[1], [0], [0], [1], [0, 0, 1, 1], [], []>} : vector<25x64xf32>, vector<64x128xf32>, vector<25x128xf32> -> vector<25x128xf32>
    %153 = arith.addf %148, %152 : vector<25x128xf32>
    %c4_149 = arith.constant 4 : index
    %c0_150 = arith.constant 0 : index
    %154 = tpu.strided_load %arg16[%c4_149, %c0_150] {strides = array<i32: 2, 1>} : memref<56x64xf32, #tpu.memory_space<vmem>>, vector<25x64xf32>
    %c4_151 = arith.constant 4 : index
    %c0_152 = arith.constant 0 : index
    %c0_153 = arith.constant 0 : index
    %155 = vector.load %arg6[%c4_151, %c0_152, %c0_153] : memref<7x64x128xf32, #tpu.memory_space<vmem>>, vector<1x64x128xf32>
    %156 = vector.shape_cast %155 : vector<1x64x128xf32> to vector<64x128xf32>
    %cst_154 = arith.constant dense<0.000000e+00> : vector<25x128xf32>
    %157 = tpu.matmul %154, %156, %cst_154 {dimension_numbers = #tpu.dot_dimension_numbers<[1], [0], [0], [1], [0, 0, 1, 1], [], []>} : vector<25x64xf32>, vector<64x128xf32>, vector<25x128xf32> -> vector<25x128xf32>
    %158 = arith.addf %153, %157 : vector<25x128xf32>
    %c5_155 = arith.constant 5 : index
    %c0_156 = arith.constant 0 : index
    %159 = tpu.strided_load %arg16[%c5_155, %c0_156] {strides = array<i32: 2, 1>} : memref<56x64xf32, #tpu.memory_space<vmem>>, vector<25x64xf32>
    %c5_157 = arith.constant 5 : index
    %c0_158 = arith.constant 0 : index
    %c0_159 = arith.constant 0 : index
    %160 = vector.load %arg6[%c5_157, %c0_158, %c0_159] : memref<7x64x128xf32, #tpu.memory_space<vmem>>, vector<1x64x128xf32>
    %161 = vector.shape_cast %160 : vector<1x64x128xf32> to vector<64x128xf32>
    %cst_160 = arith.constant dense<0.000000e+00> : vector<25x128xf32>
    %162 = tpu.matmul %159, %161, %cst_160 {dimension_numbers = #tpu.dot_dimension_numbers<[1], [0], [0], [1], [0, 0, 1, 1], [], []>} : vector<25x64xf32>, vector<64x128xf32>, vector<25x128xf32> -> vector<25x128xf32>
    %163 = arith.addf %158, %162 : vector<25x128xf32>
    %c6_161 = arith.constant 6 : index
    %c0_162 = arith.constant 0 : index
    %164 = tpu.strided_load %arg16[%c6_161, %c0_162] {strides = array<i32: 2, 1>} : memref<56x64xf32, #tpu.memory_space<vmem>>, vector<25x64xf32>
    %c6_163 = arith.constant 6 : index
    %c0_164 = arith.constant 0 : index
    %c0_165 = arith.constant 0 : index
    %165 = vector.load %arg6[%c6_163, %c0_164, %c0_165] : memref<7x64x128xf32, #tpu.memory_space<vmem>>, vector<1x64x128xf32>
    %166 = vector.shape_cast %165 : vector<1x64x128xf32> to vector<64x128xf32>
    %cst_166 = arith.constant dense<0.000000e+00> : vector<25x128xf32>
    %167 = tpu.matmul %164, %166, %cst_166 {dimension_numbers = #tpu.dot_dimension_numbers<[1], [0], [0], [1], [0, 0, 1, 1], [], []>} : vector<25x64xf32>, vector<64x128xf32>, vector<25x128xf32> -> vector<25x128xf32>
    %168 = arith.addf %163, %167 : vector<25x128xf32>
    %c0_167 = arith.constant 0 : index
    %c0_168 = arith.constant 0 : index
    %169 = vector.load %arg7[%c0_167, %c0_168] : memref<1x128xf32, #tpu.memory_space<vmem>>, vector<1x128xf32>
    %170 = vector.broadcast %169 : vector<1x128xf32> to vector<25x128xf32>
    %171 = arith.addf %168, %170 : vector<25x128xf32>
    %cst_169 = arith.constant 0.000000e+00 : f32
    %172 = vector.broadcast %cst_169 : f32 to vector<25x128xf32>
    %173 = arith.maximumf %171, %172 : vector<25x128xf32>
    %cst_170 = arith.constant 0.000000e+00 : f32
    %174 = vector.broadcast %cst_170 : f32 to vector<1x128xf32>
    %c0_171 = arith.constant 0 : index
    %c0_172 = arith.constant 0 : index
    %175 = vector.load %arg17[%c0_171, %c0_172] : memref<27x128xf32, #tpu.memory_space<vmem>>, vector<1x128xf32>
    tpu.vector_store %arg17[%c0_171, %c0_172], %174 {strides = array<i32>} : memref<27x128xf32, #tpu.memory_space<vmem>>, vector<1x128xf32>,
    %cst_173 = arith.constant 0.000000e+00 : f32
    %176 = vector.broadcast %cst_173 : f32 to vector<1x128xf32>
    %c26 = arith.constant 26 : index
    %c0_174 = arith.constant 0 : index
    %177 = vector.load %arg17[%c26, %c0_174] : memref<27x128xf32, #tpu.memory_space<vmem>>, vector<1x128xf32>
    tpu.vector_store %arg17[%c26, %c0_174], %176 {strides = array<i32>} : memref<27x128xf32, #tpu.memory_space<vmem>>, vector<1x128xf32>,
    %c1_175 = arith.constant 1 : index
    %c0_176 = arith.constant 0 : index
    %178 = vector.load %arg17[%c1_175, %c0_176] : memref<27x128xf32, #tpu.memory_space<vmem>>, vector<25x128xf32>
    tpu.vector_store %arg17[%c1_175, %c0_176], %173 {strides = array<i32>} : memref<27x128xf32, #tpu.memory_space<vmem>>, vector<25x128xf32>,
    %c0_177 = arith.constant 0 : index
    %c0_178 = arith.constant 0 : index
    %179 = tpu.strided_load %arg17[%c0_177, %c0_178] {strides = array<i32: 2, 1>} : memref<27x128xf32, #tpu.memory_space<vmem>>, vector<13x128xf32>
    %c1_179 = arith.constant 1 : index
    %c0_180 = arith.constant 0 : index
    %180 = tpu.strided_load %arg17[%c1_179, %c0_180] {strides = array<i32: 2, 1>} : memref<27x128xf32, #tpu.memory_space<vmem>>, vector<13x128xf32>
    %181 = arith.maximumf %179, %180 : vector<13x128xf32>
    %c2_181 = arith.constant 2 : index
    %c0_182 = arith.constant 0 : index
    %182 = tpu.strided_load %arg17[%c2_181, %c0_182] {strides = array<i32: 2, 1>} : memref<27x128xf32, #tpu.memory_space<vmem>>, vector<13x128xf32>
    %183 = arith.maximumf %181, %182 : vector<13x128xf32>
    %cst_183 = arith.constant 0.000000e+00 : f32
    %184 = vector.broadcast %cst_183 : f32 to vector<1x64xf32>
    %185 = vector.extract_strided_slice %183 {offsets = [0, 0], sizes = [1, 128], strides = [1, 1]} : vector<13x128xf32> to vector<1x128xf32>
    %c0_184 = arith.constant 0 : index
    %c0_185 = arith.constant 0 : index
    %c0_186 = arith.constant 0 : index
    %186 = vector.load %arg8[%c0_184, %c0_185, %c0_186] : memref<13x128x64xf32, #tpu.memory_space<vmem>>, vector<1x128x64xf32>
    %187 = vector.shape_cast %186 : vector<1x128x64xf32> to vector<128x64xf32>
    %cst_187 = arith.constant dense<0.000000e+00> : vector<1x64xf32>
    %188 = tpu.matmul %185, %187, %cst_187 {dimension_numbers = #tpu.dot_dimension_numbers<[1], [0], [0], [1], [0, 0, 1, 1], [], []>} : vector<1x128xf32>, vector<128x64xf32>, vector<1x64xf32> -> vector<1x64xf32>
    %189 = arith.addf %184, %188 : vector<1x64xf32>
    %190 = vector.extract_strided_slice %183 {offsets = [1, 0], sizes = [1, 128], strides = [1, 1]} : vector<13x128xf32> to vector<1x128xf32>
    %c1_188 = arith.constant 1 : index
    %c0_189 = arith.constant 0 : index
    %c0_190 = arith.constant 0 : index
    %191 = vector.load %arg8[%c1_188, %c0_189, %c0_190] : memref<13x128x64xf32, #tpu.memory_space<vmem>>, vector<1x128x64xf32>
    %192 = vector.shape_cast %191 : vector<1x128x64xf32> to vector<128x64xf32>
    %cst_191 = arith.constant dense<0.000000e+00> : vector<1x64xf32>
    %193 = tpu.matmul %190, %192, %cst_191 {dimension_numbers = #tpu.dot_dimension_numbers<[1], [0], [0], [1], [0, 0, 1, 1], [], []>} : vector<1x128xf32>, vector<128x64xf32>, vector<1x64xf32> -> vector<1x64xf32>
    %194 = arith.addf %189, %193 : vector<1x64xf32>
    %195 = vector.extract_strided_slice %183 {offsets = [2, 0], sizes = [1, 128], strides = [1, 1]} : vector<13x128xf32> to vector<1x128xf32>
    %c2_192 = arith.constant 2 : index
    %c0_193 = arith.constant 0 : index
    %c0_194 = arith.constant 0 : index
    %196 = vector.load %arg8[%c2_192, %c0_193, %c0_194] : memref<13x128x64xf32, #tpu.memory_space<vmem>>, vector<1x128x64xf32>
    %197 = vector.shape_cast %196 : vector<1x128x64xf32> to vector<128x64xf32>
    %cst_195 = arith.constant dense<0.000000e+00> : vector<1x64xf32>
    %198 = tpu.matmul %195, %197, %cst_195 {dimension_numbers = #tpu.dot_dimension_numbers<[1], [0], [0], [1], [0, 0, 1, 1], [], []>} : vector<1x128xf32>, vector<128x64xf32>, vector<1x64xf32> -> vector<1x64xf32>
    %199 = arith.addf %194, %198 : vector<1x64xf32>
    %200 = vector.extract_strided_slice %183 {offsets = [3, 0], sizes = [1, 128], strides = [1, 1]} : vector<13x128xf32> to vector<1x128xf32>
    %c3_196 = arith.constant 3 : index
    %c0_197 = arith.constant 0 : index
    %c0_198 = arith.constant 0 : index
    %201 = vector.load %arg8[%c3_196, %c0_197, %c0_198] : memref<13x128x64xf32, #tpu.memory_space<vmem>>, vector<1x128x64xf32>
    %202 = vector.shape_cast %201 : vector<1x128x64xf32> to vector<128x64xf32>
    %cst_199 = arith.constant dense<0.000000e+00> : vector<1x64xf32>
    %203 = tpu.matmul %200, %202, %cst_199 {dimension_numbers = #tpu.dot_dimension_numbers<[1], [0], [0], [1], [0, 0, 1, 1], [], []>} : vector<1x128xf32>, vector<128x64xf32>, vector<1x64xf32> -> vector<1x64xf32>
    %204 = arith.addf %199, %203 : vector<1x64xf32>
    %205 = vector.extract_strided_slice %183 {offsets = [4, 0], sizes = [1, 128], strides = [1, 1]} : vector<13x128xf32> to vector<1x128xf32>
    %c4_200 = arith.constant 4 : index
    %c0_201 = arith.constant 0 : index
    %c0_202 = arith.constant 0 : index
    %206 = vector.load %arg8[%c4_200, %c0_201, %c0_202] : memref<13x128x64xf32, #tpu.memory_space<vmem>>, vector<1x128x64xf32>
    %207 = vector.shape_cast %206 : vector<1x128x64xf32> to vector<128x64xf32>
    %cst_203 = arith.constant dense<0.000000e+00> : vector<1x64xf32>
    %208 = tpu.matmul %205, %207, %cst_203 {dimension_numbers = #tpu.dot_dimension_numbers<[1], [0], [0], [1], [0, 0, 1, 1], [], []>} : vector<1x128xf32>, vector<128x64xf32>, vector<1x64xf32> -> vector<1x64xf32>
    %209 = arith.addf %204, %208 : vector<1x64xf32>
    %210 = vector.extract_strided_slice %183 {offsets = [5, 0], sizes = [1, 128], strides = [1, 1]} : vector<13x128xf32> to vector<1x128xf32>
    %c5_204 = arith.constant 5 : index
    %c0_205 = arith.constant 0 : index
    %c0_206 = arith.constant 0 : index
    %211 = vector.load %arg8[%c5_204, %c0_205, %c0_206] : memref<13x128x64xf32, #tpu.memory_space<vmem>>, vector<1x128x64xf32>
    %212 = vector.shape_cast %211 : vector<1x128x64xf32> to vector<128x64xf32>
    %cst_207 = arith.constant dense<0.000000e+00> : vector<1x64xf32>
    %213 = tpu.matmul %210, %212, %cst_207 {dimension_numbers = #tpu.dot_dimension_numbers<[1], [0], [0], [1], [0, 0, 1, 1], [], []>} : vector<1x128xf32>, vector<128x64xf32>, vector<1x64xf32> -> vector<1x64xf32>
    %214 = arith.addf %209, %213 : vector<1x64xf32>
    %215 = vector.extract_strided_slice %183 {offsets = [6, 0], sizes = [1, 128], strides = [1, 1]} : vector<13x128xf32> to vector<1x128xf32>
    %c6_208 = arith.constant 6 : index
    %c0_209 = arith.constant 0 : index
    %c0_210 = arith.constant 0 : index
    %216 = vector.load %arg8[%c6_208, %c0_209, %c0_210] : memref<13x128x64xf32, #tpu.memory_space<vmem>>, vector<1x128x64xf32>
    %217 = vector.shape_cast %216 : vector<1x128x64xf32> to vector<128x64xf32>
    %cst_211 = arith.constant dense<0.000000e+00> : vector<1x64xf32>
    %218 = tpu.matmul %215, %217, %cst_211 {dimension_numbers = #tpu.dot_dimension_numbers<[1], [0], [0], [1], [0, 0, 1, 1], [], []>} : vector<1x128xf32>, vector<128x64xf32>, vector<1x64xf32> -> vector<1x64xf32>
    %219 = arith.addf %214, %218 : vector<1x64xf32>
    %220 = vector.extract_strided_slice %183 {offsets = [7, 0], sizes = [1, 128], strides = [1, 1]} : vector<13x128xf32> to vector<1x128xf32>
    %c7 = arith.constant 7 : index
    %c0_212 = arith.constant 0 : index
    %c0_213 = arith.constant 0 : index
    %221 = vector.load %arg8[%c7, %c0_212, %c0_213] : memref<13x128x64xf32, #tpu.memory_space<vmem>>, vector<1x128x64xf32>
    %222 = vector.shape_cast %221 : vector<1x128x64xf32> to vector<128x64xf32>
    %cst_214 = arith.constant dense<0.000000e+00> : vector<1x64xf32>
    %223 = tpu.matmul %220, %222, %cst_214 {dimension_numbers = #tpu.dot_dimension_numbers<[1], [0], [0], [1], [0, 0, 1, 1], [], []>} : vector<1x128xf32>, vector<128x64xf32>, vector<1x64xf32> -> vector<1x64xf32>
    %224 = arith.addf %219, %223 : vector<1x64xf32>
    %225 = vector.extract_strided_slice %183 {offsets = [8, 0], sizes = [1, 128], strides = [1, 1]} : vector<13x128xf32> to vector<1x128xf32>
    %c8 = arith.constant 8 : index
    %c0_215 = arith.constant 0 : index
    %c0_216 = arith.constant 0 : index
    %226 = vector.load %arg8[%c8, %c0_215, %c0_216] : memref<13x128x64xf32, #tpu.memory_space<vmem>>, vector<1x128x64xf32>
    %227 = vector.shape_cast %226 : vector<1x128x64xf32> to vector<128x64xf32>
    %cst_217 = arith.constant dense<0.000000e+00> : vector<1x64xf32>
    %228 = tpu.matmul %225, %227, %cst_217 {dimension_numbers = #tpu.dot_dimension_numbers<[1], [0], [0], [1], [0, 0, 1, 1], [], []>} : vector<1x128xf32>, vector<128x64xf32>, vector<1x64xf32> -> vector<1x64xf32>
    %229 = arith.addf %224, %228 : vector<1x64xf32>
    %230 = vector.extract_strided_slice %183 {offsets = [9, 0], sizes = [1, 128], strides = [1, 1]} : vector<13x128xf32> to vector<1x128xf32>
    %c9 = arith.constant 9 : index
    %c0_218 = arith.constant 0 : index
    %c0_219 = arith.constant 0 : index
    %231 = vector.load %arg8[%c9, %c0_218, %c0_219] : memref<13x128x64xf32, #tpu.memory_space<vmem>>, vector<1x128x64xf32>
    %232 = vector.shape_cast %231 : vector<1x128x64xf32> to vector<128x64xf32>
    %cst_220 = arith.constant dense<0.000000e+00> : vector<1x64xf32>
    %233 = tpu.matmul %230, %232, %cst_220 {dimension_numbers = #tpu.dot_dimension_numbers<[1], [0], [0], [1], [0, 0, 1, 1], [], []>} : vector<1x128xf32>, vector<128x64xf32>, vector<1x64xf32> -> vector<1x64xf32>
    %234 = arith.addf %229, %233 : vector<1x64xf32>
    %235 = vector.extract_strided_slice %183 {offsets = [10, 0], sizes = [1, 128], strides = [1, 1]} : vector<13x128xf32> to vector<1x128xf32>
    %c10 = arith.constant 10 : index
    %c0_221 = arith.constant 0 : index
    %c0_222 = arith.constant 0 : index
    %236 = vector.load %arg8[%c10, %c0_221, %c0_222] : memref<13x128x64xf32, #tpu.memory_space<vmem>>, vector<1x128x64xf32>
    %237 = vector.shape_cast %236 : vector<1x128x64xf32> to vector<128x64xf32>
    %cst_223 = arith.constant dense<0.000000e+00> : vector<1x64xf32>
    %238 = tpu.matmul %235, %237, %cst_223 {dimension_numbers = #tpu.dot_dimension_numbers<[1], [0], [0], [1], [0, 0, 1, 1], [], []>} : vector<1x128xf32>, vector<128x64xf32>, vector<1x64xf32> -> vector<1x64xf32>
    %239 = arith.addf %234, %238 : vector<1x64xf32>
    %240 = vector.extract_strided_slice %183 {offsets = [11, 0], sizes = [1, 128], strides = [1, 1]} : vector<13x128xf32> to vector<1x128xf32>
    %c11 = arith.constant 11 : index
    %c0_224 = arith.constant 0 : index
    %c0_225 = arith.constant 0 : index
    %241 = vector.load %arg8[%c11, %c0_224, %c0_225] : memref<13x128x64xf32, #tpu.memory_space<vmem>>, vector<1x128x64xf32>
    %242 = vector.shape_cast %241 : vector<1x128x64xf32> to vector<128x64xf32>
    %cst_226 = arith.constant dense<0.000000e+00> : vector<1x64xf32>
    %243 = tpu.matmul %240, %242, %cst_226 {dimension_numbers = #tpu.dot_dimension_numbers<[1], [0], [0], [1], [0, 0, 1, 1], [], []>} : vector<1x128xf32>, vector<128x64xf32>, vector<1x64xf32> -> vector<1x64xf32>
    %244 = arith.addf %239, %243 : vector<1x64xf32>
    %245 = vector.extract_strided_slice %183 {offsets = [12, 0], sizes = [1, 128], strides = [1, 1]} : vector<13x128xf32> to vector<1x128xf32>
    %c12 = arith.constant 12 : index
    %c0_227 = arith.constant 0 : index
    %c0_228 = arith.constant 0 : index
    %246 = vector.load %arg8[%c12, %c0_227, %c0_228] : memref<13x128x64xf32, #tpu.memory_space<vmem>>, vector<1x128x64xf32>
    %247 = vector.shape_cast %246 : vector<1x128x64xf32> to vector<128x64xf32>
    %cst_229 = arith.constant dense<0.000000e+00> : vector<1x64xf32>
    %248 = tpu.matmul %245, %247, %cst_229 {dimension_numbers = #tpu.dot_dimension_numbers<[1], [0], [0], [1], [0, 0, 1, 1], [], []>} : vector<1x128xf32>, vector<128x64xf32>, vector<1x64xf32> -> vector<1x64xf32>
    %249 = arith.addf %244, %248 : vector<1x64xf32>
    %c0_230 = arith.constant 0 : index
    %c0_231 = arith.constant 0 : index
    %250 = vector.load %arg9[%c0_230, %c0_231] : memref<1x64xf32, #tpu.memory_space<vmem>>, vector<1x64xf32>
    %251 = arith.addf %249, %250 : vector<1x64xf32>
    %cst_232 = arith.constant 0.000000e+00 : f32
    %252 = vector.broadcast %cst_232 : f32 to vector<1x64xf32>
    %253 = arith.maximumf %251, %252 : vector<1x64xf32>
    %c0_233 = arith.constant 0 : index
    %c0_234 = arith.constant 0 : index
    %254 = vector.load %arg10[%c0_233, %c0_234] : memref<1x64xf32, #tpu.memory_space<vmem>>, vector<1x64xf32>
    %255 = arith.mulf %253, %254 : vector<1x64xf32>
    %cst_235 = arith.constant dense<0.000000e+00> : vector<1xf32>
    %256 = vector.multi_reduction <add>, %255, %cst_235 [1] : vector<1x64xf32> to vector<1xf32>
    %257 = vector.shape_cast %256 : vector<1xf32> to vector<1x1xf32>
    %c0_236 = arith.constant 0 : index
    %c0_237 = arith.constant 0 : index
    %258 = vector.load %arg11[%c0_236, %c0_237] : memref<1x1xf32, #tpu.memory_space<vmem>>, vector<1x1xf32>
    %259 = arith.addf %257, %258 : vector<1x1xf32>
    %260 = math.absf %259 : vector<1x1xf32>
    %cst_238 = arith.constant 0.000000e+00 : f32
    %261 = vector.broadcast %cst_238 : f32 to vector<1x1xf32>
    %262 = arith.subf %261, %260 : vector<1x1xf32>
    %263 = math.exp %262 : vector<1x1xf32>
    %cst_239 = arith.constant 0.000000e+00 : f32
    %264 = vector.broadcast %cst_239 : f32 to vector<1x1xf32>
    %265 = arith.cmpf oge, %259, %264 : vector<1x1xf32>
    %cst_240 = arith.constant 1.000000e+00 : f32
    %266 = vector.broadcast %cst_240 : f32 to vector<1x1xf32>
    %267 = arith.addf %266, %263 : vector<1x1xf32>
    %cst_241 = arith.constant 1.000000e+00 : f32
    %268 = vector.broadcast %cst_241 : f32 to vector<1x1xf32>
    %269 = arith.divf %268, %267 : vector<1x1xf32>
    %cst_242 = arith.constant 1.000000e+00 : f32
    %270 = vector.broadcast %cst_242 : f32 to vector<1x1xf32>
    %271 = arith.addf %270, %263 : vector<1x1xf32>
    %272 = arith.divf %263, %271 : vector<1x1xf32>
    %273 = arith.select %265, %269, %272 : vector<1x1xi1>, vector<1x1xf32>
    %274 = vector.shape_cast %273 : vector<1x1xf32> to vector<1x1xf32>
    %275 = vector.broadcast %274 : vector<1x1xf32> to vector<1x128xf32>
    %c0_243 = arith.constant 0 : index
    %c0_244 = arith.constant 0 : index
    %c0_245 = arith.constant 0 : index
    %276 = vector.load %arg12[%c0_243, %c0_244, %c0_245] : memref<1x1x128xf32, #tpu.memory_space<vmem>>, vector<1x1x128xf32>
    %277 = vector.shape_cast %276 : vector<1x1x128xf32> to vector<1x128xf32>
    %278 = vector.shape_cast %275 : vector<1x128xf32> to vector<1x1x128xf32>
    tpu.vector_store %arg12[%c0_243, %c0_244, %c0_245], %278 {strides = array<i32>} : memref<1x1x128xf32, #tpu.memory_space<vmem>>, vector<1x1x128xf32>,
    return
  }
  func.func @transform_0(%arg0: i32) -> (i32, i32, i32) {
    %c0_i32 = arith.constant 0 : i32
    %c0_i32_0 = arith.constant 0 : i32
    %c0_i32_1 = arith.constant 0 : i32
    return %arg0, %c0_i32, %c0_i32_0 : i32, i32, i32
  }
  func.func @transform_1(%arg0: i32) -> (i32, i32, i32) {
    %c0_i32 = arith.constant 0 : i32
    %c0_i32_0 = arith.constant 0 : i32
    %c0_i32_1 = arith.constant 0 : i32
    %c0_i32_2 = arith.constant 0 : i32
    return %c0_i32, %c0_i32_0, %c0_i32_1 : i32, i32, i32
  }
  func.func @transform_2(%arg0: i32) -> (i32, i32) {
    %c0_i32 = arith.constant 0 : i32
    %c0_i32_0 = arith.constant 0 : i32
    %c0_i32_1 = arith.constant 0 : i32
    return %c0_i32, %c0_i32_0 : i32, i32
  }
  func.func @transform_3(%arg0: i32) -> (i32, i32, i32) {
    %c0_i32 = arith.constant 0 : i32
    %c0_i32_0 = arith.constant 0 : i32
    %c0_i32_1 = arith.constant 0 : i32
    %c0_i32_2 = arith.constant 0 : i32
    return %c0_i32, %c0_i32_0, %c0_i32_1 : i32, i32, i32
  }
  func.func @transform_4(%arg0: i32) -> (i32, i32) {
    %c0_i32 = arith.constant 0 : i32
    %c0_i32_0 = arith.constant 0 : i32
    %c0_i32_1 = arith.constant 0 : i32
    return %c0_i32, %c0_i32_0 : i32, i32
  }
  func.func @transform_5(%arg0: i32) -> (i32, i32, i32) {
    %c0_i32 = arith.constant 0 : i32
    %c0_i32_0 = arith.constant 0 : i32
    %c0_i32_1 = arith.constant 0 : i32
    %c0_i32_2 = arith.constant 0 : i32
    return %c0_i32, %c0_i32_0, %c0_i32_1 : i32, i32, i32
  }
  func.func @transform_6(%arg0: i32) -> (i32, i32) {
    %c0_i32 = arith.constant 0 : i32
    %c0_i32_0 = arith.constant 0 : i32
    %c0_i32_1 = arith.constant 0 : i32
    return %c0_i32, %c0_i32_0 : i32, i32
  }
  func.func @transform_7(%arg0: i32) -> (i32, i32, i32) {
    %c0_i32 = arith.constant 0 : i32
    %c0_i32_0 = arith.constant 0 : i32
    %c0_i32_1 = arith.constant 0 : i32
    %c0_i32_2 = arith.constant 0 : i32
    return %c0_i32, %c0_i32_0, %c0_i32_1 : i32, i32, i32
  }
  func.func @transform_8(%arg0: i32) -> (i32, i32) {
    %c0_i32 = arith.constant 0 : i32
    %c0_i32_0 = arith.constant 0 : i32
    %c0_i32_1 = arith.constant 0 : i32
    return %c0_i32, %c0_i32_0 : i32, i32
  }
  func.func @transform_9(%arg0: i32) -> (i32, i32) {
    %c0_i32 = arith.constant 0 : i32
    %c0_i32_0 = arith.constant 0 : i32
    %c0_i32_1 = arith.constant 0 : i32
    return %c0_i32, %c0_i32_0 : i32, i32
  }
  func.func @transform_10(%arg0: i32) -> (i32, i32) {
    %c0_i32 = arith.constant 0 : i32
    %c0_i32_0 = arith.constant 0 : i32
    %c0_i32_1 = arith.constant 0 : i32
    return %c0_i32, %c0_i32_0 : i32, i32
  }
  func.func @transform_11(%arg0: i32) -> (i32, i32, i32) {
    %c0_i32 = arith.constant 0 : i32
    %c0_i32_0 = arith.constant 0 : i32
    %c0_i32_1 = arith.constant 0 : i32
    return %arg0, %c0_i32, %c0_i32_0 : i32, i32, i32
  }
}

</mosaic_0001>

<bundles_post_ra>
// kernel: cnn_forward.1
= control target key start
LH: loop header
LB: loop body
LE: loop exit
PB: predicated region body
PF: predicated region fallthrough
CT: control target
= control target key end

     0   :  { %s6941_s19 = smov 0   ;;  %s9883_s0 = inlined_call_operand.vmem [shape: f32[2,806,1], index: 0, kind: input, shape index: {}]   ;;  %s9884_s1 = inlined_call_operand.vmem [shape: f32[7,1,32], index: 1, kind: input, shape index: {}]   ;;  %s9885_s2 = inlined_call_operand.vmem [shape: f32[1,32], index: 2, kind: input, shape index: {}]   ;;  %s9886_s3 = inlined_call_operand.vmem [shape: f32[7,32,64], index: 3, kind: input, shape index: {}]   ;;  %s9887_s4 = inlined_call_operand.vmem [shape: f32[1,64], index: 4, kind: input, shape index: {}]   ;;  %s9888_s5 = inlined_call_operand.vmem [shape: f32[7,64,128], index: 5, kind: input, shape index: {}]   ;;  %s9889_s6 = inlined_call_operand.vmem [shape: f32[1,128], index: 6, kind: input, shape index: {}]   ;;  %s9890_s7 = inlined_call_operand.vmem [shape: f32[13,128,64], index: 7, kind: input, shape index: {}]   ;;  %s9891_s8 = inlined_call_operand.vmem [shape: f32[1,64], index: 8, kind: input, shape index: {}]   ;;  %s9892_s9 = inlined_call_operand.vmem [shape: f32[1,64], index: 9, kind: input, shape index: {}]   ;;  %s9893_s10 = inlined_call_operand.<no memory space> [shape: f32[1,1], index: 10, kind: input, shape index: {}]   ;;  %s9894_s11 = inlined_call_operand.vmem [shape: f32[2,1,128], index: 11, kind: output, shape index: {}]  }
   0x1   :  { %v16_v0 = vstv %s9893_s10 }
   0x2   :  { %17 = vst [vmem:[#allocation7] sm:$0x1] %v16_v0 }
   0x3 LB: > { %s6070_s20 = sadd.s32 4294967295, %s6874_s19   ;;  %p6074_p0 = scmp.ge.s32.totalorder %s6874_s19, 1  ;;  %s6874_s19 = sphi %s6941_s19, %s23_s19  }
   0x4   : > { %p339_p1 = scmp.lt.s32.totalorder %s6874_s19, 3 }
   0x6   : > { %p340_p2 = pnand %p6074_p0, %p339_p1 }
   0x8   : > { %343 = sbr.rel (%p340_p2) target bundleno = 2088 (0x828), region = 64 }
   0xd   : > { %p377_p3 = scmp.lt.s32.totalorder %s6070_s20, 1  ;;  %v6876_v1 = vmov 0   ;;  %vm3672_vm0 = vcmask 253952   ;;  %vm3675_vm1 = vcmask 261120   ;;  %vm3925_vm2 = vcmask 256000  }
   0xe   : > { %6837 = vset.pattern.permute.xlu2 %v6876_v1  ;;  %6836 = vset.pattern.permute.xlu1 %v6876_v1  ;;  %vm4928_vm3 = vcmask 516096   ;;  %vm4931_vm4 = vcmask 523264   ;;  %vm5001_vm5 = vcmask 518144   ;;  %vm4944_vm6 = vcmask 519168  }
   0xf   : > { %6835 = vset.pattern.permute.xlu0 %v6876_v1  ;;  %s10220_s20 = smov (!%p377_p3, %s6070_s20), 1  ;;  %vm5010_vm7 = vcmask 517120  }
  0x10   : > { %s6824_s10 = smul.u32 808, %s10220_s20  ;;  %s384_s21 = scalar_lea.vmem %s9894_s11, %s10220_s20 }
  0x12   : > { %s6955_s23 = scalar_lea.vmem %s9883_s0, %s6824_s10 }
  0x13   : > { %v6079_v2 = vld [vmem:[%s6955_s23 + $0x40] ss:$2 sm:$0xff]  ;;  %v6080_v5 = vld [vmem:[%s6955_s23 + $0x50] ss:$2 sm:$0xff]  ;;  %v6125_v59 = vld [vmem:[%s6955_s23 + $0x1] ss:$2 sm:$0xff] }
  0x14   : > { %v6077_v3 = vld [vmem:[%s6955_s23 + $0x20] ss:$2 sm:$0xff]  ;;  %507 = vperm.xlu2 %6837, %v6079_v2   ;;  %v6078_v6 = vld [vmem:[%s6955_s23 + $0x30] ss:$2 sm:$0xff]  ;;  %v6128_v1 = vld [vmem:[%s6955_s23 + $0x31] ss:$2 sm:$0xff] }
  0x15   : > { %v385_v4 = vld [vmem:[%s6955_s23] ss:$2 sm:$0xff]  ;;  %497 = vperm.xlu1 %6836, %v6077_v3   ;;  %v6076_v7 = vld [vmem:[%s6955_s23 + $0x10] ss:$2 sm:$0xff]  ;;  %v6127_v2 = vld [vmem:[%s6955_s23 + $0x21] ss:$2 sm:$0xff] }
  0x16   : > { %487 = vperm.xlu0 %6835, %v385_v4   ;;  %v6083_v8 = vld [vmem:[%s6955_s23 + $0x80] ss:$2 sm:$0xff]  ;;  %v6082_v9 = vld [vmem:[%s6955_s23 + $0x70] ss:$2 sm:$0xff]  ;;  %v6126_v3 = vld [vmem:[%s6955_s23 + $0x11] ss:$2 sm:$0xff] }
  0x17   : > { %v6081_v10 = vld [vmem:[%s6955_s23 + $0x60] ss:$2 sm:$0xff]  ;;  %v6086_v11 = vld [vmem:[%s6955_s23 + $0xb0] ss:$2 sm:$0xff] }
  0x18   : > { %v6085_v12 = vld [vmem:[%s6955_s23 + $0xa0] ss:$2 sm:$0xff]  ;;  %v6084_v13 = vld [vmem:[%s6955_s23 + $0x90] ss:$2 sm:$0xff] }
  0x19   : > { %v6089_v14 = vld [vmem:[%s6955_s23 + $0xe0] ss:$2 sm:$0xff]  ;;  %v6088_v15 = vld [vmem:[%s6955_s23 + $0xd0] ss:$2 sm:$0xff] }
  0x1a   : > { %v6087_v16 = vld [vmem:[%s6955_s23 + $0xc0] ss:$2 sm:$0xff]  ;;  %v6092_v17 = vld [vmem:[%s6955_s23 + $0x110] ss:$2 sm:$0xff] }
  0x1b   : > { %v6091_v18 = vld [vmem:[%s6955_s23 + $0x100] ss:$2 sm:$0xff]  ;;  %v6090_v19 = vld [vmem:[%s6955_s23 + $0xf0] ss:$2 sm:$0xff] }
  0x1c   : > { %512 = vperm.xlu2 %6837, %v6080_v5   ;;  %v6095_v20 = vld [vmem:[%s6955_s23 + $0x140] ss:$2 sm:$0xff]  ;;  %v6094_v21 = vld [vmem:[%s6955_s23 + $0x130] ss:$2 sm:$0xff] }
  0x1d   : > { %502 = vperm.xlu1 %6836, %v6078_v6   ;;  %v6093_v22 = vld [vmem:[%s6955_s23 + $0x120] ss:$2 sm:$0xff]  ;;  %v6098_v23 = vld [vmem:[%s6955_s23 + $0x170] ss:$2 sm:$0xff] }
  0x1e   : > { %492 = vperm.xlu0 %6835, %v6076_v7   ;;  %v6097_v24 = vld [vmem:[%s6955_s23 + $0x160] ss:$2 sm:$0xff]  ;;  %v6096_v25 = vld [vmem:[%s6955_s23 + $0x150] ss:$2 sm:$0xff]  ;;  %v6131_v7 = vld [vmem:[%s6955_s23 + $0x61] ss:$2 sm:$0xff] }
  0x1f   : > { %v6101_v26 = vld [vmem:[%s6955_s23 + $0x1a0] ss:$2 sm:$0xff]  ;;  %v6100_v27 = vld [vmem:[%s6955_s23 + $0x190] ss:$2 sm:$0xff] }
  0x20   : > { %v6099_v28 = vld [vmem:[%s6955_s23 + $0x180] ss:$2 sm:$0xff]  ;;  %v6104_v29 = vld [vmem:[%s6955_s23 + $0x1d0] ss:$2 sm:$0xff] }
  0x21   : > { %v6103_v30 = vld [vmem:[%s6955_s23 + $0x1c0] ss:$2 sm:$0xff]  ;;  %v6102_v31 = vld [vmem:[%s6955_s23 + $0x1b0] ss:$2 sm:$0xff] }
  0x22   : > { %v6107_v32 = vld [vmem:[%s6955_s23 + $0x200] ss:$2 sm:$0xff]  ;;  %v6106_v33 = vld [vmem:[%s6955_s23 + $0x1f0] ss:$2 sm:$0xff] }
  0x23   : > { %v6105_v34 = vld [vmem:[%s6955_s23 + $0x1e0] ss:$2 sm:$0xff]  ;;  %v6110_v35 = vld [vmem:[%s6955_s23 + $0x230] ss:$2 sm:$0xff] }
  0x24   : > { %527 = vperm.xlu2 %6837, %v6083_v8   ;;  %v6109_v36 = vld [vmem:[%s6955_s23 + $0x220] ss:$2 sm:$0xff]  ;;  %v6108_v37 = vld [vmem:[%s6955_s23 + $0x210] ss:$2 sm:$0xff]  ;;  %v6130_v8 = vld [vmem:[%s6955_s23 + $0x51] ss:$2 sm:$0xff] }
  0x25   : > { %522 = vperm.xlu1 %6836, %v6082_v9   ;;  %v6113_v39 = vld [vmem:[%s6955_s23 + $0x260] ss:$2 sm:$0xff]  ;;  %v6112_v40 = vld [vmem:[%s6955_s23 + $0x250] ss:$2 sm:$0xff]  ;;  %v6129_v9 = vld [vmem:[%s6955_s23 + $0x41] ss:$2 sm:$0xff] }
  0x26   : > { %517 = vperm.xlu0 %6835, %v6081_v10   ;;  %v6111_v41 = vld [vmem:[%s6955_s23 + $0x240] ss:$2 sm:$0xff]  ;;  %v6116_v43 = vld [vmem:[%s6955_s23 + $0x290] ss:$2 sm:$0xff] }
  0x27   : > { %v6115_v44 = vld [vmem:[%s6955_s23 + $0x280] ss:$2 sm:$0xff]  ;;  %v6114_v45 = vld [vmem:[%s6955_s23 + $0x270] ss:$2 sm:$0xff] }
  0x28   : > { %v6119_v47 = vld [vmem:[%s6955_s23 + $0x2c0] ss:$2 sm:$0xff]  ;;  %v6118_v48 = vld [vmem:[%s6955_s23 + $0x2b0] ss:$2 sm:$0xff] }
  0x29   : > { %v6117_v49 = vld [vmem:[%s6955_s23 + $0x2a0] ss:$2 sm:$0xff]  ;;  %v6122_v53 = vld [vmem:[%s6955_s23 + $0x2f0] ss:$2 sm:$0xff] }
  0x2a   : > { %v6121_v54 = vld [vmem:[%s6955_s23 + $0x2e0] ss:$2 sm:$0xff]  ;;  %v6120_v55 = vld [vmem:[%s6955_s23 + $0x2d0] ss:$2 sm:$0xff] }
  0x2b   : > { %v6124_v60 = vld [vmem:[%s6955_s23 + $0x310] ss:$2 sm:$0xff]  ;;  %v6123_v61 = vld [vmem:[%s6955_s23 + $0x300] ss:$2 sm:$0xff] }
  0x2c   : > { %542 = vperm.xlu2 %6837, %v6086_v11  }
  0x2d   : > { %537 = vperm.xlu1 %6836, %v6085_v12  }
  0x2e   : > { %532 = vperm.xlu0 %6835, %v6084_v13   ;;  %v6134_v13 = vld [vmem:[%s6955_s23 + $0x91] ss:$2 sm:$0xff] }
  0x34   : > { %557 = vperm.xlu2 %6837, %v6089_v14   ;;  %v6133_v14 = vld [vmem:[%s6955_s23 + $0x81] ss:$2 sm:$0xff] }
  0x35   : > { %552 = vperm.xlu1 %6836, %v6088_v15   ;;  %v6132_v15 = vld [vmem:[%s6955_s23 + $0x71] ss:$2 sm:$0xff] }
  0x36   : > { %547 = vperm.xlu0 %6835, %v6087_v16  }
  0x3c   : > { %572 = vperm.xlu2 %6837, %v6092_v17  }
  0x3d   : > { %567 = vperm.xlu1 %6836, %v6091_v18  }
  0x3e   : > { %562 = vperm.xlu0 %6835, %v6090_v19   ;;  %v6137_v19 = vld [vmem:[%s6955_s23 + $0xc1] ss:$2 sm:$0xff] }
  0x44   : > { %587 = vperm.xlu2 %6837, %v6095_v20   ;;  %v6136_v20 = vld [vmem:[%s6955_s23 + $0xb1] ss:$2 sm:$0xff] }
  0x45   : > { %582 = vperm.xlu1 %6836, %v6094_v21   ;;  %v6135_v21 = vld [vmem:[%s6955_s23 + $0xa1] ss:$2 sm:$0xff] }
  0x46   : > { %577 = vperm.xlu0 %6835, %v6093_v22  }
  0x4c   : > { %602 = vperm.xlu2 %6837, %v6098_v23  }
  0x4d   : > { %597 = vperm.xlu1 %6836, %v6097_v24  }
  0x4e   : > { %592 = vperm.xlu0 %6835, %v6096_v25   ;;  %v6140_v25 = vld [vmem:[%s6955_s23 + $0xf1] ss:$2 sm:$0xff] }
  0x54   : > { %617 = vperm.xlu2 %6837, %v6101_v26   ;;  %v6139_v26 = vld [vmem:[%s6955_s23 + $0xe1] ss:$2 sm:$0xff] }
  0x55   : > { %612 = vperm.xlu1 %6836, %v6100_v27   ;;  %v6138_v27 = vld [vmem:[%s6955_s23 + $0xd1] ss:$2 sm:$0xff] }
  0x56   : > { %607 = vperm.xlu0 %6835, %v6099_v28  }
  0x5c   : > { %632 = vperm.xlu2 %6837, %v6104_v29  }
  0x5d   : > { %627 = vperm.xlu1 %6836, %v6103_v30  }
  0x5e   : > { %622 = vperm.xlu0 %6835, %v6102_v31   ;;  %v6143_v31 = vld [vmem:[%s6955_s23 + $0x121] ss:$2 sm:$0xff] }
  0x64   : > { %647 = vperm.xlu2 %6837, %v6107_v32   ;;  %v6142_v32 = vld [vmem:[%s6955_s23 + $0x111] ss:$2 sm:$0xff] }
  0x65   : > { %642 = vperm.xlu1 %6836, %v6106_v33   ;;  %v6141_v33 = vld [vmem:[%s6955_s23 + $0x101] ss:$2 sm:$0xff] }
  0x66   : > { %637 = vperm.xlu0 %6835, %v6105_v34  }
  0x6c   : > { %662 = vperm.xlu2 %6837, %v6110_v35  }
  0x6d   : > { %657 = vperm.xlu1 %6836, %v6109_v36  }
  0x6e   : > { %652 = vperm.xlu0 %6835, %v6108_v37   ;;  %v6993_v38 = vpop.permute.xlu2 %507  ;;  %v6146_v37 = vld [vmem:[%s6955_s23 + $0x151] ss:$2 sm:$0xff] }
  0x6f   : > { %9895 = vst [vmem:[#allocation8_spill] sm:$0xff] %v6993_v38 }
  0x74   : > { %677 = vperm.xlu2 %6837, %v6113_v39   ;;  %v6145_v39 = vld [vmem:[%s6955_s23 + $0x141] ss:$2 sm:$0xff] }
  0x75   : > { %672 = vperm.xlu1 %6836, %v6112_v40   ;;  %v6144_v40 = vld [vmem:[%s6955_s23 + $0x131] ss:$2 sm:$0xff] }
  0x76   : > { %667 = vperm.xlu0 %6835, %v6111_v41   ;;  %v6998_v42 = vpop.permute.xlu2 %512 }
  0x77   : > { %9896 = vst [vmem:[#allocation9_spill] sm:$0xff] %v6998_v42 }
  0x7c   : > { %692 = vperm.xlu2 %6837, %v6116_v43  }
  0x7d   : > { %687 = vperm.xlu1 %6836, %v6115_v44  }
  0x7e   : > { %682 = vperm.xlu0 %6835, %v6114_v45   ;;  %v7003_v46 = vpop.permute.xlu2 %527  ;;  %v6149_v45 = vld [vmem:[%s6955_s23 + $0x181] ss:$2 sm:$0xff] }
  0x7f   : > { %9897 = vst [vmem:[#allocation10_spill] sm:$0xff] %v7003_v46  ;;  %v6335_v46 = vld [vmem:[%s6955_s23 + $0x65] ss:$2 sm:$0xff] }
  0x84   : > { %707 = vperm.xlu2 %6837, %v6119_v47   ;;  %v6148_v47 = vld [vmem:[%s6955_s23 + $0x171] ss:$2 sm:$0xff] }
  0x85   : > { %702 = vperm.xlu1 %6836, %v6118_v48   ;;  %v6147_v48 = vld [vmem:[%s6955_s23 + $0x161] ss:$2 sm:$0xff] }
  0x86   : > { %697 = vperm.xlu0 %6835, %v6117_v49   ;;  %v7008_v50 = vpop.permute.xlu2 %542 }
  0x87   : > { %9898 = vst [vmem:[#allocation11_spill] sm:$0xff] %v7008_v50  ;;  %v7010_v51 = vpop.permute.xlu1 %497  ;;  %v6281_v50 = vld [vmem:[%s6955_s23 + $0x34] ss:$2 sm:$0xff] }
  0x88   : > { %v7012_v52 = vpop.permute.xlu0 %487 }
  0x8c   : > { %722 = vperm.xlu2 %6837, %v6122_v53  }
  0x8d   : > { %717 = vperm.xlu1 %6836, %v6121_v54  }
  0x8e   : > { %712 = vperm.xlu0 %6835, %v6120_v55   ;;  %v7017_v56 = vpop.permute.xlu2 %557  ;;  %v6152_v55 = vld [vmem:[%s6955_s23 + $0x1b1] ss:$2 sm:$0xff] }
  0x8f   : > { %9899 = vst [vmem:[#allocation12_spill] sm:$0xff] %v7017_v56  ;;  %v7019_v57 = vpop.permute.xlu1 %502  ;;  %v6273_v56 = vld [vmem:[%s6955_s23 + $0x2e3] ss:$2 sm:$0xff] }
  0x90   : > { %v7021_v58 = vpop.permute.xlu0 %492 }
  0x94   : > { %942 = vperm.xlu2 %6837, %v6125_v59   ;;  %v6151_v59 = vld [vmem:[%s6955_s23 + $0x1a1] ss:$2 sm:$0xff] }
  0x95   : > { %732 = vperm.xlu1 %6836, %v6124_v60   ;;  %v6150_v60 = vld [vmem:[%s6955_s23 + $0x191] ss:$2 sm:$0xff] }
  0x96   : > { %727 = vperm.xlu0 %6835, %v6123_v61   ;;  %v7026_v62 = vpop.permute.xlu2 %572 }
  0x97   : > { %9900 = vst [vmem:[#allocation13_spill] sm:$0xff] %v7026_v62  ;;  %v7028_v63 = vpop.permute.xlu1 %522  ;;  %v6227_v62 = vld [vmem:[%s6955_s23 + $0x3] ss:$2 sm:$0xff] }
  0x98   : > { %9901 = vst [vmem:[#allocation14_spill] sm:$0xff] %v7028_v63  ;;  %v7030_v0 = vpop.permute.xlu0 %517  ;;  %v6389_v63 = vld [vmem:[%s6955_s23 + $0x96] ss:$2 sm:$0xff] }
  0x99   : > { %9902 = vst [vmem:[#allocation15_spill] sm:$0xff] %v7030_v0 }
  0x9c   : > { %957 = vperm.xlu2 %6837, %v6128_v1  }
  0x9d   : > { %952 = vperm.xlu1 %6836, %v6127_v2  }
  0x9e   : > { %947 = vperm.xlu0 %6835, %v6126_v3   ;;  %v7035_v4 = vpop.permute.xlu2 %587  ;;  %v6155_v3 = vld [vmem:[%s6955_s23 + $0x1e1] ss:$2 sm:$0xff] }
  0x9f   : > { %9903 = vst [vmem:[#allocation16_spill] sm:$0xff] %v7035_v4  ;;  %v7037_v5 = vpop.permute.xlu1 %537  ;;  %v6221_v4 = vld [vmem:[%s6955_s23 + $0x2d2] ss:$2 sm:$0xff] }
  0xa0   : > { %9904 = vst [vmem:[#allocation17_spill] sm:$0xff] %v7037_v5  ;;  %v7039_v6 = vpop.permute.xlu0 %532  ;;  %v6338_v5 = vld [vmem:[%s6955_s23 + $0x95] ss:$2 sm:$0xff] }
  0xa1   : > { %9905 = vst [vmem:[#allocation18_spill] sm:$0xff] %v7039_v6  ;;  %v6329_v6 = vld [vmem:[%s6955_s23 + $0x5] ss:$2 sm:$0xff] }
  0xa4   : > { %972 = vperm.xlu2 %6837, %v6131_v7   ;;  %v6154_v7 = vld [vmem:[%s6955_s23 + $0x1d1] ss:$2 sm:$0xff] }
  0xa5   : > { %967 = vperm.xlu1 %6836, %v6130_v8   ;;  %v6153_v8 = vld [vmem:[%s6955_s23 + $0x1c1] ss:$2 sm:$0xff] }
  0xa6   : > { %962 = vperm.xlu0 %6835, %v6129_v9   ;;  %v7044_v10 = vpop.permute.xlu2 %602 }
  0xa7   : > { %9906 = vst [vmem:[#allocation19_spill] sm:$0xff] %v7044_v10  ;;  %v7046_v11 = vpop.permute.xlu1 %552  ;;  %v6212_v10 = vld [vmem:[%s6955_s23 + $0x242] ss:$2 sm:$0xff] }
  0xa8   : > { %9907 = vst [vmem:[#allocation20_spill] sm:$0xff] %v7046_v11  ;;  %v7048_v12 = vpop.permute.xlu0 %547  ;;  %v6261_v11 = vld [vmem:[%s6955_s23 + $0x223] ss:$2 sm:$0xff] }
  0xa9   : > { %9908 = vst [vmem:[#allocation21_spill] sm:$0xff] %v7048_v12  ;;  %v6267_v12 = vld [vmem:[%s6955_s23 + $0x283] ss:$2 sm:$0xff] }
  0xac   : > { %987 = vperm.xlu2 %6837, %v6134_v13  }
  0xad   : > { %982 = vperm.xlu1 %6836, %v6133_v14  }
  0xae   : > { %977 = vperm.xlu0 %6835, %v6132_v15   ;;  %v7053_v16 = vpop.permute.xlu2 %617  ;;  %v6158_v15 = vld [vmem:[%s6955_s23 + $0x211] ss:$2 sm:$0xff] }
  0xaf   : > { %9909 = vst [vmem:[#allocation22_spill] sm:$0xff] %v7053_v16  ;;  %v7055_v17 = vpop.permute.xlu1 %567  ;;  %v6199_v16 = vld [vmem:[%s6955_s23 + $0x172] ss:$2 sm:$0xff] }
  0xb0   : > { %9910 = vst [vmem:[#allocation23_spill] sm:$0xff] %v7055_v17  ;;  %v7057_v18 = vpop.permute.xlu0 %562  ;;  %v6231_v17 = vld [vmem:[%s6955_s23 + $0x43] ss:$2 sm:$0xff] }
  0xb1   : > { %9911 = vst [vmem:[#allocation24_spill] sm:$0xff] %v7057_v18  ;;  %v6236_v18 = vld [vmem:[%s6955_s23 + $0x93] ss:$2 sm:$0xff] }
  0xb4   : > { %1002 = vperm.xlu2 %6837, %v6137_v19   ;;  %v6157_v19 = vld [vmem:[%s6955_s23 + $0x201] ss:$2 sm:$0xff] }
  0xb5   : > { %997 = vperm.xlu1 %6836, %v6136_v20   ;;  %v6156_v20 = vld [vmem:[%s6955_s23 + $0x1f1] ss:$2 sm:$0xff] }
  0xb6   : > { %992 = vperm.xlu0 %6835, %v6135_v21   ;;  %v7062_v22 = vpop.permute.xlu2 %632 }
  0xb7   : > { %9912 = vst [vmem:[#allocation25_spill] sm:$0xff] %v7062_v22  ;;  %v7064_v23 = vpop.permute.xlu1 %582  ;;  %v6192_v22 = vld [vmem:[%s6955_s23 + $0x102] ss:$2 sm:$0xff] }
  0xb8   : > { %9913 = vst [vmem:[#allocation26_spill] sm:$0xff] %v7064_v23  ;;  %v7066_v24 = vpop.permute.xlu0 %577  ;;  %v6229_v23 = vld [vmem:[%s6955_s23 + $0x23] ss:$2 sm:$0xff] }
  0xb9   : > { %9914 = vst [vmem:[#allocation27_spill] sm:$0xff] %v7066_v24  ;;  %v6233_v24 = vld [vmem:[%s6955_s23 + $0x63] ss:$2 sm:$0xff] }
  0xbc   : > { %1017 = vperm.xlu2 %6837, %v6140_v25  }
  0xbd   : > { %1012 = vperm.xlu1 %6836, %v6139_v26  }
  0xbe   : > { %1007 = vperm.xlu0 %6835, %v6138_v27   ;;  %v7071_v28 = vpop.permute.xlu2 %647  ;;  %v6161_v27 = vld [vmem:[%s6955_s23 + $0x241] ss:$2 sm:$0xff] }
  0xbf   : > { %9915 = vst [vmem:[#allocation28_spill] sm:$0xff] %v7071_v28  ;;  %v7073_v29 = vpop.permute.xlu1 %597  ;;  %v6189_v28 = vld [vmem:[%s6955_s23 + $0xd2] ss:$2 sm:$0xff] }
  0xc0   : > { %9916 = vst [vmem:[#allocation29_spill] sm:$0xff] %v7073_v29  ;;  %v7075_v30 = vpop.permute.xlu0 %592  ;;  %v6224_v29 = vld [vmem:[%s6955_s23 + $0x302] ss:$2 sm:$0xff] }
  0xc1   : > { %9917 = vst [vmem:[#allocation30_spill] sm:$0xff] %v7075_v30  ;;  %v6218_v30 = vld [vmem:[%s6955_s23 + $0x2a2] ss:$2 sm:$0xff] }
  0xc4   : > { %1032 = vperm.xlu2 %6837, %v6143_v31   ;;  %v6160_v31 = vld [vmem:[%s6955_s23 + $0x231] ss:$2 sm:$0xff] }
  0xc5   : > { %1027 = vperm.xlu1 %6836, %v6142_v32   ;;  %v6159_v32 = vld [vmem:[%s6955_s23 + $0x221] ss:$2 sm:$0xff] }
  0xc6   : > { %1022 = vperm.xlu0 %6835, %v6141_v33   ;;  %v7080_v34 = vpop.permute.xlu2 %662 }
  0xc7   : > { %9918 = vst [vmem:[#allocation31_spill] sm:$0xff] %v7080_v34  ;;  %v7082_v35 = vpop.permute.xlu1 %612  ;;  %v6185_v34 = vld [vmem:[%s6955_s23 + $0x92] ss:$2 sm:$0xff] }
  0xc8   : > { %9919 = vst [vmem:[#allocation32_spill] sm:$0xff] %v7082_v35  ;;  %v7084_v36 = vpop.permute.xlu0 %607  ;;  %v6196_v35 = vld [vmem:[%s6955_s23 + $0x142] ss:$2 sm:$0xff] }
  0xc9   : > { %9920 = vst [vmem:[#allocation33_spill] sm:$0xff] %v7084_v36  ;;  %v6197_v36 = vld [vmem:[%s6955_s23 + $0x152] ss:$2 sm:$0xff] }
  0xcc   : > { %1047 = vperm.xlu2 %6837, %v6146_v37  }
  0xcd   : > { %1042 = vperm.xlu1 %6836, %v6145_v39  }
  0xce   : > { %1037 = vperm.xlu0 %6835, %v6144_v40   ;;  %v7089_v41 = vpop.permute.xlu2 %677  ;;  %v6164_v40 = vld [vmem:[%s6955_s23 + $0x271] ss:$2 sm:$0xff] }
  0xcf   : > { %9921 = vst [vmem:[#allocation34_spill] sm:$0xff] %v7089_v41  ;;  %v7091_v43 = vpop.permute.xlu1 %627  ;;  %v6186_v41 = vld [vmem:[%s6955_s23 + $0xa2] ss:$2 sm:$0xff] }
  0xd0   : > { %9922 = vst [vmem:[#allocation35_spill] sm:$0xff] %v7091_v43  ;;  %v7093_v44 = vpop.permute.xlu0 %622  ;;  %v6191_v43 = vld [vmem:[%s6955_s23 + $0xf2] ss:$2 sm:$0xff] }
  0xd1   : > { %9923 = vst [vmem:[#allocation36_spill] sm:$0xff] %v7093_v44  ;;  %v6194_v44 = vld [vmem:[%s6955_s23 + $0x122] ss:$2 sm:$0xff] }
  0xd4   : > { %1062 = vperm.xlu2 %6837, %v6149_v45   ;;  %v6163_v45 = vld [vmem:[%s6955_s23 + $0x261] ss:$2 sm:$0xff] }
  0xd5   : > { %1057 = vperm.xlu1 %6836, %v6148_v47   ;;  %v6162_v47 = vld [vmem:[%s6955_s23 + $0x251] ss:$2 sm:$0xff] }
  0xd6   : > { %1052 = vperm.xlu0 %6835, %v6147_v48   ;;  %v7098_v49 = vpop.permute.xlu2 %692 }
  0xd7   : > { %9924 = vst [vmem:[#allocation37_spill] sm:$0xff] %v7098_v49  ;;  %v7100_v53 = vpop.permute.xlu1 %642  ;;  %v6179_v49 = vld [vmem:[%s6955_s23 + $0x32] ss:$2 sm:$0xff] }
  0xd8   : > { %9925 = vst [vmem:[#allocation38_spill] sm:$0xff] %v7100_v53  ;;  %v7102_v54 = vpop.permute.xlu0 %637  ;;  %v6187_v53 = vld [vmem:[%s6955_s23 + $0xb2] ss:$2 sm:$0xff] }
  0xd9   : > { %9926 = vst [vmem:[#allocation39_spill] sm:$0xff] %v7102_v54  ;;  %v6190_v54 = vld [vmem:[%s6955_s23 + $0xe2] ss:$2 sm:$0xff] }
  0xdc   : > { %1077 = vperm.xlu2 %6837, %v6152_v55  }
  0xdd   : > { %1072 = vperm.xlu1 %6836, %v6151_v59  }
  0xde   : > { %1067 = vperm.xlu0 %6835, %v6150_v60   ;;  %v7107_v61 = vpop.permute.xlu2 %707  ;;  %v6167_v60 = vld [vmem:[%s6955_s23 + $0x2a1] ss:$2 sm:$0xff] }
  0xdf   : > { %9927 = vst [vmem:[#allocation40_spill] sm:$0xff] %v7107_v61  ;;  %v7109_v1 = vpop.permute.xlu1 %657  ;;  %v6176_v61 = vld [vmem:[%s6955_s23 + $0x2] ss:$2 sm:$0xff] }
  0xe0   : > { %9928 = vst [vmem:[#allocation41_spill] sm:$0xff] %v7109_v1  ;;  %v7111_v2 = vpop.permute.xlu0 %652  ;;  %v6188_v1 = vld [vmem:[%s6955_s23 + $0xc2] ss:$2 sm:$0xff] }
  0xe1   : > { %9929 = vst [vmem:[#allocation42_spill] sm:$0xff] %v7111_v2  ;;  %v6184_v2 = vld [vmem:[%s6955_s23 + $0x82] ss:$2 sm:$0xff] }
  0xe4   : > { %1092 = vperm.xlu2 %6837, %v6155_v3   ;;  %v6166_v3 = vld [vmem:[%s6955_s23 + $0x291] ss:$2 sm:$0xff] }
  0xe5   : > { %1087 = vperm.xlu1 %6836, %v6154_v7   ;;  %v6165_v7 = vld [vmem:[%s6955_s23 + $0x281] ss:$2 sm:$0xff] }
  0xe6   : > { %1082 = vperm.xlu0 %6835, %v6153_v8   ;;  %v7116_v9 = vpop.permute.xlu2 %722 }
  0xe7   : > { %v7118_v13 = vpop.permute.xlu1 %672 }
  0xe8   : > { %9930 = vst [vmem:[#allocation43_spill] sm:$0xff] %v7118_v13  ;;  %v7120_v14 = vpop.permute.xlu0 %667  ;;  %v6182_v13 = vld [vmem:[%s6955_s23 + $0x62] ss:$2 sm:$0xff] }
  0xe9   : > { %9931 = vst [vmem:[#allocation44_spill] sm:$0xff] %v7120_v14  ;;  %v6181_v14 = vld [vmem:[%s6955_s23 + $0x52] ss:$2 sm:$0xff] }
  0xec   : > { %1107 = vperm.xlu2 %6837, %v6158_v15  }
  0xed   : > { %1102 = vperm.xlu1 %6836, %v6157_v19  }
  0xee   : > { %1097 = vperm.xlu0 %6835, %v6156_v20   ;;  %v7125_v21 = vpop.permute.xlu2 %942  ;;  %v6170_v20 = vld [vmem:[%s6955_s23 + $0x2d1] ss:$2 sm:$0xff] }
  0xef   : > { %v7127_v25 = vpop.permute.xlu1 %687 }
  0xf0   : > { %9932 = vst [vmem:[#allocation45_spill] sm:$0xff] %v7127_v25  ;;  %v7129_v26 = vpop.permute.xlu0 %682  ;;  %v6180_v25 = vld [vmem:[%s6955_s23 + $0x42] ss:$2 sm:$0xff] }
  0xf1   : > { %9933 = vst [vmem:[#allocation46_spill] sm:$0xff] %v7129_v26  ;;  %v6183_v26 = vld [vmem:[%s6955_s23 + $0x72] ss:$2 sm:$0xff] }
  0xf4   : > { %1122 = vperm.xlu2 %6837, %v6161_v27   ;;  %v6169_v27 = vld [vmem:[%s6955_s23 + $0x2c1] ss:$2 sm:$0xff] }
  0xf5   : > { %1117 = vperm.xlu1 %6836, %v6160_v31   ;;  %v6168_v31 = vld [vmem:[%s6955_s23 + $0x2b1] ss:$2 sm:$0xff] }
  0xf6   : > { %1112 = vperm.xlu0 %6835, %v6159_v32   ;;  %v7134_v33 = vpop.permute.xlu2 %957 }
  0xf7   : > { %v7136_v37 = vpop.permute.xlu1 %702 }
  0xf8   : > { %9934 = vst [vmem:[#allocation47_spill] sm:$0xff] %v7136_v37  ;;  %v7138_v39 = vpop.permute.xlu0 %697  ;;  %v6174_v37 = vld [vmem:[%s6955_s23 + $0x311] ss:$2 sm:$0xff] }
  0xf9   : > { %9935 = vst [vmem:[#allocation48_spill] sm:$0xff] %v7138_v39  ;;  %v6178_v39 = vld [vmem:[%s6955_s23 + $0x22] ss:$2 sm:$0xff] }
  0xfc   : > { %1137 = vperm.xlu2 %6837, %v6164_v40  }
  0xfd   : > { %1132 = vperm.xlu1 %6836, %v6163_v45  }
  0xfe   : > { %1127 = vperm.xlu0 %6835, %v6162_v47   ;;  %v7143_v48 = vpop.permute.xlu2 %972  ;;  %v6173_v47 = vld [vmem:[%s6955_s23 + $0x301] ss:$2 sm:$0xff] }
  0xff   : > { %v7145_v55 = vpop.permute.xlu1 %717 }
 0x100   : > { %v7147_v59 = vpop.permute.xlu0 %712 }
 0x104   : > { %1152 = vperm.xlu2 %6837, %v6167_v60   ;;  %v6172_v60 = vld [vmem:[%s6955_s23 + $0x2f1] ss:$2 sm:$0xff] }
 0x105   : > { %1147 = vperm.xlu1 %6836, %v6166_v3   ;;  %v6171_v3 = vld [vmem:[%s6955_s23 + $0x2e1] ss:$2 sm:$0xff] }
 0x106   : > { %1142 = vperm.xlu0 %6835, %v6165_v7   ;;  %v7152_v8 = vpop.permute.xlu2 %987 }
 0x107   : > { %9936 = vst [vmem:[#allocation49_spill] sm:$0xff] %v7152_v8  ;;  %v7154_v15 = vpop.permute.xlu1 %732  ;;  %v6385_v8 = vld [vmem:[%s6955_s23 + $0x56] ss:$2 sm:$0xff] }
 0x108   : > { %v7156_v19 = vpop.permute.xlu0 %727 }
 0x10c   : > { %1167 = vperm.xlu2 %6837, %v6170_v20  }
 0x10d   : > { %1162 = vperm.xlu1 %6836, %v6169_v27  }
 0x10e   : > { %1157 = vperm.xlu0 %6835, %v6168_v31   ;;  %v7161_v32 = vpop.permute.xlu2 %1002  ;;  %v6177_v31 = vld [vmem:[%s6955_s23 + $0x12] ss:$2 sm:$0xff] }
 0x10f   : > { %9937 = vst [vmem:[#allocation50_spill] sm:$0xff] %v7161_v32  ;;  %v7163_v40 = vpop.permute.xlu1 %952  ;;  %v6269_v32 = vld [vmem:[%s6955_s23 + $0x2a3] ss:$2 sm:$0xff] }
 0x110   : > { %v7165_v45 = vpop.permute.xlu0 %947 }
 0x114   : > { %1182 = vperm.xlu2 %6837, %v6173_v47  }
 0x115   : > { %1177 = vperm.xlu1 %6836, %v6172_v60  }
 0x116   : > { %1172 = vperm.xlu0 %6835, %v6171_v3   ;;  %v7170_v7 = vpop.permute.xlu2 %1017 }
 0x117   : > { %9938 = vst [vmem:[#allocation51_spill] sm:$0xff] %v7170_v7  ;;  %v7172_v20 = vpop.permute.xlu1 %967  ;;  %v6240_v7 = vld [vmem:[%s6955_s23 + $0xd3] ss:$2 sm:$0xff] }
 0x118   : > { %9939 = vst [vmem:[#allocation52_spill] sm:$0xff] %v7172_v20  ;;  %v7174_v27 = vpop.permute.xlu0 %962  ;;  %v6291_v20 = vld [vmem:[%s6955_s23 + $0xd4] ss:$2 sm:$0xff] }
 0x119   : > { %9940 = vst [vmem:[#allocation53_spill] sm:$0xff] %v7174_v27 }
 0x11c   : > { %1402 = vperm.xlu2 %6837, %v6177_v31  }
 0x11d   : > { %1397 = vperm.xlu1 %6836, %v6176_v61  }
 0x11e   : > { %1187 = vperm.xlu0 %6835, %v6174_v37   ;;  %v7179_v47 = vpop.permute.xlu2 %1032 }
 0x11f   : > { %9941 = vst [vmem:[#allocation54_spill] sm:$0xff] %v7179_v47  ;;  %v7181_v60 = vpop.permute.xlu1 %982  ;;  %v6237_v47 = vld [vmem:[%s6955_s23 + $0xa3] ss:$2 sm:$0xff] }
 0x120   : > { %9942 = vst [vmem:[#allocation55_spill] sm:$0xff] %v7181_v60  ;;  %v7183_v3 = vpop.permute.xlu0 %977  ;;  %v6384_v60 = vld [vmem:[%s6955_s23 + $0x46] ss:$2 sm:$0xff] }
 0x121   : > { %9943 = vst [vmem:[#allocation56_spill] sm:$0xff] %v7183_v3 }
 0x124   : > { %1417 = vperm.xlu2 %6837, %v6180_v25  }
 0x125   : > { %1412 = vperm.xlu1 %6836, %v6179_v49  }
 0x126   : > { %1407 = vperm.xlu0 %6835, %v6178_v39   ;;  %v7188_v31 = vpop.permute.xlu2 %1047 }
 0x127   : > { %9944 = vst [vmem:[#allocation57_spill] sm:$0xff] %v7188_v31  ;;  %v7190_v61 = vpop.permute.xlu1 %997  ;;  %v6220_v31 = vld [vmem:[%s6955_s23 + $0x2c2] ss:$2 sm:$0xff] }
 0x128   : > { %9945 = vst [vmem:[#allocation58_spill] sm:$0xff] %v7190_v61  ;;  %v7192_v37 = vpop.permute.xlu0 %992  ;;  %v6280_v61 = vld [vmem:[%s6955_s23 + $0x24] ss:$2 sm:$0xff] }
 0x129   : > { %9946 = vst [vmem:[#allocation59_spill] sm:$0xff] %v7192_v37 }
 0x12c   : > { %1432 = vperm.xlu2 %6837, %v6183_v26  }
 0x12d   : > { %1427 = vperm.xlu1 %6836, %v6182_v13  }
 0x12e   : > { %1422 = vperm.xlu0 %6835, %v6181_v14   ;;  %v7197_v25 = vpop.permute.xlu2 %1062 }
 0x12f   : > { %9947 = vst [vmem:[#allocation60_spill] sm:$0xff] %v7197_v25  ;;  %v7199_v49 = vpop.permute.xlu1 %1012  ;;  %v6200_v25 = vld [vmem:[%s6955_s23 + $0x182] ss:$2 sm:$0xff] }
 0x130   : > { %9948 = vst [vmem:[#allocation61_spill] sm:$0xff] %v7199_v49  ;;  %v7201_v39 = vpop.permute.xlu0 %1007  ;;  %v6279_v49 = vld [vmem:[%s6955_s23 + $0x14] ss:$2 sm:$0xff] }
 0x131   : > { %9949 = vst [vmem:[#allocation62_spill] sm:$0xff] %v7201_v39  ;;  %v6270_v39 = vld [vmem:[%s6955_s23 + $0x2b3] ss:$2 sm:$0xff] }
 0x134   : > { %1447 = vperm.xlu2 %6837, %v6186_v41  }
 0x135   : > { %1442 = vperm.xlu1 %6836, %v6185_v34  }
 0x136   : > { %1437 = vperm.xlu0 %6835, %v6184_v2   ;;  %v7206_v26 = vpop.permute.xlu2 %1077 }
 0x137   : > { %9950 = vst [vmem:[#allocation63_spill] sm:$0xff] %v7206_v26  ;;  %v7208_v13 = vpop.permute.xlu1 %1027  ;;  %v6193_v26 = vld [vmem:[%s6955_s23 + $0x112] ss:$2 sm:$0xff] }
 0x138   : > { %9951 = vst [vmem:[#allocation64_spill] sm:$0xff] %v7208_v13  ;;  %v7210_v14 = vpop.permute.xlu0 %1022  ;;  %v6230_v13 = vld [vmem:[%s6955_s23 + $0x33] ss:$2 sm:$0xff] }
 0x139   : > { %9952 = vst [vmem:[#allocation65_spill] sm:$0xff] %v7210_v14  ;;  %v6234_v14 = vld [vmem:[%s6955_s23 + $0x73] ss:$2 sm:$0xff] }
 0x13c   : > { %1462 = vperm.xlu2 %6837, %v6189_v28  }
 0x13d   : > { %1457 = vperm.xlu1 %6836, %v6188_v1  }
 0x13e   : > { %1452 = vperm.xlu0 %6835, %v6187_v53   ;;  %v7215_v41 = vpop.permute.xlu2 %1092 }
 0x13f   : > { %9953 = vst [vmem:[#allocation66_spill] sm:$0xff] %v7215_v41  ;;  %v7217_v34 = vpop.permute.xlu1 %1042  ;;  %v6195_v41 = vld [vmem:[%s6955_s23 + $0x132] ss:$2 sm:$0xff] }
 0x140   : > { %9954 = vst [vmem:[#allocation67_spill] sm:$0xff] %v7217_v34  ;;  %v7219_v2 = vpop.permute.xlu0 %1037  ;;  %v6225_v34 = vld [vmem:[%s6955_s23 + $0x312] ss:$2 sm:$0xff] }
 0x141   : > { %9955 = vst [vmem:[#allocation68_spill] sm:$0xff] %v7219_v2  ;;  %v6228_v2 = vld [vmem:[%s6955_s23 + $0x13] ss:$2 sm:$0xff] }
 0x144   : > { %1477 = vperm.xlu2 %6837, %v6192_v22  }
 0x145   : > { %1472 = vperm.xlu1 %6836, %v6191_v43  }
 0x146   : > { %1467 = vperm.xlu0 %6835, %v6190_v54   ;;  %v7224_v28 = vpop.permute.xlu2 %1107 }
 0x147   : > { %9956 = vst [vmem:[#allocation69_spill] sm:$0xff] %v7224_v28  ;;  %v7226_v1 = vpop.permute.xlu1 %1057  ;;  %v6198_v28 = vld [vmem:[%s6955_s23 + $0x162] ss:$2 sm:$0xff] }
 0x148   : > { %9957 = vst [vmem:[#allocation70_spill] sm:$0xff] %v7226_v1  ;;  %v7228_v53 = vpop.permute.xlu0 %1052  ;;  %v6215_v1 = vld [vmem:[%s6955_s23 + $0x272] ss:$2 sm:$0xff] }
 0x149   : > { %9958 = vst [vmem:[#allocation71_spill] sm:$0xff] %v7228_v53  ;;  %v6223_v53 = vld [vmem:[%s6955_s23 + $0x2f2] ss:$2 sm:$0xff] }
 0x14c   : > { %1492 = vperm.xlu2 %6837, %v6195_v41  }
 0x14d   : > { %1487 = vperm.xlu1 %6836, %v6194_v44  }
 0x14e   : > { %1482 = vperm.xlu0 %6835, %v6193_v26   ;;  %v7233_v22 = vpop.permute.xlu2 %1122 }
 0x14f   : > { %9959 = vst [vmem:[#allocation72_spill] sm:$0xff] %v7233_v22  ;;  %v7235_v43 = vpop.permute.xlu1 %1072  ;;  %v6201_v22 = vld [vmem:[%s6955_s23 + $0x192] ss:$2 sm:$0xff] }
 0x150   : > { %9960 = vst [vmem:[#allocation73_spill] sm:$0xff] %v7235_v43  ;;  %v7237_v54 = vpop.permute.xlu0 %1067  ;;  %v6209_v43 = vld [vmem:[%s6955_s23 + $0x212] ss:$2 sm:$0xff] }
 0x151   : > { %9961 = vst [vmem:[#allocation74_spill] sm:$0xff] %v7237_v54  ;;  %v6203_v54 = vld [vmem:[%s6955_s23 + $0x1b2] ss:$2 sm:$0xff] }
 0x154   : > { %1507 = vperm.xlu2 %6837, %v6198_v28  }
 0x155   : > { %1502 = vperm.xlu1 %6836, %v6197_v36  }
 0x156   : > { %1497 = vperm.xlu0 %6835, %v6196_v35   ;;  %v7242_v41 = vpop.permute.xlu2 %1137 }
 0x157   : > { %9962 = vst [vmem:[#allocation75_spill] sm:$0xff] %v7242_v41  ;;  %v7244_v44 = vpop.permute.xlu1 %1087  ;;  %v6204_v41 = vld [vmem:[%s6955_s23 + $0x1c2] ss:$2 sm:$0xff] }
 0x158   : > { %9963 = vst [vmem:[#allocation76_spill] sm:$0xff] %v7244_v44  ;;  %v7246_v26 = vpop.permute.xlu0 %1082  ;;  %v6202_v44 = vld [vmem:[%s6955_s23 + $0x1a2] ss:$2 sm:$0xff] }
 0x159   : > { %9964 = vst [vmem:[#allocation77_spill] sm:$0xff] %v7246_v26  ;;  %v6206_v26 = vld [vmem:[%s6955_s23 + $0x1e2] ss:$2 sm:$0xff] }
 0x15c   : > { %1522 = vperm.xlu2 %6837, %v6201_v22  }
 0x15d   : > { %1517 = vperm.xlu1 %6836, %v6200_v25  }
 0x15e   : > { %1512 = vperm.xlu0 %6835, %v6199_v16   ;;  %v7251_v28 = vpop.permute.xlu2 %1152 }
 0x15f   : > { %9965 = vst [vmem:[#allocation78_spill] sm:$0xff] %v7251_v28  ;;  %v7253_v36 = vpop.permute.xlu1 %1102  ;;  %v6207_v28 = vld [vmem:[%s6955_s23 + $0x1f2] ss:$2 sm:$0xff] }
 0x160   : > { %9966 = vst [vmem:[#allocation79_spill] sm:$0xff] %v7253_v36  ;;  %v7255_v35 = vpop.permute.xlu0 %1097  ;;  %v6205_v36 = vld [vmem:[%s6955_s23 + $0x1d2] ss:$2 sm:$0xff] }
 0x161   : > { %9967 = vst [vmem:[#allocation80_spill] sm:$0xff] %v7255_v35  ;;  %v6210_v35 = vld [vmem:[%s6955_s23 + $0x222] ss:$2 sm:$0xff] }
 0x164   : > { %1537 = vperm.xlu2 %6837, %v6204_v41  }
 0x165   : > { %1532 = vperm.xlu1 %6836, %v6203_v54  }
 0x166   : > { %1527 = vperm.xlu0 %6835, %v6202_v44   ;;  %v7260_v22 = vpop.permute.xlu2 %1167 }
 0x167   : > { %v7262_v25 = vpop.permute.xlu1 %1117 }
 0x168   : > { %9968 = vst [vmem:[#allocation81_spill] sm:$0xff] %v7262_v25  ;;  %v7264_v16 = vpop.permute.xlu0 %1112  ;;  %v6208_v25 = vld [vmem:[%s6955_s23 + $0x202] ss:$2 sm:$0xff] }
 0x169   : > { %9969 = vst [vmem:[#allocation82_spill] sm:$0xff] %v7264_v16  ;;  %v6213_v16 = vld [vmem:[%s6955_s23 + $0x252] ss:$2 sm:$0xff] }
 0x16c   : > { %1552 = vperm.xlu2 %6837, %v6207_v28  }
 0x16d   : > { %1547 = vperm.xlu1 %6836, %v6206_v26  }
 0x16e   : > { %1542 = vperm.xlu0 %6835, %v6205_v36   ;;  %v7269_v41 = vpop.permute.xlu2 %1182 }
 0x16f   : > { %v7271_v54 = vpop.permute.xlu1 %1132 }
 0x170   : > { %9970 = vst [vmem:[#allocation83_spill] sm:$0xff] %v7271_v54  ;;  %v7273_v44 = vpop.permute.xlu0 %1127  ;;  %v6211_v54 = vld [vmem:[%s6955_s23 + $0x232] ss:$2 sm:$0xff] }
 0x171   : > { %9971 = vst [vmem:[#allocation84_spill] sm:$0xff] %v7273_v44  ;;  %v6216_v44 = vld [vmem:[%s6955_s23 + $0x282] ss:$2 sm:$0xff] }
 0x174   : > { %1567 = vperm.xlu2 %6837, %v6210_v35  }
 0x175   : > { %1562 = vperm.xlu1 %6836, %v6209_v43  }
 0x176   : > { %1557 = vperm.xlu0 %6835, %v6208_v25   ;;  %v7278_v28 = vpop.permute.xlu2 %1402 }
 0x177   : > { %v7280_v26 = vpop.permute.xlu1 %1147 }
 0x178   : > { %9972 = vst [vmem:[#allocation85_spill] sm:$0xff] %v7280_v26  ;;  %v7282_v36 = vpop.permute.xlu0 %1142  ;;  %v6214_v26 = vld [vmem:[%s6955_s23 + $0x262] ss:$2 sm:$0xff] }
 0x179   : > { %9973 = vst [vmem:[#allocation86_spill] sm:$0xff] %v7282_v36  ;;  %v6219_v36 = vld [vmem:[%s6955_s23 + $0x2b2] ss:$2 sm:$0xff] }
 0x17c   : > { %1582 = vperm.xlu2 %6837, %v6213_v16  }
 0x17d   : > { %1577 = vperm.xlu1 %6836, %v6212_v10  }
 0x17e   : > { %1572 = vperm.xlu0 %6835, %v6211_v54   ;;  %v7287_v35 = vpop.permute.xlu2 %1417 }
 0x17f   : > { %9974 = vst [vmem:[#allocation87_spill] sm:$0xff] %v7287_v35  ;;  %v7289_v43 = vpop.permute.xlu1 %1162 }
 0x180   : > { %9975 = vst [vmem:[#allocation88_spill] sm:$0xff] %v7289_v43  ;;  %v7291_v25 = vpop.permute.xlu0 %1157  ;;  %v6217_v43 = vld [vmem:[%s6955_s23 + $0x292] ss:$2 sm:$0xff] }
 0x181   : > { %9976 = vst [vmem:[#allocation89_spill] sm:$0xff] %v7291_v25  ;;  %v6222_v25 = vld [vmem:[%s6955_s23 + $0x2e2] ss:$2 sm:$0xff] }
 0x184   : > { %1597 = vperm.xlu2 %6837, %v6216_v44  }
 0x185   : > { %1592 = vperm.xlu1 %6836, %v6215_v1  }
 0x186   : > { %1587 = vperm.xlu0 %6835, %v6214_v26   ;;  %v7296_v16 = vpop.permute.xlu2 %1432 }
 0x187   : > { %9977 = vst [vmem:[#allocation90_spill] sm:$0xff] %v7296_v16  ;;  %v7298_v10 = vpop.permute.xlu1 %1177  ;;  %v6390_v16 = vld [vmem:[%s6955_s23 + $0xa6] ss:$2 sm:$0xff] }
 0x188   : > { %v7300_v54 = vpop.permute.xlu0 %1172 }
 0x18c   : > { %1612 = vperm.xlu2 %6837, %v6219_v36  }
 0x18d   : > { %1607 = vperm.xlu1 %6836, %v6218_v30  }
 0x18e   : > { %1602 = vperm.xlu0 %6835, %v6217_v43   ;;  %v7305_v44 = vpop.permute.xlu2 %1447 }
 0x18f   : > { %9978 = vst [vmem:[#allocation91_spill] sm:$0xff] %v7305_v44  ;;  %v7307_v1 = vpop.permute.xlu1 %1397  ;;  %v6339_v44 = vld [vmem:[%s6955_s23 + $0xa5] ss:$2 sm:$0xff] }
 0x190   : > { %v7309_v26 = vpop.permute.xlu0 %1187 }
 0x194   : > { %1627 = vperm.xlu2 %6837, %v6222_v25  }
 0x195   : > { %1622 = vperm.xlu1 %6836, %v6221_v4  }
 0x196   : > { %1617 = vperm.xlu0 %6835, %v6220_v31   ;;  %v7314_v36 = vpop.permute.xlu2 %1462 }
 0x197   : > { %9979 = vst [vmem:[#allocation92_spill] sm:$0xff] %v7314_v36  ;;  %v7316_v30 = vpop.permute.xlu1 %1412  ;;  %v6243_v36 = vld [vmem:[%s6955_s23 + $0x103] ss:$2 sm:$0xff] }
 0x198   : > { %v7318_v43 = vpop.permute.xlu0 %1407 }
 0x19c   : > { %1642 = vperm.xlu2 %6837, %v6225_v34  }
 0x19d   : > { %1637 = vperm.xlu1 %6836, %v6224_v29  }
 0x19e   : > { %1632 = vperm.xlu0 %6835, %v6223_v53   ;;  %v7323_v25 = vpop.permute.xlu2 %1477 }
 0x19f   : > { %9980 = vst [vmem:[#allocation93_spill] sm:$0xff] %v7323_v25  ;;  %v7325_v4 = vpop.permute.xlu1 %1427  ;;  %v6232_v25 = vld [vmem:[%s6955_s23 + $0x53] ss:$2 sm:$0xff] }
 0x1a0   : > { %9981 = vst [vmem:[#allocation94_spill] sm:$0xff] %v7325_v4  ;;  %v7327_v31 = vpop.permute.xlu0 %1422 }
 0x1a1   : > { %9982 = vst [vmem:[#allocation95_spill] sm:$0xff] %v7327_v31 }
 0x1a4   : > { %1862 = vperm.xlu2 %6837, %v6229_v23  }
 0x1a5   : > { %1857 = vperm.xlu1 %6836, %v6228_v2  }
 0x1a6   : > { %1852 = vperm.xlu0 %6835, %v6227_v62   ;;  %v7332_v34 = vpop.permute.xlu2 %1492 }
 0x1a7   : > { %9983 = vst [vmem:[#allocation96_spill] sm:$0xff] %v7332_v34  ;;  %v7334_v29 = vpop.permute.xlu1 %1442  ;;  %v6235_v34 = vld [vmem:[%s6955_s23 + $0x83] ss:$2 sm:$0xff] }
 0x1a8   : > { %9984 = vst [vmem:[#allocation97_spill] sm:$0xff] %v7334_v29  ;;  %v7336_v53 = vpop.permute.xlu0 %1437  ;;  %v6324_v29 = vld [vmem:[%s6955_s23 + $0x2e4] ss:$2 sm:$0xff] }
 0x1a9   : > { %9985 = vst [vmem:[#allocation98_spill] sm:$0xff] %v7336_v53  ;;  %v6327_v53 = vld [vmem:[%s6955_s23 + $0x314] ss:$2 sm:$0xff] }
 0x1ac   : > { %1877 = vperm.xlu2 %6837, %v6232_v25  }
 0x1ad   : > { %1872 = vperm.xlu1 %6836, %v6231_v17  }
 0x1ae   : > { %1867 = vperm.xlu0 %6835, %v6230_v13   ;;  %v7341_v23 = vpop.permute.xlu2 %1507 }
 0x1af   : > { %9986 = vst [vmem:[#allocation99_spill] sm:$0xff] %v7341_v23  ;;  %v7343_v2 = vpop.permute.xlu1 %1457  ;;  %v6238_v23 = vld [vmem:[%s6955_s23 + $0xb3] ss:$2 sm:$0xff] }
 0x1b0   : > { %9987 = vst [vmem:[#allocation100_spill] sm:$0xff] %v7343_v2  ;;  %v7345_v62 = vpop.permute.xlu0 %1452  ;;  %v6264_v2 = vld [vmem:[%s6955_s23 + $0x253] ss:$2 sm:$0xff] }
 0x1b1   : > { %9988 = vst [vmem:[#allocation101_spill] sm:$0xff] %v7345_v62  ;;  %v6276_v62 = vld [vmem:[%s6955_s23 + $0x313] ss:$2 sm:$0xff] }
 0x1b4   : > { %1892 = vperm.xlu2 %6837, %v6235_v34  }
 0x1b5   : > { %1887 = vperm.xlu1 %6836, %v6234_v14  }
 0x1b6   : > { %1882 = vperm.xlu0 %6835, %v6233_v24   ;;  %v7350_v25 = vpop.permute.xlu2 %1522 }
 0x1b7   : > { %9989 = vst [vmem:[#allocation102_spill] sm:$0xff] %v7350_v25  ;;  %v7352_v17 = vpop.permute.xlu1 %1472  ;;  %v6241_v25 = vld [vmem:[%s6955_s23 + $0xe3] ss:$2 sm:$0xff] }
 0x1b8   : > { %9990 = vst [vmem:[#allocation103_spill] sm:$0xff] %v7352_v17  ;;  %v7354_v13 = vpop.permute.xlu0 %1467  ;;  %v6239_v17 = vld [vmem:[%s6955_s23 + $0xc3] ss:$2 sm:$0xff] }
 0x1b9   : > { %9991 = vst [vmem:[#allocation104_spill] sm:$0xff] %v7354_v13  ;;  %v6274_v13 = vld [vmem:[%s6955_s23 + $0x2f3] ss:$2 sm:$0xff] }
 0x1bc   : > { %1907 = vperm.xlu2 %6837, %v6238_v23  }
 0x1bd   : > { %1902 = vperm.xlu1 %6836, %v6237_v47  }
 0x1be   : > { %1897 = vperm.xlu0 %6835, %v6236_v18   ;;  %v7359_v34 = vpop.permute.xlu2 %1537 }
 0x1bf   : > { %9992 = vst [vmem:[#allocation105_spill] sm:$0xff] %v7359_v34  ;;  %v7361_v14 = vpop.permute.xlu1 %1487  ;;  %v6244_v34 = vld [vmem:[%s6955_s23 + $0x113] ss:$2 sm:$0xff] }
 0x1c0   : > { %9993 = vst [vmem:[#allocation106_spill] sm:$0xff] %v7361_v14  ;;  %v7363_v24 = vpop.permute.xlu0 %1482  ;;  %v6242_v14 = vld [vmem:[%s6955_s23 + $0xf3] ss:$2 sm:$0xff] }
 0x1c1   : > { %9994 = vst [vmem:[#allocation107_spill] sm:$0xff] %v7363_v24  ;;  %v6246_v24 = vld [vmem:[%s6955_s23 + $0x133] ss:$2 sm:$0xff] }
 0x1c4   : > { %1922 = vperm.xlu2 %6837, %v6241_v25  }
 0x1c5   : > { %1917 = vperm.xlu1 %6836, %v6240_v7  }
 0x1c6   : > { %1912 = vperm.xlu0 %6835, %v6239_v17   ;;  %v7368_v23 = vpop.permute.xlu2 %1552 }
 0x1c7   : > { %9995 = vst [vmem:[#allocation108_spill] sm:$0xff] %v7368_v23  ;;  %v7370_v47 = vpop.permute.xlu1 %1502  ;;  %v6247_v23 = vld [vmem:[%s6955_s23 + $0x143] ss:$2 sm:$0xff] }
 0x1c8   : > { %9996 = vst [vmem:[#allocation109_spill] sm:$0xff] %v7370_v47  ;;  %v7372_v18 = vpop.permute.xlu0 %1497  ;;  %v6245_v47 = vld [vmem:[%s6955_s23 + $0x123] ss:$2 sm:$0xff] }
 0x1c9   : > { %9997 = vst [vmem:[#allocation110_spill] sm:$0xff] %v7372_v18  ;;  %v6249_v18 = vld [vmem:[%s6955_s23 + $0x163] ss:$2 sm:$0xff] }
 0x1cc   : > { %1937 = vperm.xlu2 %6837, %v6244_v34  }
 0x1cd   : > { %1932 = vperm.xlu1 %6836, %v6243_v36  }
 0x1ce   : > { %1927 = vperm.xlu0 %6835, %v6242_v14   ;;  %v7377_v25 = vpop.permute.xlu2 %1567 }
 0x1cf   : > { %9998 = vst [vmem:[#allocation111_spill] sm:$0xff] %v7377_v25  ;;  %v7379_v7 = vpop.permute.xlu1 %1517  ;;  %v6250_v25 = vld [vmem:[%s6955_s23 + $0x173] ss:$2 sm:$0xff] }
 0x1d0   : > { %9999 = vst [vmem:[#allocation112_spill] sm:$0xff] %v7379_v7  ;;  %v7381_v17 = vpop.permute.xlu0 %1512  ;;  %v6248_v7 = vld [vmem:[%s6955_s23 + $0x153] ss:$2 sm:$0xff] }
 0x1d1   : > { %10000 = vst [vmem:[#allocation113_spill] sm:$0xff] %v7381_v17  ;;  %v6252_v17 = vld [vmem:[%s6955_s23 + $0x193] ss:$2 sm:$0xff] }
 0x1d4   : > { %1952 = vperm.xlu2 %6837, %v6247_v23  }
 0x1d5   : > { %1947 = vperm.xlu1 %6836, %v6246_v24  }
 0x1d6   : > { %1942 = vperm.xlu0 %6835, %v6245_v47   ;;  %v7386_v34 = vpop.permute.xlu2 %1582 }
 0x1d7   : > { %10001 = vst [vmem:[#allocation114_spill] sm:$0xff] %v7386_v34  ;;  %v7388_v36 = vpop.permute.xlu1 %1532  ;;  %v6253_v34 = vld [vmem:[%s6955_s23 + $0x1a3] ss:$2 sm:$0xff] }
 0x1d8   : > { %10002 = vst [vmem:[#allocation115_spill] sm:$0xff] %v7388_v36  ;;  %v7390_v14 = vpop.permute.xlu0 %1527  ;;  %v6251_v36 = vld [vmem:[%s6955_s23 + $0x183] ss:$2 sm:$0xff] }
 0x1d9   : > { %10003 = vst [vmem:[#allocation116_spill] sm:$0xff] %v7390_v14  ;;  %v6255_v14 = vld [vmem:[%s6955_s23 + $0x1c3] ss:$2 sm:$0xff] }
 0x1dc   : > { %1967 = vperm.xlu2 %6837, %v6250_v25  }
 0x1dd   : > { %1962 = vperm.xlu1 %6836, %v6249_v18  }
 0x1de   : > { %1957 = vperm.xlu0 %6835, %v6248_v7   ;;  %v7395_v23 = vpop.permute.xlu2 %1597 }
 0x1df   : > { %10004 = vst [vmem:[#allocation117_spill] sm:$0xff] %v7395_v23  ;;  %v7397_v24 = vpop.permute.xlu1 %1547  ;;  %v6256_v23 = vld [vmem:[%s6955_s23 + $0x1d3] ss:$2 sm:$0xff] }
 0x1e0   : > { %10005 = vst [vmem:[#allocation118_spill] sm:$0xff] %v7397_v24  ;;  %v7399_v47 = vpop.permute.xlu0 %1542  ;;  %v6254_v24 = vld [vmem:[%s6955_s23 + $0x1b3] ss:$2 sm:$0xff] }
 0x1e1   : > { %10006 = vst [vmem:[#allocation119_spill] sm:$0xff] %v7399_v47  ;;  %v6258_v47 = vld [vmem:[%s6955_s23 + $0x1f3] ss:$2 sm:$0xff] }
 0x1e4   : > { %1982 = vperm.xlu2 %6837, %v6253_v34  }
 0x1e5   : > { %1977 = vperm.xlu1 %6836, %v6252_v17  }
 0x1e6   : > { %1972 = vperm.xlu0 %6835, %v6251_v36   ;;  %v7404_v25 = vpop.permute.xlu2 %1612 }
 0x1e7   : > { %10007 = vst [vmem:[#allocation120_spill] sm:$0xff] %v7404_v25  ;;  %v7406_v18 = vpop.permute.xlu1 %1562  ;;  %v6259_v25 = vld [vmem:[%s6955_s23 + $0x203] ss:$2 sm:$0xff] }
 0x1e8   : > { %10008 = vst [vmem:[#allocation121_spill] sm:$0xff] %v7406_v18  ;;  %v7408_v7 = vpop.permute.xlu0 %1557  ;;  %v6257_v18 = vld [vmem:[%s6955_s23 + $0x1e3] ss:$2 sm:$0xff] }
 0x1e9   : > { %10009 = vst [vmem:[#allocation122_spill] sm:$0xff] %v7408_v7  ;;  %v6262_v7 = vld [vmem:[%s6955_s23 + $0x233] ss:$2 sm:$0xff] }
 0x1ec   : > { %1997 = vperm.xlu2 %6837, %v6256_v23  }
 0x1ed   : > { %1992 = vperm.xlu1 %6836, %v6255_v14  }
 0x1ee   : > { %1987 = vperm.xlu0 %6835, %v6254_v24   ;;  %v7413_v34 = vpop.permute.xlu2 %1627 }
 0x1ef   : > { %v7415_v17 = vpop.permute.xlu1 %1577 }
 0x1f0   : > { %10010 = vst [vmem:[#allocation123_spill] sm:$0xff] %v7415_v17  ;;  %v7417_v36 = vpop.permute.xlu0 %1572  ;;  %v6260_v17 = vld [vmem:[%s6955_s23 + $0x213] ss:$2 sm:$0xff] }
 0x1f1   : > { %10011 = vst [vmem:[#allocation124_spill] sm:$0xff] %v7417_v36  ;;  %v6265_v36 = vld [vmem:[%s6955_s23 + $0x263] ss:$2 sm:$0xff] }
 0x1f4   : > { %2012 = vperm.xlu2 %6837, %v6259_v25  }
 0x1f5   : > { %2007 = vperm.xlu1 %6836, %v6258_v47  }
 0x1f6   : > { %2002 = vperm.xlu0 %6835, %v6257_v18   ;;  %v7422_v23 = vpop.permute.xlu2 %1642 }
 0x1f7   : > { %v7424_v14 = vpop.permute.xlu1 %1592 }
 0x1f8   : > { %10012 = vst [vmem:[#allocation125_spill] sm:$0xff] %v7424_v14  ;;  %v7426_v24 = vpop.permute.xlu0 %1587  ;;  %v6263_v14 = vld [vmem:[%s6955_s23 + $0x243] ss:$2 sm:$0xff] }
 0x1f9   : > { %10013 = vst [vmem:[#allocation126_spill] sm:$0xff] %v7426_v24  ;;  %v6268_v24 = vld [vmem:[%s6955_s23 + $0x293] ss:$2 sm:$0xff] }
 0x1fc   : > { %2027 = vperm.xlu2 %6837, %v6262_v7  }
 0x1fd   : > { %2022 = vperm.xlu1 %6836, %v6261_v11  }
 0x1fe   : > { %2017 = vperm.xlu0 %6835, %v6260_v17   ;;  %v7431_v25 = vpop.permute.xlu2 %1862 }
 0x1ff   : > { %v7433_v47 = vpop.permute.xlu1 %1607 }
 0x200   : > { %10014 = vst [vmem:[#allocation127_spill] sm:$0xff] %v7433_v47  ;;  %v7435_v18 = vpop.permute.xlu0 %1602  ;;  %v6266_v47 = vld [vmem:[%s6955_s23 + $0x273] ss:$2 sm:$0xff] }
 0x201   : > { %10015 = vst [vmem:[#allocation128_spill] sm:$0xff] %v7435_v18  ;;  %v6272_v18 = vld [vmem:[%s6955_s23 + $0x2d3] ss:$2 sm:$0xff] }
 0x204   : > { %2042 = vperm.xlu2 %6837, %v6265_v36  }
 0x205   : > { %2037 = vperm.xlu1 %6836, %v6264_v2  }
 0x206   : > { %2032 = vperm.xlu0 %6835, %v6263_v14   ;;  %v7440_v7 = vpop.permute.xlu2 %1877 }
 0x207   : > { %10016 = vst [vmem:[#allocation129_spill] sm:$0xff] %v7440_v7  ;;  %v7442_v11 = vpop.permute.xlu1 %1622 }
 0x208   : > { %v7444_v17 = vpop.permute.xlu0 %1617 }
 0x209   : > { %10017 = vst [vmem:[#allocation130_spill] sm:$0xff] %v7444_v17  ;;  %v6275_v17 = vld [vmem:[%s6955_s23 + $0x303] ss:$2 sm:$0xff] }
 0x20c   : > { %2057 = vperm.xlu2 %6837, %v6268_v24  }
 0x20d   : > { %2052 = vperm.xlu1 %6836, %v6267_v12  }
 0x20e   : > { %2047 = vperm.xlu0 %6835, %v6266_v47   ;;  %v7449_v36 = vpop.permute.xlu2 %1892 }
 0x20f   : > { %10018 = vst [vmem:[#allocation131_spill] sm:$0xff] %v7449_v36  ;;  %v7451_v2 = vpop.permute.xlu1 %1637  ;;  %v6325_v36 = vld [vmem:[%s6955_s23 + $0x2f4] ss:$2 sm:$0xff] }
 0x210   : > { %v7453_v14 = vpop.permute.xlu0 %1632 }
 0x214   : > { %2077 = vperm.xlu2 %6837, %v6272_v18  }
 0x215   : > { %2067 = vperm.xlu1 %6836, %v6270_v39  }
 0x216   : > { %2062 = vperm.xlu0 %6835, %v6269_v32   ;;  %v7458_v24 = vpop.permute.xlu2 %1907 }
 0x217   : > { %10019 = vst [vmem:[#allocation132_spill] sm:$0xff] %v7458_v24  ;;  %v7460_v12 = vpop.permute.xlu1 %1857  ;;  %v6278_v24 = vld [vmem:[%s6955_s23 + $0x4] ss:$2 sm:$0xff] }
 0x218   : > { %v7462_v47 = vpop.permute.xlu0 %1852 }
 0x21c   : > { %2092 = vperm.xlu2 %6837, %v6275_v17  }
 0x21d   : > { %2087 = vperm.xlu1 %6836, %v6274_v13  }
 0x21e   : > { %2082 = vperm.xlu0 %6835, %v6273_v56   ;;  %v7467_v18 = vpop.permute.xlu2 %1922 }
 0x21f   : > { %10020 = vst [vmem:[#allocation133_spill] sm:$0xff] %v7467_v18  ;;  %v7469_v39 = vpop.permute.xlu1 %1872  ;;  %v6323_v18 = vld [vmem:[%s6955_s23 + $0x2d4] ss:$2 sm:$0xff] }
 0x220   : > { %10021 = vst [vmem:[#allocation134_spill] sm:$0xff] %v7469_v39  ;;  %v7471_v32 = vpop.permute.xlu0 %1867  ;;  %v7638_v39 = vld [vmem:[%s9884_s1 + $0x3] ss:$0 sm:$0xff] }
 0x221   : > { %v2104_v31 = vmul.f32 %v7638_v39, %v7460_v12  ;;  %v7668_v12 = vld [vmem:[%s9884_s1 + $0x6] ss:$0 sm:$0xff] }
 0x224   : > { %2312 = vperm.xlu2 %6837, %v6279_v49  }
 0x225   : > { %2307 = vperm.xlu1 %6836, %v6278_v24  }
 0x226   : > { %2097 = vperm.xlu0 %6835, %v6276_v62   ;;  %v7476_v17 = vpop.permute.xlu2 %1937 }
 0x227   : > { %10022 = vst [vmem:[#allocation135_spill] sm:$0xff] %v7476_v17  ;;  %v7478_v13 = vpop.permute.xlu1 %1887  ;;  %v6326_v17 = vld [vmem:[%s6955_s23 + $0x304] ss:$2 sm:$0xff] }
 0x228   : > { %10023 = vst [vmem:[#allocation136_spill] sm:$0xff] %v7478_v13  ;;  %v7480_v56 = vpop.permute.xlu0 %1882 }
 0x229   : > { %10024 = vst [vmem:[#allocation137_spill] sm:$0xff] %v7480_v56  ;;  %v6391_v56 = vld [vmem:[%s6955_s23 + $0xb6] ss:$2 sm:$0xff] }
 0x22c   : > { %2532 = vperm.xlu2 %6837, %v6323_v18  }
 0x22d   : > { %2322 = vperm.xlu1 %6836, %v6281_v50  }
 0x22e   : > { %2317 = vperm.xlu0 %6835, %v6280_v61   ;;  %v7485_v49 = vpop.permute.xlu2 %1952 }
 0x22f   : > { %10025 = vst [vmem:[#allocation138_spill] sm:$0xff] %v7485_v49  ;;  %v7487_v24 = vpop.permute.xlu1 %1902  ;;  %v6330_v49 = vld [vmem:[%s6955_s23 + $0x15] ss:$2 sm:$0xff] }
 0x230   : > { %10026 = vst [vmem:[#allocation139_spill] sm:$0xff] %v7487_v24  ;;  %v7489_v62 = vpop.permute.xlu0 %1897  ;;  %v6289_v24 = vld [vmem:[%s6955_s23 + $0xb4] ss:$2 sm:$0xff] }
 0x231   : > { %10027 = vst [vmem:[#allocation140_spill] sm:$0xff] %v7489_v62  ;;  %v6332_v62 = vld [vmem:[%s6955_s23 + $0x35] ss:$2 sm:$0xff] }
 0x234   : > { %2547 = vperm.xlu2 %6837, %v6326_v17  }
 0x235   : > { %2542 = vperm.xlu1 %6836, %v6325_v36  }
 0x236   : > { %2537 = vperm.xlu0 %6835, %v6324_v29   ;;  %v7494_v18 = vpop.permute.xlu2 %1967 }
 0x237   : > { %10028 = vst [vmem:[#allocation141_spill] sm:$0xff] %v7494_v18  ;;  %v7496_v50 = vpop.permute.xlu1 %1917  ;;  %v6374_v18 = vld [vmem:[%s6955_s23 + $0x2d5] ss:$2 sm:$0xff] }
 0x238   : > { %10029 = vst [vmem:[#allocation142_spill] sm:$0xff] %v7496_v50  ;;  %v7498_v61 = vpop.permute.xlu0 %1912  ;;  %v6331_v50 = vld [vmem:[%s6955_s23 + $0x25] ss:$2 sm:$0xff] }
 0x239   : > { %10030 = vst [vmem:[#allocation143_spill] sm:$0xff] %v7498_v61  ;;  %v6376_v61 = vld [vmem:[%s6955_s23 + $0x2f5] ss:$2 sm:$0xff] }
 0x23c   : > { %2767 = vperm.xlu2 %6837, %v6330_v49  }
 0x23d   : > { %2762 = vperm.xlu1 %6836, %v6329_v6  }
 0x23e   : > { %2552 = vperm.xlu0 %6835, %v6327_v53   ;;  %v7503_v17 = vpop.permute.xlu2 %1982 }
 0x23f   : > { %10031 = vst [vmem:[#allocation144_spill] sm:$0xff] %v7503_v17  ;;  %v7505_v36 = vpop.permute.xlu1 %1932  ;;  %v6377_v17 = vld [vmem:[%s6955_s23 + $0x305] ss:$2 sm:$0xff] }
 0x240   : > { %10032 = vst [vmem:[#allocation145_spill] sm:$0xff] %v7505_v36  ;;  %v7507_v29 = vpop.permute.xlu0 %1927  ;;  %v6375_v36 = vld [vmem:[%s6955_s23 + $0x2e5] ss:$2 sm:$0xff] }
 0x241   : > { %10033 = vst [vmem:[#allocation146_spill] sm:$0xff] %v7507_v29  ;;  %v6380_v29 = vld [vmem:[%s6955_s23 + $0x6] ss:$2 sm:$0xff] }
 0x244   : > { %2987 = vperm.xlu2 %6837, %v6374_v18  }
 0x245   : > { %2777 = vperm.xlu1 %6836, %v6332_v62  }
 0x246   : > { %2772 = vperm.xlu0 %6835, %v6331_v50   ;;  %v7512_v49 = vpop.permute.xlu2 %1997 }
 0x247   : > { %10034 = vst [vmem:[#allocation147_spill] sm:$0xff] %v7512_v49  ;;  %v7514_v6 = vpop.permute.xlu1 %1947  ;;  %v6381_v49 = vld [vmem:[%s6955_s23 + $0x16] ss:$2 sm:$0xff] }
 0x248   : > { %10035 = vst [vmem:[#allocation148_spill] sm:$0xff] %v7514_v6  ;;  %v7516_v53 = vpop.permute.xlu0 %1942  ;;  %v6378_v6 = vld [vmem:[%s6955_s23 + $0x315] ss:$2 sm:$0xff] }
 0x249   : > { %10036 = vst [vmem:[#allocation149_spill] sm:$0xff] %v7516_v53  ;;  %v6383_v53 = vld [vmem:[%s6955_s23 + $0x36] ss:$2 sm:$0xff] }
 0x24c   : > { %3002 = vperm.xlu2 %6837, %v6377_v17  }
 0x24d   : > { %2997 = vperm.xlu1 %6836, %v6376_v61  }
 0x24e   : > { %2992 = vperm.xlu0 %6835, %v6375_v36   ;;  %v7521_v18 = vpop.permute.xlu2 %2012 }
 0x24f   : > { %10037 = vst [vmem:[#allocation150_spill] sm:$0xff] %v7521_v18  ;;  %v7523_v62 = vpop.permute.xlu1 %1962  ;;  %v6425_v18 = vld [vmem:[%s6955_s23 + $0x2d6] ss:$2 sm:$0xff] }
 0x250   : > { %10038 = vst [vmem:[#allocation151_spill] sm:$0xff] %v7523_v62  ;;  %v7525_v50 = vpop.permute.xlu0 %1957  ;;  %v6382_v62 = vld [vmem:[%s6955_s23 + $0x26] ss:$2 sm:$0xff] }
 0x251   : > { %10039 = vst [vmem:[#allocation152_spill] sm:$0xff] %v7525_v50  ;;  %v6427_v50 = vld [vmem:[%s6955_s23 + $0x2f6] ss:$2 sm:$0xff] }
 0x254   : > { %3222 = vperm.xlu2 %6837, %v6381_v49  }
 0x255   : > { %3217 = vperm.xlu1 %6836, %v6380_v29  }
 0x256   : > { %3007 = vperm.xlu0 %6835, %v6378_v6   ;;  %v7530_v17 = vpop.permute.xlu2 %2027 }
 0x257   : > { %10040 = vst [vmem:[#allocation153_spill] sm:$0xff] %v7530_v17  ;;  %v7532_v61 = vpop.permute.xlu1 %1977  ;;  %v6428_v17 = vld [vmem:[%s6955_s23 + $0x306] ss:$2 sm:$0xff] }
 0x258   : > { %10041 = vst [vmem:[#allocation154_spill] sm:$0xff] %v7532_v61  ;;  %v7534_v36 = vpop.permute.xlu0 %1972  ;;  %v6426_v61 = vld [vmem:[%s6955_s23 + $0x2e6] ss:$2 sm:$0xff] }
 0x259   : > { %10042 = vst [vmem:[#allocation155_spill] sm:$0xff] %v7534_v36  ;;  %v6282_v36 = vld [vmem:[%s6955_s23 + $0x44] ss:$2 sm:$0xff] }
 0x25c   : > { %3442 = vperm.xlu2 %6837, %v6425_v18  }
 0x25d   : > { %3232 = vperm.xlu1 %6836, %v6383_v53  }
 0x25e   : > { %3227 = vperm.xlu0 %6835, %v6382_v62   ;;  %v7539_v49 = vpop.permute.xlu2 %2042 }
 0x25f   : > { %10043 = vst [vmem:[#allocation156_spill] sm:$0xff] %v7539_v49  ;;  %v7541_v29 = vpop.permute.xlu1 %1992  ;;  %v6283_v49 = vld [vmem:[%s6955_s23 + $0x54] ss:$2 sm:$0xff] }
 0x260   : > { %10044 = vst [vmem:[#allocation157_spill] sm:$0xff] %v7541_v29  ;;  %v7543_v6 = vpop.permute.xlu0 %1987  ;;  %v6429_v29 = vld [vmem:[%s6955_s23 + $0x316] ss:$2 sm:$0xff] }
 0x261   : > { %10045 = vst [vmem:[#allocation158_spill] sm:$0xff] %v7543_v6  ;;  %v6285_v6 = vld [vmem:[%s6955_s23 + $0x74] ss:$2 sm:$0xff] }
 0x264   : > { %3457 = vperm.xlu2 %6837, %v6428_v17  }
 0x265   : > { %3452 = vperm.xlu1 %6836, %v6427_v50  }
 0x266   : > { %3447 = vperm.xlu0 %6835, %v6426_v61   ;;  %v7548_v18 = vpop.permute.xlu2 %2057 }
 0x267   : > { %10046 = vst [vmem:[#allocation159_spill] sm:$0xff] %v7548_v18  ;;  %v7550_v53 = vpop.permute.xlu1 %2007  ;;  %v6333_v18 = vld [vmem:[%s6955_s23 + $0x45] ss:$2 sm:$0xff] }
 0x268   : > { %10047 = vst [vmem:[#allocation160_spill] sm:$0xff] %v7550_v53  ;;  %v7552_v62 = vpop.permute.xlu0 %2002  ;;  %v6284_v53 = vld [vmem:[%s6955_s23 + $0x64] ss:$2 sm:$0xff] }
 0x269   : > { %10048 = vst [vmem:[#allocation161_spill] sm:$0xff] %v7552_v62  ;;  %v6336_v62 = vld [vmem:[%s6955_s23 + $0x75] ss:$2 sm:$0xff] }
 0x26c   : > { %2332 = vperm.xlu2 %6837, %v6283_v49  }
 0x26d   : > { %2327 = vperm.xlu1 %6836, %v6282_v36  }
 0x26e   : > { %3462 = vperm.xlu0 %6835, %v6429_v29   ;;  %v7557_v17 = vpop.permute.xlu2 %2077 }
 0x26f   : > { %v7559_v50 = vpop.permute.xlu1 %2022 }
 0x270   : > { %10049 = vst [vmem:[#allocation162_spill] sm:$0xff] %v7559_v50  ;;  %v7561_v61 = vpop.permute.xlu0 %2017  ;;  %v6334_v50 = vld [vmem:[%s6955_s23 + $0x55] ss:$2 sm:$0xff] }
 0x271   : > { %10050 = vst [vmem:[#allocation163_spill] sm:$0xff] %v7561_v61 }
 0x274   : > { %2782 = vperm.xlu2 %6837, %v6333_v18  }
 0x275   : > { %2342 = vperm.xlu1 %6836, %v6285_v6  }
 0x276   : > { %2337 = vperm.xlu0 %6835, %v6284_v53   ;;  %v7566_v49 = vpop.permute.xlu2 %2092  ;;  %v6386_v53 = vld [vmem:[%s6955_s23 + $0x66] ss:$2 sm:$0xff] }
 0x277   : > { %v7568_v36 = vpop.permute.xlu1 %2037 }
 0x278   : > { %10051 = vst [vmem:[#allocation164_spill] sm:$0xff] %v7568_v36  ;;  %v7570_v29 = vpop.permute.xlu0 %2032 }
 0x279   : > { %10052 = vst [vmem:[#allocation165_spill] sm:$0xff] %v7570_v29  ;;  %v6286_v29 = vld [vmem:[%s6955_s23 + $0x84] ss:$2 sm:$0xff] }
 0x27c   : > { %2797 = vperm.xlu2 %6837, %v6336_v62  }
 0x27d   : > { %2792 = vperm.xlu1 %6836, %v6335_v46  }
 0x27e   : > { %2787 = vperm.xlu0 %6835, %v6334_v50   ;;  %v2313_v18 = vpop.permute.xlu2 %2312  ;;  %v6287_v50 = vld [vmem:[%s6955_s23 + $0x94] ss:$2 sm:$0xff] }
 0x27f   : > { %v7575_v61 = vpop.permute.xlu1 %2052 }
 0x280   : > { %10053 = vst [vmem:[#allocation166_spill] sm:$0xff] %v7575_v61  ;;  %v7577_v6 = vpop.permute.xlu0 %2047  ;;  %v6387_v61 = vld [vmem:[%s6955_s23 + $0x76] ss:$2 sm:$0xff] }
 0x281   : > { %10054 = vst [vmem:[#allocation167_spill] sm:$0xff] %v7577_v6  ;;  %v6337_v6 = vld [vmem:[%s6955_s23 + $0x85] ss:$2 sm:$0xff] }
 0x284   : > { %3247 = vperm.xlu2 %6837, %v6386_v53  }
 0x285   : > { %3242 = vperm.xlu1 %6836, %v6385_v8  }
 0x286   : > { %3237 = vperm.xlu0 %6835, %v6384_v60   ;;  %v7582_v36 = vpop.permute.xlu2 %2532 }
 0x287   : > { %v7584_v62 = vpop.permute.xlu1 %2067 }
 0x288   : > { %10055 = vst [vmem:[#allocation168_spill] sm:$0xff] %v7584_v62  ;;  %v7586_v46 = vpop.permute.xlu0 %2062  ;;  %v6288_v62 = vld [vmem:[%s6955_s23 + $0xa4] ss:$2 sm:$0xff] }
 0x289   : > { %10056 = vst [vmem:[#allocation169_spill] sm:$0xff] %v7586_v46 }
 0x28c   : > { %2352 = vperm.xlu2 %6837, %v6287_v50  }
 0x28d   : > { %2347 = vperm.xlu1 %6836, %v6286_v29  }
 0x28e   : > { %3252 = vperm.xlu0 %6835, %v6387_v61   ;;  %v7591_v53 = vpop.permute.xlu2 %2547  ;;  %v6340_v61 = vld [vmem:[%s6955_s23 + $0xb5] ss:$2 sm:$0xff] }
 0x28f   : > { %v7593_v8 = vpop.permute.xlu1 %2087 }
 0x290   : > { %v7595_v60 = vpop.permute.xlu0 %2082 }
 0x294   : > { %2802 = vperm.xlu2 %6837, %v6337_v6  }
 0x295   : > { %2362 = vperm.xlu1 %6836, %v6289_v24   ;;  %v7614_v24 = vld [vmem:[%s9884_s1 + $0x1] ss:$0 sm:$0xff] }
 0x296   : > { %2357 = vperm.xlu0 %6835, %v6288_v62   ;;  %v2768_v46 = vpop.permute.xlu2 %2767  ;;  %v7619_v62 = vld [vmem:[%s9884_s1 + $0x2] ss:$0 sm:$0xff]  ;;  %v1238_v27 = vmul.f32 %v7614_v24, %v7260_v22 }
 0x297   : > { %v7600_v50 = vpop.permute.xlu1 %2307  ;;  %v1649_v7 = vmul.f32 %v7619_v62, %v7278_v28  ;;  %v7654_v28 = vld [vmem:[%s9884_s1 + $0x5] ss:$0 sm:$0xff] }
 0x298   : > { %v7602_v29 = vpop.permute.xlu0 %2097 }
 0x29c   : > { %2817 = vperm.xlu2 %6837, %v6340_v61   ;;  %v6388_v61 = vld [vmem:[%s6955_s23 + $0x86] ss:$2 sm:$0xff] }
 0x29d   : > { %2812 = vperm.xlu1 %6836, %v6339_v44   ;;  %v1194_v44 = vmul.f32 %v7614_v24, %v7165_v45  ;;  %v7643_v45 = vld [vmem:[%s9884_s1 + $0x4] ss:$0 sm:$0xff] }
 0x29e   : > { %2807 = vperm.xlu0 %6835, %v6338_v5   ;;  %v2988_v37 = vpop.permute.xlu2 %2987  ;;  %v7627_v5 = vld [vmem:[%s9884_s1] ss:$0 sm:$0xff]  ;;  %v2559_v38 = vmul.f32 %v7643_v45, %v2313_v18 }
 0x29f   : > { %v7607_v13 = vpop.permute.xlu1 %2322  ;;  %v739_v3 = vmul.f32 %v7627_v5, %v7021_v58  ;;  %v783_v4 = vmul.f32 %v7627_v5, %v7147_v59  ;;  %v7681_v59 = vld [vmem:[%s9885_s2] ss:$0 sm:$0xff] }
 0x2a0   : > { %v7609_v6 = vpop.permute.xlu0 %2317 }
 0x2a1   : > { %v1244_v58 = vadd.f32 %v1194_v44, %v739_v3  ;;  %v3014_v44 = vmul.f32 %v7654_v28, %v2768_v46  ;;  %v1288_v22 = vadd.f32 %v1238_v27, %v783_v4  ;;  %v2603_v4 = vmul.f32 %v7643_v45, %v7582_v36 }
 0x2a2   : > { %v786_v36 = vmul.f32 %v7627_v5, %v7156_v19 }
 0x2a3   : > { %v1699_v35 = vadd.f32 %v1649_v7, %v1244_v58  ;;  %v1693_v7 = vmul.f32 %v7619_v62, %v7442_v11  ;;  %v6877_v11 = vmov 0.0  }
 0x2a4   : > { %3267 = vperm.xlu2 %6837, %v6390_v16   ;;  %3673 = vst.msk [vmem:[#allocation2] sm:$0x1] %vm3672_vm0, %v6877_v11 }
 0x2a5   : > { %3262 = vperm.xlu1 %6836, %v6389_v63   ;;  %v2154_v3 = vadd.f32 %v2104_v31, %v1699_v35  ;;  %v2148_v35 = vmul.f32 %v7638_v39, %v7557_v17  ;;  %v1743_v27 = vadd.f32 %v1693_v7, %v1288_v22  ;;  %v6341_v17 = vld [vmem:[%s6955_s23 + $0xc5] ss:$2 sm:$0xff]  ;;  %5448 = vst [vmem:[#allocation6] sm:$0x1] %v6877_v11 }
 0x2a6   : > { %3257 = vperm.xlu0 %6835, %v6388_v61   ;;  %v7645_v16 = vpop.permute.xlu2 %3002  ;;  %v6290_v61 = vld [vmem:[%s6955_s23 + $0xc4] ss:$2 sm:$0xff]  ;;  %5449 = vst [vmem:[#allocation6 + $0x1a] sm:$0x1] %v6877_v11  ;;  %v1696_v7 = vmul.f32 %v7619_v62, %v7451_v2 }
 0x2a7   : > { %v7647_v63 = vpop.permute.xlu1 %2542  ;;  %v2609_v18 = vadd.f32 %v2559_v38, %v2154_v3  ;;  %v6292_v3 = vld [vmem:[%s6955_s23 + $0xe4] ss:$2 sm:$0xff]  ;;  %3926 = vst.msk [vmem:[#allocation3] sm:$0x7] %vm3925_vm2, %v6877_v11 }
 0x2a8   : > { %v7656_v42 = vpop.permute.xlu0 %2537  ;;  %3927 = vst.msk [vmem:[#allocation3 + $0xcb] sm:$0x7] %vm3925_vm2, %v6877_v11 }
 0x2a9   : > { %v3064_v58 = vadd.f32 %v3014_v44, %v2609_v18  ;;  %v1241_v44 = vmul.f32 %v7614_v24, %v7269_v41  ;;  %v2198_v18 = vadd.f32 %v2148_v35, %v1743_v27  ;;  %4929 = vst.msk [vmem:[#allocation4] sm:$0x1] %vm4928_vm3, %v6877_v11 }
 0x2aa   : > { %5002 = vst.msk [vmem:[#allocation5] sm:$0x7] %vm5001_vm5, %v6877_v11 }
 0x2ab   : > { %v2653_v22 = vadd.f32 %v2603_v4, %v2198_v18  ;;  %v2606_v4 = vmul.f32 %v7643_v45, %v7591_v53  ;;  %v1648_v53 = vmul.f32 %v7619_v62, %v7307_v1  ;;  %5003 = vst.msk [vmem:[#allocation5 + $0x35] sm:$0x7] %vm5001_vm5, %v6877_v11  ;;  %v6547_v11 = vld [vmem:[%s9888_s5 + $0x48] sm:$0xff] }
 0x2ac   : > { %2372 = vperm.xlu2 %6837, %v6291_v20  }
 0x2ad   : > { %2367 = vperm.xlu1 %6836, %v6290_v61   ;;  %v6293_v61 = vld [vmem:[%s6955_s23 + $0xf4] ss:$2 sm:$0xff] }
 0x2ae   : > { %3272 = vperm.xlu0 %6835, %v6391_v56   ;;  %v3223_v31 = vpop.permute.xlu2 %3222 }
 0x2af   : > { %v7676_v46 = vpop.permute.xlu1 %2762  ;;  %v3469_v20 = vmul.f32 %v7668_v12, %v3223_v31  ;;  %v3058_v31 = vmul.f32 %v7654_v28, %v2988_v37 }
 0x2b0   : > { %v7684_v38 = vpop.permute.xlu0 %2552 }
 0x2b1   : > { %v3519_v56 = vadd.f32 %v3469_v20, %v3064_v58  ;;  %v1291_v58 = vadd.f32 %v1241_v44, %v786_v36  ;;  %v2151_v20 = vmul.f32 %v7638_v39, %v7566_v49  ;;  %v3108_v27 = vadd.f32 %v3058_v31, %v2653_v22 }
 0x2b2   : > { %v1193_v44 = vmul.f32 %v7614_v24, %v7125_v21  ;;  %v3061_v49 = vmul.f32 %v7654_v28, %v7645_v16  ;;  %v738_v36 = vmul.f32 %v7627_v5, %v7012_v52 }
 0x2b3   : > { %v3573_v0 = vadd.f32 %v7681_v59, %v3519_v56  ;;  %v1746_v2 = vadd.f32 %v1696_v7, %v1291_v58 }
 0x2b4   : > { %2822 = vperm.xlu2 %6837, %v6341_v17   ;;  %v6344_v17 = vld [vmem:[%s6955_s23 + $0xf5] ss:$2 sm:$0xff]  ;;  %v1243_v16 = vadd.f32 %v1193_v44, %v738_v36  ;;  %v741_v44 = vmul.f32 %v7627_v5, %v7019_v57  ;;  %v740_v57 = vmul.f32 %v7627_v5, %v7010_v51  ;;  %v1650_v36 = vmul.f32 %v7619_v62, %v7318_v43 }
 0x2b5   : > { %2382 = vperm.xlu1 %6836, %v6293_v61   ;;  %v3623_v41 = vmax.f32 %v3573_v0, 0.0  ;;  %v6343_v61 = vld [vmem:[%s6955_s23 + $0xe5] ss:$2 sm:$0xff]  ;;  %v2201_v18 = vadd.f32 %v2151_v20, %v1746_v2  ;;  %v6394_v2 = vld [vmem:[%s6955_s23 + $0xe6] ss:$2 sm:$0xff]  ;;  %v2106_v51 = vmul.f32 %v7638_v39, %v7471_v32 }
 0x2b6   : > { %2377 = vperm.xlu0 %6835, %v6292_v3   ;;  %v3443_v37 = vpop.permute.xlu2 %3442  ;;  %v6342_v3 = vld [vmem:[%s6955_s23 + $0xd5] ss:$2 sm:$0xff]  ;;  %v1698_v1 = vadd.f32 %v1648_v53, %v1243_v16  ;;  %v6432_v32 = vld [vmem:[%s9886_s3 + $0x28] sm:$0xff] }
 0x2b7   : > { %v7702_v35 = vpop.permute.xlu1 %2777  ;;  %3677 = vst.msk [vmem:[#allocation2 + $0x9] sm:$0xff] %vm3675_vm1, %v3623_v41  ;;  %v3513_v19 = vmul.f32 %v7668_v12, %v3443_v37  ;;  %v2656_v7 = vadd.f32 %v2606_v4, %v2201_v18  ;;  %v2103_v37 = vmul.f32 %v7638_v39, %v7462_v47  ;;  %v6393_v4 = vld [vmem:[%s6955_s23 + $0xd6] ss:$2 sm:$0xff]  ;;  %v3013_v47 = vmul.f32 %v7654_v28, %v7676_v46 }
 0x2b8   : > { %v7708_v56 = vpop.permute.xlu0 %2772  ;;  %v1195_v18 = vmul.f32 %v7614_v24, %v7163_v40  ;;  %v1651_v46 = vmul.f32 %v7619_v62, %v7316_v30  ;;  %v6463_v30 = vld [vmem:[%s9886_s3 + $0x50] sm:$0xff] }
 0x2b9   : > { %v3563_v0 = vadd.f32 %v3513_v19, %v3108_v27  ;;  %v3111_v58 = vadd.f32 %v3061_v49, %v2656_v7  ;;  %v2558_v27 = vmul.f32 %v7643_v45, %v7600_v50  ;;  %v6434_v50 = vld [vmem:[%s9886_s3 + $0x38] sm:$0xff] }
 0x2ba   : > { %4064 = vmatpush.msra.mxu0 %v6434_v50  ;;  %6816 = vmatpush.msra.mxu1 %v6434_v50 }
 0x2bb   : > { %v3617_v31 = vadd.f32 %v7681_v59, %v3563_v0  ;;  %v1196_v0 = vmul.f32 %v7614_v24, %v7134_v33  ;;  %v6464_v33 = vld [vmem:[%s9886_s3 + $0x58] sm:$0xff] }
 0x2bc   : > { %2837 = vperm.xlu2 %6837, %v6344_v17   ;;  %v6392_v17 = vld [vmem:[%s6955_s23 + $0xc6] ss:$2 sm:$0xff]  ;;  %4285 = vmatpush.msra.mxu2 %v6464_v33  ;;  %v3015_v33 = vmul.f32 %v7654_v28, %v7708_v56 }
 0x2bd   : > { %2832 = vperm.xlu1 %6836, %v6343_v61   ;;  %v3667_v22 = vmax.f32 %v3617_v31, 0.0  ;;  %v2153_v61 = vadd.f32 %v2103_v37, %v1698_v1  ;;  %v1246_v40 = vadd.f32 %v1196_v0, %v741_v44  ;;  %v1245_v37 = vadd.f32 %v1195_v18, %v740_v57 }
 0x2be   : > { %2827 = vperm.xlu0 %6835, %v6342_v3   ;;  %v3458_v21 = vpop.permute.xlu2 %3457  ;;  %4286 = vmatpush.msra.mxu2 %v6463_v30  ;;  %v2560_v0 = vmul.f32 %v7643_v45, %v7609_v6  ;;  %v3016_v44 = vmul.f32 %v7654_v28, %v7702_v35  ;;  %v1239_v18 = vmul.f32 %v7614_v24, %v7300_v54 }
 0x2bf   : > { %v7724_v41 = vpop.permute.xlu1 %2997  ;;  %3721 = vst.msk [vmem:[#allocation2 + $0x169] sm:$0xff] %vm3675_vm1, %v3667_v22  ;;  %v3516_v52 = vmul.f32 %v7668_v12, %v3458_v21  ;;  %v2608_v49 = vadd.f32 %v2558_v27, %v2153_v61  ;;  %v6433_v22 = vld [vmem:[%s9886_s3 + $0x30] sm:$0xff]  ;;  %v1701_v1 = vadd.f32 %v1651_v46, %v1246_v40  ;;  %v2561_v27 = vmul.f32 %v7643_v45, %v7607_v13  ;;  %v6431_v61 = vld [vmem:[%s9886_s3 + $0x20] sm:$0xff] }
 0x2c0   : > { %v7730_v20 = vpop.permute.xlu0 %2992  ;;  %4065 = vmatpush.msra.mxu0 %v6433_v22  ;;  %6817 = vmatpush.msra.mxu1 %v6433_v22  ;;  %v1240_v13 = vmul.f32 %v7614_v24, %v7298_v10  ;;  %v785_v46 = vmul.f32 %v7627_v5, %v7116_v9  ;;  %v1695_v10 = vmul.f32 %v7619_v62, %v7453_v14 }
 0x2c1   : > { %v3566_v19 = vadd.f32 %v3516_v52, %v3111_v58  ;;  %v3063_v43 = vadd.f32 %v3013_v47, %v2608_v49  ;;  %v2105_v58 = vmul.f32 %v7638_v39, %v7431_v25  ;;  %v6462_v52 = vld [vmem:[%s9886_s3 + $0x48] sm:$0xff]  ;;  %v6461_v47 = vld [vmem:[%s9886_s3 + $0x40] sm:$0xff]  ;;  %v1694_v54 = vmul.f32 %v7619_v62, %v7413_v34 }
 0x2c2   : > { %v6294_v25 = vld [vmem:[%s6955_s23 + $0x104] ss:$2 sm:$0xff]  ;;  %4066 = vmatpush.msra.mxu0 %v6432_v32  ;;  %4287 = vmatpush.msra.mxu2 %v6462_v52  ;;  %v1290_v9 = vadd.f32 %v1240_v13, %v785_v46  ;;  %v2150_v14 = vmul.f32 %v7638_v39, %v7593_v8  ;;  %v2149_v34 = vmul.f32 %v7638_v39, %v7595_v60  ;;  %v6345_v8 = vld [vmem:[%s6955_s23 + $0x105] ss:$2 sm:$0xff] }
 0x2c3   : > { %v3620_v3 = vadd.f32 %v7681_v59, %v3566_v19  ;;  %6818 = vmatpush.msra.mxu1 %v6432_v32  ;;  %v2604_v52 = vmul.f32 %v7643_v45, %v7656_v42 }
 0x2c4   : > { %3287 = vperm.xlu2 %6837, %v6394_v2   ;;  %v6295_v2 = vld [vmem:[%s6955_s23 + $0x114] ss:$2 sm:$0xff]  ;;  %4067 = vmatpush.msra.mxu0 %v6431_v61 }
 0x2c5   : > { %3282 = vperm.xlu1 %6836, %v6393_v4   ;;  %v3670_v31 = vmax.f32 %v3620_v3, 0.0  ;;  %v1700_v4 = vadd.f32 %v1650_v36, %v1245_v37  ;;  %v2156_v3 = vadd.f32 %v2106_v51, %v1701_v1  ;;  %4288 = vmatpush.msra.mxu2 %v6461_v47 }
 0x2c6   : > { %3277 = vperm.xlu0 %6835, %v6392_v17   ;;  %v7758_v53 = vpop.permute.xlu2 %2332  ;;  %v6395_v17 = vld [vmem:[%s6955_s23 + $0xf6] ss:$2 sm:$0xff]  ;;  %6819 = vmatpush.msra.mxu1 %v6431_v61  ;;  %v1697_v61 = vmul.f32 %v7619_v62, %v7422_v23  ;;  %v2152_v23 = vmul.f32 %v7638_v39, %v7602_v29 }
 0x2c7   : > { %v3218_v7 = vpop.permute.xlu1 %3217  ;;  %3724 = vst.msk [vmem:[#allocation2 + $0x181] sm:$0xff] %vm3675_vm1, %v3670_v31  ;;  %v2155_v50 = vadd.f32 %v2105_v58, %v1700_v4  ;;  %v2611_v49 = vadd.f32 %v2561_v27, %v2156_v3  ;;  %v784_v31 = vmul.f32 %v7627_v5, %v7145_v55  ;;  %v6297_v58 = vld [vmem:[%s6955_s23 + $0x134] ss:$2 sm:$0xff]  ;;  %v6296_v27 = vld [vmem:[%s6955_s23 + $0x124] ss:$2 sm:$0xff] }
 0x2c8   : > { %v3468_v21 = vmul.f32 %v7668_v12, %v3218_v7  ;;  %v7772_v16 = vpop.permute.xlu0 %3007 }
 0x2c9   : > { %v2610_v57 = vadd.f32 %v2560_v0, %v2155_v50  ;;  %v3066_v36 = vadd.f32 %v3016_v44, %v2611_v49  ;;  %v1289_v22 = vadd.f32 %v1239_v18, %v784_v31  ;;  %v6348_v31 = vld [vmem:[%s6955_s23 + $0x135] ss:$2 sm:$0xff] }
 0x2ca   : > { %v3518_v19 = vadd.f32 %v3468_v21, %v3063_v43  ;;  %v1745_v43 = vadd.f32 %v1695_v10, %v1290_v9  ;;  %v2605_v21 = vmul.f32 %v7643_v45, %v7647_v63  ;;  %v3059_v63 = vmul.f32 %v7654_v28, %v7730_v20 }
 0x2cb   : > { %v3065_v30 = vadd.f32 %v3015_v33, %v2610_v57  ;;  %v1744_v32 = vadd.f32 %v1694_v54, %v1289_v22  ;;  %v6347_v54 = vld [vmem:[%s6955_s23 + $0x125] ss:$2 sm:$0xff]  ;;  %v2607_v9 = vmul.f32 %v7643_v45, %v7684_v38  ;;  %v3981_v38 = vld [vmem:[%s9886_s3 + $0x18] sm:$0xff] }
 0x2cc   : > { %v3572_v6 = vadd.f32 %v7681_v59, %v3518_v19  ;;  %2392 = vperm.xlu2 %6837, %v6295_v2   ;;  %v1242_v19 = vmul.f32 %v7614_v24, %v7309_v26  ;;  %v2200_v60 = vadd.f32 %v2150_v14, %v1745_v43  ;;  %v3060_v2 = vmul.f32 %v7654_v28, %v7724_v41 }
 0x2cd   : > { %2387 = vperm.xlu1 %6836, %v6294_v25   ;;  %v2199_v4 = vadd.f32 %v2149_v34, %v1744_v32  ;;  %v787_v26 = vmul.f32 %v7627_v5, %v7154_v15  ;;  %4159 = vmatpush.msrb.mxu1 %v3981_v38 }
 0x2ce   : > { %v3622_v35 = vmax.f32 %v3572_v6, 0.0  ;;  %3292 = vperm.xlu0 %6835, %v6395_v17   ;;  %v7814_v56 = vpop.permute.xlu2 %2782  ;;  %v2655_v42 = vadd.f32 %v2605_v21, %v2200_v60 }
 0x2cf   : > { %v3233_v40 = vpop.permute.xlu1 %3232  ;;  %v2654_v41 = vadd.f32 %v2604_v52, %v2199_v4  ;;  %v1292_v33 = vadd.f32 %v1242_v19, %v787_v26  ;;  %v6397_v19 = vld [vmem:[%s6955_s23 + $0x116] ss:$2 sm:$0xff]  ;;  %v6396_v4 = vld [vmem:[%s6955_s23 + $0x106] ss:$2 sm:$0xff] }
 0x2d0   : > { %3676 = vst.msk [vmem:[#allocation2 + $0x1] sm:$0xff] %vm3675_vm1, %v3622_v35  ;;  %v3471_v55 = vmul.f32 %v7668_v12, %v3233_v40  ;;  %v3228_v7 = vpop.permute.xlu0 %3227  ;;  %v3110_v6 = vadd.f32 %v3060_v2, %v2655_v42  ;;  %v3979_v2 = vld [vmem:[%s9886_s3 + $0x8] sm:$0xff] }
 0x2d1   : > { %v3470_v51 = vmul.f32 %v7668_v12, %v3228_v7  ;;  %v3109_v46 = vadd.f32 %v3059_v63, %v2654_v41  ;;  %v1747_v40 = vadd.f32 %v1697_v61, %v1292_v33  ;;  %v3062_v7 = vmul.f32 %v7654_v28, %v7772_v16  ;;  %v10059_v33 = vld [vmem:[#allocation137_spill] sm:$0xff] }
 0x2d2   : > { %v3521_v37 = vadd.f32 %v3471_v55, %v3066_v36  ;;  %v6346_v36 = vld [vmem:[%s6955_s23 + $0x115] ss:$2 sm:$0xff] }
 0x2d3   : > { %v3520_v1 = vadd.f32 %v3470_v51, %v3065_v30  ;;  %v2202_v29 = vadd.f32 %v2152_v23, %v1747_v40  ;;  %v2109_v23 = vmul.f32 %v7638_v39, %v10059_v33  ;;  %v6349_v33 = vld [vmem:[%s6955_s23 + $0x145] ss:$2 sm:$0xff] }
 0x2d4   : > { %v3575_v25 = vadd.f32 %v7681_v59, %v3521_v37  ;;  %2842 = vperm.xlu2 %6837, %v6345_v8  }
 0x2d5   : > { %v3574_v0 = vadd.f32 %v7681_v59, %v3520_v1  ;;  %2402 = vperm.xlu1 %6836, %v6297_v58   ;;  %v2657_v30 = vadd.f32 %v2607_v9, %v2202_v29  ;;  %v3980_v58 = vld [vmem:[%s9886_s3 + $0x10] sm:$0xff] }
 0x2d6   : > { %v3625_v17 = vmax.f32 %v3575_v25, 0.0  ;;  %2397 = vperm.xlu0 %6835, %v6296_v27   ;;  %v7842_v13 = vpop.permute.xlu2 %2797  ;;  %v6398_v1 = vld [vmem:[%s6955_s23 + $0x126] ss:$2 sm:$0xff]  ;;  %4160 = vmatpush.msrb.mxu1 %v3980_v58  ;;  %v6399_v29 = vld [vmem:[%s6955_s23 + $0x136] ss:$2 sm:$0xff] }
 0x2d7   : > { %v3624_v47 = vmax.f32 %v3574_v0, 0.0  ;;  %v3453_v3 = vpop.permute.xlu1 %3452  ;;  %v3726_v20 = vld [vmem:[#allocation2] ss:$2 sm:$0xff]  ;;  %v3776_v44 = vld [vmem:[#allocation2 + $0x1] ss:$2 sm:$0xff]  ;;  %v3112_v32 = vadd.f32 %v3062_v7, %v2657_v30  ;;  %v10064_v30 = vld [vmem:[#allocation9_spill] sm:$0xff] }
 0x2d8   : > { %3679 = vst.msk [vmem:[#allocation2 + $0x19] sm:$0xff] %vm3675_vm1, %v3625_v17  ;;  %v3515_v18 = vmul.f32 %v7668_v12, %v3453_v3  ;;  %v3448_v50 = vpop.permute.xlu0 %3447  ;;  %v3825_v15 = vmax.f32 %v3726_v20, %v3776_v44  ;;  %v3851_v49 = vld [vmem:[#allocation2 + $0x2] ss:$2 sm:$0xff]  ;;  %4161 = vmatpush.msrb.mxu1 %v3979_v2  ;;  %v1199_v17 = vmul.f32 %v7614_v24, %v7143_v48  ;;  %v10058_v20 = vld [vmem:[#allocation94_spill] sm:$0xff] }
 0x2d9   : > { %3678 = vst.msk [vmem:[#allocation2 + $0x11] sm:$0xff] %vm3675_vm1, %v3624_v47  ;;  %v3514_v10 = vmul.f32 %v7668_v12, %v3448_v50  ;;  %v3978_v0 = vld [vmem:[%s9886_s3] sm:$0xff]  ;;  %v1654_v44 = vmul.f32 %v7619_v62, %v10058_v20  ;;  %v10062_v7 = vld [vmem:[#allocation8_spill] sm:$0xff]  ;;  %v2563_v20 = vmul.f32 %v7643_v45, %v7758_v53 }
 0x2da   : > { %v3565_v35 = vadd.f32 %v3515_v18, %v3110_v6  ;;  %v3900_v57 = vmax.f32 %v3825_v15, %v3851_v49  ;;  %4162 = vmatpush.msrb.mxu1 %v3978_v0  ;;  %v10057_v47 = vld [vmem:[#allocation15_spill] sm:$0xff] }
 0x2db   : > { %v3564_v14 = vadd.f32 %v3514_v10, %v3109_v46  ;;  %v744_v3 = vmul.f32 %v7627_v5, %v10057_v47  ;;  %v10060_v10 = vld [vmem:[#allocation53_spill] sm:$0xff] }
 0x2dc   : > { %v3619_v55 = vadd.f32 %v7681_v59, %v3565_v35  ;;  %3928 = vst.msk [vmem:[#allocation3 + $0x3] sm:$0xff] %vm3675_vm1, %v3900_v57  ;;  %2857 = vperm.xlu2 %6837, %v6348_v31   ;;  %v1197_v49 = vmul.f32 %v7614_v24, %v10060_v10  ;;  %v6299_v35 = vld [vmem:[%s6955_s23 + $0x154] ss:$2 sm:$0xff]  ;;  %v6298_v31 = vld [vmem:[%s6955_s23 + $0x144] ss:$2 sm:$0xff] }
 0x2dd   : > { %v3618_v22 = vadd.f32 %v7681_v59, %v3564_v14  ;;  %2852 = vperm.xlu1 %6836, %v6347_v54   ;;  %v1249_v15 = vadd.f32 %v1199_v17, %v744_v3  ;;  %v10061_v57 = vld [vmem:[#allocation52_spill] sm:$0xff] }
 0x2de   : > { %v3669_v34 = vmax.f32 %v3619_v55, 0.0  ;;  %2847 = vperm.xlu0 %6835, %v6346_v36   ;;  %v7863_v43 = vpop.permute.xlu2 %3247  ;;  %v1198_v40 = vmul.f32 %v7614_v24, %v10061_v57 }
 0x2df   : > { %v3668_v51 = vmax.f32 %v3618_v22, 0.0  ;;  %v7865_v21 = vpop.permute.xlu1 %2327  ;;  %v1704_v9 = vadd.f32 %v1654_v44, %v1249_v15  ;;  %v742_v22 = vmul.f32 %v7627_v5, %v10062_v7  ;;  %v3474_v44 = vmul.f32 %v7668_v12, %v7863_v43 }
 0x2e0   : > { %3723 = vst.msk [vmem:[#allocation2 + $0x179] sm:$0xff] %vm3675_vm1, %v3669_v34  ;;  %v3463_v16 = vpop.permute.xlu0 %3462  ;;  %v3728_v37 = vld [vmem:[#allocation2 + $0x10] ss:$2 sm:$0xff]  ;;  %v3778_v8 = vld [vmem:[#allocation2 + $0x11] ss:$2 sm:$0xff]  ;;  %v10063_v34 = vld [vmem:[#allocation87_spill] sm:$0xff] }
 0x2e1   : > { %3722 = vst.msk [vmem:[#allocation2 + $0x171] sm:$0xff] %vm3675_vm1, %v3668_v51  ;;  %v3517_v52 = vmul.f32 %v7668_v12, %v3463_v16  ;;  %v3826_v27 = vmax.f32 %v3728_v37, %v3778_v8  ;;  %v3853_v60 = vld [vmem:[#allocation2 + $0x12] ss:$2 sm:$0xff]  ;;  %v1652_v38 = vmul.f32 %v7619_v62, %v10063_v34  ;;  %v743_v51 = vmul.f32 %v7627_v5, %v10064_v30  ;;  %v10065_v16 = vld [vmem:[#allocation95_spill] sm:$0xff] }
 0x2e2   : > { %v1653_v37 = vmul.f32 %v7619_v62, %v10065_v16  ;;  %v2159_v8 = vadd.f32 %v2109_v23, %v1704_v9  ;;  %v1247_v58 = vadd.f32 %v1197_v49, %v742_v22  ;;  %v6301_v23 = vld [vmem:[%s6955_s23 + $0x174] ss:$2 sm:$0xff] }
 0x2e3   : > { %v3567_v25 = vadd.f32 %v3517_v52, %v3112_v32  ;;  %v3901_v63 = vmax.f32 %v3826_v27, %v3853_v60  ;;  %v10066_v32 = vld [vmem:[#allocation134_spill] sm:$0xff]  ;;  %v10067_v60 = vld [vmem:[#allocation129_spill] sm:$0xff] }
 0x2e4   : > { %3307 = vperm.xlu2 %6837, %v6398_v1   ;;  %v2107_v52 = vmul.f32 %v7638_v39, %v10066_v32  ;;  %v2108_v2 = vmul.f32 %v7638_v39, %v10067_v60  ;;  %v1702_v17 = vadd.f32 %v1652_v38, %v1247_v58 }
 0x2e5   : > { %v3621_v42 = vadd.f32 %v7681_v59, %v3567_v25  ;;  %3302 = vperm.xlu1 %6836, %v6397_v19   ;;  %3929 = vst.msk [vmem:[#allocation3 + $0xb] sm:$0xff] %vm3675_vm1, %v3901_v63  ;;  %v1248_v19 = vadd.f32 %v1198_v40, %v743_v51 }
 0x2e6   : > { %3297 = vperm.xlu0 %6835, %v6396_v4   ;;  %v7886_v61 = vpop.permute.xlu2 %2352  ;;  %v2157_v15 = vadd.f32 %v2107_v52, %v1702_v17 }
 0x2e7   : > { %v3671_v26 = vmax.f32 %v3621_v42, 0.0  ;;  %v7888_v41 = vpop.permute.xlu1 %2342  ;;  %v1703_v3 = vadd.f32 %v1653_v37, %v1248_v19  ;;  %v6351_v19 = vld [vmem:[%s6955_s23 + $0x165] ss:$2 sm:$0xff] }
 0x2e8   : > { %v2338_v6 = vpop.permute.xlu0 %2337  ;;  %v3772_v18 = vld [vmem:[#allocation2 + $0x170] ss:$2 sm:$0xff]  ;;  %v3822_v50 = vld [vmem:[#allocation2 + $0x171] ss:$2 sm:$0xff]  ;;  %v2565_v37 = vmul.f32 %v7643_v45, %v7888_v41 }
 0x2e9   : > { %3725 = vst.msk [vmem:[#allocation2 + $0x189] sm:$0xff] %vm3675_vm1, %v3671_v26  ;;  %v3848_v48 = vmax.f32 %v3772_v18, %v3822_v50  ;;  %v3897_v46 = vld [vmem:[#allocation2 + $0x172] ss:$2 sm:$0xff]  ;;  %v2564_v14 = vmul.f32 %v7643_v45, %v2338_v6  ;;  %v2562_v26 = vmul.f32 %v7643_v45, %v7865_v21  ;;  %v10068_v50 = vld [vmem:[#allocation56_spill] sm:$0xff]  ;;  %v2158_v10 = vadd.f32 %v2108_v2, %v1703_v3 }
 0x2eb   : > { %v3923_v54 = vmax.f32 %v3848_v48, %v3897_v46  ;;  %v2614_v25 = vadd.f32 %v2564_v14, %v2159_v8  ;;  %v1200_v48 = vmul.f32 %v7614_v24, %v10068_v50  ;;  %v2612_v57 = vadd.f32 %v2562_v26, %v2157_v15  ;;  %v10072_v15 = vld [vmem:[#allocation59_spill] sm:$0xff] }
 0x2ec   : > { %v3983_v36 = vld [vmem:[#allocation3 + $0x1] ss:$2 sm:$0xff]  ;;  %v4204_v55 = vld [vmem:[#allocation3 + $0x2] ss:$2 sm:$0xff]  ;;  %2412 = vperm.xlu2 %6837, %v6299_v35   ;;  %v2613_v40 = vadd.f32 %v2563_v20, %v2158_v10 }
 0x2ed   : > { %6435 = vmatmul.msk.f32.vlgmr.msra.gmra.mxu0 %vm3675_vm1, %v3983_v36  ;;  %6465 = vmatmul.msk.f32.vlgmr.msra.gmra.mxu2 %vm3675_vm1, %v4204_v55  ;;  %3951 = vst.msk [vmem:[#allocation3 + $0xbb] sm:$0xff] %vm3675_vm1, %v3923_v54  ;;  %v6300_v35 = vld [vmem:[%s6955_s23 + $0x164] ss:$2 sm:$0xff]  ;;  %v10070_v54 = vld [vmem:[#allocation90_spill] sm:$0xff] }
 0x2ee   : > { %2407 = vperm.xlu1 %6836, %v6298_v31   ;;  %3312 = vperm.xlu0 %6835, %v6399_v29   ;;  %v7918_v1 = vpop.permute.xlu2 %2802  ;;  %v10069_v31 = vld [vmem:[#allocation14_spill] sm:$0xff]  ;;  %v1655_v43 = vmul.f32 %v7619_v62, %v10070_v54  ;;  %v10071_v36 = vld [vmem:[#allocation136_spill] sm:$0xff]  ;;  %v3017_v29 = vmul.f32 %v7654_v28, %v7814_v56 }
 0x2ef   : > { %v2793_v27 = vpop.permute.xlu1 %2792  ;;  %v745_v53 = vmul.f32 %v7627_v5, %v10069_v31  ;;  %v2110_v55 = vmul.f32 %v7638_v39, %v10071_v36  ;;  %v3953_v50 = vld [vmem:[#allocation3] ss:$2 sm:$0xff] }
 0x2f0   : > { %v3019_v4 = vmul.f32 %v7654_v28, %v2793_v27  ;;  %v2788_v63 = vpop.permute.xlu0 %2787  ;;  %v3774_v0 = vld [vmem:[#allocation2 + $0x180] ss:$2 sm:$0xff]  ;;  %v3824_v42 = vld [vmem:[#allocation2 + $0x181] ss:$2 sm:$0xff]  ;;  %v3067_v8 = vadd.f32 %v3017_v29, %v2612_v57 }
 0x2f1   : > { %v3849_v47 = vmax.f32 %v3774_v0, %v3824_v42  ;;  %v3899_v18 = vld [vmem:[#allocation2 + $0x182] ss:$2 sm:$0xff]  ;;  %v3018_v21 = vmul.f32 %v7654_v28, %v2788_v63  ;;  %v1250_v14 = vadd.f32 %v1200_v48, %v745_v53  ;;  %v6352_v27 = vld [vmem:[%s6955_s23 + $0x175] ss:$2 sm:$0xff]  ;;  %v3020_v0 = vmul.f32 %v7654_v28, %v7842_v13 }
 0x2f2   : > { %v3069_v6 = vadd.f32 %v3019_v4, %v2614_v25  ;;  %v6350_v25 = vld [vmem:[%s6955_s23 + $0x155] ss:$2 sm:$0xff]  ;;  %v6400_v48 = vld [vmem:[%s6955_s23 + $0x146] ss:$2 sm:$0xff] }
 0x2f3   : > { %v3924_v46 = vmax.f32 %v3849_v47, %v3899_v18  ;;  %v3068_v38 = vadd.f32 %v3018_v21, %v2613_v40  ;;  %v1705_v16 = vadd.f32 %v1655_v43, %v1250_v14  ;;  %v6401_v18 = vld [vmem:[%s6955_s23 + $0x156] ss:$2 sm:$0xff] }
 0x2f4   : > { %v3524_v49 = vadd.f32 %v3474_v44, %v3069_v6  ;;  %2862 = vperm.xlu2 %6837, %v6349_v33   ;;  %v6402_v6 = vld [vmem:[%s6955_s23 + $0x166] ss:$2 sm:$0xff]  ;;  %v1203_v33 = vmul.f32 %v7614_v24, %v10072_v15 }
 0x2f5   : > { %3952 = vst.msk [vmem:[#allocation3 + $0xc3] sm:$0xff] %vm3675_vm1, %v3924_v46  ;;  %v2160_v32 = vadd.f32 %v2110_v55, %v1705_v16  ;;  %v10076_v55 = vld [vmem:[#allocation55_spill] sm:$0xff] }
 0x2f6   : > { %v3578_v9 = vadd.f32 %v7681_v59, %v3524_v49  ;;  %2422 = vperm.xlu1 %6836, %v6301_v23   ;;  %2417 = vperm.xlu0 %6835, %v6300_v35   ;;  %v7945_v7 = vpop.permute.xlu2 %2817  ;;  %v10073_v49 = vld [vmem:[#allocation17_spill] sm:$0xff]  ;;  %v10074_v35 = vld [vmem:[#allocation91_spill] sm:$0xff]  ;;  %v1201_v29 = vmul.f32 %v7614_v24, %v10076_v55 }
 0x2f7   : > { %v3243_v22 = vpop.permute.xlu1 %3242  ;;  %v2615_v4 = vadd.f32 %v2565_v37, %v2160_v32  ;;  %v748_v21 = vmul.f32 %v7627_v5, %v10073_v49  ;;  %v1658_v31 = vmul.f32 %v7619_v62, %v10074_v35  ;;  %v10079_v32 = vld [vmem:[#allocation98_spill] sm:$0xff]  ;;  %v2567_v49 = vmul.f32 %v7643_v45, %v7886_v61  ;;  %v6304_v55 = vld [vmem:[%s6955_s23 + $0x1a4] ss:$2 sm:$0xff] }
 0x2f8   : > { %v3628_v34 = vmax.f32 %v3578_v9, 0.0  ;;  %v3473_v30 = vmul.f32 %v7668_v12, %v3243_v22  ;;  %v3238_v51 = vpop.permute.xlu0 %3237  ;;  %v10075_v9 = vld [vmem:[#allocation139_spill] sm:$0xff] }
 0x2f9   : > { %v3472_v58 = vmul.f32 %v7668_v12, %v3238_v51  ;;  %v3070_v3 = vadd.f32 %v3020_v0, %v2615_v4  ;;  %v1253_v40 = vadd.f32 %v1203_v33, %v748_v21  ;;  %v2113_v14 = vmul.f32 %v7638_v39, %v10075_v9  ;;  %v6303_v22 = vld [vmem:[%s6955_s23 + $0x194] ss:$2 sm:$0xff] }
 0x2fa   : > { %3682 = vst.msk [vmem:[#allocation2 + $0x31] sm:$0xff] %vm3675_vm1, %v3628_v34  ;;  %v3523_v56 = vadd.f32 %v3473_v30, %v3068_v38  ;;  %v6302_v34 = vld [vmem:[%s6955_s23 + $0x184] ss:$2 sm:$0xff] }
 0x2fb   : > { %v3522_v52 = vadd.f32 %v3472_v58, %v3067_v8  ;;  %v10077_v30 = vld [vmem:[#allocation49_spill] sm:$0xff]  ;;  %v1708_v16 = vadd.f32 %v1658_v31, %v1253_v40  ;;  %v10078_v58 = vld [vmem:[#allocation10_spill] sm:$0xff] }
 0x2fc   : > { %v3577_v60 = vadd.f32 %v7681_v59, %v3523_v56  ;;  %v4007_v2 = vld [vmem:[#allocation3 + $0xc1] ss:$2 sm:$0xf]  ;;  %2877 = vperm.xlu2 %6837, %v6352_v27   ;;  %v1202_v51 = vmul.f32 %v7614_v24, %v10077_v30  ;;  %v6403_v8 = vld [vmem:[%s6955_s23 + $0x176] ss:$2 sm:$0xff]  ;;  %v746_v56 = vmul.f32 %v7627_v5, %v10078_v58 }
 0x2fd   : > { %v3576_v63 = vadd.f32 %v7681_v59, %v3522_v52  ;;  %6447 = vmatmul.msk.f32.vlgmr.msra.gmra.mxu1 %vm3675_vm1, %v4007_v2  ;;  %v1656_v52 = vmul.f32 %v7619_v62, %v10079_v32  ;;  %v10080_v27 = vld [vmem:[#allocation18_spill] sm:$0xff] }
 0x2fe   : > { %v3627_v41 = vmax.f32 %v3577_v60, 0.0  ;;  %2872 = vperm.xlu1 %6836, %v6351_v19   ;;  %2867 = vperm.xlu0 %6835, %v6350_v25   ;;  %v7960_v17 = vpop.permute.xlu2 %3267  ;;  %v747_v19 = vmul.f32 %v7627_v5, %v10080_v27  ;;  %v10081_v60 = vld [vmem:[#allocation97_spill] sm:$0xff]  ;;  %v2163_v25 = vadd.f32 %v2113_v14, %v1708_v16  ;;  %v1251_v4 = vadd.f32 %v1201_v29, %v746_v56  ;;  %v10085_v29 = vld [vmem:[#allocation11_spill] sm:$0xff]  ;;  %v10087_v16 = vld [vmem:[#allocation132_spill] sm:$0xff] }
 0x2ff   : > { %v3626_v42 = vmax.f32 %v3576_v63, 0.0  ;;  %v2348_v26 = vpop.permute.xlu1 %2347  ;;  %v1657_v2 = vmul.f32 %v7619_v62, %v10081_v60  ;;  %v10082_v63 = vld [vmem:[#allocation131_spill] sm:$0xff]  ;;  %v3478_v21 = vmul.f32 %v7668_v12, %v7960_v17  ;;  %v749_v61 = vmul.f32 %v7627_v5, %v10085_v29  ;;  %v6481_v30 = vld [vmem:[%s9886_s3 + $0x78] sm:$0xff] }
 0x300   : > { %3681 = vst.msk [vmem:[#allocation2 + $0x29] sm:$0xff] %vm3675_vm1, %v3627_v41  ;;  %v3253_v47 = vpop.permute.xlu0 %3252  ;;  %v2111_v41 = vmul.f32 %v7638_v39, %v10082_v63  ;;  %v2566_v15 = vmul.f32 %v7643_v45, %v2348_v26  ;;  %v6305_v40 = vld [vmem:[%s6955_s23 + $0x1b4] ss:$2 sm:$0xff]  ;;  %v3021_v5 = vmul.f32 %v7654_v28, %v7918_v1  ;;  %6820 = vmatpush.msra.mxu3 %v6481_v30 }
 0x301   : > { %3680 = vst.msk [vmem:[#allocation2 + $0x21] sm:$0xff] %vm3675_vm1, %v3626_v42  ;;  %v3475_v20 = vmul.f32 %v7668_v12, %v3253_v47  ;;  %v1252_v47 = vadd.f32 %v1202_v51, %v747_v19  ;;  %4424 = vmatpush.msrb.mxu0 %v6481_v30  ;;  %v10091_v30 = vld [vmem:[#allocation133_spill] sm:$0xff] }
 0x303   : > { %v3525_v44 = vadd.f32 %v3475_v20, %v3070_v3  ;;  %v10083_v3 = vld [vmem:[#allocation140_spill] sm:$0xff] }
 0x304   : > { %3327 = vperm.xlu2 %6837, %v6402_v6   ;;  %v2112_v20 = vmul.f32 %v7638_v39, %v10083_v3 }
 0x305   : > { %v3579_v13 = vadd.f32 %v7681_v59, %v3525_v44  ;;  %6448 = vmatmul.msk.f32.vlgmr.msrb.gmra.mxu1 %vm3675_vm1, %v3953_v50 }
 0x306   : > { %3322 = vperm.xlu1 %6836, %v6401_v18   ;;  %3317 = vperm.xlu0 %6835, %v6400_v48   ;;  %v7972_v46 = vpop.permute.xlu2 %2372 }
 0x307   : > { %v3629_v23 = vmax.f32 %v3579_v13, 0.0  ;;  %v7974_v10 = vpop.permute.xlu1 %2362  ;;  %v1706_v13 = vadd.f32 %v1656_v52, %v1251_v4 }
 0x308   : > { %v2358_v53 = vpop.permute.xlu0 %2357  ;;  %v3730_v54 = vld [vmem:[#allocation2 + $0x20] ss:$2 sm:$0xff]  ;;  %v3780_v43 = vld [vmem:[#allocation2 + $0x21] ss:$2 sm:$0xff]  ;;  %v2569_v1 = vmul.f32 %v7643_v45, %v7974_v10 }
 0x309   : > { %3683 = vst.msk [vmem:[#allocation2 + $0x39] sm:$0xff] %vm3675_vm1, %v3629_v23  ;;  %v3827_v57 = vmax.f32 %v3730_v54, %v3780_v43  ;;  %v3855_v36 = vld [vmem:[#allocation2 + $0x22] ss:$2 sm:$0xff]  ;;  %v2568_v37 = vmul.f32 %v7643_v45, %v2358_v53  ;;  %v1707_v23 = vadd.f32 %v1657_v2, %v1252_v47  ;;  %v10084_v53 = vld [vmem:[#allocation58_spill] sm:$0xff]  ;;  %v2161_v43 = vadd.f32 %v2111_v41, %v1706_v13 }
 0x30a   : > { %v1204_v54 = vmul.f32 %v7614_v24, %v10084_v53  ;;  %v6356_v41 = vld [vmem:[%s6955_s23 + $0x1b5] ss:$2 sm:$0xff] }
 0x30b   : > { %v3902_v38 = vmax.f32 %v3827_v57, %v3855_v36  ;;  %v2618_v44 = vadd.f32 %v2568_v37, %v2163_v25  ;;  %v6353_v57 = vld [vmem:[%s6955_s23 + $0x185] ss:$2 sm:$0xff]  ;;  %v2162_v14 = vadd.f32 %v2112_v20, %v1707_v23  ;;  %v2114_v37 = vmul.f32 %v7638_v39, %v10087_v16  ;;  %v6354_v47 = vld [vmem:[%s6955_s23 + $0x195] ss:$2 sm:$0xff] }
 0x30c   : > { %2432 = vperm.xlu2 %6837, %v6303_v22   ;;  %v10086_v22 = vld [vmem:[#allocation101_spill] sm:$0xff]  ;;  %v1254_v51 = vadd.f32 %v1204_v54, %v749_v61  ;;  %v6479_v25 = vld [vmem:[%s9886_s3 + $0x68] sm:$0xff]  ;;  %v8071_v54 = vld [vmem:[%s9884_s1 + $0x1] ss:$0 sm:$0xff] }
 0x30d   : > { %3930 = vst.msk [vmem:[#allocation3 + $0x13] sm:$0xff] %vm3675_vm1, %v3902_v38  ;;  %v1659_v17 = vmul.f32 %v7619_v62, %v10086_v22  ;;  %v2617_v38 = vadd.f32 %v2567_v49, %v2162_v14  ;;  %v6480_v39 = vld [vmem:[%s9886_s3 + $0x70] sm:$0xff] }
 0x30e   : > { %2427 = vperm.xlu1 %6836, %v6302_v34   ;;  %3332 = vperm.xlu0 %6835, %v6403_v8   ;;  %v8002_v0 = vpop.permute.xlu2 %2822  ;;  %v2616_v34 = vadd.f32 %v2566_v15, %v2161_v43  ;;  %v10088_v43 = vld [vmem:[#allocation61_spill] sm:$0xff]  ;;  %v10089_v14 = vld [vmem:[#allocation12_spill] sm:$0xff] }
 0x30f   : > { %v2813_v42 = vpop.permute.xlu1 %2812  ;;  %v1709_v27 = vadd.f32 %v1659_v17, %v1254_v51  ;;  %6821 = vmatpush.msra.mxu3 %v6480_v39  ;;  %4425 = vmatpush.msrb.mxu0 %v6480_v39  ;;  %v8109_v39 = vld [vmem:[%s9884_s1 + $0x4] ss:$0 sm:$0xff] }
 0x310   : > { %v3023_v6 = vmul.f32 %v7654_v28, %v2813_v42  ;;  %v2808_v18 = vpop.permute.xlu0 %2807  ;;  %v3732_v50 = vld [vmem:[#allocation2 + $0x30] ss:$2 sm:$0xff]  ;;  %v3782_v48 = vld [vmem:[#allocation2 + $0x31] ss:$2 sm:$0xff]  ;;  %v3071_v19 = vadd.f32 %v3021_v5, %v2616_v34 }
 0x311   : > { %v3828_v33 = vmax.f32 %v3732_v50, %v3782_v48  ;;  %v3857_v31 = vld [vmem:[#allocation2 + $0x32] ss:$2 sm:$0xff]  ;;  %v3022_v26 = vmul.f32 %v7654_v28, %v2808_v18  ;;  %v2164_v4 = vadd.f32 %v2114_v37, %v1709_v27  ;;  %v6355_v42 = vld [vmem:[%s6955_s23 + $0x1a5] ss:$2 sm:$0xff]  ;;  %6822 = vmatpush.msra.mxu3 %v6479_v25  ;;  %4426 = vmatpush.msrb.mxu0 %v6479_v25 }
 0x312   : > { %v3073_v35 = vadd.f32 %v3023_v6, %v2618_v44  ;;  %v6478_v18 = vld [vmem:[%s9886_s3 + $0x60] sm:$0xff]  ;;  %v3024_v48 = vmul.f32 %v7654_v28, %v7945_v7  ;;  %v10095_v25 = vld [vmem:[#allocation100_spill] sm:$0xff] }
 0x313   : > { %v3903_v9 = vmax.f32 %v3828_v33, %v3857_v31  ;;  %v3072_v56 = vadd.f32 %v3022_v26, %v2617_v38  ;;  %v2619_v44 = vadd.f32 %v2569_v1, %v2164_v4  ;;  %6823 = vmatpush.msra.mxu3 %v6478_v18  ;;  %4427 = vmatpush.msrb.mxu0 %v6478_v18  ;;  %v6406_v28 = vld [vmem:[%s6955_s23 + $0x1a6] ss:$2 sm:$0xff]  ;;  %v6405_v7 = vld [vmem:[%s6955_s23 + $0x196] ss:$2 sm:$0xff] }
 0x314   : > { %v3528_v36 = vadd.f32 %v3478_v21, %v3073_v35  ;;  %2882 = vperm.xlu2 %6837, %v6353_v57   ;;  %v6404_v31 = vld [vmem:[%s6955_s23 + $0x186] ss:$2 sm:$0xff]  ;;  %v1207_v57 = vmul.f32 %v8071_v54, %v10088_v43  ;;  %v8089_v26 = vld [vmem:[%s9884_s1 + $0x2] ss:$0 sm:$0xff]  ;;  %v10092_v37 = vld [vmem:[#allocation50_spill] sm:$0xff] }
 0x315   : > { %3931 = vst.msk [vmem:[#allocation3 + $0x1b] sm:$0xff] %vm3675_vm1, %v3903_v9  ;;  %v3074_v49 = vadd.f32 %v3024_v48, %v2619_v44  ;;  %v1205_v5 = vmul.f32 %v8071_v54, %v10092_v37  ;;  %v6306_v1 = vld [vmem:[%s6955_s23 + $0x1c4] ss:$2 sm:$0xff]  ;;  %v1660_v4 = vmul.f32 %v8089_v26, %v10095_v25 }
 0x316   : > { %v3582_v24 = vadd.f32 %v7681_v59, %v3528_v36  ;;  %2442 = vperm.xlu1 %6836, %v6305_v40   ;;  %2437 = vperm.xlu0 %6835, %v6304_v55   ;;  %v8031_v62 = vpop.permute.xlu2 %2837  ;;  %v10090_v55 = vld [vmem:[#allocation104_spill] sm:$0xff] }
 0x317   : > { %v3263_v8 = vpop.permute.xlu1 %3262  ;;  %v1662_v29 = vmul.f32 %v8089_v26, %v10090_v55 }
 0x318   : > { %v3632_v58 = vmax.f32 %v3582_v24, 0.0  ;;  %v3477_v32 = vmul.f32 %v7668_v12, %v3263_v8  ;;  %v3258_v52 = vpop.permute.xlu0 %3257  ;;  %v8097_v24 = vld [vmem:[%s9884_s1 + $0x3] ss:$0 sm:$0xff]  ;;  %v6307_v8 = vld [vmem:[%s6955_s23 + $0x1d4] ss:$2 sm:$0xff] }
 0x319   : > { %v3476_v60 = vmul.f32 %v7668_v12, %v3258_v52  ;;  %v2117_v51 = vmul.f32 %v8097_v24, %v10091_v30  ;;  %v6309_v30 = vld [vmem:[%s6955_s23 + $0x1f4] ss:$2 sm:$0xff] }
 0x31a   : > { %3686 = vst.msk [vmem:[#allocation2 + $0x51] sm:$0xff] %vm3675_vm1, %v3632_v58  ;;  %v3527_v2 = vadd.f32 %v3477_v32, %v3072_v56  ;;  %v10093_v56 = vld [vmem:[#allocation62_spill] sm:$0xff] }
 0x31b   : > { %v3526_v63 = vadd.f32 %v3476_v60, %v3071_v19  ;;  %v1206_v32 = vmul.f32 %v8071_v54, %v10093_v56  ;;  %v6407_v19 = vld [vmem:[%s6955_s23 + $0x1b6] ss:$2 sm:$0xff] }
 0x31c   : > { %v3581_v45 = vadd.f32 %v7681_v59, %v3527_v2  ;;  %v3985_v10 = vld [vmem:[#allocation3 + $0x11] ss:$2 sm:$0xff]  ;;  %v3955_v3 = vld [vmem:[#allocation3 + $0x10] ss:$2 sm:$0xff]  ;;  %2897 = vperm.xlu2 %6837, %v6356_v41   ;;  %v8160_v56 = vld [vmem:[%s9885_s2] ss:$0 sm:$0xff] }
 0x31d   : > { %v4206_v20 = vld [vmem:[#allocation3 + $0x12] ss:$2 sm:$0xff]  ;;  %v3580_v6 = vadd.f32 %v7681_v59, %v3526_v63  ;;  %6436 = vmatmul.msk.f32.gmra.mxu0 %vm3675_vm1, %v3985_v10  ;;  %6449 = vmatmul.msk.f32.gmra.mxu1 %vm3675_vm1, %v3955_v3  ;;  %v10098_v3 = vld [vmem:[#allocation143_spill] sm:$0xff] }
 0x31e   : > { %v3631_v50 = vmax.f32 %v3581_v45, 0.0  ;;  %6466 = vmatmul.msk.f32.gmra.mxu2 %vm3675_vm1, %v4206_v20  ;;  %2892 = vperm.xlu1 %6836, %v6355_v42   ;;  %v8057_v15 = vpop.permute.xlu2 %3287  ;;  %v10094_v60 = vld [vmem:[#allocation21_spill] sm:$0xff]  ;;  %v10096_v63 = vld [vmem:[#allocation20_spill] sm:$0xff]  ;;  %v2115_v20 = vmul.f32 %v8097_v24, %v10098_v3 }
 0x31f   : > { %v3630_v13 = vmax.f32 %v3580_v6, 0.0  ;;  %2887 = vperm.xlu0 %6835, %v6354_v47   ;;  %v8059_v33 = vpop.permute.xlu1 %2367  ;;  %v10097_v42 = vld [vmem:[#allocation92_spill] sm:$0xff] }
 0x320   : > { %3685 = vst.msk [vmem:[#allocation2 + $0x49] sm:$0xff] %vm3675_vm1, %v3631_v50  ;;  %v3273_v23 = vpop.permute.xlu0 %3272  ;;  %v1661_v47 = vmul.f32 %v8089_v26, %v10097_v42  ;;  %v10099_v50 = vld [vmem:[#allocation142_spill] sm:$0xff] }
 0x321   : > { %3684 = vst.msk [vmem:[#allocation2 + $0x41] sm:$0xff] %vm3675_vm1, %v3630_v13  ;;  %v3479_v21 = vmul.f32 %v7668_v12, %v3273_v23  ;;  %v2116_v48 = vmul.f32 %v8097_v24, %v10099_v50  ;;  %v8132_v23 = vld [vmem:[%s9884_s1 + $0x5] ss:$0 sm:$0xff] }
 0x323   : > { %v3529_v35 = vadd.f32 %v3479_v21, %v3074_v49 }
 0x324   : > { %3347 = vperm.xlu2 %6837, %v6406_v28  }
 0x325   : > { %v3583_v53 = vadd.f32 %v7681_v59, %v3529_v35  ;;  %v8082_v59 = vld [vmem:[%s9884_s1] ss:$0 sm:$0xff] }
 0x326   : > { %3342 = vperm.xlu1 %6836, %v6405_v7   ;;  %v8075_v9 = vpop.permute.xlu2 %2392  ;;  %v752_v36 = vmul.f32 %v8082_v59, %v10089_v14  ;;  %v750_v2 = vmul.f32 %v8082_v59, %v10094_v60  ;;  %v751_v41 = vmul.f32 %v8082_v59, %v10096_v63 }
 0x327   : > { %v3633_v40 = vmax.f32 %v3583_v53, 0.0  ;;  %3337 = vperm.xlu0 %6835, %v6404_v31   ;;  %v8077_v12 = vpop.permute.xlu1 %2382  ;;  %v2570_v31 = vmul.f32 %v8109_v39, %v8059_v33 }
 0x328   : > { %v2378_v61 = vpop.permute.xlu0 %2377  ;;  %v3734_v22 = vld [vmem:[#allocation2 + $0x40] ss:$2 sm:$0xff]  ;;  %v3784_v17 = vld [vmem:[#allocation2 + $0x41] ss:$2 sm:$0xff]  ;;  %v1257_v38 = vadd.f32 %v1207_v57, %v752_v36  ;;  %v1255_v10 = vadd.f32 %v1205_v5, %v750_v2  ;;  %v1256_v18 = vadd.f32 %v1206_v32, %v751_v41  ;;  %v2571_v57 = vmul.f32 %v8109_v39, %v7972_v46 }
 0x329   : > { %3687 = vst.msk [vmem:[#allocation2 + $0x59] sm:$0xff] %vm3675_vm1, %v3633_v40  ;;  %v3829_v34 = vmax.f32 %v3734_v22, %v3784_v17  ;;  %v3859_v16 = vld [vmem:[#allocation2 + $0x42] ss:$2 sm:$0xff]  ;;  %v2572_v27 = vmul.f32 %v8109_v39, %v2378_v61  ;;  %v6357_v22 = vld [vmem:[%s6955_s23 + $0x1c5] ss:$2 sm:$0xff] }
 0x32a   : > { %v1712_v52 = vadd.f32 %v1662_v29, %v1257_v38  ;;  %v1710_v7 = vadd.f32 %v1660_v4, %v1255_v10  ;;  %v1711_v43 = vadd.f32 %v1661_v47, %v1256_v18  ;;  %v8142_v40 = vld [vmem:[%s9884_s1 + $0x6] ss:$0 sm:$0xff]  ;;  %v2573_v47 = vmul.f32 %v8109_v39, %v8077_v12  ;;  %v6359_v18 = vld [vmem:[%s6955_s23 + $0x1e5] ss:$2 sm:$0xff] }
 0x32b   : > { %v3904_v58 = vmax.f32 %v3829_v34, %v3859_v16  ;;  %v3482_v14 = vmul.f32 %v8142_v40, %v8057_v15  ;;  %v10100_v29 = vld [vmem:[#allocation51_spill] sm:$0xff]  ;;  %v10101_v16 = vld [vmem:[#allocation24_spill] sm:$0xff] }
 0x32c   : > { %v2167_v45 = vadd.f32 %v2117_v51, %v1712_v52  ;;  %2452 = vperm.xlu2 %6837, %v6307_v8   ;;  %v1208_v61 = vmul.f32 %v8071_v54, %v10100_v29  ;;  %v2165_v33 = vadd.f32 %v2115_v20, %v1710_v7  ;;  %v2166_v34 = vadd.f32 %v2116_v48, %v1711_v43  ;;  %v6308_v51 = vld [vmem:[%s6955_s23 + $0x1e4] ss:$2 sm:$0xff] }
 0x32d   : > { %3932 = vst.msk [vmem:[#allocation3 + $0x23] sm:$0xff] %vm3675_vm1, %v3904_v58  ;;  %v753_v37 = vmul.f32 %v8082_v59, %v10101_v16  ;;  %v10102_v5 = vld [vmem:[#allocation103_spill] sm:$0xff]  ;;  %v10106_v16 = vld [vmem:[#allocation106_spill] sm:$0xff] }
 0x32e   : > { %2447 = vperm.xlu1 %6836, %v6306_v1   ;;  %v8125_v44 = vpop.permute.xlu2 %2842  ;;  %v2622_v13 = vadd.f32 %v2572_v27, %v2167_v45  ;;  %v1663_v15 = vmul.f32 %v8089_v26, %v10102_v5  ;;  %v2620_v8 = vadd.f32 %v2570_v31, %v2165_v33  ;;  %v2621_v58 = vadd.f32 %v2571_v57, %v2166_v34  ;;  %v10103_v27 = vld [vmem:[#allocation146_spill] sm:$0xff] }
 0x32f   : > { %3352 = vperm.xlu0 %6835, %v6407_v19   ;;  %v2833_v6 = vpop.permute.xlu1 %2832  ;;  %v1258_v52 = vadd.f32 %v1208_v61, %v753_v37  ;;  %v2118_v1 = vmul.f32 %v8097_v24, %v10103_v27  ;;  %v3025_v19 = vmul.f32 %v8132_v23, %v8002_v0  ;;  %v3028_v31 = vmul.f32 %v8132_v23, %v8031_v62  ;;  %v6410_v61 = vld [vmem:[%s6955_s23 + $0x1e6] ss:$2 sm:$0xff]  ;;  %v6409_v33 = vld [vmem:[%s6955_s23 + $0x1d6] ss:$2 sm:$0xff] }
 0x330   : > { %v3027_v49 = vmul.f32 %v8132_v23, %v2833_v6  ;;  %v2828_v21 = vpop.permute.xlu0 %2827  ;;  %v3736_v35 = vld [vmem:[#allocation2 + $0x50] ss:$2 sm:$0xff]  ;;  %v3786_v28 = vld [vmem:[#allocation2 + $0x51] ss:$2 sm:$0xff]  ;;  %v1666_v37 = vmul.f32 %v8089_v26, %v10106_v16 }
 0x331   : > { %v3830_v53 = vmax.f32 %v3736_v35, %v3786_v28  ;;  %v3861_v55 = vld [vmem:[#allocation2 + $0x52] ss:$2 sm:$0xff]  ;;  %v3026_v46 = vmul.f32 %v8132_v23, %v2828_v21  ;;  %v1713_v42 = vadd.f32 %v1663_v15, %v1258_v52  ;;  %v3075_v45 = vadd.f32 %v3025_v19, %v2620_v8  ;;  %v6360_v6 = vld [vmem:[%s6955_s23 + $0x1f5] ss:$2 sm:$0xff] }
 0x332   : > { %v3077_v36 = vadd.f32 %v3027_v49, %v2622_v13  ;;  %v6358_v28 = vld [vmem:[%s6955_s23 + $0x1d5] ss:$2 sm:$0xff] }
 0x333   : > { %v3905_v17 = vmax.f32 %v3830_v53, %v3861_v55  ;;  %v3076_v4 = vadd.f32 %v3026_v46, %v2621_v58  ;;  %v2168_v3 = vadd.f32 %v2118_v1, %v1713_v42  ;;  %v10107_v27 = vld [vmem:[#allocation149_spill] sm:$0xff] }
 0x334   : > { %v3532_v38 = vadd.f32 %v3482_v14, %v3077_v36  ;;  %2902 = vperm.xlu2 %6837, %v6357_v22   ;;  %v6408_v22 = vld [vmem:[%s6955_s23 + $0x1c6] ss:$2 sm:$0xff]  ;;  %v2121_v1 = vmul.f32 %v8097_v24, %v10107_v27 }
 0x335   : > { %3933 = vst.msk [vmem:[#allocation3 + $0x2b] sm:$0xff] %vm3675_vm1, %v3905_v17  ;;  %v2623_v21 = vadd.f32 %v2573_v47, %v2168_v3  ;;  %v10104_v17 = vld [vmem:[#allocation54_spill] sm:$0xff] }
 0x336   : > { %v3586_v32 = vadd.f32 %v8160_v56, %v3532_v38  ;;  %2462 = vperm.xlu1 %6836, %v6309_v30   ;;  %v8167_v60 = vpop.permute.xlu2 %2857  ;;  %v1211_v34 = vmul.f32 %v8071_v54, %v10104_v17  ;;  %v10105_v30 = vld [vmem:[#allocation27_spill] sm:$0xff] }
 0x337   : > { %2457 = vperm.xlu0 %6835, %v6308_v51   ;;  %v3283_v2 = vpop.permute.xlu1 %3282  ;;  %v3078_v36 = vadd.f32 %v3028_v31, %v2623_v21  ;;  %v756_v51 = vmul.f32 %v8082_v59, %v10105_v30  ;;  %v2575_v30 = vmul.f32 %v8109_v39, %v8075_v9 }
 0x338   : > { %v3636_v25 = vmax.f32 %v3586_v32, 0.0  ;;  %v3481_v63 = vmul.f32 %v8142_v40, %v3283_v2  ;;  %v3278_v41 = vpop.permute.xlu0 %3277  ;;  %v10108_v2 = vld [vmem:[#allocation65_spill] sm:$0xff] }
 0x339   : > { %v3480_v10 = vmul.f32 %v8142_v40, %v3278_v41  ;;  %v1261_v52 = vadd.f32 %v1211_v34, %v756_v51 }
 0x33a   : > { %3690 = vst.msk [vmem:[#allocation2 + $0x71] sm:$0xff] %vm3675_vm1, %v3636_v25  ;;  %v3531_v0 = vadd.f32 %v3481_v63, %v3076_v4  ;;  %v1209_v25 = vmul.f32 %v8071_v54, %v10108_v2  ;;  %v10109_v63 = vld [vmem:[#allocation64_spill] sm:$0xff]  ;;  %v10117_v2 = vld [vmem:[#allocation26_spill] sm:$0xff] }
 0x33b   : > { %v3530_v20 = vadd.f32 %v3480_v10, %v3075_v45  ;;  %v1210_v41 = vmul.f32 %v8071_v54, %v10109_v63  ;;  %v1716_v42 = vadd.f32 %v1666_v37, %v1261_v52  ;;  %v6311_v45 = vld [vmem:[%s6955_s23 + $0x214] ss:$2 sm:$0xff]  ;;  %v6310_v10 = vld [vmem:[%s6955_s23 + $0x204] ss:$2 sm:$0xff] }
 0x33c   : > { %v3585_v50 = vadd.f32 %v8160_v56, %v3531_v0  ;;  %v3987_v48 = vld [vmem:[#allocation3 + $0x21] ss:$2 sm:$0xff]  ;;  %v3957_v13 = vld [vmem:[#allocation3 + $0x20] ss:$2 sm:$0xff]  ;;  %2917 = vperm.xlu2 %6837, %v6360_v6  }
 0x33d   : > { %v4208_v49 = vld [vmem:[#allocation3 + $0x22] ss:$2 sm:$0xff]  ;;  %v3584_v35 = vadd.f32 %v8160_v56, %v3530_v20  ;;  %6437 = vmatmul.msk.f32.gmra.mxu0 %vm3675_vm1, %v3987_v48  ;;  %6450 = vmatmul.msk.f32.gmra.mxu1 %vm3675_vm1, %v3957_v13  ;;  %v4347_v12 = vld [vmem:[#allocation3 + $0x23] ss:$2 sm:$0xff]  ;;  %v10111_v20 = vld [vmem:[#allocation93_spill] sm:$0xff]  ;;  %v2171_v21 = vadd.f32 %v2121_v1, %v1716_v42 }
 0x33e   : > { %v3635_v7 = vmax.f32 %v3585_v50, 0.0  ;;  %6467 = vmatmul.msk.f32.gmra.mxu2 %vm3675_vm1, %v4208_v49  ;;  %6484 = vmatmul.msk.f32.vlgmr.msra.gmra.mxu3 %vm3675_vm1, %v4347_v12  ;;  %v8185_v43 = vpop.permute.xlu2 %3307  ;;  %v10110_v0 = vld [vmem:[#allocation23_spill] sm:$0xff]  ;;  %v1664_v6 = vmul.f32 %v8089_v26, %v10111_v20  ;;  %v10112_v50 = vld [vmem:[#allocation13_spill] sm:$0xff] }
 0x33f   : > { %v3634_v53 = vmax.f32 %v3584_v35, 0.0  ;;  %2912 = vperm.xlu1 %6836, %v6359_v18   ;;  %v2388_v57 = vpop.permute.xlu1 %2387  ;;  %2907 = vperm.xlu0 %6835, %v6358_v28   ;;  %v754_v3 = vmul.f32 %v8082_v59, %v10110_v0  ;;  %v6411_v18 = vld [vmem:[%s6955_s23 + $0x1f6] ss:$2 sm:$0xff]  ;;  %v755_v48 = vmul.f32 %v8082_v59, %v10112_v50  ;;  %v3486_v51 = vmul.f32 %v8142_v40, %v8185_v43  ;;  %v6361_v1 = vld [vmem:[%s6955_s23 + $0x205] ss:$2 sm:$0xff] }
 0x340   : > { %3689 = vst.msk [vmem:[#allocation2 + $0x69] sm:$0xff] %vm3675_vm1, %v3635_v7  ;;  %v3293_v14 = vpop.permute.xlu0 %3292  ;;  %v10113_v13 = vld [vmem:[#allocation107_spill] sm:$0xff]  ;;  %v10114_v12 = vld [vmem:[#allocation145_spill] sm:$0xff]  ;;  %v2574_v17 = vmul.f32 %v8109_v39, %v2388_v57  ;;  %v10118_v43 = vld [vmem:[#allocation96_spill] sm:$0xff] }
 0x341   : > { %3688 = vst.msk [vmem:[#allocation2 + $0x61] sm:$0xff] %vm3675_vm1, %v3634_v53  ;;  %v3483_v55 = vmul.f32 %v8142_v40, %v3293_v14  ;;  %v1665_v49 = vmul.f32 %v8089_v26, %v10113_v13  ;;  %v1259_v35 = vadd.f32 %v1209_v25, %v754_v3  ;;  %v2119_v28 = vmul.f32 %v8097_v24, %v10114_v12  ;;  %v10115_v53 = vld [vmem:[#allocation135_spill] sm:$0xff]  ;;  %v10119_v0 = vld [vmem:[#allocation148_spill] sm:$0xff] }
 0x342   : > { %v1260_v31 = vadd.f32 %v1210_v41, %v755_v48  ;;  %v2120_v14 = vmul.f32 %v8097_v24, %v10115_v53  ;;  %v757_v25 = vmul.f32 %v8082_v59, %v10117_v2  ;;  %v1667_v63 = vmul.f32 %v8089_v26, %v10118_v43  ;;  %v10122_v43 = vld [vmem:[#allocation99_spill] sm:$0xff] }
 0x343   : > { %v3533_v29 = vadd.f32 %v3483_v55, %v3078_v36  ;;  %v2122_v3 = vmul.f32 %v8097_v24, %v10119_v0 }
 0x344   : > { %3367 = vperm.xlu2 %6837, %v6410_v61  }
 0x345   : > { %v3587_v62 = vadd.f32 %v8160_v56, %v3533_v29 }
 0x346   : > { %v8202_v5 = vpop.permute.xlu2 %2412 }
 0x347   : > { %v3637_v38 = vmax.f32 %v3587_v62, 0.0  ;;  %3362 = vperm.xlu1 %6836, %v6409_v33   ;;  %v8196_v46 = vpop.permute.xlu1 %2402  ;;  %3357 = vperm.xlu0 %6835, %v6408_v22   ;;  %v1714_v22 = vadd.f32 %v1664_v6, %v1259_v35 }
 0x348   : > { %v2398_v15 = vpop.permute.xlu0 %2397  ;;  %v3738_v8 = vld [vmem:[#allocation2 + $0x60] ss:$2 sm:$0xff]  ;;  %v3788_v58 = vld [vmem:[#allocation2 + $0x61] ss:$2 sm:$0xff] }
 0x349   : > { %3691 = vst.msk [vmem:[#allocation2 + $0x79] sm:$0xff] %vm3675_vm1, %v3637_v38  ;;  %v3831_v32 = vmax.f32 %v3738_v8, %v3788_v58  ;;  %v3863_v19 = vld [vmem:[#allocation2 + $0x62] ss:$2 sm:$0xff]  ;;  %v2576_v47 = vmul.f32 %v8109_v39, %v2398_v15  ;;  %v1715_v38 = vadd.f32 %v1665_v49, %v1260_v31  ;;  %v2169_v58 = vadd.f32 %v2119_v28, %v1714_v22  ;;  %v6364_v28 = vld [vmem:[%s6955_s23 + $0x235] ss:$2 sm:$0xff] }
 0x34a   : > { %v10116_v15 = vld [vmem:[#allocation68_spill] sm:$0xff] }
 0x34b   : > { %v3906_v4 = vmax.f32 %v3831_v32, %v3863_v19  ;;  %v2626_v36 = vadd.f32 %v2576_v47, %v2171_v21  ;;  %v1212_v8 = vmul.f32 %v8071_v54, %v10116_v15  ;;  %v2170_v52 = vadd.f32 %v2120_v14, %v1715_v38  ;;  %v6313_v19 = vld [vmem:[%s6955_s23 + $0x234] ss:$2 sm:$0xff] }
 0x34c   : > { %2472 = vperm.xlu2 %6837, %v6311_v45   ;;  %v2624_v9 = vadd.f32 %v2574_v17, %v2169_v58  ;;  %v3029_v45 = vmul.f32 %v8132_v23, %v8125_v44  ;;  %v2577_v21 = vmul.f32 %v8109_v39, %v8196_v46  ;;  %v6362_v46 = vld [vmem:[%s6955_s23 + $0x215] ss:$2 sm:$0xff]  ;;  %v6413_v58 = vld [vmem:[%s6955_s23 + $0x216] ss:$2 sm:$0xff] }
 0x34d   : > { %3934 = vst.msk [vmem:[#allocation3 + $0x33] sm:$0xff] %vm3675_vm1, %v3906_v4  ;;  %v6312_v4 = vld [vmem:[%s6955_s23 + $0x224] ss:$2 sm:$0xff]  ;;  %v2625_v41 = vadd.f32 %v2575_v30, %v2170_v52  ;;  %v1262_v47 = vadd.f32 %v1212_v8, %v757_v25 }
 0x34e   : > { %v8228_v55 = vpop.permute.xlu2 %2862  ;;  %v3079_v13 = vadd.f32 %v3029_v45, %v2624_v9  ;;  %v6414_v8 = vld [vmem:[%s6955_s23 + $0x226] ss:$2 sm:$0xff] }
 0x34f   : > { %2467 = vperm.xlu1 %6836, %v6310_v10   ;;  %v2853_v7 = vpop.permute.xlu1 %2852  ;;  %3372 = vperm.xlu0 %6835, %v6411_v18   ;;  %v1717_v44 = vadd.f32 %v1667_v63, %v1262_v47  ;;  %v10121_v9 = vld [vmem:[#allocation29_spill] sm:$0xff]  ;;  %v1670_v63 = vmul.f32 %v8089_v26, %v10122_v43  ;;  %v10132_v43 = vld [vmem:[#allocation70_spill] sm:$0xff] }
 0x350   : > { %v3031_v29 = vmul.f32 %v8132_v23, %v2853_v7  ;;  %v2848_v61 = vpop.permute.xlu0 %2847  ;;  %v3740_v33 = vld [vmem:[#allocation2 + $0x70] ss:$2 sm:$0xff]  ;;  %v3790_v62 = vld [vmem:[#allocation2 + $0x71] ss:$2 sm:$0xff] }
 0x351   : > { %v3832_v34 = vmax.f32 %v3740_v33, %v3790_v62  ;;  %v3865_v37 = vld [vmem:[#allocation2 + $0x72] ss:$2 sm:$0xff]  ;;  %v3030_v57 = vmul.f32 %v8132_v23, %v2848_v61  ;;  %v6363_v7 = vld [vmem:[%s6955_s23 + $0x225] ss:$2 sm:$0xff]  ;;  %v2172_v31 = vadd.f32 %v2122_v3, %v1717_v44 }
 0x352   : > { %v3081_v16 = vadd.f32 %v3031_v29, %v2626_v36 }
 0x353   : > { %v3907_v32 = vmax.f32 %v3832_v34, %v3865_v37  ;;  %v3080_v6 = vadd.f32 %v3030_v57, %v2625_v41  ;;  %v2627_v62 = vadd.f32 %v2577_v21, %v2172_v31  ;;  %v3032_v34 = vmul.f32 %v8132_v23, %v8167_v60 }
 0x354   : > { %v3536_v27 = vadd.f32 %v3486_v51, %v3081_v16  ;;  %2922 = vperm.xlu2 %6837, %v6361_v1  }
 0x355   : > { %3935 = vst.msk [vmem:[#allocation3 + $0x3b] sm:$0xff] %vm3675_vm1, %v3907_v32  ;;  %v3082_v16 = vadd.f32 %v3032_v34, %v2627_v62  ;;  %v6412_v32 = vld [vmem:[%s6955_s23 + $0x206] ss:$2 sm:$0xff] }
 0x356   : > { %v3590_v42 = vadd.f32 %v8160_v56, %v3536_v27  ;;  %v8252_v18 = vpop.permute.xlu2 %2877  ;;  %v10120_v27 = vld [vmem:[#allocation71_spill] sm:$0xff] }
 0x357   : > { %2482 = vperm.xlu1 %6836, %v6313_v19   ;;  %v3303_v10 = vpop.permute.xlu1 %3302  ;;  %2477 = vperm.xlu0 %6835, %v6312_v4   ;;  %v1215_v60 = vmul.f32 %v8071_v54, %v10120_v27  ;;  %v760_v4 = vmul.f32 %v8082_v59, %v10121_v9 }
 0x358   : > { %v3640_v20 = vmax.f32 %v3590_v42, 0.0  ;;  %v3485_v50 = vmul.f32 %v8142_v40, %v3303_v10  ;;  %v3298_v48 = vpop.permute.xlu0 %3297  ;;  %v10123_v10 = vld [vmem:[#allocation151_spill] sm:$0xff] }
 0x359   : > { %v3484_v49 = vmul.f32 %v8142_v40, %v3298_v48  ;;  %v1265_v45 = vadd.f32 %v1215_v60, %v760_v4  ;;  %v2125_v0 = vmul.f32 %v8097_v24, %v10123_v10  ;;  %v6314_v48 = vld [vmem:[%s6955_s23 + $0x244] ss:$2 sm:$0xff] }
 0x35a   : > { %3694 = vst.msk [vmem:[#allocation2 + $0x91] sm:$0xff] %vm3675_vm1, %v3640_v20  ;;  %v3535_v35 = vadd.f32 %v3485_v50, %v3080_v6  ;;  %v10124_v20 = vld [vmem:[#allocation67_spill] sm:$0xff] }
 0x35b   : > { %v3534_v12 = vadd.f32 %v3484_v49, %v3079_v13  ;;  %v1213_v6 = vmul.f32 %v8071_v54, %v10124_v20  ;;  %v6315_v50 = vld [vmem:[%s6955_s23 + $0x254] ss:$2 sm:$0xff]  ;;  %v1720_v44 = vadd.f32 %v1670_v63, %v1265_v45  ;;  %v1216_v63 = vmul.f32 %v8071_v54, %v10132_v43 }
 0x35c   : > { %v3589_v53 = vadd.f32 %v8160_v56, %v3535_v35  ;;  %v3989_v14 = vld [vmem:[#allocation3 + $0x31] ss:$2 sm:$0xff]  ;;  %v3959_v36 = vld [vmem:[#allocation3 + $0x30] ss:$2 sm:$0xff]  ;;  %2937 = vperm.xlu2 %6837, %v6364_v28  }
 0x35d   : > { %v4210_v29 = vld [vmem:[#allocation3 + $0x32] ss:$2 sm:$0xff]  ;;  %v3588_v61 = vadd.f32 %v8160_v56, %v3534_v12  ;;  %6438 = vmatmul.msk.f32.gmra.mxu0 %vm3675_vm1, %v3989_v14  ;;  %6451 = vmatmul.msk.f32.gmra.mxu1 %vm3675_vm1, %v3959_v36  ;;  %v4349_v33 = vld [vmem:[#allocation3 + $0x33] ss:$2 sm:$0xff]  ;;  %v10133_v20 = vld [vmem:[#allocation19_spill] sm:$0xff] }
 0x35e   : > { %v3639_v22 = vmax.f32 %v3589_v53, 0.0  ;;  %6468 = vmatmul.msk.f32.gmra.mxu2 %vm3675_vm1, %v4210_v29  ;;  %6485 = vmatmul.msk.f32.gmra.mxu3 %vm3675_vm1, %v4349_v33  ;;  %v3328_v38 = vpop.permute.xlu2 %3327  ;;  %v10125_v13 = vld [vmem:[#allocation57_spill] sm:$0xff]  ;;  %v10126_v12 = vld [vmem:[#allocation16_spill] sm:$0xff]  ;;  %v10128_v53 = vld [vmem:[#allocation30_spill] sm:$0xff] }
 0x35f   : > { %v3638_v17 = vmax.f32 %v3588_v61, 0.0  ;;  %2932 = vperm.xlu1 %6836, %v6363_v7   ;;  %2927 = vperm.xlu0 %6835, %v6362_v46   ;;  %v1214_v49 = vmul.f32 %v8071_v54, %v10125_v13  ;;  %v6415_v35 = vld [vmem:[%s6955_s23 + $0x236] ss:$2 sm:$0xff]  ;;  %v758_v28 = vmul.f32 %v8082_v59, %v10126_v12  ;;  %v759_v14 = vmul.f32 %v8082_v59, %v10128_v53 }
 0x360   : > { %3693 = vst.msk [vmem:[#allocation2 + $0x89] sm:$0xff] %vm3675_vm1, %v3639_v22  ;;  %v2408_v30 = vpop.permute.xlu1 %2407  ;;  %v3313_v51 = vpop.permute.xlu0 %3312  ;;  %v10127_v7 = vld [vmem:[#allocation110_spill] sm:$0xff]  ;;  %v10129_v36 = vld [vmem:[#allocation109_spill] sm:$0xff]  ;;  %v2175_v61 = vadd.f32 %v2125_v0, %v1720_v44 }
 0x361   : > { %3692 = vst.msk [vmem:[#allocation2 + $0x81] sm:$0xff] %vm3675_vm1, %v3638_v17  ;;  %v3487_v37 = vmul.f32 %v8142_v40, %v3313_v51  ;;  %v1668_v31 = vmul.f32 %v8089_v26, %v10127_v7  ;;  %v1669_v29 = vmul.f32 %v8089_v26, %v10129_v36  ;;  %v1263_v33 = vadd.f32 %v1213_v6, %v758_v28  ;;  %v10130_v46 = vld [vmem:[#allocation138_spill] sm:$0xff]  ;;  %v10131_v51 = vld [vmem:[#allocation152_spill] sm:$0xff]  ;;  %v10135_v44 = vld [vmem:[#allocation141_spill] sm:$0xff] }
 0x362   : > { %v2123_v62 = vmul.f32 %v8097_v24, %v10130_v46  ;;  %v1264_v34 = vadd.f32 %v1214_v49, %v759_v14  ;;  %v2578_v27 = vmul.f32 %v8109_v39, %v2408_v30  ;;  %v761_v6 = vmul.f32 %v8082_v59, %v10133_v20 }
 0x363   : > { %v3537_v15 = vadd.f32 %v3487_v37, %v3082_v16  ;;  %v2124_v16 = vmul.f32 %v8097_v24, %v10131_v51 }
 0x364   : > { %3387 = vperm.xlu2 %6837, %v6414_v8   ;;  %v1266_v49 = vadd.f32 %v1216_v63, %v761_v6  ;;  %v6418_v63 = vld [vmem:[%s6955_s23 + $0x266] ss:$2 sm:$0xff] }
 0x365   : > { %v3591_v52 = vadd.f32 %v8160_v56, %v3537_v15 }
 0x366   : > { %v8279_v1 = vpop.permute.xlu2 %2432 }
 0x367   : > { %3382 = vperm.xlu1 %6836, %v6413_v58   ;;  %v3641_v57 = vmax.f32 %v3591_v52, 0.0  ;;  %3377 = vperm.xlu0 %6835, %v6412_v32   ;;  %v1718_v52 = vadd.f32 %v1668_v31, %v1263_v33 }
 0x368   : > { %v8281_v19 = vpop.permute.xlu1 %2422  ;;  %v3742_v2 = vld [vmem:[#allocation2 + $0x80] ss:$2 sm:$0xff]  ;;  %v3792_v25 = vld [vmem:[#allocation2 + $0x81] ss:$2 sm:$0xff]  ;;  %v2418_v41 = vpop.permute.xlu0 %2417 }
 0x369   : > { %v3833_v42 = vmax.f32 %v3742_v2, %v3792_v25  ;;  %3695 = vst.msk [vmem:[#allocation2 + $0x99] sm:$0xff] %vm3675_vm1, %v3641_v57  ;;  %v3867_v47 = vld [vmem:[#allocation2 + $0x82] ss:$2 sm:$0xff]  ;;  %v2580_v21 = vmul.f32 %v8109_v39, %v2418_v41  ;;  %v1719_v57 = vadd.f32 %v1669_v29, %v1264_v34  ;;  %v2579_v2 = vmul.f32 %v8109_v39, %v8202_v5  ;;  %v10134_v5 = vld [vmem:[#allocation113_spill] sm:$0xff] }
 0x36a   : > { %v3490_v25 = vmul.f32 %v8142_v40, %v3328_v38  ;;  %v2173_v41 = vadd.f32 %v2123_v62, %v1718_v52  ;;  %v1671_v38 = vmul.f32 %v8089_v26, %v10134_v5  ;;  %v2581_v29 = vmul.f32 %v8109_v39, %v8281_v19  ;;  %v6367_v34 = vld [vmem:[%s6955_s23 + $0x265] ss:$2 sm:$0xff]  ;;  %v10137_v5 = vld [vmem:[#allocation22_spill] sm:$0xff] }
 0x36b   : > { %v3908_v3 = vmax.f32 %v3833_v42, %v3867_v47  ;;  %v2630_v37 = vadd.f32 %v2580_v21, %v2175_v61  ;;  %v6365_v42 = vld [vmem:[%s6955_s23 + $0x245] ss:$2 sm:$0xff]  ;;  %v6317_v47 = vld [vmem:[%s6955_s23 + $0x274] ss:$2 sm:$0xff]  ;;  %v2174_v10 = vadd.f32 %v2124_v16, %v1719_v57  ;;  %v2126_v21 = vmul.f32 %v8097_v24, %v10135_v44 }
 0x36c   : > { %2492 = vperm.xlu2 %6837, %v6315_v50   ;;  %v2628_v50 = vadd.f32 %v2578_v27, %v2173_v41  ;;  %v1721_v36 = vadd.f32 %v1671_v38, %v1266_v49  ;;  %v3036_v27 = vmul.f32 %v8132_v23, %v8252_v18  ;;  %v6417_v41 = vld [vmem:[%s6955_s23 + $0x256] ss:$2 sm:$0xff]  ;;  %v764_v38 = vmul.f32 %v8082_v59, %v10137_v5 }
 0x36d   : > { %3936 = vst.msk [vmem:[#allocation3 + $0x43] sm:$0xff] %vm3675_vm1, %v3908_v3  ;;  %v6316_v3 = vld [vmem:[%s6955_s23 + $0x264] ss:$2 sm:$0xff] }
 0x36e   : > { %v8309_v22 = vpop.permute.xlu2 %2882  ;;  %v2176_v46 = vadd.f32 %v2126_v21, %v1721_v36  ;;  %v10139_v21 = vld [vmem:[#allocation144_spill] sm:$0xff]  ;;  %v6319_v36 = vld [vmem:[%s6955_s23 + $0x294] ss:$2 sm:$0xff] }
 0x36f   : > { %2487 = vperm.xlu1 %6836, %v6314_v48   ;;  %3392 = vperm.xlu0 %6835, %v6415_v35   ;;  %v2629_v48 = vadd.f32 %v2579_v2, %v2174_v10  ;;  %v3033_v35 = vmul.f32 %v8132_v23, %v8228_v55 }
 0x370   : > { %v2873_v17 = vpop.permute.xlu1 %2872  ;;  %v2868_v8 = vpop.permute.xlu0 %2867  ;;  %v3744_v58 = vld [vmem:[#allocation2 + $0x90] ss:$2 sm:$0xff]  ;;  %v3794_v32 = vld [vmem:[#allocation2 + $0x91] ss:$2 sm:$0xff] }
 0x371   : > { %v3035_v15 = vmul.f32 %v8132_v23, %v2873_v17  ;;  %v3834_v60 = vmax.f32 %v3744_v58, %v3794_v32  ;;  %v3869_v4 = vld [vmem:[#allocation2 + $0x92] ss:$2 sm:$0xff]  ;;  %v3034_v30 = vmul.f32 %v8132_v23, %v2868_v8  ;;  %v3083_v61 = vadd.f32 %v3033_v35, %v2628_v50  ;;  %v6368_v17 = vld [vmem:[%s6955_s23 + $0x275] ss:$2 sm:$0xff]  ;;  %v10138_v50 = vld [vmem:[#allocation116_spill] sm:$0xff] }
 0x372   : > { %v2631_v8 = vadd.f32 %v2581_v29, %v2176_v46  ;;  %v6366_v32 = vld [vmem:[%s6955_s23 + $0x255] ss:$2 sm:$0xff]  ;;  %v2129_v35 = vmul.f32 %v8097_v24, %v10139_v21  ;;  %v6318_v29 = vld [vmem:[%s6955_s23 + $0x284] ss:$2 sm:$0xff] }
 0x373   : > { %v3085_v9 = vadd.f32 %v3035_v15, %v2630_v37  ;;  %v3909_v45 = vmax.f32 %v3834_v60, %v3869_v4  ;;  %v3084_v31 = vadd.f32 %v3034_v30, %v2629_v48  ;;  %v1674_v48 = vmul.f32 %v8089_v26, %v10138_v50  ;;  %v10142_v46 = vld [vmem:[#allocation32_spill] sm:$0xff]  ;;  %v10148_v50 = vld [vmem:[#allocation63_spill] sm:$0xff] }
 0x374   : > { %2942 = vperm.xlu2 %6837, %v6365_v42   ;;  %v6416_v42 = vld [vmem:[%s6955_s23 + $0x246] ss:$2 sm:$0xff] }
 0x375   : > { %v3540_v0 = vadd.f32 %v3490_v25, %v3085_v9  ;;  %3937 = vst.msk [vmem:[#allocation3 + $0x4b] sm:$0xff] %vm3675_vm1, %v3909_v45  ;;  %v3086_v9 = vadd.f32 %v3036_v27, %v2631_v8 }
 0x376   : > { %v8334_v12 = vpop.permute.xlu2 %2897 }
 0x377   : > { %v3594_v13 = vadd.f32 %v8160_v56, %v3540_v0  ;;  %2502 = vperm.xlu1 %6836, %v6317_v47   ;;  %2497 = vperm.xlu0 %6835, %v6316_v3   ;;  %v10136_v47 = vld [vmem:[#allocation73_spill] sm:$0xff] }
 0x378   : > { %v3323_v28 = vpop.permute.xlu1 %3322  ;;  %v3318_v14 = vpop.permute.xlu0 %3317  ;;  %v1219_v45 = vmul.f32 %v8071_v54, %v10136_v47 }
 0x379   : > { %v3644_v7 = vmax.f32 %v3594_v13, 0.0  ;;  %v3489_v53 = vmul.f32 %v8142_v40, %v3323_v28  ;;  %v3488_v33 = vmul.f32 %v8142_v40, %v3318_v14 }
 0x37a   : > { %v1269_v44 = vadd.f32 %v1219_v45, %v764_v38 }
 0x37b   : > { %3698 = vst.msk [vmem:[#allocation2 + $0xb1] sm:$0xff] %vm3675_vm1, %v3644_v7  ;;  %v3539_v55 = vadd.f32 %v3489_v53, %v3084_v31  ;;  %v3538_v62 = vadd.f32 %v3488_v33, %v3083_v61  ;;  %v10140_v7 = vld [vmem:[#allocation60_spill] sm:$0xff]  ;;  %v10141_v53 = vld [vmem:[#allocation74_spill] sm:$0xff] }
 0x37c   : > { %v3991_v16 = vld [vmem:[#allocation3 + $0x41] ss:$2 sm:$0xff]  ;;  %v3961_v37 = vld [vmem:[#allocation3 + $0x40] ss:$2 sm:$0xff]  ;;  %2957 = vperm.xlu2 %6837, %v6368_v17   ;;  %v1217_v31 = vmul.f32 %v8071_v54, %v10140_v7  ;;  %v1218_v14 = vmul.f32 %v8071_v54, %v10141_v53  ;;  %v1724_v61 = vadd.f32 %v1674_v48, %v1269_v44  ;;  %v1220_v48 = vmul.f32 %v8071_v54, %v10148_v50  ;;  %v10149_v7 = vld [vmem:[#allocation36_spill] sm:$0xff] }
 0x37d   : > { %v3593_v51 = vadd.f32 %v8160_v56, %v3539_v55  ;;  %v4212_v15 = vld [vmem:[#allocation3 + $0x42] ss:$2 sm:$0xff]  ;;  %v3592_v58 = vadd.f32 %v8160_v56, %v3538_v62  ;;  %6439 = vmatmul.msk.f32.gmra.mxu0 %vm3675_vm1, %v3991_v16  ;;  %6452 = vmatmul.msk.f32.gmra.mxu1 %vm3675_vm1, %v3961_v37  ;;  %v4351_v19 = vld [vmem:[#allocation3 + $0x43] ss:$2 sm:$0xff]  ;;  %v763_v62 = vmul.f32 %v8082_v59, %v10142_v46  ;;  %v10143_v17 = vld [vmem:[#allocation33_spill] sm:$0xff] }
 0x37e   : > { %6469 = vmatmul.msk.f32.gmra.mxu2 %vm3675_vm1, %v4212_v15  ;;  %6486 = vmatmul.msk.f32.gmra.mxu3 %vm3675_vm1, %v4351_v19  ;;  %v8352_v57 = vpop.permute.xlu2 %3347  ;;  %v6419_v55 = vld [vmem:[%s6955_s23 + $0x276] ss:$2 sm:$0xff]  ;;  %v10145_v37 = vld [vmem:[#allocation112_spill] sm:$0xff]  ;;  %v2179_v8 = vadd.f32 %v2129_v35, %v1724_v61 }
 0x37f   : > { %v3643_v52 = vmax.f32 %v3593_v51, 0.0  ;;  %v3642_v60 = vmax.f32 %v3592_v58, 0.0  ;;  %2952 = vperm.xlu1 %6836, %v6367_v34   ;;  %2947 = vperm.xlu0 %6835, %v6366_v32   ;;  %v762_v34 = vmul.f32 %v8082_v59, %v10143_v17  ;;  %v10144_v51 = vld [vmem:[#allocation102_spill] sm:$0xff]  ;;  %v1672_v15 = vmul.f32 %v8089_v26, %v10145_v37  ;;  %v6422_v50 = vld [vmem:[%s6955_s23 + $0x2a6] ss:$2 sm:$0xff] }
 0x380   : > { %v2428_v2 = vpop.permute.xlu1 %2427  ;;  %v3333_v25 = vpop.permute.xlu0 %3332  ;;  %v1673_v16 = vmul.f32 %v8089_v26, %v10144_v51  ;;  %v1268_v32 = vadd.f32 %v1218_v14, %v763_v62  ;;  %v6321_v44 = vld [vmem:[%s6955_s23 + $0x2b4] ss:$2 sm:$0xff] }
 0x381   : > { %3697 = vst.msk [vmem:[#allocation2 + $0xa9] sm:$0xff] %vm3675_vm1, %v3643_v52  ;;  %v3491_v4 = vmul.f32 %v8142_v40, %v3333_v25  ;;  %v1267_v19 = vadd.f32 %v1217_v31, %v762_v34  ;;  %v10146_v52 = vld [vmem:[#allocation155_spill] sm:$0xff]  ;;  %v10151_v61 = vld [vmem:[#allocation158_spill] sm:$0xff] }
 0x382   : > { %3696 = vst.msk [vmem:[#allocation2 + $0xa1] sm:$0xff] %vm3675_vm1, %v3642_v60  ;;  %v2127_v27 = vmul.f32 %v8097_v24, %v10146_v52  ;;  %v1723_v47 = vadd.f32 %v1673_v16, %v1268_v32  ;;  %v10150_v31 = vld [vmem:[#allocation115_spill] sm:$0xff] }
 0x383   : > { %v3541_v43 = vadd.f32 %v3491_v4, %v3086_v9  ;;  %v1722_v45 = vadd.f32 %v1672_v15, %v1267_v19  ;;  %v6372_v32 = vld [vmem:[%s6955_s23 + $0x2b5] ss:$2 sm:$0xff]  ;;  %v6371_v52 = vld [vmem:[%s6955_s23 + $0x2a5] ss:$2 sm:$0xff] }
 0x384   : > { %3407 = vperm.xlu2 %6837, %v6418_v63  }
 0x385   : > { %v3595_v18 = vadd.f32 %v8160_v56, %v3541_v43  ;;  %v10147_v43 = vld [vmem:[#allocation154_spill] sm:$0xff] }
 0x386   : > { %v8363_v0 = vpop.permute.xlu2 %2452  ;;  %v2128_v63 = vmul.f32 %v8097_v24, %v10147_v43 }
 0x387   : > { %v3645_v10 = vmax.f32 %v3595_v18, 0.0  ;;  %3402 = vperm.xlu1 %6836, %v6417_v41   ;;  %3397 = vperm.xlu0 %6835, %v6416_v42  }
 0x388   : > { %v8365_v30 = vpop.permute.xlu1 %2442  ;;  %v2438_v3 = vpop.permute.xlu0 %2437  ;;  %v2178_v21 = vadd.f32 %v2128_v63, %v1723_v47  ;;  %v6370_v63 = vld [vmem:[%s6955_s23 + $0x295] ss:$2 sm:$0xff]  ;;  %v3040_v47 = vmul.f32 %v8132_v23, %v8334_v12 }
 0x389   : > { %v3746_v20 = vld [vmem:[#allocation2 + $0xa0] ss:$2 sm:$0xff]  ;;  %v3796_v6 = vld [vmem:[#allocation2 + $0xa1] ss:$2 sm:$0xff]  ;;  %3699 = vst.msk [vmem:[#allocation2 + $0xb9] sm:$0xff] %vm3675_vm1, %v3645_v10  ;;  %v2584_v33 = vmul.f32 %v8109_v39, %v2438_v3  ;;  %v2582_v10 = vmul.f32 %v8109_v39, %v2428_v2  ;;  %v2585_v15 = vmul.f32 %v8109_v39, %v8365_v30 }
 0x38a   : > { %v3835_v13 = vmax.f32 %v3746_v20, %v3796_v6  ;;  %v3871_v49 = vld [vmem:[#allocation2 + $0xa2] ss:$2 sm:$0xff]  ;;  %v2583_v20 = vmul.f32 %v8109_v39, %v8279_v1  ;;  %v3494_v6 = vmul.f32 %v8142_v40, %v8352_v57  ;;  %v765_v1 = vmul.f32 %v8082_v59, %v10149_v7 }
 0x38b   : > { %v2634_v41 = vadd.f32 %v2584_v33, %v2179_v8  ;;  %v6320_v2 = vld [vmem:[%s6955_s23 + $0x2a4] ss:$2 sm:$0xff]  ;;  %v1675_v57 = vmul.f32 %v8089_v26, %v10150_v31  ;;  %v2130_v33 = vmul.f32 %v8097_v24, %v10151_v61 }
 0x38c   : > { %v3910_v28 = vmax.f32 %v3835_v13, %v3871_v49  ;;  %2512 = vperm.xlu2 %6837, %v6319_v36   ;;  %v2177_v13 = vadd.f32 %v2127_v27, %v1722_v45  ;;  %v6369_v49 = vld [vmem:[%s6955_s23 + $0x285] ss:$2 sm:$0xff]  ;;  %v2633_v14 = vadd.f32 %v2583_v20, %v2178_v21 }
 0x38d   : > { %v10155_v61 = vld [vmem:[#allocation161_spill] sm:$0xff] }
 0x38e   : > { %3938 = vst.msk [vmem:[#allocation3 + $0x53] sm:$0xff] %vm3675_vm1, %v3910_v28  ;;  %v8391_v58 = vpop.permute.xlu2 %2902  ;;  %v2632_v53 = vadd.f32 %v2582_v10, %v2177_v13  ;;  %v6420_v13 = vld [vmem:[%s6955_s23 + $0x286] ss:$2 sm:$0xff] }
 0x38f   : > { %2507 = vperm.xlu1 %6836, %v6318_v29   ;;  %3412 = vperm.xlu0 %6835, %v6419_v55   ;;  %v1270_v29 = vadd.f32 %v1220_v48, %v765_v1  ;;  %v3037_v55 = vmul.f32 %v8132_v23, %v8309_v22  ;;  %v6421_v48 = vld [vmem:[%s6955_s23 + $0x296] ss:$2 sm:$0xff] }
 0x390   : > { %v2893_v60 = vpop.permute.xlu1 %2892  ;;  %v3748_v9 = vld [vmem:[#allocation2 + $0xb0] ss:$2 sm:$0xff]  ;;  %v3798_v4 = vld [vmem:[#allocation2 + $0xb1] ss:$2 sm:$0xff] }
 0x391   : > { %v2888_v25 = vpop.permute.xlu0 %2887  ;;  %v3039_v18 = vmul.f32 %v8132_v23, %v2893_v60  ;;  %v3836_v42 = vmax.f32 %v3748_v9, %v3798_v4  ;;  %v3873_v3 = vld [vmem:[#allocation2 + $0xb2] ss:$2 sm:$0xff]  ;;  %v1725_v37 = vadd.f32 %v1675_v57, %v1270_v29  ;;  %v3087_v8 = vadd.f32 %v3037_v55, %v2632_v53 }
 0x392   : > { %v3038_v28 = vmul.f32 %v8132_v23, %v2888_v25  ;;  %v10154_v1 = vld [vmem:[#allocation118_spill] sm:$0xff] }
 0x393   : > { %v3089_v5 = vadd.f32 %v3039_v18, %v2634_v41  ;;  %v3911_v38 = vmax.f32 %v3836_v42, %v3873_v3  ;;  %v2180_v27 = vadd.f32 %v2130_v33, %v1725_v37  ;;  %v1678_v31 = vmul.f32 %v8089_v26, %v10154_v1  ;;  %v10157_v37 = vld [vmem:[#allocation76_spill] sm:$0xff] }
 0x394   : > { %2962 = vperm.xlu2 %6837, %v6369_v49   ;;  %v3088_v34 = vadd.f32 %v3038_v28, %v2633_v14  ;;  %v2133_v33 = vmul.f32 %v8097_v24, %v10155_v61 }
 0x395   : > { %v3544_v35 = vadd.f32 %v3494_v6, %v3089_v5  ;;  %3939 = vst.msk [vmem:[#allocation3 + $0x5b] sm:$0xff] %vm3675_vm1, %v3911_v38  ;;  %v2635_v41 = vadd.f32 %v2585_v15, %v2180_v27  ;;  %v1222_v15 = vmul.f32 %v8071_v54, %v10157_v37  ;;  %v10159_v27 = vld [vmem:[#allocation105_spill] sm:$0xff] }
 0x396   : > { %v8419_v46 = vpop.permute.xlu2 %2917 }
 0x397   : > { %v3598_v36 = vadd.f32 %v8160_v56, %v3544_v35  ;;  %2522 = vperm.xlu1 %6836, %v6321_v44   ;;  %2517 = vperm.xlu0 %6835, %v6320_v2   ;;  %v3090_v6 = vadd.f32 %v3040_v47, %v2635_v41  ;;  %v10152_v44 = vld [vmem:[#allocation66_spill] sm:$0xff]  ;;  %v10153_v2 = vld [vmem:[#allocation39_spill] sm:$0xff] }
 0x398   : > { %v3343_v62 = vpop.permute.xlu1 %3342  ;;  %v1223_v12 = vmul.f32 %v8071_v54, %v10152_v44  ;;  %v768_v7 = vmul.f32 %v8082_v59, %v10153_v2  ;;  %v2587_v44 = vmul.f32 %v8109_v39, %v8363_v0  ;;  %v8488_v2 = vld [vmem:[%s9884_s1 + $0x1] ss:$0 sm:$0xff]  ;;  %v8498_v0 = vld [vmem:[%s9884_s1] ss:$0 sm:$0xff] }
 0x399   : > { %v3648_v17 = vmax.f32 %v3598_v36, 0.0  ;;  %v3493_v51 = vmul.f32 %v8142_v40, %v3343_v62  ;;  %v3338_v16 = vpop.permute.xlu0 %3337  ;;  %v10156_v62 = vld [vmem:[#allocation77_spill] sm:$0xff] }
 0x39a   : > { %v3492_v19 = vmul.f32 %v8142_v40, %v3338_v16  ;;  %v1273_v29 = vadd.f32 %v1223_v12, %v768_v7  ;;  %v10164_v7 = vld [vmem:[#allocation80_spill] sm:$0xff] }
 0x39b   : > { %3702 = vst.msk [vmem:[#allocation2 + $0xd1] sm:$0xff] %vm3675_vm1, %v3648_v17  ;;  %v3543_v22 = vadd.f32 %v3493_v51, %v3088_v34  ;;  %v1221_v17 = vmul.f32 %v8071_v54, %v10156_v62  ;;  %v6322_v34 = vld [vmem:[%s6955_s23 + $0x2c4] ss:$2 sm:$0xff]  ;;  %v6271_v51 = vld [vmem:[%s6955_s23 + $0x2c3] ss:$2 sm:$0xff]  ;;  %v1224_v1 = vmul.f32 %v8488_v2, %v10164_v7 }
 0x39c   : > { %v3542_v60 = vadd.f32 %v3492_v19, %v3087_v8  ;;  %v3993_v25 = vld [vmem:[#allocation3 + $0x51] ss:$2 sm:$0xff]  ;;  %v3963_v9 = vld [vmem:[#allocation3 + $0x50] ss:$2 sm:$0xff]  ;;  %2977 = vperm.xlu2 %6837, %v6372_v32   ;;  %v1728_v8 = vadd.f32 %v1678_v31, %v1273_v29 }
 0x39d   : > { %v4214_v4 = vld [vmem:[#allocation3 + $0x52] ss:$2 sm:$0xff]  ;;  %v3597_v43 = vadd.f32 %v8160_v56, %v3543_v22  ;;  %6440 = vmatmul.msk.f32.gmra.mxu0 %vm3675_vm1, %v3993_v25  ;;  %6453 = vmatmul.msk.f32.gmra.mxu1 %vm3675_vm1, %v3963_v9  ;;  %v4353_v30 = vld [vmem:[#allocation3 + $0x53] ss:$2 sm:$0xff]  ;;  %v10158_v32 = vld [vmem:[#allocation35_spill] sm:$0xff] }
 0x39e   : > { %v3596_v18 = vadd.f32 %v8160_v56, %v3542_v60  ;;  %6470 = vmatmul.msk.f32.gmra.mxu2 %vm3675_vm1, %v4214_v4  ;;  %6487 = vmatmul.msk.f32.gmra.mxu3 %vm3675_vm1, %v4353_v30  ;;  %v3368_v10 = vpop.permute.xlu2 %3367  ;;  %v6423_v22 = vld [vmem:[%s6955_s23 + $0x2b6] ss:$2 sm:$0xff]  ;;  %v1676_v60 = vmul.f32 %v8089_v26, %v10159_v27  ;;  %v2183_v30 = vadd.f32 %v2133_v33, %v1728_v8  ;;  %v8518_v8 = vld [vmem:[%s9884_s1 + $0x3] ss:$0 sm:$0xff] }
 0x39f   : > { %v3647_v42 = vmax.f32 %v3597_v43, 0.0  ;;  %2972 = vperm.xlu1 %6836, %v6371_v52   ;;  %2967 = vperm.xlu0 %6835, %v6370_v63   ;;  %v766_v52 = vmul.f32 %v8082_v59, %v10158_v32  ;;  %v10160_v25 = vld [vmem:[#allocation25_spill] sm:$0xff]  ;;  %v10161_v4 = vld [vmem:[#allocation119_spill] sm:$0xff]  ;;  %v3498_v12 = vmul.f32 %v8142_v40, %v3368_v10  ;;  %v10165_v10 = vld [vmem:[#allocation38_spill] sm:$0xff] }
 0x3a0   : > { %v3646_v45 = vmax.f32 %v3596_v18, 0.0  ;;  %v2448_v3 = vpop.permute.xlu1 %2447  ;;  %v767_v9 = vmul.f32 %v8082_v59, %v10160_v25  ;;  %v1677_v43 = vmul.f32 %v8089_v26, %v10161_v4  ;;  %v10162_v63 = vld [vmem:[#allocation157_spill] sm:$0xff]  ;;  %v769_v29 = vmul.f32 %v8498_v0, %v10165_v10  ;;  %v8506_v33 = vld [vmem:[%s9884_s1 + $0x2] ss:$0 sm:$0xff] }
 0x3a1   : > { %3701 = vst.msk [vmem:[#allocation2 + $0xc9] sm:$0xff] %vm3675_vm1, %v3647_v42  ;;  %v3353_v20 = vpop.permute.xlu0 %3352  ;;  %v1271_v54 = vadd.f32 %v1221_v17, %v766_v52  ;;  %v2131_v41 = vmul.f32 %v8097_v24, %v10162_v63  ;;  %v10169_v7 = vld [vmem:[#allocation41_spill] sm:$0xff] }
 0x3a2   : > { %3700 = vst.msk [vmem:[#allocation2 + $0xc1] sm:$0xff] %vm3675_vm1, %v3646_v45  ;;  %v3495_v5 = vmul.f32 %v8142_v40, %v3353_v20  ;;  %v1272_v47 = vadd.f32 %v1222_v15, %v767_v9  ;;  %v10163_v45 = vld [vmem:[#allocation147_spill] sm:$0xff] }
 0x3a3   : > { %v2132_v20 = vmul.f32 %v8097_v24, %v10163_v45  ;;  %v8527_v9 = vld [vmem:[%s9884_s1 + $0x4] ss:$0 sm:$0xff] }
 0x3a4   : > { %v3545_v38 = vadd.f32 %v3495_v5, %v3090_v6  ;;  %3427 = vperm.xlu2 %6837, %v6422_v50   ;;  %v1726_v50 = vadd.f32 %v1676_v60, %v1271_v54 }
 0x3a6   : > { %v3599_v49 = vadd.f32 %v8160_v56, %v3545_v38  ;;  %v8446_v35 = vpop.permute.xlu2 %2472  ;;  %v2181_v31 = vadd.f32 %v2131_v41, %v1726_v50 }
 0x3a7   : > { %3422 = vperm.xlu1 %6836, %v6421_v48   ;;  %3417 = vperm.xlu0 %6835, %v6420_v13   ;;  %v2586_v48 = vmul.f32 %v8109_v39, %v2448_v3 }
 0x3a8   : > { %v3649_v21 = vmax.f32 %v3599_v49, 0.0  ;;  %v8448_v28 = vpop.permute.xlu1 %2462  ;;  %v1727_v49 = vadd.f32 %v1677_v43, %v1272_v47 }
 0x3a9   : > { %v2458_v57 = vpop.permute.xlu0 %2457  ;;  %v3750_v53 = vld [vmem:[#allocation2 + $0xc0] ss:$2 sm:$0xff]  ;;  %v3800_v14 = vld [vmem:[#allocation2 + $0xc1] ss:$2 sm:$0xff]  ;;  %v2636_v61 = vadd.f32 %v2586_v48, %v2181_v31  ;;  %v2589_v4 = vmul.f32 %v8527_v9, %v8448_v28 }
 0x3aa   : > { %3703 = vst.msk [vmem:[#allocation2 + $0xd9] sm:$0xff] %vm3675_vm1, %v3649_v21  ;;  %v3837_v36 = vmax.f32 %v3750_v53, %v3800_v14  ;;  %v3875_v55 = vld [vmem:[#allocation2 + $0xc2] ss:$2 sm:$0xff]  ;;  %v2588_v19 = vmul.f32 %v8109_v39, %v2458_v57  ;;  %v2182_v53 = vadd.f32 %v2132_v20, %v1727_v49  ;;  %v6373_v39 = vld [vmem:[%s6955_s23 + $0x2c5] ss:$2 sm:$0xff] }
 0x3ab   : > { %v6424_v57 = vld [vmem:[%s6955_s23 + $0x2c6] ss:$2 sm:$0xff] }
 0x3ac   : > { %v3912_v16 = vmax.f32 %v3837_v36, %v3875_v55  ;;  %2527 = vperm.xlu2 %6837, %v6322_v34   ;;  %v2638_v6 = vadd.f32 %v2588_v19, %v2183_v30  ;;  %v10166_v55 = vld [vmem:[#allocation108_spill] sm:$0xff]  ;;  %v2637_v17 = vadd.f32 %v2587_v44, %v2182_v53  ;;  %v8550_v48 = vld [vmem:[%s9884_s1 + $0x6] ss:$0 sm:$0xff]  ;;  %v10168_v44 = vld [vmem:[#allocation82_spill] sm:$0xff] }
 0x3ad   : > { %v1679_v62 = vmul.f32 %v8506_v33, %v10166_v55  ;;  %v10167_v19 = vld [vmem:[#allocation160_spill] sm:$0xff]  ;;  %v10170_v31 = vld [vmem:[#allocation111_spill] sm:$0xff] }
 0x3ae   : > { %3940 = vst.msk [vmem:[#allocation3 + $0x63] sm:$0xff] %vm3675_vm1, %v3912_v16  ;;  %v8476_v18 = vpop.permute.xlu2 %2922  ;;  %v3041_v16 = vmul.f32 %v8132_v23, %v8391_v58 }
 0x3af   : > { %2072 = vperm.xlu1 %6836, %v6271_v51   ;;  %3432 = vperm.xlu0 %6835, %v6423_v22   ;;  %v1274_v51 = vadd.f32 %v1224_v1, %v769_v29  ;;  %v2134_v22 = vmul.f32 %v8518_v8, %v10167_v19  ;;  %v772_v1 = vmul.f32 %v8498_v0, %v10169_v7  ;;  %v10171_v29 = vld [vmem:[#allocation162_spill] sm:$0xff]  ;;  %v10180_v7 = vld [vmem:[#allocation81_spill] sm:$0xff] }
 0x3b0   : > { %v3091_v25 = vadd.f32 %v3041_v16, %v2636_v61  ;;  %v2137_v61 = vmul.f32 %v8518_v8, %v10171_v29 }
 0x3b1   : > { %v2913_v42 = vpop.permute.xlu1 %2912  ;;  %v2908_v26 = vpop.permute.xlu0 %2907  ;;  %v3752_v5 = vld [vmem:[#allocation2 + $0xd0] ss:$2 sm:$0xff]  ;;  %v3802_v38 = vld [vmem:[#allocation2 + $0xd1] ss:$2 sm:$0xff]  ;;  %v1729_v58 = vadd.f32 %v1679_v62, %v1274_v51  ;;  %v10173_v51 = vld [vmem:[#allocation79_spill] sm:$0xff] }
 0x3b2   : > { %v3043_v59 = vmul.f32 %v8132_v23, %v2913_v42  ;;  %v3838_v13 = vmax.f32 %v3752_v5, %v3802_v38  ;;  %v3877_v24 = vld [vmem:[#allocation2 + $0xd2] ss:$2 sm:$0xff]  ;;  %v3042_v36 = vmul.f32 %v8132_v23, %v2908_v26  ;;  %v8541_v26 = vld [vmem:[%s9884_s1 + $0x5] ss:$0 sm:$0xff]  ;;  %v1225_v16 = vmul.f32 %v8488_v2, %v10173_v51 }
 0x3b3   : > { %v2184_v54 = vadd.f32 %v2134_v22, %v1729_v58  ;;  %v10177_v58 = vld [vmem:[#allocation122_spill] sm:$0xff] }
 0x3b4   : > { %v3093_v21 = vadd.f32 %v3043_v59, %v2638_v6  ;;  %v3913_v3 = vmax.f32 %v3838_v13, %v3877_v24  ;;  %v3092_v52 = vadd.f32 %v3042_v36, %v2637_v17  ;;  %v10172_v17 = vld [vmem:[#allocation69_spill] sm:$0xff] }
 0x3b5   : > { %v2639_v20 = vadd.f32 %v2589_v4, %v2184_v54  ;;  %v1680_v4 = vmul.f32 %v8506_v33, %v10177_v58 }
 0x3b6   : > { %v3548_v14 = vadd.f32 %v3498_v12, %v3093_v21  ;;  %3941 = vst.msk [vmem:[#allocation3 + $0x6b] sm:$0xff] %vm3675_vm1, %v3913_v3  ;;  %v8513_v37 = vpop.permute.xlu2 %2937  ;;  %v1227_v12 = vmul.f32 %v8488_v2, %v10168_v44 }
 0x3b7   : > { %3437 = vperm.xlu1 %6836, %v6424_v57   ;;  %2982 = vperm.xlu0 %6835, %v6373_v39   ;;  %v1682_v57 = vmul.f32 %v8506_v33, %v10170_v31 }
 0x3b8   : > { %v3602_v34 = vadd.f32 %v8160_v56, %v3548_v14  ;;  %v1277_v10 = vadd.f32 %v1227_v12, %v772_v1  ;;  %v1228_v1 = vmul.f32 %v8488_v2, %v10180_v7 }
 0x3b9   : > { %v3363_v15 = vpop.permute.xlu1 %3362  ;;  %v3358_v60 = vpop.permute.xlu0 %3357 }
 0x3ba   : > { %v3652_v32 = vmax.f32 %v3602_v34, 0.0  ;;  %v3497_v27 = vmul.f32 %v8142_v40, %v3363_v15  ;;  %v3496_v23 = vmul.f32 %v8142_v40, %v3358_v60  ;;  %v1226_v34 = vmul.f32 %v8488_v2, %v10172_v17 }
 0x3bb   : > { %v1732_v19 = vadd.f32 %v1682_v57, %v1277_v10 }
 0x3bc   : > { %3706 = vst.msk [vmem:[#allocation2 + $0xf1] sm:$0xff] %vm3675_vm1, %v3652_v32  ;;  %v3547_v43 = vadd.f32 %v3497_v27, %v3092_v52  ;;  %v3546_v30 = vadd.f32 %v3496_v23, %v3091_v25  ;;  %v10174_v32 = vld [vmem:[#allocation28_spill] sm:$0xff]  ;;  %v10175_v27 = vld [vmem:[#allocation42_spill] sm:$0xff]  ;;  %v10176_v25 = vld [vmem:[#allocation121_spill] sm:$0xff] }
 0x3bd   : > { %v3995_v41 = vld [vmem:[#allocation3 + $0x61] ss:$2 sm:$0xff]  ;;  %v3965_v42 = vld [vmem:[#allocation3 + $0x60] ss:$2 sm:$0xff]  ;;  %v770_v52 = vmul.f32 %v8498_v0, %v10174_v32  ;;  %v771_v60 = vmul.f32 %v8498_v0, %v10175_v27  ;;  %v1681_v23 = vmul.f32 %v8506_v33, %v10176_v25 }
 0x3be   : > { %v3601_v63 = vadd.f32 %v8160_v56, %v3547_v43  ;;  %v4216_v47 = vld [vmem:[#allocation3 + $0x62] ss:$2 sm:$0xff]  ;;  %v3600_v40 = vadd.f32 %v8160_v56, %v3546_v30  ;;  %6441 = vmatmul.msk.f32.gmra.mxu0 %vm3675_vm1, %v3995_v41  ;;  %6454 = vmatmul.msk.f32.gmra.mxu1 %vm3675_vm1, %v3965_v42  ;;  %v4355_v45 = vld [vmem:[#allocation3 + $0x63] ss:$2 sm:$0xff]  ;;  %v3044_v56 = vmul.f32 %v8541_v26, %v8419_v46  ;;  %v3388_v5 = vpop.permute.xlu2 %3387 }
 0x3bf   : > { %6471 = vmatmul.msk.f32.gmra.mxu2 %vm3675_vm1, %v4216_v47  ;;  %6488 = vmatmul.msk.f32.gmra.mxu3 %vm3675_vm1, %v4355_v45  ;;  %v8558_v46 = vld [vmem:[%s9885_s2] ss:$0 sm:$0xff]  ;;  %v2187_v43 = vadd.f32 %v2137_v61, %v1732_v19  ;;  %v1276_v30 = vadd.f32 %v1226_v34, %v771_v60  ;;  %v1275_v54 = vadd.f32 %v1225_v16, %v770_v52  ;;  %v10179_v47 = vld [vmem:[#allocation163_spill] sm:$0xff]  ;;  %v10183_v34 = vld [vmem:[#allocation153_spill] sm:$0xff] }
 0x3c0   : > { %v3651_v6 = vmax.f32 %v3601_v63, 0.0  ;;  %v3650_v28 = vmax.f32 %v3600_v40, 0.0  ;;  %v3094_v50 = vadd.f32 %v3044_v56, %v2639_v20  ;;  %v10178_v63 = vld [vmem:[#allocation150_spill] sm:$0xff]  ;;  %v2136_v40 = vmul.f32 %v8518_v8, %v10179_v47 }
 0x3c1   : > { %v2468_v59 = vpop.permute.xlu1 %2467  ;;  %v3373_v38 = vpop.permute.xlu0 %3372  ;;  %v2135_v41 = vmul.f32 %v8518_v8, %v10178_v63  ;;  %v2591_v56 = vmul.f32 %v8527_v9, %v8446_v35  ;;  %v2138_v51 = vmul.f32 %v8518_v8, %v10183_v34 }
 0x3c2   : > { %3705 = vst.msk [vmem:[#allocation2 + $0xe9] sm:$0xff] %vm3675_vm1, %v3651_v6  ;;  %v3499_v13 = vmul.f32 %v8550_v48, %v3373_v38  ;;  %v1731_v6 = vadd.f32 %v1681_v23, %v1276_v30  ;;  %v2590_v44 = vmul.f32 %v8527_v9, %v2468_v59 }
 0x3c3   : > { %3704 = vst.msk [vmem:[#allocation2 + $0xe1] sm:$0xff] %vm3675_vm1, %v3650_v28  ;;  %v1730_v28 = vadd.f32 %v1680_v4, %v1275_v54 }
 0x3c4   : > { %v3549_v49 = vadd.f32 %v3499_v13, %v3094_v50 }
 0x3c5   : > { %v2185_v31 = vadd.f32 %v2135_v41, %v1730_v28 }
 0x3c6   : > { %v3603_v21 = vadd.f32 %v8558_v46, %v3549_v49  ;;  %v8570_v55 = vpop.permute.xlu2 %2492  ;;  %v3502_v49 = vmul.f32 %v8550_v48, %v3388_v5  ;;  %v10182_v5 = vld [vmem:[#allocation124_spill] sm:$0xff] }
 0x3c7   : > { %v1683_v59 = vmul.f32 %v8506_v33, %v10182_v5  ;;  %v2640_v61 = vadd.f32 %v2590_v44, %v2185_v31  ;;  %v10186_v31 = vld [vmem:[#allocation126_spill] sm:$0xff] }
 0x3c8   : > { %v3653_v3 = vmax.f32 %v3603_v21, 0.0 }
 0x3c9   : > { %v8561_v24 = vpop.permute.xlu1 %2482  ;;  %v2478_v36 = vpop.permute.xlu0 %2477 }
 0x3ca   : > { %v3754_v53 = vld [vmem:[#allocation2 + $0xe0] ss:$2 sm:$0xff]  ;;  %v3804_v14 = vld [vmem:[#allocation2 + $0xe1] ss:$2 sm:$0xff]  ;;  %3707 = vst.msk [vmem:[#allocation2 + $0xf9] sm:$0xff] %vm3675_vm1, %v3653_v3  ;;  %v2592_v22 = vmul.f32 %v8527_v9, %v2478_v36  ;;  %v2186_v3 = vadd.f32 %v2136_v40, %v1731_v6  ;;  %v2593_v60 = vmul.f32 %v8527_v9, %v8561_v24 }
 0x3cb   : > { %v3839_v39 = vmax.f32 %v3754_v53, %v3804_v14  ;;  %v3879_v62 = vld [vmem:[#allocation2 + $0xe2] ss:$2 sm:$0xff] }
 0x3cc   : > { %v2642_v45 = vadd.f32 %v2592_v22, %v2187_v43  ;;  %v2641_v29 = vadd.f32 %v2591_v56, %v2186_v3 }
 0x3cd   : > { %v3914_v15 = vmax.f32 %v3839_v39, %v3879_v62  ;;  %v10181_v39 = vld [vmem:[#allocation31_spill] sm:$0xff] }
 0x3ce   : > { %v8597_v53 = vpop.permute.xlu2 %2942  ;;  %v773_v10 = vmul.f32 %v8498_v0, %v10181_v39 }
 0x3cf   : > { %3942 = vst.msk [vmem:[#allocation3 + $0x73] sm:$0xff] %vm3675_vm1, %v3914_v15  ;;  %v3045_v15 = vmul.f32 %v8541_v26, %v8476_v18 }
 0x3d0   : > { %v1278_v17 = vadd.f32 %v1228_v1, %v773_v10  ;;  %v10187_v10 = vld [vmem:[#allocation156_spill] sm:$0xff] }
 0x3d1   : > { %v2933_v42 = vpop.permute.xlu1 %2932  ;;  %v2928_v38 = vpop.permute.xlu0 %2927  ;;  %v3756_v50 = vld [vmem:[#allocation2 + $0xf0] ss:$2 sm:$0xff]  ;;  %v3806_v13 = vld [vmem:[#allocation2 + $0xf1] ss:$2 sm:$0xff]  ;;  %v3095_v23 = vadd.f32 %v3045_v15, %v2640_v61  ;;  %v2141_v5 = vmul.f32 %v8518_v8, %v10187_v10 }
 0x3d2   : > { %v3047_v20 = vmul.f32 %v8541_v26, %v2933_v42  ;;  %v3840_v21 = vmax.f32 %v3756_v50, %v3806_v13  ;;  %v3881_v57 = vld [vmem:[#allocation2 + $0xf2] ss:$2 sm:$0xff]  ;;  %v3046_v35 = vmul.f32 %v8541_v26, %v2928_v38  ;;  %v1733_v52 = vadd.f32 %v1683_v59, %v1278_v17  ;;  %v10189_v17 = vld [vmem:[#allocation84_spill] sm:$0xff] }
 0x3d3   : > { %v1230_v34 = vmul.f32 %v8488_v2, %v10189_v17  ;;  %v6532_v15 = vld [vmem:[%s9886_s3 + $0xd8] sm:$0xff]  ;;  %v10199_v17 = vld [vmem:[#allocation167_spill] sm:$0xff] }
 0x3d4   : > { %v3097_v12 = vadd.f32 %v3047_v20, %v2642_v45  ;;  %v3915_v36 = vmax.f32 %v3840_v21, %v3881_v57  ;;  %v3096_v22 = vadd.f32 %v3046_v35, %v2641_v29  ;;  %v2188_v4 = vadd.f32 %v2138_v51, %v1733_v52  ;;  %v10188_v29 = vld [vmem:[#allocation72_spill] sm:$0xff]  ;;  %4841 = vmatpush.msrb.mxu2 %v6532_v15 }
 0x3d5   : > { %v3048_v20 = vmul.f32 %v8541_v26, %v8513_v37  ;;  %v10185_v37 = vld [vmem:[#allocation34_spill] sm:$0xff]  ;;  %v1686_v57 = vmul.f32 %v8506_v33, %v10186_v31  ;;  %v1229_v61 = vmul.f32 %v8488_v2, %v10188_v29 }
 0x3d6   : > { %v3552_v14 = vadd.f32 %v3502_v49, %v3097_v12  ;;  %3943 = vst.msk [vmem:[#allocation3 + $0x7b] sm:$0xff] %vm3675_vm1, %v3915_v36  ;;  %v2643_v41 = vadd.f32 %v2593_v60, %v2188_v4  ;;  %v8616_v42 = vpop.permute.xlu2 %2957  ;;  %v10184_v49 = vld [vmem:[#allocation83_spill] sm:$0xff]  ;;  %v776_v1 = vmul.f32 %v8498_v0, %v10185_v37 }
 0x3d7   : > { %v1231_v44 = vmul.f32 %v8488_v2, %v10184_v49  ;;  %v2595_v49 = vmul.f32 %v8527_v9, %v8570_v55  ;;  %v10198_v55 = vld [vmem:[#allocation125_spill] sm:$0xff] }
 0x3d8   : > { %v3606_v62 = vadd.f32 %v8558_v46, %v3552_v14  ;;  %v3098_v56 = vadd.f32 %v3048_v20, %v2643_v41 }
 0x3d9   : > { %v3383_v16 = vpop.permute.xlu1 %3382  ;;  %v3378_v27 = vpop.permute.xlu0 %3377  ;;  %v1281_v39 = vadd.f32 %v1231_v44, %v776_v1  ;;  %v10196_v1 = vld [vmem:[#allocation75_spill] sm:$0xff] }
 0x3da   : > { %v3656_v19 = vmax.f32 %v3606_v62, 0.0  ;;  %v3501_v32 = vmul.f32 %v8550_v48, %v3383_v16  ;;  %v3500_v58 = vmul.f32 %v8550_v48, %v3378_v27  ;;  %v10192_v27 = vld [vmem:[#allocation43_spill] sm:$0xff]  ;;  %v1232_v31 = vmul.f32 %v8488_v2, %v10196_v1 }
 0x3db   : > { %v1736_v51 = vadd.f32 %v1686_v57, %v1281_v39  ;;  %v775_v60 = vmul.f32 %v8498_v0, %v10192_v27  ;;  %v10202_v1 = vld [vmem:[#allocation127_spill] sm:$0xff] }
 0x3dc   : > { %3710 = vst.msk [vmem:[#allocation2 + $0x111] sm:$0xff] %vm3675_vm1, %v3656_v19  ;;  %v3551_v25 = vadd.f32 %v3501_v32, %v3096_v22  ;;  %v3550_v30 = vadd.f32 %v3500_v58, %v3095_v23  ;;  %v10190_v19 = vld [vmem:[#allocation44_spill] sm:$0xff]  ;;  %v10191_v32 = vld [vmem:[#allocation123_spill] sm:$0xff] }
 0x3dd   : > { %v3997_v18 = vld [vmem:[#allocation3 + $0x71] ss:$2 sm:$0xff]  ;;  %v3967_v54 = vld [vmem:[#allocation3 + $0x70] ss:$2 sm:$0xff]  ;;  %v774_v22 = vmul.f32 %v8498_v0, %v10190_v19  ;;  %v1684_v52 = vmul.f32 %v8506_v33, %v10191_v32  ;;  %v2191_v58 = vadd.f32 %v2141_v5, %v1736_v51 }
 0x3de   : > { %v3605_v43 = vadd.f32 %v8558_v46, %v3551_v25  ;;  %v4218_v63 = vld [vmem:[#allocation3 + $0x72] ss:$2 sm:$0xff]  ;;  %v3604_v40 = vadd.f32 %v8558_v46, %v3550_v30  ;;  %6442 = vmatmul.msk.f32.gmra.mxu0 %vm3675_vm1, %v3997_v18  ;;  %6455 = vmatmul.msk.f32.gmra.mxu1 %vm3675_vm1, %v3967_v54  ;;  %v4357_v24 = vld [vmem:[#allocation3 + $0x73] ss:$2 sm:$0xff]  ;;  %v3408_v21 = vpop.permute.xlu2 %3407  ;;  %v1280_v54 = vadd.f32 %v1230_v34, %v775_v60 }
 0x3df   : > { %6472 = vmatmul.msk.f32.gmra.mxu2 %vm3675_vm1, %v4218_v63  ;;  %6489 = vmatmul.msk.f32.gmra.mxu3 %vm3675_vm1, %v4357_v24  ;;  %v10193_v25 = vld [vmem:[#allocation114_spill] sm:$0xff]  ;;  %v1279_v4 = vadd.f32 %v1229_v61, %v774_v22  ;;  %v10195_v63 = vld [vmem:[#allocation164_spill] sm:$0xff]  ;;  %v3506_v44 = vmul.f32 %v8550_v48, %v3408_v21  ;;  %v1687_v21 = vmul.f32 %v8506_v33, %v10198_v55 }
 0x3e0   : > { %v3655_v47 = vmax.f32 %v3605_v43, 0.0  ;;  %v3654_v6 = vmax.f32 %v3604_v40, 0.0  ;;  %v1685_v23 = vmul.f32 %v8506_v33, %v10193_v25  ;;  %v10194_v43 = vld [vmem:[#allocation165_spill] sm:$0xff]  ;;  %v2140_v41 = vmul.f32 %v8518_v8, %v10195_v63 }
 0x3e1   : > { %v2488_v45 = vpop.permute.xlu1 %2487  ;;  %v3393_v28 = vpop.permute.xlu0 %3392  ;;  %v2139_v30 = vmul.f32 %v8518_v8, %v10194_v43  ;;  %v3049_v61 = vmul.f32 %v8541_v26, %v8597_v53  ;;  %v2142_v34 = vmul.f32 %v8518_v8, %v10199_v17  ;;  %v6515_v53 = vld [vmem:[%s9886_s3 + $0xb8] sm:$0xff] }
 0x3e2   : > { %3709 = vst.msk [vmem:[#allocation2 + $0x109] sm:$0xff] %vm3675_vm1, %v3655_v47  ;;  %v3503_v38 = vmul.f32 %v8550_v48, %v3393_v28  ;;  %v1734_v28 = vadd.f32 %v1684_v52, %v1279_v4  ;;  %4702 = vmatpush.msra.mxu1 %v6515_v53 }
 0x3e3   : > { %3708 = vst.msk [vmem:[#allocation2 + $0x101] sm:$0xff] %vm3675_vm1, %v3654_v6 }
 0x3e4   : > { %v3553_v50 = vadd.f32 %v3503_v38, %v3098_v56  ;;  %v2594_v56 = vmul.f32 %v8527_v9, %v2488_v45  ;;  %v2189_v57 = vadd.f32 %v2139_v30, %v1734_v28 }
 0x3e6   : > { %v3607_v13 = vadd.f32 %v8558_v46, %v3553_v50  ;;  %v8663_v38 = vpop.permute.xlu2 %2512  ;;  %v2644_v10 = vadd.f32 %v2594_v56, %v2189_v57 }
 0x3e8   : > { %v3657_v7 = vmax.f32 %v3607_v13, 0.0  ;;  %v1735_v13 = vadd.f32 %v1685_v23, %v1280_v54  ;;  %v3099_v22 = vadd.f32 %v3049_v61, %v2644_v10 }
 0x3e9   : > { %v8631_v12 = vpop.permute.xlu1 %2502  ;;  %v2498_v3 = vpop.permute.xlu0 %2497 }
 0x3ea   : > { %v3758_v14 = vld [vmem:[#allocation2 + $0x100] ss:$2 sm:$0xff]  ;;  %v3808_v35 = vld [vmem:[#allocation2 + $0x101] ss:$2 sm:$0xff]  ;;  %3711 = vst.msk [vmem:[#allocation2 + $0x119] sm:$0xff] %vm3675_vm1, %v3657_v7  ;;  %v2596_v16 = vmul.f32 %v8527_v9, %v2498_v3  ;;  %v2597_v27 = vmul.f32 %v8527_v9, %v8631_v12 }
 0x3eb   : > { %v3841_v36 = vmax.f32 %v3758_v14, %v3808_v35  ;;  %v3883_v59 = vld [vmem:[#allocation2 + $0x102] ss:$2 sm:$0xff]  ;;  %v2190_v14 = vadd.f32 %v2140_v41, %v1735_v13  ;;  %v10200_v13 = vld [vmem:[#allocation78_spill] sm:$0xff] }
 0x3ec   : > { %v2646_v47 = vadd.f32 %v2596_v16, %v2191_v58 }
 0x3ed   : > { %v3916_v62 = vmax.f32 %v3841_v36, %v3883_v59  ;;  %v10197_v36 = vld [vmem:[#allocation46_spill] sm:$0xff]  ;;  %v2645_v5 = vadd.f32 %v2595_v49, %v2190_v14  ;;  %v1235_v49 = vmul.f32 %v8488_v2, %v10200_v13 }
 0x3ee   : > { %v777_v39 = vmul.f32 %v8498_v0, %v10197_v36  ;;  %v8689_v25 = vpop.permute.xlu2 %2962 }
 0x3ef   : > { %3944 = vst.msk [vmem:[#allocation3 + $0x83] sm:$0xff] %vm3675_vm1, %v3916_v62 }
 0x3f0   : > { %v1282_v29 = vadd.f32 %v1232_v31, %v777_v39  ;;  %v1690_v31 = vmul.f32 %v8506_v33, %v10202_v1  ;;  %v10203_v39 = vld [vmem:[#allocation169_spill] sm:$0xff] }
 0x3f1   : > { %v2953_v18 = vpop.permute.xlu1 %2952  ;;  %v2948_v24 = vpop.permute.xlu0 %2947  ;;  %v3760_v20 = vld [vmem:[#allocation2 + $0x110] ss:$2 sm:$0xff]  ;;  %v3810_v6 = vld [vmem:[#allocation2 + $0x111] ss:$2 sm:$0xff]  ;;  %v2145_v10 = vmul.f32 %v8518_v8, %v10203_v39 }
 0x3f2   : > { %v3051_v40 = vmul.f32 %v8541_v26, %v2953_v18  ;;  %v3842_v50 = vmax.f32 %v3760_v20, %v3810_v6  ;;  %v3885_v37 = vld [vmem:[#allocation2 + $0x112] ss:$2 sm:$0xff]  ;;  %v3050_v45 = vmul.f32 %v8541_v26, %v2948_v24  ;;  %v1737_v52 = vadd.f32 %v1687_v21, %v1282_v29 }
 0x3f3   : > { %v3052_v24 = vmul.f32 %v8541_v26, %v8616_v42  ;;  %v6531_v21 = vld [vmem:[%s9886_s3 + $0xd0] sm:$0xff]  ;;  %v10205_v29 = vld [vmem:[#allocation86_spill] sm:$0xff] }
 0x3f4   : > { %v3101_v7 = vadd.f32 %v3051_v40, %v2646_v47  ;;  %v3917_v3 = vmax.f32 %v3842_v50, %v3885_v37  ;;  %v3100_v16 = vadd.f32 %v3050_v45, %v2645_v5  ;;  %v2192_v58 = vadd.f32 %v2142_v34, %v1737_v52  ;;  %v10201_v37 = vld [vmem:[#allocation48_spill] sm:$0xff]  ;;  %v10204_v5 = vld [vmem:[#allocation85_spill] sm:$0xff]  ;;  %4842 = vmatpush.msrb.mxu2 %v6531_v21 }
 0x3f5   : > { %v780_v42 = vmul.f32 %v8498_v0, %v10201_v37  ;;  %v1233_v61 = vmul.f32 %v8488_v2, %v10205_v29  ;;  %v10209_v52 = vld [vmem:[#allocation128_spill] sm:$0xff]  ;;  %v10212_v37 = vld [vmem:[#allocation89_spill] sm:$0xff] }
 0x3f6   : > { %v3556_v35 = vadd.f32 %v3506_v44, %v3101_v7  ;;  %3945 = vst.msk [vmem:[#allocation3 + $0x8b] sm:$0xff] %vm3675_vm1, %v3917_v3  ;;  %v2647_v63 = vadd.f32 %v2597_v27, %v2192_v58  ;;  %v8702_v50 = vpop.permute.xlu2 %2977  ;;  %v1689_v27 = vmul.f32 %v8506_v33, %v10209_v52  ;;  %v10210_v58 = vld [vmem:[#allocation159_spill] sm:$0xff] }
 0x3f7   : > { %v1285_v36 = vadd.f32 %v1235_v49, %v780_v42  ;;  %v1236_v42 = vmul.f32 %v8488_v2, %v10212_v37 }
 0x3f8   : > { %v3610_v59 = vadd.f32 %v8558_v46, %v3556_v35  ;;  %v3102_v6 = vadd.f32 %v3052_v24, %v2647_v63  ;;  %v2599_v24 = vmul.f32 %v8527_v9, %v8663_v38  ;;  %v6514_v38 = vld [vmem:[%s9886_s3 + $0xb0] sm:$0xff] }
 0x3f9   : > { %v3403_v62 = vpop.permute.xlu1 %3402  ;;  %v3398_v19 = vpop.permute.xlu0 %3397  ;;  %v1740_v17 = vadd.f32 %v1690_v31, %v1285_v36  ;;  %4703 = vmatpush.msra.mxu1 %v6514_v38 }
 0x3fa   : > { %v3660_v51 = vmax.f32 %v3610_v59, 0.0  ;;  %v3505_v15 = vmul.f32 %v8550_v48, %v3403_v62  ;;  %v3504_v32 = vmul.f32 %v8550_v48, %v3398_v19  ;;  %v1234_v59 = vmul.f32 %v8488_v2, %v10204_v5 }
 0x3fc   : > { %3714 = vst.msk [vmem:[#allocation2 + $0x131] sm:$0xff] %vm3675_vm1, %v3660_v51  ;;  %v3555_v60 = vadd.f32 %v3505_v15, %v3100_v16  ;;  %v3554_v23 = vadd.f32 %v3504_v32, %v3099_v22  ;;  %v10206_v51 = vld [vmem:[#allocation37_spill] sm:$0xff] }
 0x3fd   : > { %v3999_v43 = vld [vmem:[#allocation3 + $0x81] ss:$2 sm:$0xff]  ;;  %v3969_v30 = vld [vmem:[#allocation3 + $0x80] ss:$2 sm:$0xff]  ;;  %v779_v16 = vmul.f32 %v8498_v0, %v10206_v51 }
 0x3fe   : > { %v3609_v4 = vadd.f32 %v8558_v46, %v3555_v60  ;;  %v4220_v18 = vld [vmem:[#allocation3 + $0x82] ss:$2 sm:$0xff]  ;;  %v3608_v54 = vadd.f32 %v8558_v46, %v3554_v23  ;;  %6443 = vmatmul.msk.f32.gmra.mxu0 %vm3675_vm1, %v3999_v43  ;;  %6456 = vmatmul.msk.f32.gmra.mxu1 %vm3675_vm1, %v3969_v30  ;;  %v4359_v12 = vld [vmem:[#allocation3 + $0x83] ss:$2 sm:$0xff]  ;;  %v10207_v15 = vld [vmem:[#allocation45_spill] sm:$0xff]  ;;  %v2195_v60 = vadd.f32 %v2145_v10, %v1740_v17  ;;  %v3428_v43 = vpop.permute.xlu2 %3427 }
 0x3ff   : > { %6473 = vmatmul.msk.f32.gmra.mxu2 %vm3675_vm1, %v4220_v18  ;;  %6490 = vmatmul.msk.f32.gmra.mxu3 %vm3675_vm1, %v4359_v12  ;;  %v778_v19 = vmul.f32 %v8498_v0, %v10207_v15  ;;  %v10208_v22 = vld [vmem:[#allocation117_spill] sm:$0xff]  ;;  %v1284_v53 = vadd.f32 %v1234_v59, %v779_v16  ;;  %v10211_v18 = vld [vmem:[#allocation166_spill] sm:$0xff]  ;;  %v10215_v59 = vld [vmem:[#allocation168_spill] sm:$0xff] }
 0x400   : > { %v3659_v41 = vmax.f32 %v3609_v4, 0.0  ;;  %v3658_v47 = vmax.f32 %v3608_v54, 0.0  ;;  %v1688_v32 = vmul.f32 %v8506_v33, %v10208_v22  ;;  %v2144_v4 = vmul.f32 %v8518_v8, %v10210_v58 }
 0x401   : > { %v2508_v40 = vpop.permute.xlu1 %2507  ;;  %v3413_v20 = vpop.permute.xlu0 %3412  ;;  %v1283_v23 = vadd.f32 %v1233_v61, %v778_v19  ;;  %v2143_v54 = vmul.f32 %v8518_v8, %v10211_v18  ;;  %v2146_v29 = vmul.f32 %v8518_v8, %v10215_v59 }
 0x402   : > { %3713 = vst.msk [vmem:[#allocation2 + $0x129] sm:$0xff] %vm3675_vm1, %v3659_v41  ;;  %v3507_v28 = vmul.f32 %v8550_v48, %v3413_v20  ;;  %v2598_v13 = vmul.f32 %v8527_v9, %v2508_v40  ;;  %v10214_v40 = vld [vmem:[#allocation120_spill] sm:$0xff] }
 0x403   : > { %3712 = vst.msk [vmem:[#allocation2 + $0x121] sm:$0xff] %vm3675_vm1, %v3658_v47  ;;  %v1738_v41 = vadd.f32 %v1688_v32, %v1283_v23  ;;  %v1739_v47 = vadd.f32 %v1689_v27, %v1284_v53  ;;  %v1691_v39 = vmul.f32 %v8506_v33, %v10214_v40 }
 0x404   : > { %v3557_v56 = vadd.f32 %v3507_v28, %v3102_v6 }
 0x405   : > { %v2194_v1 = vadd.f32 %v2144_v4, %v1739_v47  ;;  %v10216_v4 = vld [vmem:[#allocation88_spill] sm:$0xff]  ;;  %v10218_v47 = vld [vmem:[#allocation130_spill] sm:$0xff] }
 0x406   : > { %v3611_v44 = vadd.f32 %v8558_v46, %v3557_v56  ;;  %v3510_v56 = vmul.f32 %v8550_v48, %v3428_v43  ;;  %v1237_v43 = vmul.f32 %v8488_v2, %v10216_v4  ;;  %v1692_v2 = vmul.f32 %v8506_v33, %v10218_v47  ;;  %v6513_v33 = vld [vmem:[%s9886_s3 + $0xa8] sm:$0xff]  ;;  %v2528_v37 = vpop.permute.xlu2 %2527 }
 0x407   : > { %v2649_v10 = vadd.f32 %v2599_v24, %v2194_v1  ;;  %v3056_v24 = vmul.f32 %v8541_v26, %v8702_v50  ;;  %4704 = vmatpush.msra.mxu1 %v6513_v33  ;;  %v4345_v47 = vld [vmem:[#allocation3 + $0x13] ss:$2 sm:$0xff] }
 0x408   : > { %v3661_v57 = vmax.f32 %v3611_v44, 0.0 }
 0x409   : > { %v8707_v7 = vpop.permute.xlu1 %2522  ;;  %v2518_v35 = vpop.permute.xlu0 %2517 }
 0x40a   : > { %v3762_v3 = vld [vmem:[#allocation2 + $0x120] ss:$2 sm:$0xff]  ;;  %v3812_v14 = vld [vmem:[#allocation2 + $0x121] ss:$2 sm:$0xff]  ;;  %3715 = vst.msk [vmem:[#allocation2 + $0x139] sm:$0xff] %vm3675_vm1, %v3661_v57  ;;  %v2600_v34 = vmul.f32 %v8527_v9, %v2518_v35  ;;  %v2193_v57 = vadd.f32 %v2143_v54, %v1738_v41  ;;  %v2601_v19 = vmul.f32 %v8527_v9, %v8707_v7 }
 0x40b   : > { %v3843_v45 = vmax.f32 %v3762_v3, %v3812_v14  ;;  %v3887_v55 = vld [vmem:[#allocation2 + $0x122] ss:$2 sm:$0xff] }
 0x40c   : > { %v2650_v12 = vadd.f32 %v2600_v34, %v2195_v60 }
 0x40d   : > { %v3918_v62 = vmax.f32 %v3843_v45, %v3887_v55  ;;  %v10213_v45 = vld [vmem:[#allocation47_spill] sm:$0xff]  ;;  %v2648_v55 = vadd.f32 %v2598_v13, %v2193_v57 }
 0x40e   : > { %v781_v36 = vmul.f32 %v8498_v0, %v10213_v45 }
 0x40f   : > { %3946 = vst.msk [vmem:[#allocation3 + $0x93] sm:$0xff] %vm3675_vm1, %v3918_v62  ;;  %v3053_v62 = vmul.f32 %v8541_v26, %v8689_v25 }
 0x410   : > { %v1286_v5 = vadd.f32 %v1236_v42, %v781_v36 }
 0x411   : > { %v2973_v30 = vpop.permute.xlu1 %2972  ;;  %v2968_v20 = vpop.permute.xlu0 %2967  ;;  %v3764_v6 = vld [vmem:[#allocation2 + $0x130] ss:$2 sm:$0xff]  ;;  %v3814_v28 = vld [vmem:[#allocation2 + $0x131] ss:$2 sm:$0xff]  ;;  %v3103_v32 = vadd.f32 %v3053_v62, %v2648_v55  ;;  %v6512_v62 = vld [vmem:[%s9886_s3 + $0xa0] sm:$0xff] }
 0x412   : > { %v3055_v63 = vmul.f32 %v8541_v26, %v2973_v30  ;;  %v3844_v44 = vmax.f32 %v3764_v6, %v3814_v28  ;;  %v3889_v31 = vld [vmem:[#allocation2 + $0x132] ss:$2 sm:$0xff]  ;;  %v3054_v14 = vmul.f32 %v8541_v26, %v2968_v20  ;;  %v1741_v16 = vadd.f32 %v1691_v39, %v1286_v5  ;;  %4705 = vmatpush.msra.mxu1 %v6512_v62 }
 0x414   : > { %v3105_v49 = vadd.f32 %v3055_v63, %v2650_v12  ;;  %v3919_v35 = vmax.f32 %v3844_v44, %v3889_v31  ;;  %v3104_v34 = vadd.f32 %v3054_v14, %v2649_v10  ;;  %v2196_v27 = vadd.f32 %v2146_v29, %v1741_v16  ;;  %v10217_v63 = vld [vmem:[#allocation40_spill] sm:$0xff] }
 0x415   : > { %v782_v41 = vmul.f32 %v8498_v0, %v10217_v63  ;;  %v6530_v0 = vld [vmem:[%s9886_s3 + $0xc8] sm:$0xff]  ;;  %v8829_v63 = vpop.f32.mrf.mxu0 }
 0x416   : > { %v3560_v3 = vadd.f32 %v3510_v56, %v3105_v49  ;;  %3947 = vst.msk [vmem:[#allocation3 + $0x9b] sm:$0xff] %vm3675_vm1, %v3919_v35  ;;  %v2651_v30 = vadd.f32 %v2601_v19, %v2196_v27  ;;  %4843 = vmatpush.msrb.mxu2 %v6530_v0  ;;  %v6497_v19 = vld [vmem:[%s9886_s3 + $0x90] sm:$0xff] }
 0x417   : > { %v1287_v28 = vadd.f32 %v1237_v43, %v782_v41 }
 0x418   : > { %v3614_v21 = vadd.f32 %v8558_v46, %v3560_v3  ;;  %v3106_v13 = vadd.f32 %v3056_v24, %v2651_v30  ;;  %v8823_v30 = vpop.f32.mrf.mxu1  ;;  %v4760_v24 = vld [vmem:[#allocation3 + $0x6] ss:$2 sm:$0xff] }
 0x419   : > { %v3423_v61 = vpop.permute.xlu1 %3422  ;;  %v3418_v15 = vpop.permute.xlu0 %3417  ;;  %v1742_v50 = vadd.f32 %v1692_v2, %v1287_v28  ;;  %v4621_v2 = vld [vmem:[#allocation3 + $0x5] ss:$2 sm:$0xff] }
 0x41a   : > { %v3664_v17 = vmax.f32 %v3614_v21, 0.0  ;;  %v3509_v51 = vmul.f32 %v8550_v48, %v3423_v61  ;;  %v3508_v52 = vmul.f32 %v8550_v48, %v3418_v15 }
 0x41c   : > { %3718 = vst.msk [vmem:[#allocation2 + $0x151] sm:$0xff] %vm3675_vm1, %v3664_v17  ;;  %v3559_v22 = vadd.f32 %v3509_v51, %v3104_v34  ;;  %v3558_v53 = vadd.f32 %v3508_v52, %v3103_v32 }
 0x41d   : > { %v4001_v25 = vld [vmem:[#allocation3 + $0x91] ss:$2 sm:$0xff]  ;;  %v3971_v23 = vld [vmem:[#allocation3 + $0x90] ss:$2 sm:$0xff] }
 0x41e   : > { %v3613_v60 = vadd.f32 %v8558_v46, %v3559_v22  ;;  %v4222_v58 = vld [vmem:[#allocation3 + $0x92] ss:$2 sm:$0xff]  ;;  %v3612_v7 = vadd.f32 %v8558_v46, %v3558_v53  ;;  %6444 = vmatmul.msk.f32.gmra.mxu0 %vm3675_vm1, %v4001_v25  ;;  %6457 = vmatmul.msk.f32.gmra.mxu1 %vm3675_vm1, %v3971_v23  ;;  %v4361_v54 = vld [vmem:[#allocation3 + $0x93] ss:$2 sm:$0xff]  ;;  %v6495_v25 = vld [vmem:[%s9886_s3 + $0x80] sm:$0xff] }
 0x41f   : > { %6474 = vmatmul.msk.f32.gmra.mxu2 %vm3675_vm1, %v4222_v58  ;;  %6491 = vmatmul.msk.f32.gmra.mxu3 %vm3675_vm1, %v4361_v54  ;;  %v6496_v22 = vld [vmem:[%s9886_s3 + $0x88] sm:$0xff]  ;;  %v4228_v54 = vld [vmem:[#allocation3 + $0xc2] ss:$2 sm:$0xf] }
 0x420   : > { %v3663_v18 = vmax.f32 %v3613_v60, 0.0  ;;  %v3662_v20 = vmax.f32 %v3612_v7, 0.0  ;;  %v4343_v7 = vld [vmem:[#allocation3 + $0x3] ss:$2 sm:$0xff]  ;;  %v8831_v41 = vpop.f32.mrf.mxu1 }
 0x421   : > { %v2073_v12 = vpop.permute.xlu1 %2072  ;;  %v3433_v6 = vpop.permute.xlu0 %3432 }
 0x422   : > { %3717 = vst.msk [vmem:[#allocation2 + $0x149] sm:$0xff] %vm3675_vm1, %v3663_v18  ;;  %v2147_v56 = vmul.f32 %v8518_v8, %v2073_v12  ;;  %v3511_v49 = vmul.f32 %v8550_v48, %v3433_v6  ;;  %v2602_v8 = vmul.f32 %v8527_v9, %v2528_v37  ;;  %v3977_v18 = vld [vmem:[#allocation3 + $0xc0] ss:$2 sm:$0xf]  ;;  %v8838_v6 = vpop.f32.mrf.mxu0  ;;  %v4625_v37 = vld [vmem:[#allocation3 + $0x25] ss:$2 sm:$0xff] }
 0x423   : > { %3716 = vst.msk [vmem:[#allocation2 + $0x141] sm:$0xff] %vm3675_vm1, %v3662_v20  ;;  %v4367_v12 = vld [vmem:[#allocation3 + $0xc3] ss:$2 sm:$0xf]  ;;  %v8836_v20 = vpop.f32.mrf.mxu2 }
 0x424   : > { %v3561_v44 = vadd.f32 %v3511_v49, %v3106_v13  ;;  %v2197_v42 = vadd.f32 %v2147_v56, %v1742_v50  ;;  %v4482_v56 = vld [vmem:[#allocation3 + $0x4] ss:$2 sm:$0xff]  ;;  %v4623_v13 = vld [vmem:[#allocation3 + $0x15] ss:$2 sm:$0xff] }
 0x425   : > { %v4762_v49 = vld [vmem:[#allocation3 + $0x16] ss:$2 sm:$0xff] }
 0x426   : > { %v3615_v1 = vadd.f32 %v8558_v46, %v3561_v44  ;;  %v2652_v38 = vadd.f32 %v2602_v8, %v2197_v42  ;;  %v4484_v44 = vld [vmem:[#allocation3 + $0x14] ss:$2 sm:$0xff] }
 0x427   : > { %v4764_v42 = vld [vmem:[#allocation3 + $0x26] ss:$2 sm:$0xff] }
 0x428   : > { %v3665_v31 = vmax.f32 %v3615_v1, 0.0  ;;  %v8840_v28 = vpop.f32.mrf.mxu1 }
 0x429   : > { %v3438_v57 = vpop.permute.xlu1 %3437  ;;  %v2983_v3 = vpop.permute.xlu0 %2982 }
 0x42a   : > { %v3766_v14 = vld [vmem:[#allocation2 + $0x140] ss:$2 sm:$0xff]  ;;  %v3816_v35 = vld [vmem:[#allocation2 + $0x141] ss:$2 sm:$0xff]  ;;  %3719 = vst.msk [vmem:[#allocation2 + $0x159] sm:$0xff] %vm3675_vm1, %v3665_v31  ;;  %v3057_v45 = vmul.f32 %v8541_v26, %v2983_v3  ;;  %v3512_v39 = vmul.f32 %v8550_v48, %v3438_v57  ;;  %v8847_v33 = vpop.f32.mrf.mxu0 }
 0x42b   : > { %v3845_v36 = vmax.f32 %v3766_v14, %v3816_v35  ;;  %v3891_v40 = vld [vmem:[#allocation2 + $0x142] ss:$2 sm:$0xff]  ;;  %v8845_v0 = vpop.f32.mrf.mxu2  ;;  %v4627_v3 = vld [vmem:[#allocation3 + $0x35] ss:$2 sm:$0xff] }
 0x42c   : > { %v3107_v10 = vadd.f32 %v3057_v45, %v2652_v38  ;;  %v6529_v26 = vld [vmem:[%s9886_s3 + $0xc0] sm:$0xff]  ;;  %v4766_v14 = vld [vmem:[#allocation3 + $0x36] ss:$2 sm:$0xff] }
 0x42d   : > { %v3920_v55 = vmax.f32 %v3845_v36, %v3891_v40  ;;  %4844 = vmatpush.msrb.mxu2 %v6529_v26  ;;  %v4486_v57 = vld [vmem:[#allocation3 + $0x24] ss:$2 sm:$0xff]  ;;  %v4488_v36 = vld [vmem:[#allocation3 + $0x34] ss:$2 sm:$0xff]  ;;  %v4629_v40 = vld [vmem:[#allocation3 + $0x45] ss:$2 sm:$0xff] }
 0x42e   : > { %v3562_v21 = vadd.f32 %v3512_v39, %v3107_v10  ;;  %v4768_v39 = vld [vmem:[#allocation3 + $0x46] ss:$2 sm:$0xff] }
 0x42f   : > { %3948 = vst.msk [vmem:[#allocation3 + $0xa3] sm:$0xff] %vm3675_vm1, %v3920_v55  ;;  %v4492_v26 = vld [vmem:[#allocation3 + $0x54] ss:$2 sm:$0xff] }
 0x430   : > { %v3616_v9 = vadd.f32 %v8558_v46, %v3562_v21  ;;  %v6498_v46 = vld [vmem:[%s9886_s3 + $0x98] sm:$0xff]  ;;  %v8849_v50 = vpop.f32.mrf.mxu1 }
 0x431   : > { %v3768_v5 = vld [vmem:[#allocation2 + $0x150] ss:$2 sm:$0xff]  ;;  %v3818_v59 = vld [vmem:[#allocation2 + $0x151] ss:$2 sm:$0xff]  ;;  %4563 = vmatpush.msra.mxu0 %v6498_v46 }
 0x432   : > { %v3666_v29 = vmax.f32 %v3616_v9, 0.0  ;;  %v3846_v61 = vmax.f32 %v3768_v5, %v3818_v59  ;;  %v3893_v48 = vld [vmem:[#allocation2 + $0x152] ss:$2 sm:$0xff]  ;;  %v8856_v8 = vpop.f32.mrf.mxu0  ;;  %v4631_v5 = vld [vmem:[#allocation3 + $0x55] ss:$2 sm:$0xff] }
 0x433   : > { %4564 = vmatpush.msra.mxu0 %v6497_v19  ;;  %v8854_v1 = vpop.f32.mrf.mxu2  ;;  %v4490_v9 = vld [vmem:[#allocation3 + $0x44] ss:$2 sm:$0xff] }
 0x434   : > { %3720 = vst.msk [vmem:[#allocation2 + $0x161] sm:$0xff] %vm3675_vm1, %v3666_v29  ;;  %v3921_v17 = vmax.f32 %v3846_v61, %v3893_v48  ;;  %v4770_v59 = vld [vmem:[#allocation3 + $0x56] ss:$2 sm:$0xff]  ;;  %v4633_v48 = vld [vmem:[#allocation3 + $0x65] ss:$2 sm:$0xff] }
 0x435   : > { %4565 = vmatpush.msra.mxu0 %v6496_v22  ;;  %v4774_v19 = vld [vmem:[#allocation3 + $0x76] ss:$2 sm:$0xff] }
 0x436   : > { %3949 = vst.msk [vmem:[#allocation3 + $0xab] sm:$0xff] %vm3675_vm1, %v3921_v17  ;;  %v4772_v17 = vld [vmem:[#allocation3 + $0x66] ss:$2 sm:$0xff] }
 0x437   : > { %4566 = vmatpush.msra.mxu0 %v6495_v25 }
 0x438   : > { %v8858_v31 = vpop.f32.mrf.mxu1 }
 0x43a   : > { %v8865_v38 = vpop.f32.mrf.mxu0 }
 0x43b   : > { %v3770_v34 = vld [vmem:[#allocation2 + $0x160] ss:$2 sm:$0xff]  ;;  %v3820_v51 = vld [vmem:[#allocation2 + $0x161] ss:$2 sm:$0xff]  ;;  %v8863_v35 = vpop.f32.mrf.mxu2 }
 0x43c   : > { %v3847_v16 = vmax.f32 %v3770_v34, %v3820_v51  ;;  %v3895_v15 = vld [vmem:[#allocation2 + $0x162] ss:$2 sm:$0xff] }
 0x43d   : > { %v4003_v32 = vld [vmem:[#allocation3 + $0xa1] ss:$2 sm:$0xff]  ;;  %v3973_v52 = vld [vmem:[#allocation3 + $0xa0] ss:$2 sm:$0xff] }
 0x43e   : > { %v4224_v27 = vld [vmem:[#allocation3 + $0xa2] ss:$2 sm:$0xff]  ;;  %6445 = vmatmul.msk.f32.gmra.mxu0 %vm3675_vm1, %v4003_v32  ;;  %6458 = vmatmul.msk.f32.gmra.mxu1 %vm3675_vm1, %v3973_v52  ;;  %v4363_v60 = vld [vmem:[#allocation3 + $0xa3] ss:$2 sm:$0xff]  ;;  %v3922_v53 = vmax.f32 %v3847_v16, %v3895_v15 }
 0x43f   : > { %6475 = vmatmul.msk.f32.gmra.mxu2 %vm3675_vm1, %v4224_v27  ;;  %6492 = vmatmul.msk.f32.gmra.mxu3 %vm3675_vm1, %v4363_v60  ;;  %v4494_v16 = vld [vmem:[#allocation3 + $0x64] ss:$2 sm:$0xff]  ;;  %v4635_v15 = vld [vmem:[#allocation3 + $0x75] ss:$2 sm:$0xff]  ;;  %v4496_v27 = vld [vmem:[#allocation3 + $0x74] ss:$2 sm:$0xff] }
 0x440   : > { %3950 = vst.msk [vmem:[#allocation3 + $0xb3] sm:$0xff] %vm3675_vm1, %v3922_v53  ;;  %v8867_v45 = vpop.f32.mrf.mxu1  ;;  %v4637_v60 = vld [vmem:[#allocation3 + $0x85] ss:$2 sm:$0xff]  ;;  %v4776_v53 = vld [vmem:[#allocation3 + $0x86] ss:$2 sm:$0xff] }
 0x442   : > { %v8874_v55 = vpop.f32.mrf.mxu0 }
 0x443   : > { %v8872_v10 = vpop.f32.mrf.mxu2 }
 0x447   : > { %v4005_v23 = vld [vmem:[#allocation3 + $0xb1] ss:$2 sm:$0xff]  ;;  %v3975_v58 = vld [vmem:[#allocation3 + $0xb0] ss:$2 sm:$0xff] }
 0x448   : > { %v4226_v4 = vld [vmem:[#allocation3 + $0xb2] ss:$2 sm:$0xff]  ;;  %6446 = vmatmul.msk.f32.gmra.mxu0 %vm3675_vm1, %v4005_v23  ;;  %6459 = vmatmul.msk.f32.gmra.mxu1 %vm3675_vm1, %v3975_v58  ;;  %v4365_v43 = vld [vmem:[#allocation3 + $0xb3] ss:$2 sm:$0xff]  ;;  %v8876_v21 = vpop.f32.mrf.mxu1 }
 0x449   : > { %6476 = vmatmul.msk.f32.gmra.mxu2 %vm3675_vm1, %v4226_v4  ;;  %6493 = vmatmul.msk.f32.gmra.mxu3 %vm3675_vm1, %v4365_v43  ;;  %v4498_v4 = vld [vmem:[#allocation3 + $0x84] ss:$2 sm:$0xff]  ;;  %v4639_v43 = vld [vmem:[#allocation3 + $0x95] ss:$2 sm:$0xff] }
 0x44a   : > { %v8883_v61 = vpop.f32.mrf.mxu0 }
 0x44b   : > { %v8881_v29 = vpop.f32.mrf.mxu2 }
 0x450   : > { %6460 = vmatmul.msk.f32.gmra.mxu1 %vm3675_vm1, %v3977_v18  ;;  %6482 = vmatmul.msk.f32.vlgmr.msrb.gmra.mxu0 %vm3675_vm1, %v4343_v7  ;;  %v8885_v62 = vpop.f32.mrf.mxu1  ;;  %v4778_v18 = vld [vmem:[#allocation3 + $0x96] ss:$2 sm:$0xff] }
 0x451   : > { %6477 = vmatmul.msk.f32.gmra.mxu2 %vm3675_vm1, %v4228_v54  ;;  %6494 = vmatmul.msk.f32.gmra.mxu3 %vm3675_vm1, %v4367_v12 }
 0x453   : > { %v8890_v46 = vpop.f32.mrf.mxu2 }
 0x458   : > { %6483 = vmatmul.msk.f32.gmra.mxu0 %vm3675_vm1, %v4345_v47  ;;  %6516 = vmatmul.msk.f32.vlgmr.msra.gmra.mxu1 %vm3675_vm1, %v4621_v2  ;;  %v4500_v47 = vld [vmem:[#allocation3 + $0x94] ss:$2 sm:$0xff]  ;;  %v4641_v2 = vld [vmem:[#allocation3 + $0xa5] ss:$2 sm:$0xff] }
 0x459   : > { %6533 = vmatmul.msk.f32.vlgmr.msrb.gmra.mxu2 %vm3675_vm1, %v4760_v24  ;;  %v4780_v24 = vld [vmem:[#allocation3 + $0xa6] ss:$2 sm:$0xff] }
 0x45b   : > { %v8892_v34 = vpop.f32.mrf.mxu0  ;;  %v8894_v51 = vpop.f32.mrf.mxu1 }
 0x460   : > { %6499 = vmatmul.msk.f32.vlgmr.msra.gmra.mxu0 %vm3675_vm1, %v4482_v56  ;;  %6517 = vmatmul.msk.f32.gmra.mxu1 %vm3675_vm1, %v4623_v13  ;;  %v4502_v56 = vld [vmem:[#allocation3 + $0xa4] ss:$2 sm:$0xff]  ;;  %v4643_v13 = vld [vmem:[#allocation3 + $0xb5] ss:$2 sm:$0xff] }
 0x461   : > { %6534 = vmatmul.msk.f32.gmra.mxu2 %vm3675_vm1, %v4762_v49  ;;  %v4782_v49 = vld [vmem:[#allocation3 + $0xb6] ss:$2 sm:$0xff] }
 0x462   : > { %v8899_v22 = vpop.f32.mrf.mxu2 }
 0x468   : > { %6500 = vmatmul.msk.f32.gmra.mxu0 %vm3675_vm1, %v4484_v44  ;;  %6518 = vmatmul.msk.f32.gmra.mxu1 %vm3675_vm1, %v4625_v37  ;;  %v4504_v44 = vld [vmem:[#allocation3 + $0xb4] ss:$2 sm:$0xff]  ;;  %v4645_v37 = vld [vmem:[#allocation3 + $0xc5] ss:$2 sm:$0xf] }
 0x469   : > { %6535 = vmatmul.msk.f32.gmra.mxu2 %vm3675_vm1, %v4764_v42  ;;  %v4784_v42 = vld [vmem:[#allocation3 + $0xc6] ss:$2 sm:$0xf] }
 0x470   : > { %6501 = vmatmul.msk.f32.gmra.mxu0 %vm3675_vm1, %v4486_v57  ;;  %6519 = vmatmul.msk.f32.gmra.mxu1 %vm3675_vm1, %v4627_v3 }
 0x471   : > { %6536 = vmatmul.msk.f32.gmra.mxu2 %vm3675_vm1, %v4766_v14 }
 0x478   : > { %6502 = vmatmul.msk.f32.gmra.mxu0 %vm3675_vm1, %v4488_v36  ;;  %6520 = vmatmul.msk.f32.gmra.mxu1 %vm3675_vm1, %v4629_v40  ;;  %v4506_v36 = vld [vmem:[#allocation3 + $0xc4] ss:$2 sm:$0xf] }
 0x479   : > { %6537 = vmatmul.msk.f32.gmra.mxu2 %vm3675_vm1, %v4768_v39 }
 0x47b   : > { %v8901_v32 = vpop.f32.mrf.mxu0  ;;  %v8903_v52 = vpop.f32.mrf.mxu1 }
 0x480   : > { %6503 = vmatmul.msk.f32.gmra.mxu0 %vm3675_vm1, %v4490_v9  ;;  %6521 = vmatmul.msk.f32.gmra.mxu1 %vm3675_vm1, %v4631_v5 }
 0x481   : > { %6538 = vmatmul.msk.f32.gmra.mxu2 %vm3675_vm1, %v4770_v59 }
 0x482   : > { %v8908_v25 = vpop.f32.mrf.mxu2 }
 0x488   : > { %6504 = vmatmul.msk.f32.gmra.mxu0 %vm3675_vm1, %v4492_v26  ;;  %6522 = vmatmul.msk.f32.gmra.mxu1 %vm3675_vm1, %v4633_v48 }
 0x489   : > { %6539 = vmatmul.msk.f32.gmra.mxu2 %vm3675_vm1, %v4772_v17 }
 0x490   : > { %6505 = vmatmul.msk.f32.gmra.mxu0 %vm3675_vm1, %v4494_v16  ;;  %6523 = vmatmul.msk.f32.gmra.mxu1 %vm3675_vm1, %v4635_v15 }
 0x491   : > { %6540 = vmatmul.msk.f32.gmra.mxu2 %vm3675_vm1, %v4774_v19 }
 0x498   : > { %6506 = vmatmul.msk.f32.gmra.mxu0 %vm3675_vm1, %v4496_v27  ;;  %6524 = vmatmul.msk.f32.gmra.mxu1 %vm3675_vm1, %v4637_v60 }
 0x499   : > { %6541 = vmatmul.msk.f32.gmra.mxu2 %vm3675_vm1, %v4776_v53 }
 0x49b   : > { %v4096_v23 = vpop.f32.mrf.mxu0  ;;  %v4191_v58 = vpop.f32.mrf.mxu1 }
 0x49c   : > { %v4192_v7 = vadd.f32 %v4191_v58, %v4096_v23  ;;  %v4165_v23 = vadd.f32 %v8831_v41, %v8829_v63 }
 0x49e   : > { %v4329_v58 = vadd.f32 %v8836_v20, %v4165_v23  ;;  %v6589_v23 = vld [vmem:[%s9888_s5 + $0x118] sm:$0xff] }
 0x4a0   : > { %6507 = vmatmul.msk.f32.gmra.mxu0 %vm3675_vm1, %v4498_v4  ;;  %6525 = vmatmul.msk.f32.gmra.mxu1 %vm3675_vm1, %v4639_v43 }
 0x4a1   : > { %6542 = vmatmul.msk.f32.gmra.mxu2 %vm3675_vm1, %v4778_v18 }
 0x4a2   : > { %v4317_v54 = vpop.f32.mrf.mxu2 }
 0x4a3   : > { %v8913_v12 = vadd.f32 %v4317_v54, %v4192_v7 }
 0x4a8   : > { %6508 = vmatmul.msk.f32.gmra.mxu0 %vm3675_vm1, %v4500_v47  ;;  %6526 = vmatmul.msk.f32.gmra.mxu1 %vm3675_vm1, %v4641_v2  ;;  %v4168_v47 = vadd.f32 %v8840_v28, %v8838_v6 }
 0x4a9   : > { %6543 = vmatmul.msk.f32.gmra.mxu2 %vm3675_vm1, %v4780_v24 }
 0x4aa   : > { %v4330_v24 = vadd.f32 %v8845_v0, %v4168_v47  ;;  %v6593_v0 = vld [vmem:[%s9888_s5 + $0x138] sm:$0xff] }
 0x4ab   : > { %5287 = vmatpush.msrb.mxu0 %v6593_v0 }
 0x4b0   : > { %6509 = vmatmul.msk.f32.gmra.mxu0 %vm3675_vm1, %v4502_v56  ;;  %6527 = vmatmul.msk.f32.gmra.mxu1 %vm3675_vm1, %v4643_v13 }
 0x4b1   : > { %6544 = vmatmul.msk.f32.gmra.mxu2 %vm3675_vm1, %v4782_v49 }
 0x4b8   : > { %6510 = vmatmul.msk.f32.gmra.mxu0 %vm3675_vm1, %v4504_v44  ;;  %6528 = vmatmul.msk.f32.gmra.mxu1 %vm3675_vm1, %v4645_v37  ;;  %v4171_v44 = vadd.f32 %v8849_v50, %v8847_v33  ;;  %v6553_v37 = vld [vmem:[%s9888_s5 + $0x78] sm:$0xff]  ;;  %v6552_v33 = vld [vmem:[%s9888_s5 + $0x70] sm:$0xff] }
 0x4b9   : > { %6545 = vmatmul.msk.f32.gmra.mxu2 %vm3675_vm1, %v4784_v42  ;;  %5064 = vmatpush.msrb.mxu3 %v6553_v37  ;;  %v6592_v50 = vld [vmem:[%s9888_s5 + $0x130] sm:$0xff] }
 0x4ba   : > { %v4331_v42 = vadd.f32 %v8854_v1, %v4171_v44  ;;  %5288 = vmatpush.msrb.mxu0 %v6592_v50  ;;  %v6591_v1 = vld [vmem:[%s9888_s5 + $0x128] sm:$0xff]  ;;  %v6617_v44 = vld [vmem:[%s9888_s5 + $0x1b8] sm:$0xff] }
 0x4bb   : > { %v4099_v57 = vpop.f32.mrf.mxu0  ;;  %v4194_v3 = vpop.f32.mrf.mxu1  ;;  %5065 = vmatpush.msrb.mxu3 %v6552_v33  ;;  %5411 = vmatpush.msra.mxu2 %v6617_v44 }
 0x4bc   : > { %v4195_v14 = vadd.f32 %v4194_v3, %v4099_v57  ;;  %v4435_v3 = vpop.f32.mrf.mxu3  ;;  %5289 = vmatpush.msrb.mxu0 %v6591_v1 }
 0x4c0   : > { %6511 = vmatmul.msk.f32.gmra.mxu0 %vm3675_vm1, %v4506_v36  ;;  %v6551_v36 = vld [vmem:[%s9888_s5 + $0x68] sm:$0xff] }
 0x4c1   : > { %5066 = vmatpush.msrb.mxu3 %v6551_v36 }
 0x4c2   : > { %v4320_v40 = vpop.f32.mrf.mxu2 }
 0x4c3   : > { %v8925_v39 = vadd.f32 %v4320_v40, %v4195_v14  ;;  %v4470_v40 = vadd.f32 %v4435_v3, %v4331_v42  ;;  %v6616_v42 = vld [vmem:[%s9888_s5 + $0x1b0] sm:$0xff] }
 0x4c4   : > { %5412 = vmatpush.msra.mxu2 %v6616_v42 }
 0x4c5   : > { %v4102_v9 = vpop.f32.mrf.mxu0  ;;  %v4197_v5 = vpop.f32.mrf.mxu1 }
 0x4c6   : > { %v4198_v59 = vadd.f32 %v4197_v5, %v4102_v9 }
 0x4cc   : > { %v4323_v26 = vpop.f32.mrf.mxu2 }
 0x4cd   : > { %v8927_v48 = vadd.f32 %v4323_v26, %v4198_v59  ;;  %v4200_v17 = vpop.f32.mrf.mxu1  ;;  %v4429_v16 = vpop.f32.mrf.mxu0  ;;  %v6550_v59 = vld [vmem:[%s9888_s5 + $0x60] sm:$0xff] }
 0x4ce   : > { %v4201_v15 = vadd.f32 %v4200_v17, %v8823_v30  ;;  %v4468_v4 = vadd.f32 %v4429_v16, %v4329_v58  ;;  %v8942_v30 = vld [vmem:[%s9887_s4] ss:$0 sm:$0xff]  ;;  %5067 = vmatpush.msrb.mxu3 %v6550_v59 }
 0x4cf   : > { %v6590_v26 = vld [vmem:[%s9888_s5 + $0x120] sm:$0xff] }
 0x4d0   : > { %5290 = vmatpush.msrb.mxu0 %v6590_v26 }
 0x4d2   : > { %5291 = vmatpush.msrb.mxu0 %v6589_v23 }
 0x4d4   : > { %v4326_v19 = vpop.f32.mrf.mxu2 }
 0x4d5   : > { %v8932_v27 = vadd.f32 %v4326_v19, %v4201_v15  ;;  %v4432_v60 = vpop.f32.mrf.mxu0  ;;  %v4707_v53 = vpop.f32.mrf.mxu1  ;;  %v4174_v15 = vadd.f32 %v8858_v31, %v8856_v8  ;;  %v6548_v31 = vld [vmem:[%s9888_s5 + $0x50] sm:$0xff] }
 0x4d6   : > { %v4469_v63 = vadd.f32 %v4432_v60, %v4330_v24  ;;  %v6586_v24 = vld [vmem:[%s9888_s5 + $0x100] sm:$0xff] }
 0x4d7   : > { %v4332_v58 = vadd.f32 %v8863_v35, %v4174_v15  ;;  %v6587_v35 = vld [vmem:[%s9888_s5 + $0x108] sm:$0xff] }
 0x4dc   : > { %v4846_v43 = vpop.f32.mrf.mxu2 }
 0x4dd   : > { %v4568_v18 = vpop.f32.mrf.mxu0  ;;  %v4710_v7 = vpop.f32.mrf.mxu1 }
 0x4de   : > { %v4607_v54 = vadd.f32 %v4568_v18, %v4468_v4  ;;  %v6588_v4 = vld [vmem:[%s9888_s5 + $0x110] sm:$0xff] }
 0x4df   : > { %5292 = vmatpush.msrb.mxu0 %v6588_v4 }
 0x4e0   : > { %v4746_v2 = vadd.f32 %v4707_v53, %v4607_v54  ;;  %v6549_v53 = vld [vmem:[%s9888_s5 + $0x58] sm:$0xff] }
 0x4e1   : > { %5068 = vmatpush.msrb.mxu3 %v6549_v53  ;;  %5293 = vmatpush.msrb.mxu0 %v6587_v35  ;;  %v6610_v35 = vld [vmem:[%s9888_s5 + $0x180] sm:$0xff] }
 0x4e2   : > { %v4885_v56 = vadd.f32 %v4846_v43, %v4746_v2  ;;  %v4438_v43 = vpop.f32.mrf.mxu3  ;;  %v6546_v2 = vld [vmem:[%s9888_s5 + $0x40] sm:$0xff] }
 0x4e3   : > { %5069 = vmatpush.msrb.mxu3 %v6548_v31  ;;  %5294 = vmatpush.msrb.mxu0 %v6586_v24  ;;  %v6599_v31 = vld [vmem:[%s9888_s5 + $0x148] sm:$0xff] }
 0x4e4   : > { %v4902_v41 = vadd.f32 %v8942_v30, %v4885_v56  ;;  %v4849_v20 = vpop.f32.mrf.mxu2 }
 0x4e5   : > { %v4571_v13 = vpop.f32.mrf.mxu0  ;;  %v4713_v49 = vpop.f32.mrf.mxu1  ;;  %5070 = vmatpush.msrb.mxu3 %v6547_v11  ;;  %v6598_v11 = vld [vmem:[%s9888_s5 + $0x140] sm:$0xff] }
 0x4e6   : > { %v4915_v6 = vmax.f32 %v4902_v41, 0.0  ;;  %v4608_v28 = vadd.f32 %v4571_v13, %v4469_v63  ;;  %v4177_v41 = vadd.f32 %v8867_v45, %v8865_v38  ;;  %v6604_v45 = vld [vmem:[%s9888_s5 + $0x170] sm:$0xff] }
 0x4e7   : > { %5071 = vmatpush.msrb.mxu3 %v6546_v2 }
 0x4e8   : > { %4932 = vst.msk [vmem:[#allocation4 + $0x1] sm:$0xff] %vm4931_vm4, %v4915_v6  ;;  %v4747_v57 = vadd.f32 %v4710_v7, %v4608_v28  ;;  %v4471_v7 = vadd.f32 %v4438_v43, %v4332_v58  ;;  %v4333_v37 = vadd.f32 %v8872_v10, %v4177_v41  ;;  %v6603_v10 = vld [vmem:[%s9888_s5 + $0x168] sm:$0xff] }
 0x4ea   : > { %v4886_v14 = vadd.f32 %v4849_v20, %v4747_v57  ;;  %v4441_v57 = vpop.f32.mrf.mxu3 }
 0x4eb   : > { %v4472_v36 = vadd.f32 %v4441_v57, %v4333_v37 }
 0x4ec   : > { %v4903_v9 = vadd.f32 %v8942_v30, %v4886_v14  ;;  %v4852_v5 = vpop.f32.mrf.mxu2  ;;  %v6615_v14 = vld [vmem:[%s9888_s5 + $0x1a8] sm:$0xff] }
 0x4ed   : > { %v4574_v17 = vpop.f32.mrf.mxu0  ;;  %v4716_v16 = vpop.f32.mrf.mxu1  ;;  %5413 = vmatpush.msra.mxu2 %v6615_v14 }
 0x4ee   : > { %v4916_v19 = vmax.f32 %v4903_v9, 0.0  ;;  %v4609_v60 = vadd.f32 %v4574_v17, %v4470_v40  ;;  %v6602_v9 = vld [vmem:[%s9888_s5 + $0x160] sm:$0xff]  ;;  %v4180_v17 = vadd.f32 %v8876_v21, %v8874_v55  ;;  %v6600_v55 = vld [vmem:[%s9888_s5 + $0x150] sm:$0xff] }
 0x4ef   : > { %v6612_v21 = vld [vmem:[%s9888_s5 + $0x190] sm:$0xff] }
 0x4f0   : > { %4933 = vst.msk [vmem:[#allocation4 + $0x9] sm:$0xff] %vm4931_vm4, %v4916_v19  ;;  %v4748_v8 = vadd.f32 %v4713_v49, %v4609_v60  ;;  %v6605_v49 = vld [vmem:[%s9888_s5 + $0x178] sm:$0xff]  ;;  %v4334_v53 = vadd.f32 %v8881_v29, %v4180_v17  ;;  %v6611_v29 = vld [vmem:[%s9888_s5 + $0x188] sm:$0xff] }
 0x4f1   : > { %5349 = vmatpush.msrb.mxu1 %v6605_v49  ;;  %v6601_v19 = vld [vmem:[%s9888_s5 + $0x158] sm:$0xff] }
 0x4f2   : > { %v4887_v18 = vadd.f32 %v4852_v5, %v4748_v8  ;;  %v6614_v5 = vld [vmem:[%s9888_s5 + $0x1a0] sm:$0xff]  ;;  %v6613_v60 = vld [vmem:[%s9888_s5 + $0x198] sm:$0xff]  ;;  %v4444_v58 = vpop.f32.mrf.mxu3 }
 0x4f3   : > { %5350 = vmatpush.msrb.mxu1 %v6604_v45  ;;  %5414 = vmatpush.msra.mxu2 %v6614_v5  ;;  %v4473_v4 = vadd.f32 %v4444_v58, %v4334_v53  ;;  %v4186_v45 = vadd.f32 %v8894_v51, %v8892_v34  ;;  %v4189_v51 = vadd.f32 %v8903_v52, %v8901_v32 }
 0x4f4   : > { %v4904_v54 = vadd.f32 %v8942_v30, %v4887_v18  ;;  %v4855_v47 = vpop.f32.mrf.mxu2 }
 0x4f5   : > { %v4577_v56 = vpop.f32.mrf.mxu0  ;;  %v4719_v63 = vpop.f32.mrf.mxu1  ;;  %5351 = vmatpush.msrb.mxu1 %v6603_v10  ;;  %5415 = vmatpush.msra.mxu2 %v6613_v60  ;;  %v4336_v57 = vadd.f32 %v8899_v22, %v4186_v45  ;;  %v4337_v17 = vadd.f32 %v8908_v25, %v4189_v51 }
 0x4f6   : > { %v4917_v20 = vmax.f32 %v4904_v54, 0.0  ;;  %v4610_v13 = vadd.f32 %v4577_v56, %v4471_v7 }
 0x4f7   : > { %v4946_v6 = vld [vmem:[#allocation4] ss:$2 sm:$0xff]  ;;  %v4960_v28 = vld [vmem:[#allocation4 + $0x1] ss:$2 sm:$0xff]  ;;  %5352 = vmatpush.msrb.mxu1 %v6602_v9  ;;  %5416 = vmatpush.msra.mxu2 %v6612_v21 }
 0x4f8   : > { %4934 = vst.msk [vmem:[#allocation4 + $0x11] sm:$0xff] %vm4931_vm4, %v4917_v20  ;;  %v4749_v0 = vadd.f32 %v4716_v16, %v4610_v13  ;;  %v4973_v38 = vmax.f32 %v4946_v6, %v4960_v28  ;;  %v4981_v33 = vld [vmem:[#allocation4 + $0x2] ss:$2 sm:$0xff] }
 0x4f9   : > { %5353 = vmatpush.msrb.mxu1 %v6601_v19  ;;  %5417 = vmatpush.msra.mxu2 %v6611_v29 }
 0x4fa   : > { %v4888_v50 = vadd.f32 %v4855_v47, %v4749_v0  ;;  %v4994_v3 = vmax.f32 %v4973_v38, %v4981_v33  ;;  %v4183_v47 = vadd.f32 %v8885_v62, %v8883_v61  ;;  %v4447_v49 = vpop.f32.mrf.mxu3 }
 0x4fb   : > { %5354 = vmatpush.msrb.mxu1 %v6600_v55  ;;  %5418 = vmatpush.msra.mxu2 %v6610_v35 }
 0x4fc   : > { %v4905_v1 = vadd.f32 %v8942_v30, %v4888_v50  ;;  %v4858_v40 = vpop.f32.mrf.mxu2  ;;  %5004 = vst.msk [vmem:[#allocation5 + $0x3] sm:$0xff] %vm4931_vm4, %v4994_v3  ;;  %v4335_v41 = vadd.f32 %v8890_v46, %v4183_v47 }
 0x4fd   : > { %v4580_v59 = vpop.f32.mrf.mxu0  ;;  %v4722_v26 = vpop.f32.mrf.mxu1  ;;  %5355 = vmatpush.msrb.mxu1 %v6599_v31 }
 0x4fe   : > { %v4918_v16 = vmax.f32 %v4905_v1, 0.0  ;;  %v4611_v15 = vadd.f32 %v4580_v59, %v4472_v36  ;;  %v4474_v37 = vadd.f32 %v4447_v49, %v4335_v41 }
 0x4ff   : > { %5356 = vmatpush.msrb.mxu1 %v6598_v11 }
 0x500   : > { %4935 = vst.msk [vmem:[#allocation4 + $0x19] sm:$0xff] %vm4931_vm4, %v4918_v16  ;;  %v4750_v23 = vadd.f32 %v4719_v63, %v4611_v15 }
 0x502   : > { %v4889_v8 = vadd.f32 %v4858_v40, %v4750_v23  ;;  %v4450_v50 = vpop.f32.mrf.mxu3 }
 0x503   : > { %v4475_v36 = vadd.f32 %v4450_v50, %v4336_v57 }
 0x504   : > { %v4906_v43 = vadd.f32 %v8942_v30, %v4889_v8  ;;  %v4861_v18 = vpop.f32.mrf.mxu2 }
 0x505   : > { %v4583_v7 = vpop.f32.mrf.mxu0  ;;  %v4725_v54 = vpop.f32.mrf.mxu1 }
 0x506   : > { %v4919_v2 = vmax.f32 %v4906_v43, 0.0  ;;  %v4612_v24 = vadd.f32 %v4583_v7, %v4473_v4 }
 0x507   : > { %v4948_v56 = vld [vmem:[#allocation4 + $0x10] ss:$2 sm:$0xff]  ;;  %v4962_v63 = vld [vmem:[#allocation4 + $0x11] ss:$2 sm:$0xff] }
 0x508   : > { %4936 = vst.msk [vmem:[#allocation4 + $0x21] sm:$0xff] %vm4931_vm4, %v4919_v2  ;;  %v4751_v20 = vadd.f32 %v4722_v26, %v4612_v24  ;;  %v4974_v13 = vmax.f32 %v4948_v56, %v4962_v63  ;;  %v4983_v44 = vld [vmem:[#allocation4 + $0x12] ss:$2 sm:$0xff] }
 0x50a   : > { %v4890_v6 = vadd.f32 %v4861_v18, %v4751_v20  ;;  %v4995_v28 = vmax.f32 %v4974_v13, %v4983_v44  ;;  %v4453_v19 = vpop.f32.mrf.mxu3 }
 0x50b   : > { %v4476_v55 = vadd.f32 %v4453_v19, %v4337_v17 }
 0x50c   : > { %v4907_v0 = vadd.f32 %v8942_v30, %v4890_v6  ;;  %v4864_v38 = vpop.f32.mrf.mxu2  ;;  %5005 = vst.msk [vmem:[#allocation5 + $0xb] sm:$0xff] %vm4931_vm4, %v4995_v28 }
 0x50d   : > { %v4586_v61 = vpop.f32.mrf.mxu0  ;;  %v4728_v62 = vpop.f32.mrf.mxu1 }
 0x50e   : > { %v4920_v46 = vmax.f32 %v4907_v0, 0.0  ;;  %v4613_v42 = vadd.f32 %v4586_v61, %v4474_v37 }
 0x510   : > { %4937 = vst.msk [vmem:[#allocation4 + $0x29] sm:$0xff] %vm4931_vm4, %v4920_v46  ;;  %v4752_v33 = vadd.f32 %v4725_v54, %v4613_v42 }
 0x512   : > { %v4891_v3 = vadd.f32 %v4864_v38, %v4752_v33  ;;  %v4456_v31 = vpop.f32.mrf.mxu3 }
 0x513   : > { %v5028_v10 = vld [vmem:[#allocation5 + $0x1] ss:$2 sm:$0xff]  ;;  %v5251_v14 = vld [vmem:[#allocation5 + $0x4] ss:$2 sm:$0xff]  ;;  %v4477_v11 = vadd.f32 %v4456_v31, %v8913_v12 }
 0x514   : > { %v4908_v1 = vadd.f32 %v8942_v30, %v4891_v3  ;;  %v4867_v40 = vpop.f32.mrf.mxu2  ;;  %6554 = vmatmul.msk.f32.vlgmr.msrb.gmra.mxu3 %vm4931_vm4, %v5028_v10  ;;  %6594 = vmatmul.msk.f32.vlgmr.msrb.gmra.mxu0 %vm4931_vm4, %v5251_v14  ;;  %v5025_v3 = vld [vmem:[%s9888_s5 + $0x30] sm:$0xff] }
 0x515   : > { %v4589_v34 = vpop.f32.mrf.mxu0  ;;  %v4731_v26 = vpop.f32.mrf.mxu1 }
 0x516   : > { %v4921_v22 = vmax.f32 %v4908_v1, 0.0  ;;  %v4614_v9 = vadd.f32 %v4589_v34, %v4475_v36 }
 0x517   : > { %v4950_v5 = vld [vmem:[#allocation4 + $0x20] ss:$2 sm:$0xff]  ;;  %v4964_v59 = vld [vmem:[#allocation4 + $0x21] ss:$2 sm:$0xff] }
 0x518   : > { %v4975_v16 = vmax.f32 %v4950_v5, %v4964_v59  ;;  %4938 = vst.msk [vmem:[#allocation4 + $0x31] sm:$0xff] %vm4931_vm4, %v4921_v22  ;;  %v4753_v15 = vadd.f32 %v4728_v62, %v4614_v9  ;;  %v4985_v60 = vld [vmem:[#allocation4 + $0x22] ss:$2 sm:$0xff]  ;;  %v5023_v5 = vld [vmem:[%s9888_s5 + $0x20] sm:$0xff] }
 0x51a   : > { %v4996_v53 = vmax.f32 %v4975_v16, %v4985_v60  ;;  %v4892_v23 = vadd.f32 %v4867_v40, %v4753_v15  ;;  %v4459_v20 = vpop.f32.mrf.mxu3 }
 0x51b   : > { %v4478_v6 = vadd.f32 %v4459_v20, %v8925_v39  ;;  %v5026_v39 = vld [vmem:[%s9888_s5 + $0x38] sm:$0xff] }
 0x51c   : > { %5006 = vst.msk [vmem:[#allocation5 + $0x13] sm:$0xff] %vm4931_vm4, %v4996_v53  ;;  %v4909_v32 = vadd.f32 %v8942_v30, %v4892_v23  ;;  %v4870_v52 = vpop.f32.mrf.mxu2  ;;  %5105 = vmatpush.msra.mxu3 %v5026_v39  ;;  %v5022_v53 = vld [vmem:[%s9888_s5 + $0x18] sm:$0xff]  ;;  %v5021_v23 = vld [vmem:[%s9888_s5 + $0x10] sm:$0xff]  ;;  %v6578_v39 = vld [vmem:[%s9888_s5 + $0xe0] sm:$0xff] }
 0x51d   : > { %v4592_v21 = vpop.f32.mrf.mxu0  ;;  %v4734_v29 = vpop.f32.mrf.mxu1  ;;  %v6569_v20 = vld [vmem:[%s9888_s5 + $0xb8] sm:$0xff] }
 0x51e   : > { %v4922_v58 = vmax.f32 %v4909_v32, 0.0  ;;  %v4615_v8 = vadd.f32 %v4592_v21, %v4476_v55  ;;  %5106 = vmatpush.msra.mxu3 %v5025_v3 }
 0x520   : > { %4939 = vst.msk [vmem:[#allocation4 + $0x39] sm:$0xff] %vm4931_vm4, %v4922_v58  ;;  %v4754_v25 = vadd.f32 %v4731_v26, %v4615_v8 }
 0x522   : > { %v4893_v4 = vadd.f32 %v4870_v52, %v4754_v25  ;;  %v4462_v45 = vpop.f32.mrf.mxu3  ;;  %v5019_v25 = vld [vmem:[%s9888_s5] sm:$0xff] }
 0x523   : > { %v5313_v43 = vld [vmem:[#allocation5 + $0x5] ss:$2 sm:$0xff]  ;;  %v5375_v18 = vld [vmem:[#allocation5 + $0x6] ss:$2 sm:$0xff]  ;;  %v4479_v33 = vadd.f32 %v4462_v45, %v8927_v48  ;;  %v5024_v48 = vld [vmem:[%s9888_s5 + $0x28] sm:$0xff] }
 0x524   : > { %v4910_v35 = vadd.f32 %v8942_v30, %v4893_v4  ;;  %v4873_v7 = vpop.f32.mrf.mxu2  ;;  %6606 = vmatmul.msk.f32.vlgmr.msrb.gmra.mxu1 %vm4931_vm4, %v5313_v43  ;;  %6618 = vmatmul.msk.f32.vlgmr.msra.gmra.mxu2 %vm4931_vm4, %v5375_v18  ;;  %v5012_v45 = vld [vmem:[#allocation5] ss:$2 sm:$0xff] }
 0x525   : > { %v4595_v54 = vpop.f32.mrf.mxu0  ;;  %v4737_v44 = vpop.f32.mrf.mxu1  ;;  %5107 = vmatpush.msra.mxu3 %v5024_v48  ;;  %v5127_v48 = vld [vmem:[#allocation5 + $0x2] ss:$2 sm:$0xff] }
 0x526   : > { %v4923_v47 = vmax.f32 %v4910_v35, 0.0  ;;  %v4616_v2 = vadd.f32 %v4595_v54, %v4477_v11 }
 0x527   : > { %v4952_v24 = vld [vmem:[#allocation4 + $0x30] ss:$2 sm:$0xff]  ;;  %v4966_v56 = vld [vmem:[#allocation4 + $0x31] ss:$2 sm:$0xff]  ;;  %5108 = vmatpush.msra.mxu3 %v5023_v5 }
 0x528   : > { %4940 = vst.msk [vmem:[#allocation4 + $0x41] sm:$0xff] %vm4931_vm4, %v4923_v47  ;;  %v4755_v63 = vadd.f32 %v4734_v29, %v4616_v2  ;;  %v4976_v41 = vmax.f32 %v4952_v24, %v4966_v56  ;;  %v4987_v13 = vld [vmem:[#allocation4 + $0x32] ss:$2 sm:$0xff]  ;;  %v5189_v5 = vld [vmem:[#allocation5 + $0x3] ss:$2 sm:$0xff] }
 0x529   : > { %5109 = vmatpush.msra.mxu3 %v5022_v53 }
 0x52a   : > { %v4894_v49 = vadd.f32 %v4873_v7, %v4755_v63  ;;  %v4997_v12 = vmax.f32 %v4976_v41, %v4987_v13  ;;  %v4465_v16 = vpop.f32.mrf.mxu3  ;;  %v6568_v13 = vld [vmem:[%s9888_s5 + $0xb0] sm:$0xff] }
 0x52b   : > { %v4480_v15 = vadd.f32 %v4465_v16, %v8932_v27  ;;  %v5020_v27 = vld [vmem:[%s9888_s5 + $0x8] sm:$0xff]  ;;  %5110 = vmatpush.msra.mxu3 %v5021_v23  ;;  %v5484_v23 = vld [vmem:[%s9890_s7 + $0x78] sm:$0xff] }
 0x52c   : > { %v4911_v28 = vadd.f32 %v8942_v30, %v4894_v49  ;;  %5007 = vst.msk [vmem:[#allocation5 + $0x1b] sm:$0xff] %vm4931_vm4, %v4997_v12  ;;  %v4876_v37 = vpop.f32.mrf.mxu2  ;;  %v6567_v49 = vld [vmem:[%s9888_s5 + $0xa8] sm:$0xff]  ;;  %v6566_v12 = vld [vmem:[%s9888_s5 + $0xa0] sm:$0xff]  ;;  %5525 = vmatpush.msra.mxu0 %v5484_v23  ;;  %v6656_v23 = vld [vmem:[%s9890_s7 + $0x190] sm:$0xff] }
 0x52d   : > { %v4598_v0 = vpop.f32.mrf.mxu0  ;;  %v4740_v10 = vpop.f32.mrf.mxu1  ;;  %5111 = vmatpush.msra.mxu3 %v5020_v27  ;;  %v6669_v27 = vld [vmem:[%s9890_s7 + $0x1f8] sm:$0xff] }
 0x52e   : > { %v4924_v38 = vmax.f32 %v4911_v28, 0.0  ;;  %v4617_v61 = vadd.f32 %v4598_v0, %v4478_v6  ;;  %v6565_v0 = vld [vmem:[%s9888_s5 + $0x98] sm:$0xff]  ;;  %5604 = vmatpush.msrb.mxu2 %v6669_v27  ;;  %v6639_v27 = vld [vmem:[%s9890_s7 + $0x108] sm:$0xff] }
 0x52f   : > { %5112 = vmatpush.msra.mxu3 %v5019_v25  ;;  %v6668_v25 = vld [vmem:[%s9890_s7 + $0x1f0] sm:$0xff] }
 0x530   : > { %4941 = vst.msk [vmem:[#allocation4 + $0x49] sm:$0xff] %vm4931_vm4, %v4924_v38  ;;  %v4756_v62 = vadd.f32 %v4737_v44, %v4617_v61  ;;  %v6564_v38 = vld [vmem:[%s9888_s5 + $0x90] sm:$0xff]  ;;  %v6563_v61 = vld [vmem:[%s9888_s5 + $0x88] sm:$0xff]  ;;  %5605 = vmatpush.msrb.mxu2 %v6668_v25  ;;  %v6638_v25 = vld [vmem:[%s9890_s7 + $0x100] sm:$0xff] }
 0x531   : > { %5163 = vmatpush.msrb.mxu3 %v6569_v20  ;;  %v6664_v20 = vld [vmem:[%s9890_s7 + $0x1d0] sm:$0xff] }
 0x532   : > { %v4895_v46 = vadd.f32 %v4876_v37, %v4756_v62  ;;  %v6562_v62 = vld [vmem:[%s9888_s5 + $0x80] sm:$0xff] }
 0x533   : > { %v5030_v42 = vld [vmem:[#allocation5 + $0x11] ss:$2 sm:$0xff]  ;;  %v5253_v57 = vld [vmem:[#allocation5 + $0x14] ss:$2 sm:$0xff]  ;;  %5164 = vmatpush.msrb.mxu3 %v6568_v13 }
 0x534   : > { %v4912_v50 = vadd.f32 %v8942_v30, %v4895_v46  ;;  %6555 = vmatmul.msk.f32.gmra.mxu3 %vm4931_vm4, %v5030_v42  ;;  %6595 = vmatmul.msk.f32.gmra.mxu0 %vm4931_vm4, %v5253_v57  ;;  %v4879_v40 = vpop.f32.mrf.mxu2  ;;  %v5014_v46 = vld [vmem:[#allocation5 + $0x10] ss:$2 sm:$0xff]  ;;  %v6581_v57 = vld [vmem:[%s9888_s5 + $0xf8] sm:$0xff] }
 0x535   : > { %v4601_v14 = vpop.f32.mrf.mxu0  ;;  %v4743_v52 = vpop.f32.mrf.mxu1  ;;  %5165 = vmatpush.msrb.mxu3 %v6567_v49  ;;  %v6631_v49 = vld [vmem:[%s9890_s7 + $0xc8] sm:$0xff] }
 0x536   : > { %v4925_v36 = vmax.f32 %v4912_v50, 0.0  ;;  %v4618_v1 = vadd.f32 %v4601_v14, %v4479_v33  ;;  %v6580_v33 = vld [vmem:[%s9888_s5 + $0xf0] sm:$0xff]  ;;  %v6579_v50 = vld [vmem:[%s9888_s5 + $0xe8] sm:$0xff] }
 0x537   : > { %v4954_v34 = vld [vmem:[#allocation4 + $0x40] ss:$2 sm:$0xff]  ;;  %v4968_v51 = vld [vmem:[#allocation4 + $0x41] ss:$2 sm:$0xff]  ;;  %5166 = vmatpush.msrb.mxu3 %v6566_v12  ;;  %v5477_v12 = vld [vmem:[%s9890_s7 + $0x40] sm:$0xff] }
 0x538   : > { %4942 = vst.msk [vmem:[#allocation4 + $0x51] sm:$0xff] %vm4931_vm4, %v4925_v36  ;;  %v4757_v22 = vadd.f32 %v4740_v10, %v4618_v1  ;;  %v4977_v9 = vmax.f32 %v4954_v34, %v4968_v51  ;;  %v4989_v59 = vld [vmem:[#allocation4 + $0x42] ss:$2 sm:$0xff]  ;;  %v6574_v1 = vld [vmem:[%s9888_s5 + $0xc0] sm:$0xff] }
 0x539   : > { %5167 = vmatpush.msrb.mxu3 %v6565_v0  ;;  %v6577_v10 = vld [vmem:[%s9888_s5 + $0xd8] sm:$0xff]  ;;  %v6576_v14 = vld [vmem:[%s9888_s5 + $0xd0] sm:$0xff]  ;;  %v6575_v36 = vld [vmem:[%s9888_s5 + $0xc8] sm:$0xff] }
 0x53a   : > { %v4896_v26 = vadd.f32 %v4879_v40, %v4757_v22  ;;  %v4998_v17 = vmax.f32 %v4977_v9, %v4989_v59  ;;  %v5129_v40 = vld [vmem:[#allocation5 + $0x12] ss:$2 sm:$0xff]  ;;  %v5319_v9 = vld [vmem:[#allocation5 + $0x35] ss:$2 sm:$0x1] }
 0x53b   : > { %5168 = vmatpush.msrb.mxu3 %v6564_v38  ;;  %v5381_v22 = vld [vmem:[#allocation5 + $0x36] ss:$2 sm:$0x1]  ;;  %v5191_v59 = vld [vmem:[#allocation5 + $0x13] ss:$2 sm:$0xff] }
 0x53c   : > { %v4913_v19 = vadd.f32 %v8942_v30, %v4896_v26  ;;  %5008 = vst.msk [vmem:[#allocation5 + $0x23] sm:$0xff] %vm4931_vm4, %v4998_v17  ;;  %v4882_v58 = vpop.f32.mrf.mxu2  ;;  %v6646_v0 = vld [vmem:[%s9890_s7 + $0x140] sm:$0xff] }
 0x53d   : > { %v4604_v60 = vpop.f32.mrf.mxu0  ;;  %5169 = vmatpush.msrb.mxu3 %v6563_v61  ;;  %v6662_v38 = vld [vmem:[%s9890_s7 + $0x1c0] sm:$0xff]  ;;  %v6629_v61 = vld [vmem:[%s9890_s7 + $0xb8] sm:$0xff] }
 0x53e   : > { %v4926_v55 = vmax.f32 %v4913_v19, 0.0  ;;  %v4619_v32 = vadd.f32 %v4604_v60, %v4480_v15 }
 0x53f   : > { %5170 = vmatpush.msrb.mxu3 %v6562_v62  ;;  %v5475_v62 = vld [vmem:[%s9890_s7 + $0x30] sm:$0xff] }
 0x540   : > { %4943 = vst.msk [vmem:[#allocation4 + $0x59] sm:$0xff] %vm4931_vm4, %v4926_v55  ;;  %v4758_v21 = vadd.f32 %v4743_v52, %v4619_v32  ;;  %v6637_v55 = vld [vmem:[%s9890_s7 + $0xf8] sm:$0xff]  ;;  %v5483_v32 = vld [vmem:[%s9890_s7 + $0x70] sm:$0xff] }
 0x541   : > { %v6653_v52 = vld [vmem:[%s9890_s7 + $0x178] sm:$0xff]  ;;  %5526 = vmatpush.msra.mxu0 %v5483_v32  ;;  %v6623_v32 = vld [vmem:[%s9890_s7 + $0x88] sm:$0xff] }
 0x542   : > { %v4897_v8 = vadd.f32 %v4882_v58, %v4758_v21  ;;  %v6636_v21 = vld [vmem:[%s9890_s7 + $0xf0] sm:$0xff]  ;;  %5564 = vmatpush.msra.mxu1 %v6653_v52  ;;  %v5482_v58 = vld [vmem:[%s9890_s7 + $0x68] sm:$0xff]  ;;  %v5469_v52 = vld [vmem:[%s9890_s7] sm:$0xff] }
 0x543   : > { %v5315_v31 = vld [vmem:[#allocation5 + $0x15] ss:$2 sm:$0xff]  ;;  %v5377_v29 = vld [vmem:[#allocation5 + $0x16] ss:$2 sm:$0xff]  ;;  %5527 = vmatpush.msra.mxu0 %v5482_v58  ;;  %v6701_v58 = vld [vmem:[%s9890_s7 + $0x2f8] sm:$0xff] }
 0x544   : > { %v4914_v4 = vadd.f32 %v8942_v30, %v4897_v8  ;;  %6607 = vmatmul.msk.f32.gmra.mxu1 %vm4931_vm4, %v5315_v31  ;;  %6619 = vmatmul.msk.f32.gmra.mxu2 %vm4931_vm4, %v5377_v29  ;;  %v6652_v8 = vld [vmem:[%s9890_s7 + $0x170] sm:$0xff]  ;;  %v6635_v29 = vld [vmem:[%s9890_s7 + $0xe8] sm:$0xff] }
 0x545   : > { %5565 = vmatpush.msra.mxu1 %v6652_v8  ;;  %v6622_v8 = vld [vmem:[%s9890_s7 + $0x80] sm:$0xff] }
 0x546   : > { %v4927_v43 = vmax.f32 %v4914_v4, 0.0  ;;  %v5481_v4 = vld [vmem:[%s9890_s7 + $0x60] sm:$0xff] }
 0x547   : > { %v4956_v18 = vld [vmem:[#allocation4 + $0x50] ss:$2 sm:$0xff]  ;;  %v4970_v11 = vld [vmem:[#allocation4 + $0x51] ss:$2 sm:$0xff]  ;;  %5528 = vmatpush.msra.mxu0 %v5481_v4 }
 0x548   : > { %4945 = vst.msk [vmem:[#allocation4 + $0x61] sm:$0xf] %vm4944_vm6, %v4927_v43  ;;  %v4978_v35 = vmax.f32 %v4956_v18, %v4970_v11  ;;  %v4991_v7 = vld [vmem:[#allocation4 + $0x52] ss:$2 sm:$0xff] }
 0x549   : > { %v6651_v43 = vld [vmem:[%s9890_s7 + $0x168] sm:$0xff]  ;;  %v6634_v11 = vld [vmem:[%s9890_s7 + $0xe0] sm:$0xff]  ;;  %v6685_v4 = vld [vmem:[%s9890_s7 + $0x278] sm:$0xff] }
 0x54a   : > { %v4999_v54 = vmax.f32 %v4978_v35, %v4991_v7  ;;  %v6667_v18 = vld [vmem:[%s9890_s7 + $0x1e8] sm:$0xff]  ;;  %v5480_v35 = vld [vmem:[%s9890_s7 + $0x58] sm:$0xff]  ;;  %5566 = vmatpush.msra.mxu1 %v6651_v43  ;;  %v6650_v7 = vld [vmem:[%s9890_s7 + $0x160] sm:$0xff] }
 0x54b   : > { %5606 = vmatpush.msrb.mxu2 %v6667_v18  ;;  %5529 = vmatpush.msra.mxu0 %v5480_v35  ;;  %v6700_v43 = vld [vmem:[%s9890_s7 + $0x2f0] sm:$0xff]  ;;  %v6733_v35 = vld [vmem:[%s9890_s7 + $0x3f8] sm:$0xff] }
 0x54c   : > { %5009 = vst.msk [vmem:[#allocation5 + $0x2b] sm:$0xff] %vm4931_vm4, %v4999_v54  ;;  %v6666_v54 = vld [vmem:[%s9890_s7 + $0x1e0] sm:$0xff]  ;;  %5567 = vmatpush.msra.mxu1 %v6650_v7  ;;  %v6684_v7 = vld [vmem:[%s9890_s7 + $0x270] sm:$0xff] }
 0x54d   : > { %5607 = vmatpush.msrb.mxu2 %v6666_v54  ;;  %v6699_v54 = vld [vmem:[%s9890_s7 + $0x2e8] sm:$0xff] }
 0x54f   : > { %v4958_v47 = vld [vmem:[#allocation4 + $0x60] ss:$2 sm:$0x3]  ;;  %v4972_v2 = vld [vmem:[#allocation4 + $0x61] ss:$2 sm:$0x3] }
 0x550   : > { %v4979_v24 = vmax.f32 %v4958_v47, %v4972_v2  ;;  %v4993_v56 = vld [vmem:[#allocation4 + $0x62] ss:$2 sm:$0x3]  ;;  %v6633_v47 = vld [vmem:[%s9890_s7 + $0xd8] sm:$0xff]  ;;  %v5479_v2 = vld [vmem:[%s9890_s7 + $0x50] sm:$0xff] }
 0x551   : > { %5530 = vmatpush.msra.mxu0 %v5479_v2  ;;  %v6732_v2 = vld [vmem:[%s9890_s7 + $0x3f0] sm:$0xff] }
 0x552   : > { %v5000_v30 = vmax.f32 %v4979_v24, %v4993_v56  ;;  %v6649_v24 = vld [vmem:[%s9890_s7 + $0x158] sm:$0xff] }
 0x553   : > { %v5032_v63 = vld [vmem:[#allocation5 + $0x21] ss:$2 sm:$0xff]  ;;  %v5255_v41 = vld [vmem:[#allocation5 + $0x24] ss:$2 sm:$0xff]  ;;  %5568 = vmatpush.msra.mxu1 %v6649_v24  ;;  %v6683_v24 = vld [vmem:[%s9890_s7 + $0x268] sm:$0xff] }
 0x554   : > { %6556 = vmatmul.msk.f32.gmra.mxu3 %vm4931_vm4, %v5032_v63  ;;  %6596 = vmatmul.msk.f32.gmra.mxu0 %vm4931_vm4, %v5255_v41  ;;  %5011 = vst.msk [vmem:[#allocation5 + $0x33] sm:$0x3] %vm5010_vm7, %v5000_v30  ;;  %v5034_v44 = vld [vmem:[#allocation5 + $0x31] ss:$2 sm:$0x1]  ;;  %v6665_v56 = vld [vmem:[%s9890_s7 + $0x1d8] sm:$0xff] }
 0x555   : > { %v5016_v42 = vld [vmem:[#allocation5 + $0x20] ss:$2 sm:$0xff]  ;;  %v5018_v3 = vld [vmem:[#allocation5 + $0x30] ss:$2 sm:$0x1]  ;;  %v5478_v63 = vld [vmem:[%s9890_s7 + $0x48] sm:$0xff]  ;;  %5608 = vmatpush.msrb.mxu2 %v6665_v56 }
 0x556   : > { %v5131_v34 = vld [vmem:[#allocation5 + $0x22] ss:$2 sm:$0xff]  ;;  %v5133_v51 = vld [vmem:[#allocation5 + $0x32] ss:$2 sm:$0x1]  ;;  %5531 = vmatpush.msra.mxu0 %v5478_v63  ;;  %v6731_v63 = vld [vmem:[%s9890_s7 + $0x3e8] sm:$0xff] }
 0x557   : > { %v5193_v26 = vld [vmem:[#allocation5 + $0x23] ss:$2 sm:$0xff]  ;;  %5609 = vmatpush.msrb.mxu2 %v6664_v20 }
 0x558   : > { %v6632_v30 = vld [vmem:[%s9890_s7 + $0xd0] sm:$0xff]  ;;  %5532 = vmatpush.msra.mxu0 %v5477_v12  ;;  %v6698_v56 = vld [vmem:[%s9890_s7 + $0x2e0] sm:$0xff]  ;;  %v6697_v20 = vld [vmem:[%s9890_s7 + $0x2d8] sm:$0xff] }
 0x559   : > { %v6648_v41 = vld [vmem:[%s9890_s7 + $0x150] sm:$0xff]  ;;  %v6730_v12 = vld [vmem:[%s9890_s7 + $0x3e0] sm:$0xff] }
 0x55a   : > { %5569 = vmatpush.msra.mxu1 %v6648_v41  ;;  %v6682_v41 = vld [vmem:[%s9890_s7 + $0x260] sm:$0xff] }
 0x55b   : > { %v5257_v6 = vld [vmem:[#allocation5 + $0x34] ss:$2 sm:$0x1]  ;;  %v5317_v28 = vld [vmem:[#allocation5 + $0x25] ss:$2 sm:$0xff] }
 0x55c   : > { %6557 = vmatmul.msk.f32.gmra.mxu3 %vm4931_vm4, %v5034_v44  ;;  %6597 = vmatmul.msk.f32.gmra.mxu0 %vm4931_vm4, %v5257_v6  ;;  %v5379_v37 = vld [vmem:[#allocation5 + $0x26] ss:$2 sm:$0xff]  ;;  %v5195_v17 = vld [vmem:[#allocation5 + $0x33] ss:$2 sm:$0x1]  ;;  %v6647_v44 = vld [vmem:[%s9890_s7 + $0x148] sm:$0xff] }
 0x55d   : > { %6608 = vmatmul.msk.f32.gmra.mxu1 %vm4931_vm4, %v5317_v28  ;;  %6620 = vmatmul.msk.f32.gmra.mxu2 %vm4931_vm4, %v5379_v37  ;;  %v6663_v6 = vld [vmem:[%s9890_s7 + $0x1c8] sm:$0xff]  ;;  %v6630_v28 = vld [vmem:[%s9890_s7 + $0xc0] sm:$0xff]  ;;  %v5476_v37 = vld [vmem:[%s9890_s7 + $0x38] sm:$0xff] }
 0x55e   : > { %5570 = vmatpush.msra.mxu1 %v6647_v44  ;;  %5610 = vmatpush.msrb.mxu2 %v6663_v6  ;;  %v6681_v44 = vld [vmem:[%s9890_s7 + $0x258] sm:$0xff]  ;;  %v6696_v6 = vld [vmem:[%s9890_s7 + $0x2d0] sm:$0xff] }
 0x55f   : > { %5533 = vmatpush.msra.mxu0 %v5476_v37 }
 0x560   : > { %5571 = vmatpush.msra.mxu1 %v6646_v0  ;;  %5611 = vmatpush.msrb.mxu2 %v6662_v38  ;;  %v6729_v0 = vld [vmem:[%s9890_s7 + $0x3d8] sm:$0xff]  ;;  %v6680_v38 = vld [vmem:[%s9890_s7 + $0x250] sm:$0xff] }
 0x561   : > { %5534 = vmatpush.msra.mxu0 %v5475_v62  ;;  %v6712_v62 = vld [vmem:[%s9890_s7 + $0x350] sm:$0xff] }
 0x564   : > { %6558 = vmatmul.msk.f32.vlgmr.msra.gmra.mxu3 %vm4931_vm4, %v5012_v45  ;;  %v6645_v45 = vld [vmem:[%s9890_s7 + $0x138] sm:$0xff] }
 0x565   : > { %5225 = vmatpush.msra.mxu3 %v6581_v57  ;;  %6621 = vmatmul.msk.f32.gmra.mxu2 %vm4931_vm4, %v5381_v22  ;;  %v5474_v57 = vld [vmem:[%s9890_s7 + $0x28] sm:$0xff]  ;;  %v5471_v22 = vld [vmem:[%s9890_s7 + $0x10] sm:$0xff] }
 0x566   : > { %6609 = vmatmul.msk.f32.gmra.mxu1 %vm4931_vm4, %v5319_v9  ;;  %5535 = vmatpush.msra.mxu0 %v5474_v57  ;;  %v6641_v9 = vld [vmem:[%s9890_s7 + $0x118] sm:$0xff]  ;;  %v6711_v57 = vld [vmem:[%s9890_s7 + $0x348] sm:$0xff] }
 0x567   : > { %5226 = vmatpush.msra.mxu3 %v6580_v33  ;;  %v6644_v33 = vld [vmem:[%s9890_s7 + $0x130] sm:$0xff]  ;;  %5572 = vmatpush.msra.mxu1 %v6645_v45 }
 0x568   : > { %v6728_v45 = vld [vmem:[%s9890_s7 + $0x3d0] sm:$0xff] }
 0x569   : > { %5227 = vmatpush.msra.mxu3 %v6579_v50  ;;  %v6660_v50 = vld [vmem:[%s9890_s7 + $0x1b0] sm:$0xff]  ;;  %5573 = vmatpush.msra.mxu1 %v6644_v33  ;;  %v6727_v33 = vld [vmem:[%s9890_s7 + $0x3c8] sm:$0xff] }
 0x56b   : > { %5228 = vmatpush.msra.mxu3 %v6578_v39 }
 0x56c   : > { %6559 = vmatmul.msk.f32.gmra.mxu3 %vm4931_vm4, %v5014_v46  ;;  %v6661_v46 = vld [vmem:[%s9890_s7 + $0x1b8] sm:$0xff] }
 0x56d   : > { %5229 = vmatpush.msra.mxu3 %v6577_v10  ;;  %5612 = vmatpush.msrb.mxu2 %v6661_v46  ;;  %v5473_v10 = vld [vmem:[%s9890_s7 + $0x20] sm:$0xff]  ;;  %v6679_v46 = vld [vmem:[%s9890_s7 + $0x248] sm:$0xff] }
 0x56e   : > { %5536 = vmatpush.msra.mxu0 %v5473_v10  ;;  %v6710_v10 = vld [vmem:[%s9890_s7 + $0x340] sm:$0xff] }
 0x56f   : > { %5230 = vmatpush.msra.mxu3 %v6576_v14  ;;  %5613 = vmatpush.msrb.mxu2 %v6660_v50  ;;  %v6643_v14 = vld [vmem:[%s9890_s7 + $0x128] sm:$0xff]  ;;  %v6678_v50 = vld [vmem:[%s9890_s7 + $0x240] sm:$0xff] }
 0x570   : > { %5574 = vmatpush.msra.mxu1 %v6643_v14  ;;  %v6726_v14 = vld [vmem:[%s9890_s7 + $0x3c0] sm:$0xff] }
 0x571   : > { %5231 = vmatpush.msra.mxu3 %v6575_v36  ;;  %v6659_v36 = vld [vmem:[%s9890_s7 + $0x1a8] sm:$0xff] }
 0x572   : > { %5614 = vmatpush.msrb.mxu2 %v6659_v36  ;;  %v6677_v36 = vld [vmem:[%s9890_s7 + $0x238] sm:$0xff] }
 0x573   : > { %5232 = vmatpush.msra.mxu3 %v6574_v1  ;;  %v6626_v1 = vld [vmem:[%s9890_s7 + $0xa0] sm:$0xff] }
 0x574   : > { %6560 = vmatmul.msk.f32.gmra.mxu3 %vm4931_vm4, %v5016_v42  ;;  %v6628_v42 = vld [vmem:[%s9890_s7 + $0xb0] sm:$0xff] }
 0x57c   : > { %6561 = vmatmul.msk.f32.gmra.mxu3 %vm4931_vm4, %v5018_v3  ;;  %v6627_v3 = vld [vmem:[%s9890_s7 + $0xa8] sm:$0xff] }
 0x584   : > { %6570 = vmatmul.msk.f32.vlgmr.msrb.gmra.mxu3 %vm4931_vm4, %v5127_v48  ;;  %v5472_v48 = vld [vmem:[%s9890_s7 + $0x18] sm:$0xff] }
 0x585   : > { %5505 = vmatpush.msrb.mxu3 %v6637_v55  ;;  %5537 = vmatpush.msra.mxu0 %v5472_v48  ;;  %v6709_v48 = vld [vmem:[%s9890_s7 + $0x338] sm:$0xff] }
 0x587   : > { %5506 = vmatpush.msrb.mxu3 %v6636_v21  ;;  %5538 = vmatpush.msra.mxu0 %v5471_v22  ;;  %v6655_v21 = vld [vmem:[%s9890_s7 + $0x188] sm:$0xff] }
 0x588   : > { %v6691_v22 = vld [vmem:[%s9890_s7 + $0x2a8] sm:$0xff] }
 0x589   : > { %5507 = vmatpush.msrb.mxu3 %v6635_v29  ;;  %v6654_v29 = vld [vmem:[%s9890_s7 + $0x180] sm:$0xff] }
 0x58b   : > { %5508 = vmatpush.msrb.mxu3 %v6634_v11  ;;  %v6717_v11 = vld [vmem:[%s9890_s7 + $0x378] sm:$0xff] }
 0x58c   : > { %6571 = vmatmul.msk.f32.gmra.mxu3 %vm4931_vm4, %v5129_v40  ;;  %v6642_v40 = vld [vmem:[%s9890_s7 + $0x120] sm:$0xff] }
 0x58d   : > { %5509 = vmatpush.msrb.mxu3 %v6633_v47  ;;  %5575 = vmatpush.msra.mxu1 %v6642_v40  ;;  %v6716_v47 = vld [vmem:[%s9890_s7 + $0x370] sm:$0xff] }
 0x58f   : > { %5510 = vmatpush.msrb.mxu3 %v6632_v30  ;;  %5576 = vmatpush.msra.mxu1 %v6641_v9  ;;  %v6715_v30 = vld [vmem:[%s9890_s7 + $0x368] sm:$0xff]  ;;  %v6708_v9 = vld [vmem:[%s9890_s7 + $0x330] sm:$0xff] }
 0x591   : > { %5511 = vmatpush.msrb.mxu3 %v6631_v49  ;;  %v6714_v49 = vld [vmem:[%s9890_s7 + $0x360] sm:$0xff] }
 0x593   : > { %5512 = vmatpush.msrb.mxu3 %v6630_v28  ;;  %v6713_v28 = vld [vmem:[%s9890_s7 + $0x358] sm:$0xff] }
 0x594   : > { %6572 = vmatmul.msk.f32.gmra.mxu3 %vm4931_vm4, %v5131_v34  ;;  %v6658_v34 = vld [vmem:[%s9890_s7 + $0x1a0] sm:$0xff] }
 0x595   : > { %5513 = vmatpush.msrb.mxu3 %v6629_v61  ;;  %5615 = vmatpush.msrb.mxu2 %v6658_v34  ;;  %v6695_v61 = vld [vmem:[%s9890_s7 + $0x2c8] sm:$0xff]  ;;  %v6725_v34 = vld [vmem:[%s9890_s7 + $0x3b8] sm:$0xff] }
 0x597   : > { %v9199_v16 = vpop.f32.mrf.mxu3  ;;  %5514 = vmatpush.msrb.mxu3 %v6628_v42  ;;  %v6694_v42 = vld [vmem:[%s9890_s7 + $0x2c0] sm:$0xff] }
 0x599   : > { %5515 = vmatpush.msrb.mxu3 %v6627_v3  ;;  %v6693_v3 = vld [vmem:[%s9890_s7 + $0x2b8] sm:$0xff] }
 0x59b   : > { %5516 = vmatpush.msrb.mxu3 %v6626_v1  ;;  %v6692_v1 = vld [vmem:[%s9890_s7 + $0x2b0] sm:$0xff] }
 0x59c   : > { %6573 = vmatmul.msk.f32.gmra.mxu3 %vm4931_vm4, %v5133_v51  ;;  %v6625_v51 = vld [vmem:[%s9890_s7 + $0x98] sm:$0xff] }
 0x59d   : > { %5517 = vmatpush.msrb.mxu3 %v6625_v51  ;;  %v6676_v51 = vld [vmem:[%s9890_s7 + $0x230] sm:$0xff] }
 0x5a4   : > { %6582 = vmatmul.msk.f32.vlgmr.msra.gmra.mxu3 %vm4931_vm4, %v5189_v5  ;;  %v6657_v5 = vld [vmem:[%s9890_s7 + $0x198] sm:$0xff] }
 0x5a5   : > { %5616 = vmatpush.msrb.mxu2 %v6657_v5  ;;  %v6724_v5 = vld [vmem:[%s9890_s7 + $0x3b0] sm:$0xff] }
 0x5a7   : > { %5617 = vmatpush.msrb.mxu2 %v6656_v23  ;;  %v6723_v23 = vld [vmem:[%s9890_s7 + $0x3a8] sm:$0xff] }
 0x5a9   : > { %5618 = vmatpush.msrb.mxu2 %v6655_v21  ;;  %v6706_v21 = vld [vmem:[%s9890_s7 + $0x320] sm:$0xff] }
 0x5ab   : > { %5619 = vmatpush.msrb.mxu2 %v6654_v29  ;;  %v6721_v29 = vld [vmem:[%s9890_s7 + $0x398] sm:$0xff] }
 0x5ac   : > { %6583 = vmatmul.msk.f32.gmra.mxu3 %vm4931_vm4, %v5191_v59  ;;  %v6624_v59 = vld [vmem:[%s9890_s7 + $0x90] sm:$0xff] }
 0x5ad   : > { %5518 = vmatpush.msrb.mxu3 %v6624_v59  ;;  %5764 = vmatpush.msra.mxu2 %v6733_v35  ;;  %v6675_v59 = vld [vmem:[%s9890_s7 + $0x228] sm:$0xff] }
 0x5ae   : > { %v6687_v35 = vld [vmem:[%s9890_s7 + $0x288] sm:$0xff] }
 0x5af   : > { %5519 = vmatpush.msrb.mxu3 %v6623_v32  ;;  %5765 = vmatpush.msra.mxu2 %v6732_v2 }
 0x5b1   : > { %5520 = vmatpush.msrb.mxu3 %v6622_v8  ;;  %5766 = vmatpush.msra.mxu2 %v6731_v63  ;;  %v5420_v63 = vpop.f32.mrf.mxu2 }
 0x5b3   : > { %5644 = vmatpush.msra.mxu3 %v6685_v4  ;;  %5767 = vmatpush.msra.mxu2 %v6730_v12  ;;  %v5296_v4 = vpop.f32.mrf.mxu0 }
 0x5b4   : > { %6584 = vmatmul.msk.f32.gmra.mxu3 %vm4931_vm4, %v5193_v26  ;;  %v5470_v26 = vld [vmem:[%s9890_s7 + $0x8] sm:$0xff] }
 0x5b5   : > { %5539 = vmatpush.msra.mxu0 %v5470_v26  ;;  %5645 = vmatpush.msra.mxu3 %v6684_v7  ;;  %v6690_v26 = vld [vmem:[%s9890_s7 + $0x2a0] sm:$0xff]  ;;  %v6704_v7 = vld [vmem:[%s9890_s7 + $0x310] sm:$0xff] }
 0x5b6   : > { %5768 = vmatpush.msra.mxu2 %v6729_v0 }
 0x5b7   : > { %v9201_v15 = vpop.f32.mrf.mxu3  ;;  %5540 = vmatpush.msra.mxu0 %v5469_v52  ;;  %5646 = vmatpush.msra.mxu3 %v6683_v24  ;;  %v6674_v52 = vld [vmem:[%s9890_s7 + $0x220] sm:$0xff]  ;;  %v6671_v24 = vld [vmem:[%s9890_s7 + $0x208] sm:$0xff] }
 0x5b8   : > { %5769 = vmatpush.msra.mxu2 %v6728_v45 }
 0x5b9   : > { %5684 = vmatpush.msrb.mxu0 %v6701_v58  ;;  %5647 = vmatpush.msra.mxu3 %v6682_v41  ;;  %v6688_v58 = vld [vmem:[%s9890_s7 + $0x290] sm:$0xff]  ;;  %v6847_v41 = vld [vmem:[%s9889_s6] ss:$0 sm:$0xff] }
 0x5ba   : > { %5770 = vmatpush.msra.mxu2 %v6727_v33 }
 0x5bb   : > { %5685 = vmatpush.msrb.mxu0 %v6700_v43  ;;  %5648 = vmatpush.msra.mxu3 %v6681_v44  ;;  %v6670_v44 = vld [vmem:[%s9890_s7 + $0x200] sm:$0xff] }
 0x5bc   : > { %6585 = vmatmul.msk.f32.gmra.mxu3 %vm4931_vm4, %v5195_v17  ;;  %v6640_v17 = vld [vmem:[%s9890_s7 + $0x110] sm:$0xff]  ;;  %5771 = vmatpush.msra.mxu2 %v6726_v14 }
 0x5bd   : > { %5577 = vmatpush.msra.mxu1 %v6640_v17  ;;  %5686 = vmatpush.msrb.mxu0 %v6699_v54  ;;  %v6707_v17 = vld [vmem:[%s9890_s7 + $0x328] sm:$0xff]  ;;  %v5358_v54 = vpop.f32.mrf.mxu1 }
 0x5be   : > { %5649 = vmatpush.msra.mxu3 %v6680_v38  ;;  %5772 = vmatpush.msra.mxu2 %v6725_v34 }
 0x5bf   : > { %5578 = vmatpush.msra.mxu1 %v6639_v27  ;;  %5687 = vmatpush.msrb.mxu0 %v6698_v56  ;;  %v6689_v27 = vld [vmem:[%s9890_s7 + $0x298] sm:$0xff]  ;;  %v6686_v56 = vld [vmem:[%s9890_s7 + $0x280] sm:$0xff] }
 0x5c0   : > { %5650 = vmatpush.msra.mxu3 %v6679_v46  ;;  %5773 = vmatpush.msra.mxu2 %v6724_v5 }
 0x5c1   : > { %5579 = vmatpush.msra.mxu1 %v6638_v25  ;;  %5688 = vmatpush.msrb.mxu0 %v6697_v20  ;;  %v6705_v25 = vld [vmem:[%s9890_s7 + $0x318] sm:$0xff]  ;;  %v6719_v20 = vld [vmem:[%s9890_s7 + $0x388] sm:$0xff] }
 0x5c2   : > { %5651 = vmatpush.msra.mxu3 %v6678_v50  ;;  %5774 = vmatpush.msra.mxu2 %v6723_v23 }
 0x5c3   : > { %5724 = vmatpush.msrb.mxu1 %v6717_v11  ;;  %5689 = vmatpush.msrb.mxu0 %v6696_v6  ;;  %v6702_v6 = vld [vmem:[%s9890_s7 + $0x300] sm:$0xff] }
 0x5c4   : > { %5652 = vmatpush.msra.mxu3 %v6677_v36 }
 0x5c5   : > { %5725 = vmatpush.msrb.mxu1 %v6716_v47  ;;  %5690 = vmatpush.msrb.mxu0 %v6695_v61  ;;  %v6720_v47 = vld [vmem:[%s9890_s7 + $0x390] sm:$0xff]  ;;  %v5361_v45 = vpop.f32.mrf.mxu1 }
 0x5c6   : > { %5653 = vmatpush.msra.mxu3 %v6676_v51 }
 0x5c7   : > { %5726 = vmatpush.msrb.mxu1 %v6715_v30  ;;  %5691 = vmatpush.msrb.mxu0 %v6694_v42  ;;  %v6703_v30 = vld [vmem:[%s9890_s7 + $0x308] sm:$0xff] }
 0x5c8   : > { %5654 = vmatpush.msra.mxu3 %v6675_v59 }
 0x5c9   : > { %5727 = vmatpush.msrb.mxu1 %v6714_v49  ;;  %5692 = vmatpush.msrb.mxu0 %v6693_v3 }
 0x5ca   : > { %5655 = vmatpush.msra.mxu3 %v6674_v52 }
 0x5cb   : > { %5728 = vmatpush.msrb.mxu1 %v6713_v28  ;;  %5693 = vmatpush.msrb.mxu0 %v6692_v1  ;;  %v6718_v28 = vld [vmem:[%s9890_s7 + $0x380] sm:$0xff] }
 0x5cd   : > { %5729 = vmatpush.msrb.mxu1 %v6712_v62  ;;  %5694 = vmatpush.msrb.mxu0 %v6691_v22 }
 0x5cf   : > { %5730 = vmatpush.msrb.mxu1 %v6711_v57  ;;  %5695 = vmatpush.msrb.mxu0 %v6690_v26  ;;  %v5423_v57 = vpop.f32.mrf.mxu2 }
 0x5d1   : > { %5731 = vmatpush.msrb.mxu1 %v6710_v10  ;;  %5696 = vmatpush.msrb.mxu0 %v6689_v27 }
 0x5d3   : > { %5732 = vmatpush.msrb.mxu1 %v6709_v48  ;;  %5697 = vmatpush.msrb.mxu0 %v6688_v58 }
 0x5d5   : > { %5733 = vmatpush.msrb.mxu1 %v6708_v9  ;;  %5698 = vmatpush.msrb.mxu0 %v6687_v35  ;;  %v6781_v35 = vld [vmem:[%s9890_s7 + $0x578] sm:$0xff] }
 0x5d7   : > { %v9203_v19 = vpop.f32.mrf.mxu3  ;;  %5734 = vmatpush.msrb.mxu1 %v6707_v17  ;;  %5699 = vmatpush.msrb.mxu0 %v6686_v56  ;;  %v6796_v56 = vld [vmem:[%s9890_s7 + $0x5f0] sm:$0xff] }
 0x5d9   : > { %5735 = vmatpush.msrb.mxu1 %v6706_v21 }
 0x5da   : > { %v5364_v48 = vpop.f32.mrf.mxu1 }
 0x5db   : > { %5736 = vmatpush.msrb.mxu1 %v6705_v25 }
 0x5dd   : > { %5737 = vmatpush.msrb.mxu1 %v6704_v7 }
 0x5df   : > { %v9205_v60 = vpop.f32.mrf.mxu3  ;;  %5738 = vmatpush.msrb.mxu1 %v6703_v30  ;;  %v6747_v30 = vld [vmem:[%s9890_s7 + $0x468] sm:$0xff] }
 0x5e0   : > { %v5426_v22 = vpop.f32.mrf.mxu2 }
 0x5e1   : > { %5739 = vmatpush.msrb.mxu1 %v6702_v6  ;;  %v6778_v6 = vld [vmem:[%s9890_s7 + $0x560] sm:$0xff] }
 0x5e3   : > { %v5367_v23 = vpop.f32.mrf.mxu1 }
 0x5e7   : > { %v9207_v53 = vpop.f32.mrf.mxu3 }
 0x5e8   : > { %v5115_v32 = vadd.f32 %v9207_v53, %v9199_v16  ;;  %v6722_v16 = vld [vmem:[%s9890_s7 + $0x3a0] sm:$0xff]  ;;  %v6673_v53 = vld [vmem:[%s9890_s7 + $0x218] sm:$0xff]  ;;  %v5429_v27 = vpop.f32.mrf.mxu2 }
 0x5e9   : > { %5775 = vmatpush.msra.mxu2 %v6722_v16  ;;  %5656 = vmatpush.msra.mxu3 %v6673_v53 }
 0x5eb   : > { %5776 = vmatpush.msra.mxu2 %v6721_v29 }
 0x5ed   : > { %5777 = vmatpush.msra.mxu2 %v6720_v47  ;;  %v6748_v47 = vld [vmem:[%s9890_s7 + $0x470] sm:$0xff] }
 0x5ef   : > { %v9236_v31 = vpop.f32.mrf.mxu3  ;;  %5778 = vmatpush.msra.mxu2 %v6719_v20  ;;  %v6795_v20 = vld [vmem:[%s9890_s7 + $0x5e8] sm:$0xff] }
 0x5f0   : > { %v5118_v49 = vadd.f32 %v9236_v31, %v9201_v15  ;;  %v5299_v31 = vpop.f32.mrf.mxu0 }
 0x5f1   : > { %5779 = vmatpush.msra.mxu2 %v6718_v28  ;;  %v6794_v28 = vld [vmem:[%s9890_s7 + $0x5e0] sm:$0xff] }
 0x5f7   : > { %v9286_v13 = vpop.f32.mrf.mxu3 }
 0x5f8   : > { %v5121_v33 = vadd.f32 %v9286_v13, %v9203_v19  ;;  %v5302_v10 = vpop.f32.mrf.mxu0 }
 0x5ff   : > { %v9336_v39 = vpop.f32.mrf.mxu3 }
 0x600   : > { %v5124_v9 = vadd.f32 %v9336_v39, %v9205_v60  ;;  %v5305_v17 = vpop.f32.mrf.mxu0 }
 0x607   : > { %v9386_v55 = vpop.f32.mrf.mxu3 }
 0x608   : > { %v5184_v8 = vadd.f32 %v9386_v55, %v5115_v32  ;;  %v6672_v55 = vld [vmem:[%s9890_s7 + $0x210] sm:$0xff] }
 0x609   : > { %5657 = vmatpush.msra.mxu3 %v6672_v55  ;;  %v6764_v55 = vld [vmem:[%s9890_s7 + $0x4f0] sm:$0xff] }
 0x60b   : > { %5658 = vmatpush.msra.mxu3 %v6671_v24  ;;  %v6780_v24 = vld [vmem:[%s9890_s7 + $0x570] sm:$0xff] }
 0x60d   : > { %5659 = vmatpush.msra.mxu3 %v6670_v44  ;;  %v6761_v44 = vld [vmem:[%s9890_s7 + $0x4d8] sm:$0xff] }
 0x60f   : > { %v9418_v18 = vpop.f32.mrf.mxu3 }
 0x610   : > { %v5185_v0 = vadd.f32 %v9418_v18, %v5118_v49 }
 0x617   : > { %v9471_v37 = vpop.f32.mrf.mxu3 }
 0x618   : > { %v5186_v3 = vadd.f32 %v9471_v37, %v5121_v33  ;;  %v6792_v33 = vld [vmem:[%s9890_s7 + $0x5d0] sm:$0xff] }
 0x61f   : > { %v9521_v40 = vpop.f32.mrf.mxu3 }
 0x620   : > { %v5187_v19 = vadd.f32 %v9521_v40, %v5124_v9  ;;  %v6765_v40 = vld [vmem:[%s9890_s7 + $0x4f8] sm:$0xff] }
 0x621   : > { %v6789_v9 = vld [vmem:[%s9890_s7 + $0x5b8] sm:$0xff] }
 0x627   : > { %v5234_v43 = vpop.f32.mrf.mxu3 }
 0x628   : > { %v5246_v11 = vadd.f32 %v5234_v43, %v5184_v8 }
 0x62a   : > { %v5308_v2 = vadd.f32 %v5296_v4, %v5246_v11  ;;  %v6749_v11 = vld [vmem:[%s9890_s7 + $0x478] sm:$0xff] }
 0x62c   : > { %v5370_v12 = vadd.f32 %v5358_v54, %v5308_v2  ;;  %v6797_v54 = vld [vmem:[%s9890_s7 + $0x5f8] sm:$0xff]  ;;  %v6763_v2 = vld [vmem:[%s9890_s7 + $0x4e8] sm:$0xff] }
 0x62e   : > { %v5432_v15 = vadd.f32 %v5420_v63, %v5370_v12  ;;  %v6762_v63 = vld [vmem:[%s9890_s7 + $0x4e0] sm:$0xff] }
 0x62f   : > { %v5237_v38 = vpop.f32.mrf.mxu3  ;;  %v6746_v12 = vld [vmem:[%s9890_s7 + $0x460] sm:$0xff] }
 0x630   : > { %v5440_v61 = vadd.f32 %v6847_v41, %v5432_v15  ;;  %v5247_v62 = vadd.f32 %v5237_v38, %v5185_v0 }
 0x632   : > { %v5444_v46 = vmax.f32 %v5440_v61, 0.0  ;;  %v5309_v42 = vadd.f32 %v5299_v31, %v5247_v62  ;;  %v6745_v31 = vld [vmem:[%s9890_s7 + $0x458] sm:$0xff]  ;;  %v6760_v61 = vld [vmem:[%s9890_s7 + $0x4d0] sm:$0xff] }
 0x633   : > { %v6777_v62 = vld [vmem:[%s9890_s7 + $0x558] sm:$0xff] }
 0x634   : > { %5450 = vst [vmem:[#allocation6 + $0x1] sm:$0xff] %v5444_v46  ;;  %v5371_v50 = vadd.f32 %v5361_v45, %v5309_v42  ;;  %v6793_v45 = vld [vmem:[%s9890_s7 + $0x5d8] sm:$0xff]  ;;  %v6744_v46 = vld [vmem:[%s9890_s7 + $0x450] sm:$0xff]  ;;  %v6759_v42 = vld [vmem:[%s9890_s7 + $0x4c8] sm:$0xff] }
 0x636   : > { %v5433_v18 = vadd.f32 %v5423_v57, %v5371_v50  ;;  %v6776_v57 = vld [vmem:[%s9890_s7 + $0x550] sm:$0xff]  ;;  %v6743_v50 = vld [vmem:[%s9890_s7 + $0x448] sm:$0xff] }
 0x637   : > { %v5240_v14 = vpop.f32.mrf.mxu3 }
 0x638   : > { %v5441_v36 = vadd.f32 %v6847_v41, %v5433_v18  ;;  %v5248_v1 = vadd.f32 %v5240_v14, %v5186_v3  ;;  %v6758_v3 = vld [vmem:[%s9890_s7 + $0x4c0] sm:$0xff]  ;;  %v6775_v18 = vld [vmem:[%s9890_s7 + $0x548] sm:$0xff] }
 0x639   : > { %v6742_v14 = vld [vmem:[%s9890_s7 + $0x440] sm:$0xff] }
 0x63a   : > { %v5445_v34 = vmax.f32 %v5441_v36, 0.0  ;;  %v5310_v51 = vadd.f32 %v5302_v10, %v5248_v1  ;;  %v6791_v10 = vld [vmem:[%s9890_s7 + $0x5c8] sm:$0xff]  ;;  %v6757_v36 = vld [vmem:[%s9890_s7 + $0x4b8] sm:$0xff]  ;;  %v6774_v1 = vld [vmem:[%s9890_s7 + $0x540] sm:$0xff] }
 0x63c   : > { %5451 = vst [vmem:[#allocation6 + $0x9] sm:$0xff] %v5445_v34  ;;  %v5372_v5 = vadd.f32 %v5364_v48, %v5310_v51  ;;  %v6790_v48 = vld [vmem:[%s9890_s7 + $0x5c0] sm:$0xff]  ;;  %v6741_v34 = vld [vmem:[%s9890_s7 + $0x438] sm:$0xff]  ;;  %v6756_v51 = vld [vmem:[%s9890_s7 + $0x4b0] sm:$0xff] }
 0x63e   : > { %v5434_v13 = vadd.f32 %v5426_v22, %v5372_v5  ;;  %v6773_v22 = vld [vmem:[%s9890_s7 + $0x538] sm:$0xff]  ;;  %v6740_v5 = vld [vmem:[%s9890_s7 + $0x430] sm:$0xff] }
 0x63f   : > { %v5243_v59 = vpop.f32.mrf.mxu3 }
 0x640   : > { %v5442_v26 = vadd.f32 %v6847_v41, %v5434_v13  ;;  %v5249_v37 = vadd.f32 %v5243_v59, %v5187_v19  ;;  %v6755_v19 = vld [vmem:[%s9890_s7 + $0x4a8] sm:$0xff]  ;;  %v6772_v13 = vld [vmem:[%s9890_s7 + $0x530] sm:$0xff] }
 0x641   : > { %v6788_v59 = vld [vmem:[%s9890_s7 + $0x5b0] sm:$0xff] }
 0x642   : > { %v5446_v32 = vmax.f32 %v5442_v26, 0.0  ;;  %v5311_v52 = vadd.f32 %v5305_v17, %v5249_v37  ;;  %v6739_v26 = vld [vmem:[%s9890_s7 + $0x428] sm:$0xff]  ;;  %v6754_v17 = vld [vmem:[%s9890_s7 + $0x4a0] sm:$0xff] }
 0x643   : > { %v5454_v21 = vld [vmem:[#allocation6] ss:$2 sm:$0xff]  ;;  %v5458_v16 = vld [vmem:[#allocation6 + $0x1] ss:$2 sm:$0xff] }
 0x644   : > { %5452 = vst [vmem:[#allocation6 + $0x11] sm:$0xff] %v5446_v32  ;;  %v5373_v53 = vadd.f32 %v5367_v23, %v5311_v52  ;;  %v5461_v58 = vmax.f32 %v5454_v21, %v5458_v16  ;;  %v5464_v8 = vld [vmem:[#allocation6 + $0x2] ss:$2 sm:$0xff]  ;;  %v6738_v52 = vld [vmem:[%s9890_s7 + $0x420] sm:$0xff] }
 0x645   : > { %v6771_v23 = vld [vmem:[%s9890_s7 + $0x528] sm:$0xff]  ;;  %v6753_v21 = vld [vmem:[%s9890_s7 + $0x498] sm:$0xff]  ;;  %v6770_v16 = vld [vmem:[%s9890_s7 + $0x520] sm:$0xff] }
 0x646   : > { %v5435_v60 = vadd.f32 %v5429_v27, %v5373_v53  ;;  %v5467_v39 = vmax.f32 %v5461_v58, %v5464_v8  ;;  %v6787_v32 = vld [vmem:[%s9890_s7 + $0x5a8] sm:$0xff]  ;;  %v6786_v58 = vld [vmem:[%s9890_s7 + $0x5a0] sm:$0xff]  ;;  %v6737_v8 = vld [vmem:[%s9890_s7 + $0x418] sm:$0xff] }
 0x648   : > { %v5443_v25 = vadd.f32 %v6847_v41, %v5435_v60  ;;  %5541 = vmatmul.f32.vlgmr.msra.gmra.mxu0 %v5467_v39  ;;  %v5503_v29 = vrot.slane %v5467_v39, 1  ;;  %v5562_v4 = vrot.slane %v5467_v39, 2  ;;  %v5602_v43 = vrot.slane %v5467_v39, 3  ;;  %v6779_v41 = vld [vmem:[%s9890_s7 + $0x568] sm:$0xff]  ;;  %v6752_v60 = vld [vmem:[%s9890_s7 + $0x490] sm:$0xff] }
 0x649   : > { %5843 = vmatpush.msra.mxu0 %v6765_v40  ;;  %v5682_v49 = vrot.slane %v5467_v39, 5  ;;  %v5642_v0 = vrot.slane %v5467_v39, 4  ;;  %v5722_v15 = vrot.slane %v5467_v39, 6  ;;  %v5762_v38 = vrot.slane %v5467_v39, 7  ;;  %v6769_v39 = vld [vmem:[%s9890_s7 + $0x518] sm:$0xff] }
 0x64a   : > { %v5447_v7 = vmax.f32 %v5443_v25, 0.0  ;;  %5521 = vmatmul.f32.vlgmr.msrb.gmra.mxu3 %v5503_v29  ;;  %5580 = vmatmul.f32.vlgmr.msra.gmra.mxu1 %v5562_v4  ;;  %v6785_v40 = vld [vmem:[%s9890_s7 + $0x598] sm:$0xff]  ;;  %v6736_v25 = vld [vmem:[%s9890_s7 + $0x410] sm:$0xff]  ;;  %v6751_v4 = vld [vmem:[%s9890_s7 + $0x488] sm:$0xff] }
 0x64b   : > { %5620 = vmatmul.f32.vlgmr.msrb.gmra.mxu2 %v5602_v43  ;;  %5802 = vmatpush.msrb.mxu3 %v6749_v11  ;;  %v5456_v27 = vld [vmem:[#allocation6 + $0x10] ss:$2 sm:$0x1f]  ;;  %v6768_v43 = vld [vmem:[%s9890_s7 + $0x510] sm:$0xff] }
 0x64c   : > { %5453 = vst [vmem:[#allocation6 + $0x19] sm:$0x1] %v5447_v7  ;;  %5844 = vmatpush.msra.mxu0 %v6764_v55  ;;  %5883 = vmatpush.msra.mxu1 %v6781_v35  ;;  %v5466_v29 = vld [vmem:[#allocation6 + $0x12] ss:$2 sm:$0x1f]  ;;  %v6784_v55 = vld [vmem:[%s9890_s7 + $0x590] sm:$0xff] }
 0x64d   : > { %5923 = vmatpush.msrb.mxu2 %v6797_v54  ;;  %5803 = vmatpush.msrb.mxu3 %v6748_v47  ;;  %v6735_v35 = vld [vmem:[%s9890_s7 + $0x408] sm:$0xff]  ;;  %v6750_v7 = vld [vmem:[%s9890_s7 + $0x480] sm:$0xff] }
 0x64e   : > { %5845 = vmatpush.msra.mxu0 %v6763_v2  ;;  %5884 = vmatpush.msra.mxu1 %v6780_v24  ;;  %v6767_v54 = vld [vmem:[%s9890_s7 + $0x508] sm:$0xff]  ;;  %v6734_v24 = vld [vmem:[%s9890_s7 + $0x400] sm:$0xff] }
 0x64f   : > { %5924 = vmatpush.msrb.mxu2 %v6796_v56  ;;  %5804 = vmatpush.msrb.mxu3 %v6747_v30  ;;  %v6783_v47 = vld [vmem:[%s9890_s7 + $0x588] sm:$0xff]  ;;  %v6766_v56 = vld [vmem:[%s9890_s7 + $0x500] sm:$0xff] }
 0x650   : > { %5846 = vmatpush.msra.mxu0 %v6762_v63  ;;  %5885 = vmatpush.msra.mxu1 %v6779_v41  ;;  %v6782_v30 = vld [vmem:[%s9890_s7 + $0x580] sm:$0xff] }
 0x651   : > { %5925 = vmatpush.msrb.mxu2 %v6795_v20  ;;  %5700 = vmatmul.f32.vlgmr.msrb.gmra.mxu0 %v5682_v49  ;;  %v6813_v20 = vld [vmem:[%s9890_s7 + $0x678] sm:$0xff]  ;;  %v6812_v49 = vld [vmem:[%s9890_s7 + $0x670] sm:$0xff] }
 0x652   : > { %5805 = vmatpush.msrb.mxu3 %v6746_v12  ;;  %5847 = vmatpush.msra.mxu0 %v6761_v44  ;;  %v6811_v12 = vld [vmem:[%s9890_s7 + $0x668] sm:$0xff]  ;;  %v6810_v44 = vld [vmem:[%s9890_s7 + $0x660] sm:$0xff] }
 0x653   : > { %5886 = vmatpush.msra.mxu1 %v6778_v6  ;;  %5926 = vmatpush.msrb.mxu2 %v6794_v28  ;;  %v5460_v37 = vld [vmem:[#allocation6 + $0x11] ss:$2 sm:$0x1f]  ;;  %v6808_v28 = vld [vmem:[%s9890_s7 + $0x650] sm:$0xff] }
 0x654   : > { %5660 = vmatmul.f32.vlgmr.msra.gmra.mxu3 %v5642_v0  ;;  %5740 = vmatmul.f32.vlgmr.msrb.gmra.mxu1 %v5722_v15  ;;  %v5462_v53 = vmax.f32 %v5456_v27, %v5460_v37  ;;  %v6809_v6 = vld [vmem:[%s9890_s7 + $0x658] sm:$0xff]  ;;  %v6807_v0 = vld [vmem:[%s9890_s7 + $0x648] sm:$0xff]  ;;  %v6806_v15 = vld [vmem:[%s9890_s7 + $0x640] sm:$0xff] }
 0x655   : > { %5780 = vmatmul.f32.vlgmr.msra.gmra.mxu2 %v5762_v38  ;;  %5806 = vmatpush.msrb.mxu3 %v6745_v31  ;;  %v6805_v31 = vld [vmem:[%s9890_s7 + $0x638] sm:$0xff]  ;;  %v6804_v38 = vld [vmem:[%s9890_s7 + $0x630] sm:$0xff] }
 0x656   : > { %5848 = vmatpush.msra.mxu0 %v6760_v61  ;;  %5887 = vmatpush.msra.mxu1 %v6777_v62  ;;  %v9790_v11 = vmax.f32 %v5462_v53, %v5466_v29  ;;  %v6803_v61 = vld [vmem:[%s9890_s7 + $0x628] sm:$0xff]  ;;  %v6802_v62 = vld [vmem:[%s9890_s7 + $0x620] sm:$0xff] }
 0x657   : > { %5927 = vmatpush.msrb.mxu2 %v6793_v45  ;;  %5807 = vmatpush.msrb.mxu3 %v6744_v46  ;;  %v6801_v45 = vld [vmem:[%s9890_s7 + $0x618] sm:$0xff]  ;;  %v6800_v46 = vld [vmem:[%s9890_s7 + $0x610] sm:$0xff] }
 0x658   : > { %5849 = vmatpush.msra.mxu0 %v6759_v42  ;;  %5888 = vmatpush.msra.mxu1 %v6776_v57  ;;  %v5841_v2 = vrot.slane %v9790_v11, 1  ;;  %v5881_v63 = vrot.slane %v9790_v11, 2  ;;  %v5921_v41 = vrot.slane %v9790_v11, 3  ;;  %v6799_v42 = vld [vmem:[%s9890_s7 + $0x608] sm:$0xff]  ;;  %v6798_v57 = vld [vmem:[%s9890_s7 + $0x600] sm:$0xff] }
 0x659   : > { %5928 = vmatpush.msrb.mxu2 %v6792_v33  ;;  %5808 = vmatpush.msrb.mxu3 %v6743_v50  ;;  %v5961_v33 = vrot.slane %v9790_v11, 4 }
 0x65a   : > { %5850 = vmatpush.msra.mxu0 %v6758_v3  ;;  %5889 = vmatpush.msra.mxu1 %v6775_v18 }
 0x65b   : > { %5929 = vmatpush.msrb.mxu2 %v6791_v10  ;;  %5809 = vmatpush.msrb.mxu3 %v6742_v14 }
 0x65c   : > { %5851 = vmatpush.msra.mxu0 %v6757_v36  ;;  %5890 = vmatpush.msra.mxu1 %v6774_v1 }
 0x65d   : > { %5930 = vmatpush.msrb.mxu2 %v6790_v48  ;;  %5810 = vmatpush.msrb.mxu3 %v6741_v34 }
 0x65e   : > { %5852 = vmatpush.msra.mxu0 %v6756_v51  ;;  %5891 = vmatpush.msra.mxu1 %v6773_v22 }
 0x65f   : > { %5931 = vmatpush.msrb.mxu2 %v6789_v9  ;;  %5811 = vmatpush.msrb.mxu3 %v6740_v5 }
 0x660   : > { %5853 = vmatpush.msra.mxu0 %v6755_v19  ;;  %5892 = vmatpush.msra.mxu1 %v6772_v13 }
 0x661   : > { %5932 = vmatpush.msrb.mxu2 %v6788_v59  ;;  %5812 = vmatpush.msrb.mxu3 %v6739_v26 }
 0x662   : > { %5854 = vmatpush.msra.mxu0 %v6754_v17  ;;  %5893 = vmatpush.msra.mxu1 %v6771_v23 }
 0x663   : > { %5933 = vmatpush.msrb.mxu2 %v6787_v32  ;;  %5813 = vmatpush.msrb.mxu3 %v6738_v52 }
 0x664   : > { %5855 = vmatpush.msra.mxu0 %v6753_v21  ;;  %5894 = vmatpush.msra.mxu1 %v6770_v16  ;;  %v5984_v16 = vld [vmem:[%s9891_s8] sm:$0x1] }
 0x665   : > { %5934 = vmatpush.msrb.mxu2 %v6786_v58  ;;  %5814 = vmatpush.msrb.mxu3 %v6737_v8  ;;  %v5987_v8 = vld [vmem:[%s9892_s9] sm:$0x1] }
 0x666   : > { %5856 = vmatpush.msra.mxu0 %v6752_v60  ;;  %5895 = vmatpush.msra.mxu1 %v6769_v39 }
 0x667   : > { %5935 = vmatpush.msrb.mxu2 %v6785_v40  ;;  %5815 = vmatpush.msrb.mxu3 %v6736_v25  ;;  %v5992_v25 = vld [vmem:[#allocation7] sm:$0x1] }
 0x668   : > { %5857 = vmatpush.msra.mxu0 %v6751_v4  ;;  %5896 = vmatpush.msra.mxu1 %v6768_v43 }
 0x669   : > { %5936 = vmatpush.msrb.mxu2 %v6784_v55  ;;  %5816 = vmatpush.msrb.mxu3 %v6735_v35 }
 0x66a   : > { %5858 = vmatpush.msra.mxu0 %v6750_v7  ;;  %5897 = vmatpush.msra.mxu1 %v6767_v54 }
 0x66b   : > { %5937 = vmatpush.msrb.mxu2 %v6783_v47  ;;  %5859 = vmatmul.f32.vlgmr.msra.gmra.mxu0 %v5841_v2 }
 0x66c   : > { %5817 = vmatpush.msrb.mxu3 %v6734_v24  ;;  %5898 = vmatpush.msra.mxu1 %v6766_v56 }
 0x66d   : > { %5938 = vmatpush.msrb.mxu2 %v6782_v30  ;;  %5818 = vmatmul.f32.vlgmr.msrb.gmra.mxu3 %v9790_v11 }
 0x66e   : > { %5899 = vmatmul.f32.vlgmr.msra.gmra.mxu1 %v5881_v63  ;;  %5939 = vmatmul.f32.vlgmr.msrb.gmra.mxu2 %v5921_v41 }
 0x66f   : > { %5963 = vmatpush.msra.mxu3 %v6813_v20 }
 0x671   : > { %5964 = vmatpush.msra.mxu3 %v6812_v49 }
 0x673   : > { %5965 = vmatpush.msra.mxu3 %v6811_v12 }
 0x675   : > { %5966 = vmatpush.msra.mxu3 %v6810_v44 }
 0x677   : > { %5967 = vmatpush.msra.mxu3 %v6809_v6 }
 0x679   : > { %5968 = vmatpush.msra.mxu3 %v6808_v28 }
 0x67b   : > { %5969 = vmatpush.msra.mxu3 %v6807_v0 }
 0x67d   : > { %5970 = vmatpush.msra.mxu3 %v6806_v15 }
 0x67f   : > { %5971 = vmatpush.msra.mxu3 %v6805_v31 }
 0x681   : > { %5972 = vmatpush.msra.mxu3 %v6804_v38 }
 0x683   : > { %5973 = vmatpush.msra.mxu3 %v6803_v61 }
 0x685   : > { %5974 = vmatpush.msra.mxu3 %v6802_v62 }
 0x687   : > { %5975 = vmatpush.msra.mxu3 %v6801_v45 }
 0x689   : > { %5976 = vmatpush.msra.mxu3 %v6800_v46 }
 0x68b   : > { %5977 = vmatpush.msra.mxu3 %v6799_v42 }
 0x68d   : > { %5978 = vmatpush.msra.mxu3 %v6798_v57 }
 0x68e   : > { %5979 = vmatmul.f32.vlgmr.msra.gmra.mxu3 %v5961_v33 }
 0x6c5   : > { %v5542_v3 = vpop.f32.mrf.mxu0 }
 0x6c7   : > { %v5581_v10 = vpop.f32.mrf.mxu1 }
 0x6cd   : > { %v5522_v50 = vpop.f32.mrf.mxu3 }
 0x6ce   : > { %v5543_v18 = vadd.f32 %v5542_v3, %v5522_v50  ;;  %v5621_v36 = vpop.f32.mrf.mxu2  ;;  %v5701_v51 = vpop.f32.mrf.mxu0 }
 0x6d0   : > { %v5584_v14 = vadd.f32 %v5581_v10, %v5543_v18 }
 0x6d1   : > { %v5741_v9 = vpop.f32.mrf.mxu1 }
 0x6d2   : > { %v5624_v48 = vadd.f32 %v5621_v36, %v5584_v14 }
 0x6d7   : > { %v5661_v1 = vpop.f32.mrf.mxu3 }
 0x6d8   : > { %v5664_v34 = vadd.f32 %v5661_v1, %v5624_v48  ;;  %v5781_v19 = vpop.f32.mrf.mxu2 }
 0x6da   : > { %v5704_v22 = vadd.f32 %v5701_v51, %v5664_v34 }
 0x6dc   : > { %v5744_v5 = vadd.f32 %v5741_v9, %v5704_v22 }
 0x6de   : > { %v5784_v59 = vadd.f32 %v5781_v19, %v5744_v5 }
 0x6e8   : > { %v5860_v37 = vpop.f32.mrf.mxu0 }
 0x6eb   : > { %v5900_v23 = vpop.f32.mrf.mxu1 }
 0x6f0   : > { %v5819_v13 = vpop.f32.mrf.mxu3 }
 0x6f1   : > { %v5822_v26 = vadd.f32 %v5819_v13, %v5784_v59  ;;  %v5940_v52 = vpop.f32.mrf.mxu2 }
 0x6f3   : > { %v5863_v17 = vadd.f32 %v5860_v37, %v5822_v26 }
 0x6f5   : > { %v5903_v32 = vadd.f32 %v5900_v23, %v5863_v17 }
 0x6f7   : > { %v5943_v27 = vadd.f32 %v5940_v52, %v5903_v32 }
 0x711   : > { %v5980_v21 = vpop.f32.mrf.mxu3 }
 0x712   : > { %v5983_v53 = vadd.f32 %v5980_v21, %v5943_v27 }
 0x714   : > { %v5985_v58 = vadd.f32 %v5984_v16, %v5983_v53 }
 0x716   : > { %v5986_v60 = vmax.f32 %v5985_v58, 0.0 }
 0x718   : > { %v5988_v39 = vmul.f32 %v5987_v8, %v5986_v60 }
 0x71a   : > { %v5989_v40 = vsel %vm4928_vm3, %v5988_v39, 0.0 }
 0x71b   : > { %5990 = vadd.xlane.f32.xlu2 %v5989_v40 }
 0x78e   : > { %v5991_v29 = vpop.xlane.xlu2 %5990 }
 0x78f   : > { %v5993_v4 = vadd.f32 %v5992_v25, %v5991_v29 }
 0x791   : > { %v5994_v43 = vand.u32 2147483647, %v5993_v4  ;;  %vm5998_vm12 = vcmp.ge.f32.partialorder %v5993_v4, 0.0 }
 0x793   : > { %v5995_v11 = vsub.f32 0.0, %v5994_v43 }
 0x795   : > { %v5996_v55 = vmul.f32 1.442695, %v5995_v11 }
 0x797   : > { %6848 = vpow2.f32 %v5996_v55 }
 0x79d   : > { %v6849_v35 = vpop.eup %6848 }
 0x79e   : > { %v5999_v7 = vadd.f32 1.0, %v6849_v35 }
 0x7a0   : > { %6850 = vrcp.f32 %v5999_v7  ;;  %v6011_v24 = vand.u32 2147483648, %v5999_v7  ;;  %v6009_v30 = vand.u32 2147483647, %v5999_v7  ;;  %vm6005_vm9 = vweird.f32 %v5999_v7 }
 0x7a2   : > { %v6012_v41 = vor.u32 1.1754944e-38, %v6011_v24  ;;  %vm6010_vm11 = vcmp.eq.f32.partialorder %v6009_v30, 8.507059e+37 }
 0x7a6   : > { %v6851_v54 = vpop.eup %6850 }
 0x7a7   : > { %v6001_v47 = vmul.f32 %v6851_v54, %v5999_v7  ;;  %vm6006_vm8 = vweird.f32 %v6851_v54 }
 0x7a8   : > { %vm6007_vm10 = vmor %vm6005_vm9, %vm6006_vm8 }
 0x7a9   : > { %v6002_v2 = vsub.f32 1.0, %v6001_v47 }
 0x7ab   : > { %v6003_v56 = vmul.f32 %v6851_v54, %v6002_v2 }
 0x7ad   : > { %v6004_v63 = vadd.f32 %v6851_v54, %v6003_v56 }
 0x7af   : > { %v6008_v20 = vsel %vm6007_vm10, %v6851_v54, %v6004_v63 }
 0x7b0   : > { %v6013_v49 = vsel %vm6010_vm11, %v6012_v41, %v6008_v20 }
 0x7b1   : > { %v6015_v12 = vmul.f32 %v6849_v35, %v6013_v49 }
 0x7b3   : > { %v6016_v44 = vsel %vm5998_vm12, %v6013_v49, %v6015_v12 }
 0x7b4   : > { %6019 = vperm.xlu0 %6835, %v6016_v44  }
 0x826   : > { %v6020_v6 = vpop.permute.xlu0 %6019 }
 0x827   : > { %6022 = vst [vmem:[%s384_s21] sm:$0x1] %v6020_v6 }
 0x828 PF: > { %s23_s19 = sadd.s32 1, %s6874_s19  }
 0x829   : > { %p20_p4 = scmp.ge.s32.totalorder %s23_s19, 4  }
 0x82b   :  { %22 = sbr.rel (!%p20_p4) target bundleno = 3 (0x3), region = 689 }

</bundles_post_ra>
